<compile_context>
chip_gen: v7x
topology: tpu7x:2x2x1
jax: 0.10.0
libtpu: 0.0.40
codegen_flags: <defaults>
</compile_context>

<pallas_src>
import functools
import math

import jax
import jax.numpy as jnp
from jax import lax
from jax.experimental import pallas as pl
from jax.experimental.pallas import tpu as pltpu


def _round_up(x, m):
    return ((x + m - 1) // m) * m


def _ceil_div(a, b):
    return -(-a // b)


def _choose_row_tile(H, W, kH, N, k_pad, patches_itemsize,
                     max_lanes=2048, scratch_budget_bytes=8 * 1024 * 1024):
    """Pick RT (output rows per grid step).

    Goals (from the perf review): L_TILE = RT*W a multiple of 128 when W
    allows it, the (K, L_TILE) im2col scratch inside a fixed VMEM budget
    (v7x has only 64 MiB per TensorCore), and >= 4 total grid steps when
    achievable (megacore sharding + DMA/compute pipelining).
    """
    gran = 128 // math.gcd(W, 128)                 # RT granularity for lane-dense tiles
    rt_min = gran * max(1, _ceil_div(kH, gran))    # halo must fit in one tile
    max_rt = gran * _ceil_div(H, gran)
    min_steps_possible = N * _ceil_div(H, rt_min)

    best = rt_min
    rt = rt_min
    while rt <= max_rt:
        lanes = rt * W
        fits = (lanes <= max_lanes and
                k_pad * lanes * patches_itemsize <= scratch_budget_bytes)
        steps = N * _ceil_div(H, rt)
        if fits and (steps >= 4 or min_steps_possible < 4):
            best = rt                              # largest tile keeping >=4 steps
        rt += gran
    return best


# ---------------------------------------------------------------------------
# Fused kernel: Gabor filter-bank generation + im2col convolution (one tile)
# ---------------------------------------------------------------------------
def _gabor_conv_kernel(freq_ref, theta_ref, sigma_ref, psi_ref,
                       xg_ref, yg_ref, xa_ref, xb_ref, o_ref, patches_ref,
                       *, kh, kw, img_w):
    # freq/theta/sigma/psi : (Cout_pad, Cin_pad)
    # xg/yg                : (1, kH*kW, 1)    sampling grids (flattened)
    # xa_ref               : (1, 1, Cin_pad, L_TILE)   current row tile of x
    # xb_ref               : (1, 1, Cin_pad, L_TILE)   next row tile (halo)
    # o_ref                : (1, 1, Cout_pad, L_TILE)  lane-dense output tile
    # patches_ref          : (K_pad, L_TILE)           im2col VMEM scratch
    cout_pad, cin_pad = freq_ref.shape
    l_tile = patches_ref.shape[1]
    T = kh * kw
    delta = 0.001
    mm_dtype = patches_ref.dtype

    # ---- Gabor filter bank (f32 trig/exp; EUP/VPU work hidden under the
    # fill + matmul), emitted directly in im2col column order:
    # tap-major, in-channel-minor.  Recomputed per step (low priority hoist).
    freq = freq_ref[...]
    theta = theta_ref[...]
    sigma = sigma_ref[...]
    psi = psi_ref[...]
    cos_t = jnp.cos(theta)[:, None, :]                       # (Cout_pad,1,Cin_pad)
    sin_t = jnp.sin(theta)[:, None, :]
    inv_sig2 = (1.0 / ((sigma + delta) ** 2))[:, None, :]
    norm = (1.0 / (2.0 * math.pi * sigma * sigma))[:, None, :]
    freq3 = freq[:, None, :]
    psi3 = psi[:, None, :]
    xg = xg_ref[...]                                          # (1, T, 1)
    yg = yg_ref[...]
    rotx = xg * cos_t + yg * sin_t                            # (Cout_pad,T,Cin_pad)
    roty = yg * cos_t - xg * sin_t
    g = jnp.exp(-0.5 * (rotx * rotx + roty * roty) * inv_sig2)
    g = g * jnp.cos(freq3 * rotx + psi3)
    g = g * norm
    w2 = g.reshape(cout_pad, T * cin_pad).astype(mm_dtype)    # (Cout_pad, K_pad)

    # ---- lane-dense window: current row tile + halo from the next tile.
    # Single cast to the matmul dtype (bf16 by default).
    xa = xa_ref[0, 0]                                         # (Cin_pad, L_TILE) f32
    xb = xb_ref[0, 0]
    window = jnp.concatenate([xa, xb], axis=-1).astype(mm_dtype)

    # ---- im2col fill: each tap is one contiguous (Cin_pad, L_TILE) slab at
    # a static lane offset (XLU rotate), stored as whole, unmasked vregs.
    for ky in range(kh):
        for kx in range(kw):
            tap = ky * kw + kx
            off = ky * img_w + kx
            patches_ref[tap * cin_pad:(tap + 1) * cin_pad, :] = (
                window[:, off:off + l_tile])

    # ---- single MXU contraction (Cout_pad, K_pad) x (K_pad, L_TILE), f32 acc
    acc = jnp.dot(w2, patches_ref[...], preferred_element_type=jnp.float32)
    o_ref[0, 0] = acc.astype(o_ref.dtype)


# ---------------------------------------------------------------------------
# Wrapper
# ---------------------------------------------------------------------------
def gabor_conv2d_forward(x, params, *, matmul_dtype=jnp.bfloat16):
    """GaborConv2d forward: x (N,Cin,H,W) -> (N,Cout,OH,OW), VALID conv."""
    freq, theta, sigma, psi, x_grid, y_grid = params
    N, cin, H, W = x.shape
    cout = freq.shape[0]
    kH, kW = x_grid.shape
    OH, OW = H - kH + 1, W - kW + 1
    assert H >= kH and W >= kW

    mm = jnp.dtype(matmul_dtype)
    # Rows per full vreg for the patches dtype: 8 for f32, 16 for bf16.
    rows_per_vreg = (8 * 4) // mm.itemsize
    cin_pad = _round_up(cin, rows_per_vreg)        # unmasked slab stores
    cout_pad = _round_up(cout, 8)                  # f32 output sublane align
    T = kH * kW
    k_pad = T * cin_pad                            # multiple of 8 by construction

    rt = _choose_row_tile(H, W, kH, N, k_pad, mm.itemsize)
    l_tile = rt * W
    nr = _ceil_div(H, rt)
    assert l_tile >= (kH - 1) * W + (kW - 1)       # halo fits inside one extra tile

    # ---- wrapper-side layout plumbing (free): pad channels & params, flatten
    # rows into lane-dense row tiles, append one zero halo tile. -------------
    def pad_param(p, fill):
        return jnp.pad(p.astype(jnp.float32),
                       ((0, cout_pad - cout), (0, cin_pad - cin)),
                       constant_values=fill)

    freq_p = pad_param(freq, 0.0)
    theta_p = pad_param(theta, 0.0)
    sigma_p = pad_param(sigma, 1.0)                # keep 1/sigma^2 finite in padding
    psi_p = pad_param(psi, 0.0)

    x_p = jnp.pad(x.astype(jnp.float32),
                  ((0, 0), (0, cin_pad - cin), (0, nr * rt - H), (0, 0)))
    # (N, Cin_pad, NR*RT, W) -> (N, NR, Cin_pad, L_TILE), then one halo tile.
    x_r = jnp.transpose(x_p.reshape(N, cin_pad, nr, l_tile), (0, 2, 1, 3))
    x_r = jnp.pad(x_r, ((0, 0), (0, 1), (0, 0), (0, 0)))     # (N, NR+1, Cin_pad, L)

    xg = x_grid.astype(jnp.float32).reshape(1, T, 1)
    yg = y_grid.astype(jnp.float32).reshape(1, T, 1)

    # ---- VMEM budget from the actual buffers (review: no hard-coded cap) ----
    bytes_patches = k_pad * l_tile * mm.itemsize
    bytes_x = 2 * 2 * cin_pad * l_tile * 4          # 2 specs, double-buffered
    bytes_out = 2 * cout_pad * l_tile * 4
    bytes_params = 2 * (4 * cout_pad * cin_pad + 2 * T) * 4
    bytes_values = (cout_pad * k_pad + 2 * cin_pad * l_tile
                    + cout_pad * l_tile) * 4        # w2 / window / acc headroom
    vmem_limit = int(min(96 * 1024 * 1024,
                         max(8 * 1024 * 1024,
                             2 * (bytes_patches + bytes_x + bytes_out
                                  + bytes_params + bytes_values))))

    kernel = functools.partial(_gabor_conv_kernel, kh=kH, kw=kW, img_w=W)

    out4 = pl.pallas_call(
        kernel,
        out_shape=jax.ShapeDtypeStruct((N, nr, cout_pad, l_tile), jnp.float32),
        grid=(N, nr),
        in_specs=[
            pl.BlockSpec((cout_pad, cin_pad), lambda n, r: (0, 0)),   # freq
            pl.BlockSpec((cout_pad, cin_pad), lambda n, r: (0, 0)),   # theta
            pl.BlockSpec((cout_pad, cin_pad), lambda n, r: (0, 0)),   # sigma
            pl.BlockSpec((cout_pad, cin_pad), lambda n, r: (0, 0)),   # psi
            pl.BlockSpec((1, T, 1), lambda n, r: (0, 0, 0)),          # x grid
            pl.BlockSpec((1, T, 1), lambda n, r: (0, 0, 0)),          # y grid
            pl.BlockSpec((1, 1, cin_pad, l_tile),                     # row tile r
                         lambda n, r: (n, r, 0, 0)),
            pl.BlockSpec((1, 1, cin_pad, l_tile),                     # halo tile r+1
                         lambda n, r: (n, r + 1, 0, 0)),
        ],
        out_specs=pl.BlockSpec((1, 1, cout_pad, l_tile),
                               lambda n, r: (n, r, 0, 0)),
        scratch_shapes=[pltpu.VMEM((k_pad, l_tile), matmul_dtype)],
        compiler_params=pltpu.CompilerParams(
            dimension_semantics=("parallel", "parallel"),
            vmem_limit_bytes=vmem_limit,
        ),
    )(freq_p, theta_p, sigma_p, psi_p, xg, yg, x_r, x_r)

    # Unflatten (wrapper-side, free); drop padded channels and invalid borders.
    out = jnp.transpose(out4, (0, 2, 1, 3)).reshape(N, cout_pad, nr * rt, W)
    return out[:, :cout, :OH, :OW]


# ---------------------------------------------------------------------------
# Parameter initialization (mirrors GaborConv2d.__init__, deterministic)
# ---------------------------------------------------------------------------
def init_gabor_params(key, in_channels, out_channels, kernel_size):
    kH = kW = kernel_size
    k_freq, k_theta, k_psi = jax.random.split(key, 3)

    # freq = pi/2 * sqrt(2) ** (-randint(0, 5))
    freq_exp = jax.random.randint(k_freq, (out_channels, in_channels), 0, 5)
    freq = (math.pi / 2.0) * (math.sqrt(2.0) ** (-freq_exp.astype(jnp.float32)))
    # theta = pi/8 * randint(0, 8)
    theta = (math.pi / 8.0) * jax.random.randint(
        k_theta, (out_channels, in_channels), 0, 8).astype(jnp.float32)
    # sigma = pi / freq
    sigma = math.pi / freq
    # psi = pi * U(0, 1)
    psi = math.pi * jax.random.uniform(k_psi, (out_channels, in_channels),
                                       dtype=jnp.float32)

    # x0 = ceil(kH/2), y0 = ceil(kW/2)
    x0 = math.ceil(kH / 2)
    y0 = math.ceil(kW / 2)
    # torch.meshgrid([linspace(-x0+1, x0, kH), linspace(-y0+1, y0, kW)]) ('ij')
    a = jnp.linspace(-x0 + 1, x0 + 0, kH, dtype=jnp.float32)   # rows -> y
    b = jnp.linspace(-y0 + 1, y0 + 0, kW, dtype=jnp.float32)   # cols -> x
    y_grid = jnp.broadcast_to(a[:, None], (kH, kW))
    x_grid = jnp.broadcast_to(b[None, :], (kH, kW))

    return freq, theta, sigma, psi, x_grid, y_grid


def reference_gabor_weights(freq, theta, sigma, psi, x_grid, y_grid):
    """Plain-XLA Gabor weights (OIHW) for the correctness check."""
    delta = 0.001
    f = freq[:, :, None, None]
    t = theta[:, :, None, None]
    s = sigma[:, :, None, None]
    p = psi[:, :, None, None]
    x = x_grid[None, None, :, :]
    y = y_grid[None, None, :, :]
    rotx = x * jnp.cos(t) + y * jnp.sin(t)
    roty = -x * jnp.sin(t) + y * jnp.cos(t)
    g = jnp.exp(-0.5 * ((rotx ** 2 + roty ** 2) / (s + delta) ** 2))
    g = g * jnp.cos(f * rotx + p)
    return g / (2.0 * math.pi * s ** 2)


if __name__ == "__main__":
    key = jax.random.PRNGKey(0)
    k_x, k_p = jax.random.split(key)

    batch, in_channels, out_channels = 2, 4, 8
    H = W = 16
    kernel_size = 5

    x = jax.random.normal(k_x, (batch, in_channels, H, W), dtype=jnp.float32)
    params = init_gabor_params(k_p, in_channels, out_channels, kernel_size)

    out = gabor_conv2d_forward(x, params)           # bf16 operands, f32 accum
    out = jax.block_until_ready(out)
    assert out.shape == (batch, out_channels, H - kernel_size + 1,
                         W - kernel_size + 1)

    w_ref = reference_gabor_weights(*params)

    # Check 1 (tight): reference with the same bf16 operand quantization and
    # f32 accumulation -> only transcendental / accumulation-order noise.
    ref_q = lax.conv_general_dilated(
        x.astype(jnp.bfloat16), w_ref.astype(jnp.bfloat16),
        window_strides=(1, 1), padding="VALID",
        dimension_numbers=("NCHW", "OIHW", "NCHW"),
        preferred_element_type=jnp.float32)
    err_q = float(jnp.max(jnp.abs(out - ref_q)))
    assert jnp.allclose(out, ref_q, atol=1e-2, rtol=1e-2), err_q

    # Check 2 (loose): full-f32 module semantics; slack covers the bf16
    # matmul-operand quantization.
    ref_f32 = lax.conv_general_dilated(
        x, w_ref, window_strides=(1, 1), padding="VALID",
        dimension_numbers=("NCHW", "OIHW", "NCHW"))
    err_f = float(jnp.max(jnp.abs(out - ref_f32)))
    assert jnp.allclose(out, ref_f32, atol=6e-2, rtol=6e-2), err_f

    print("KERNEL_OK")
</pallas_src>

<mosaic_0001>
module attributes {stable_mosaic.version = 11 : i64} {
  func.func @_gabor_conv_kernel(%arg0: i32, %arg1: i32, %arg2: memref<8x16xf32, #tpu.memory_space<vmem>>, %arg3: memref<8x16xf32, #tpu.memory_space<vmem>>, %arg4: memref<8x16xf32, #tpu.memory_space<vmem>>, %arg5: memref<8x16xf32, #tpu.memory_space<vmem>>, %arg6: memref<1x25x1xf32, #tpu.memory_space<vmem>>, %arg7: memref<1x25x1xf32, #tpu.memory_space<vmem>>, %arg8: memref<1x1x16x128xf32, #tpu.memory_space<vmem>>, %arg9: memref<1x1x16x128xf32, #tpu.memory_space<vmem>>, %arg10: memref<1x1x8x128xf32, #tpu.memory_space<vmem>>, %arg11: memref<400x128xbf16, #tpu.memory_space<vmem>>) attributes {dimension_semantics = [#tpu.dimension_semantics<parallel>, #tpu.dimension_semantics<parallel>], iteration_bounds = array<i64: 2, 2>, scalar_prefetch = 0 : i64, scratch_operands = 1 : i64, tpu.core_type = #tpu.core_type<tc>, window_params = [{pipeline_mode = #tpu.pipeline_mode<synchronous>, transform_indices = @transform_0, window_bounds = array<i64: 8, 16>}, {pipeline_mode = #tpu.pipeline_mode<synchronous>, transform_indices = @transform_1, window_bounds = array<i64: 8, 16>}, {pipeline_mode = #tpu.pipeline_mode<synchronous>, transform_indices = @transform_2, window_bounds = array<i64: 8, 16>}, {pipeline_mode = #tpu.pipeline_mode<synchronous>, transform_indices = @transform_3, window_bounds = array<i64: 8, 16>}, {pipeline_mode = #tpu.pipeline_mode<synchronous>, transform_indices = @transform_4, window_bounds = array<i64: 1, 25, 1>}, {pipeline_mode = #tpu.pipeline_mode<synchronous>, transform_indices = @transform_5, window_bounds = array<i64: 1, 25, 1>}, {transform_indices = @transform_6, window_bounds = array<i64: 1, 1, 16, 128>}, {transform_indices = @transform_7, window_bounds = array<i64: 1, 1, 16, 128>}, {transform_indices = @transform_8, window_bounds = array<i64: 1, 1, 8, 128>}]} {
    %c0 = arith.constant 0 : index
    %c0_0 = arith.constant 0 : index
    %0 = vector.load %arg2[%c0, %c0_0] : memref<8x16xf32, #tpu.memory_space<vmem>>, vector<8x16xf32>
    %c0_1 = arith.constant 0 : index
    %c0_2 = arith.constant 0 : index
    %1 = vector.load %arg3[%c0_1, %c0_2] : memref<8x16xf32, #tpu.memory_space<vmem>>, vector<8x16xf32>
    %c0_3 = arith.constant 0 : index
    %c0_4 = arith.constant 0 : index
    %2 = vector.load %arg4[%c0_3, %c0_4] : memref<8x16xf32, #tpu.memory_space<vmem>>, vector<8x16xf32>
    %c0_5 = arith.constant 0 : index
    %c0_6 = arith.constant 0 : index
    %3 = vector.load %arg5[%c0_5, %c0_6] : memref<8x16xf32, #tpu.memory_space<vmem>>, vector<8x16xf32>
    %4 = math.cos %1 : vector<8x16xf32>
    %5 = vector.shape_cast %4 : vector<8x16xf32> to vector<8x1x16xf32>
    %6 = math.sin %1 : vector<8x16xf32>
    %7 = vector.shape_cast %6 : vector<8x16xf32> to vector<8x1x16xf32>
    %cst = arith.constant 1.000000e-03 : f32
    %8 = vector.broadcast %cst : f32 to vector<8x16xf32>
    %9 = arith.addf %2, %8 : vector<8x16xf32>
    %10 = arith.mulf %9, %9 : vector<8x16xf32>
    %cst_7 = arith.constant 1.000000e+00 : f32
    %11 = vector.broadcast %cst_7 : f32 to vector<8x16xf32>
    %12 = arith.divf %11, %10 : vector<8x16xf32>
    %13 = vector.shape_cast %12 : vector<8x16xf32> to vector<8x1x16xf32>
    %cst_8 = arith.constant 6.28318548 : f32
    %14 = vector.broadcast %cst_8 : f32 to vector<8x16xf32>
    %15 = arith.mulf %14, %2 : vector<8x16xf32>
    %16 = arith.mulf %15, %2 : vector<8x16xf32>
    %cst_9 = arith.constant 1.000000e+00 : f32
    %17 = vector.broadcast %cst_9 : f32 to vector<8x16xf32>
    %18 = arith.divf %17, %16 : vector<8x16xf32>
    %19 = vector.shape_cast %18 : vector<8x16xf32> to vector<8x1x16xf32>
    %20 = vector.shape_cast %0 : vector<8x16xf32> to vector<8x1x16xf32>
    %21 = vector.shape_cast %3 : vector<8x16xf32> to vector<8x1x16xf32>
    %c0_10 = arith.constant 0 : index
    %c0_11 = arith.constant 0 : index
    %c0_12 = arith.constant 0 : index
    %22 = vector.load %arg6[%c0_10, %c0_11, %c0_12] : memref<1x25x1xf32, #tpu.memory_space<vmem>>, vector<1x25x1xf32>
    %c0_13 = arith.constant 0 : index
    %c0_14 = arith.constant 0 : index
    %c0_15 = arith.constant 0 : index
    %23 = vector.load %arg7[%c0_13, %c0_14, %c0_15] : memref<1x25x1xf32, #tpu.memory_space<vmem>>, vector<1x25x1xf32>
    %24 = vector.broadcast %22 : vector<1x25x1xf32> to vector<8x25x16xf32>
    %25 = vector.broadcast %5 : vector<8x1x16xf32> to vector<8x25x16xf32>
    %26 = arith.mulf %24, %25 : vector<8x25x16xf32>
    %27 = vector.broadcast %23 : vector<1x25x1xf32> to vector<8x25x16xf32>
    %28 = vector.broadcast %7 : vector<8x1x16xf32> to vector<8x25x16xf32>
    %29 = arith.mulf %27, %28 : vector<8x25x16xf32>
    %30 = arith.addf %26, %29 : vector<8x25x16xf32>
    %31 = vector.broadcast %23 : vector<1x25x1xf32> to vector<8x25x16xf32>
    %32 = vector.broadcast %5 : vector<8x1x16xf32> to vector<8x25x16xf32>
    %33 = arith.mulf %31, %32 : vector<8x25x16xf32>
    %34 = vector.broadcast %22 : vector<1x25x1xf32> to vector<8x25x16xf32>
    %35 = vector.broadcast %7 : vector<8x1x16xf32> to vector<8x25x16xf32>
    %36 = arith.mulf %34, %35 : vector<8x25x16xf32>
    %37 = arith.subf %33, %36 : vector<8x25x16xf32>
    %38 = arith.mulf %30, %30 : vector<8x25x16xf32>
    %39 = arith.mulf %37, %37 : vector<8x25x16xf32>
    %40 = arith.addf %38, %39 : vector<8x25x16xf32>
    %cst_16 = arith.constant -5.000000e-01 : f32
    %41 = vector.broadcast %cst_16 : f32 to vector<8x25x16xf32>
    %42 = arith.mulf %41, %40 : vector<8x25x16xf32>
    %43 = vector.broadcast %13 : vector<8x1x16xf32> to vector<8x25x16xf32>
    %44 = arith.mulf %42, %43 : vector<8x25x16xf32>
    %45 = math.exp %44 : vector<8x25x16xf32>
    %46 = vector.broadcast %20 : vector<8x1x16xf32> to vector<8x25x16xf32>
    %47 = arith.mulf %46, %30 : vector<8x25x16xf32>
    %48 = vector.broadcast %21 : vector<8x1x16xf32> to vector<8x25x16xf32>
    %49 = arith.addf %47, %48 : vector<8x25x16xf32>
    %50 = math.cos %49 : vector<8x25x16xf32>
    %51 = arith.mulf %45, %50 : vector<8x25x16xf32>
    %52 = vector.broadcast %19 : vector<8x1x16xf32> to vector<8x25x16xf32>
    %53 = arith.mulf %51, %52 : vector<8x25x16xf32>
    %54 = vector.shape_cast %53 : vector<8x25x16xf32> to vector<8x400xf32>
    %55 = arith.truncf %54 : vector<8x400xf32> to vector<8x400xbf16>
    %c0_17 = arith.constant 0 : index
    %c0_18 = arith.constant 0 : index
    %c0_19 = arith.constant 0 : index
    %c0_20 = arith.constant 0 : index
    %56 = vector.load %arg8[%c0_17, %c0_18, %c0_19, %c0_20] : memref<1x1x16x128xf32, #tpu.memory_space<vmem>>, vector<1x1x16x128xf32>
    %57 = vector.shape_cast %56 : vector<1x1x16x128xf32> to vector<16x128xf32>
    %c0_21 = arith.constant 0 : index
    %c0_22 = arith.constant 0 : index
    %c0_23 = arith.constant 0 : index
    %c0_24 = arith.constant 0 : index
    %58 = vector.load %arg9[%c0_21, %c0_22, %c0_23, %c0_24] : memref<1x1x16x128xf32, #tpu.memory_space<vmem>>, vector<1x1x16x128xf32>
    %59 = vector.shape_cast %58 : vector<1x1x16x128xf32> to vector<16x128xf32>
    %60 = tpu.concatenate %57, %59 in 1 : vector<16x128xf32>, vector<16x128xf32> -> vector<16x256xf32>
    %61 = arith.truncf %60 : vector<16x256xf32> to vector<16x256xbf16>
    %62 = vector.extract_strided_slice %61 {offsets = [0, 0], sizes = [16, 128], strides = [1, 1]} : vector<16x256xbf16> to vector<16x128xbf16>
    %c0_25 = arith.constant 0 : index
    %c0_26 = arith.constant 0 : index
    %63 = vector.load %arg11[%c0_25, %c0_26] : memref<400x128xbf16, #tpu.memory_space<vmem>>, vector<16x128xbf16>
    tpu.vector_store %arg11[%c0_25, %c0_26], %62 {strides = array<i32>} : memref<400x128xbf16, #tpu.memory_space<vmem>>, vector<16x128xbf16>,
    %64 = vector.extract_strided_slice %61 {offsets = [0, 1], sizes = [16, 128], strides = [1, 1]} : vector<16x256xbf16> to vector<16x128xbf16>
    %c16 = arith.constant 16 : index
    %c0_27 = arith.constant 0 : index
    %65 = vector.load %arg11[%c16, %c0_27] : memref<400x128xbf16, #tpu.memory_space<vmem>>, vector<16x128xbf16>
    tpu.vector_store %arg11[%c16, %c0_27], %64 {strides = array<i32>} : memref<400x128xbf16, #tpu.memory_space<vmem>>, vector<16x128xbf16>,
    %66 = vector.extract_strided_slice %61 {offsets = [0, 2], sizes = [16, 128], strides = [1, 1]} : vector<16x256xbf16> to vector<16x128xbf16>
    %c32 = arith.constant 32 : index
    %c0_28 = arith.constant 0 : index
    %67 = vector.load %arg11[%c32, %c0_28] : memref<400x128xbf16, #tpu.memory_space<vmem>>, vector<16x128xbf16>
    tpu.vector_store %arg11[%c32, %c0_28], %66 {strides = array<i32>} : memref<400x128xbf16, #tpu.memory_space<vmem>>, vector<16x128xbf16>,
    %68 = vector.extract_strided_slice %61 {offsets = [0, 3], sizes = [16, 128], strides = [1, 1]} : vector<16x256xbf16> to vector<16x128xbf16>
    %c48 = arith.constant 48 : index
    %c0_29 = arith.constant 0 : index
    %69 = vector.load %arg11[%c48, %c0_29] : memref<400x128xbf16, #tpu.memory_space<vmem>>, vector<16x128xbf16>
    tpu.vector_store %arg11[%c48, %c0_29], %68 {strides = array<i32>} : memref<400x128xbf16, #tpu.memory_space<vmem>>, vector<16x128xbf16>,
    %70 = vector.extract_strided_slice %61 {offsets = [0, 4], sizes = [16, 128], strides = [1, 1]} : vector<16x256xbf16> to vector<16x128xbf16>
    %c64 = arith.constant 64 : index
    %c0_30 = arith.constant 0 : index
    %71 = vector.load %arg11[%c64, %c0_30] : memref<400x128xbf16, #tpu.memory_space<vmem>>, vector<16x128xbf16>
    tpu.vector_store %arg11[%c64, %c0_30], %70 {strides = array<i32>} : memref<400x128xbf16, #tpu.memory_space<vmem>>, vector<16x128xbf16>,
    %72 = vector.extract_strided_slice %61 {offsets = [0, 16], sizes = [16, 128], strides = [1, 1]} : vector<16x256xbf16> to vector<16x128xbf16>
    %c80 = arith.constant 80 : index
    %c0_31 = arith.constant 0 : index
    %73 = vector.load %arg11[%c80, %c0_31] : memref<400x128xbf16, #tpu.memory_space<vmem>>, vector<16x128xbf16>
    tpu.vector_store %arg11[%c80, %c0_31], %72 {strides = array<i32>} : memref<400x128xbf16, #tpu.memory_space<vmem>>, vector<16x128xbf16>,
    %74 = vector.extract_strided_slice %61 {offsets = [0, 17], sizes = [16, 128], strides = [1, 1]} : vector<16x256xbf16> to vector<16x128xbf16>
    %c96 = arith.constant 96 : index
    %c0_32 = arith.constant 0 : index
    %75 = vector.load %arg11[%c96, %c0_32] : memref<400x128xbf16, #tpu.memory_space<vmem>>, vector<16x128xbf16>
    tpu.vector_store %arg11[%c96, %c0_32], %74 {strides = array<i32>} : memref<400x128xbf16, #tpu.memory_space<vmem>>, vector<16x128xbf16>,
    %76 = vector.extract_strided_slice %61 {offsets = [0, 18], sizes = [16, 128], strides = [1, 1]} : vector<16x256xbf16> to vector<16x128xbf16>
    %c112 = arith.constant 112 : index
    %c0_33 = arith.constant 0 : index
    %77 = vector.load %arg11[%c112, %c0_33] : memref<400x128xbf16, #tpu.memory_space<vmem>>, vector<16x128xbf16>
    tpu.vector_store %arg11[%c112, %c0_33], %76 {strides = array<i32>} : memref<400x128xbf16, #tpu.memory_space<vmem>>, vector<16x128xbf16>,
    %78 = vector.extract_strided_slice %61 {offsets = [0, 19], sizes = [16, 128], strides = [1, 1]} : vector<16x256xbf16> to vector<16x128xbf16>
    %c128 = arith.constant 128 : index
    %c0_34 = arith.constant 0 : index
    %79 = vector.load %arg11[%c128, %c0_34] : memref<400x128xbf16, #tpu.memory_space<vmem>>, vector<16x128xbf16>
    tpu.vector_store %arg11[%c128, %c0_34], %78 {strides = array<i32>} : memref<400x128xbf16, #tpu.memory_space<vmem>>, vector<16x128xbf16>,
    %80 = vector.extract_strided_slice %61 {offsets = [0, 20], sizes = [16, 128], strides = [1, 1]} : vector<16x256xbf16> to vector<16x128xbf16>
    %c144 = arith.constant 144 : index
    %c0_35 = arith.constant 0 : index
    %81 = vector.load %arg11[%c144, %c0_35] : memref<400x128xbf16, #tpu.memory_space<vmem>>, vector<16x128xbf16>
    tpu.vector_store %arg11[%c144, %c0_35], %80 {strides = array<i32>} : memref<400x128xbf16, #tpu.memory_space<vmem>>, vector<16x128xbf16>,
    %82 = vector.extract_strided_slice %61 {offsets = [0, 32], sizes = [16, 128], strides = [1, 1]} : vector<16x256xbf16> to vector<16x128xbf16>
    %c160 = arith.constant 160 : index
    %c0_36 = arith.constant 0 : index
    %83 = vector.load %arg11[%c160, %c0_36] : memref<400x128xbf16, #tpu.memory_space<vmem>>, vector<16x128xbf16>
    tpu.vector_store %arg11[%c160, %c0_36], %82 {strides = array<i32>} : memref<400x128xbf16, #tpu.memory_space<vmem>>, vector<16x128xbf16>,
    %84 = vector.extract_strided_slice %61 {offsets = [0, 33], sizes = [16, 128], strides = [1, 1]} : vector<16x256xbf16> to vector<16x128xbf16>
    %c176 = arith.constant 176 : index
    %c0_37 = arith.constant 0 : index
    %85 = vector.load %arg11[%c176, %c0_37] : memref<400x128xbf16, #tpu.memory_space<vmem>>, vector<16x128xbf16>
    tpu.vector_store %arg11[%c176, %c0_37], %84 {strides = array<i32>} : memref<400x128xbf16, #tpu.memory_space<vmem>>, vector<16x128xbf16>,
    %86 = vector.extract_strided_slice %61 {offsets = [0, 34], sizes = [16, 128], strides = [1, 1]} : vector<16x256xbf16> to vector<16x128xbf16>
    %c192 = arith.constant 192 : index
    %c0_38 = arith.constant 0 : index
    %87 = vector.load %arg11[%c192, %c0_38] : memref<400x128xbf16, #tpu.memory_space<vmem>>, vector<16x128xbf16>
    tpu.vector_store %arg11[%c192, %c0_38], %86 {strides = array<i32>} : memref<400x128xbf16, #tpu.memory_space<vmem>>, vector<16x128xbf16>,
    %88 = vector.extract_strided_slice %61 {offsets = [0, 35], sizes = [16, 128], strides = [1, 1]} : vector<16x256xbf16> to vector<16x128xbf16>
    %c208 = arith.constant 208 : index
    %c0_39 = arith.constant 0 : index
    %89 = vector.load %arg11[%c208, %c0_39] : memref<400x128xbf16, #tpu.memory_space<vmem>>, vector<16x128xbf16>
    tpu.vector_store %arg11[%c208, %c0_39], %88 {strides = array<i32>} : memref<400x128xbf16, #tpu.memory_space<vmem>>, vector<16x128xbf16>,
    %90 = vector.extract_strided_slice %61 {offsets = [0, 36], sizes = [16, 128], strides = [1, 1]} : vector<16x256xbf16> to vector<16x128xbf16>
    %c224 = arith.constant 224 : index
    %c0_40 = arith.constant 0 : index
    %91 = vector.load %arg11[%c224, %c0_40] : memref<400x128xbf16, #tpu.memory_space<vmem>>, vector<16x128xbf16>
    tpu.vector_store %arg11[%c224, %c0_40], %90 {strides = array<i32>} : memref<400x128xbf16, #tpu.memory_space<vmem>>, vector<16x128xbf16>,
    %92 = vector.extract_strided_slice %61 {offsets = [0, 48], sizes = [16, 128], strides = [1, 1]} : vector<16x256xbf16> to vector<16x128xbf16>
    %c240 = arith.constant 240 : index
    %c0_41 = arith.constant 0 : index
    %93 = vector.load %arg11[%c240, %c0_41] : memref<400x128xbf16, #tpu.memory_space<vmem>>, vector<16x128xbf16>
    tpu.vector_store %arg11[%c240, %c0_41], %92 {strides = array<i32>} : memref<400x128xbf16, #tpu.memory_space<vmem>>, vector<16x128xbf16>,
    %94 = vector.extract_strided_slice %61 {offsets = [0, 49], sizes = [16, 128], strides = [1, 1]} : vector<16x256xbf16> to vector<16x128xbf16>
    %c256 = arith.constant 256 : index
    %c0_42 = arith.constant 0 : index
    %95 = vector.load %arg11[%c256, %c0_42] : memref<400x128xbf16, #tpu.memory_space<vmem>>, vector<16x128xbf16>
    tpu.vector_store %arg11[%c256, %c0_42], %94 {strides = array<i32>} : memref<400x128xbf16, #tpu.memory_space<vmem>>, vector<16x128xbf16>,
    %96 = vector.extract_strided_slice %61 {offsets = [0, 50], sizes = [16, 128], strides = [1, 1]} : vector<16x256xbf16> to vector<16x128xbf16>
    %c272 = arith.constant 272 : index
    %c0_43 = arith.constant 0 : index
    %97 = vector.load %arg11[%c272, %c0_43] : memref<400x128xbf16, #tpu.memory_space<vmem>>, vector<16x128xbf16>
    tpu.vector_store %arg11[%c272, %c0_43], %96 {strides = array<i32>} : memref<400x128xbf16, #tpu.memory_space<vmem>>, vector<16x128xbf16>,
    %98 = vector.extract_strided_slice %61 {offsets = [0, 51], sizes = [16, 128], strides = [1, 1]} : vector<16x256xbf16> to vector<16x128xbf16>
    %c288 = arith.constant 288 : index
    %c0_44 = arith.constant 0 : index
    %99 = vector.load %arg11[%c288, %c0_44] : memref<400x128xbf16, #tpu.memory_space<vmem>>, vector<16x128xbf16>
    tpu.vector_store %arg11[%c288, %c0_44], %98 {strides = array<i32>} : memref<400x128xbf16, #tpu.memory_space<vmem>>, vector<16x128xbf16>,
    %100 = vector.extract_strided_slice %61 {offsets = [0, 52], sizes = [16, 128], strides = [1, 1]} : vector<16x256xbf16> to vector<16x128xbf16>
    %c304 = arith.constant 304 : index
    %c0_45 = arith.constant 0 : index
    %101 = vector.load %arg11[%c304, %c0_45] : memref<400x128xbf16, #tpu.memory_space<vmem>>, vector<16x128xbf16>
    tpu.vector_store %arg11[%c304, %c0_45], %100 {strides = array<i32>} : memref<400x128xbf16, #tpu.memory_space<vmem>>, vector<16x128xbf16>,
    %102 = vector.extract_strided_slice %61 {offsets = [0, 64], sizes = [16, 128], strides = [1, 1]} : vector<16x256xbf16> to vector<16x128xbf16>
    %c320 = arith.constant 320 : index
    %c0_46 = arith.constant 0 : index
    %103 = vector.load %arg11[%c320, %c0_46] : memref<400x128xbf16, #tpu.memory_space<vmem>>, vector<16x128xbf16>
    tpu.vector_store %arg11[%c320, %c0_46], %102 {strides = array<i32>} : memref<400x128xbf16, #tpu.memory_space<vmem>>, vector<16x128xbf16>,
    %104 = vector.extract_strided_slice %61 {offsets = [0, 65], sizes = [16, 128], strides = [1, 1]} : vector<16x256xbf16> to vector<16x128xbf16>
    %c336 = arith.constant 336 : index
    %c0_47 = arith.constant 0 : index
    %105 = vector.load %arg11[%c336, %c0_47] : memref<400x128xbf16, #tpu.memory_space<vmem>>, vector<16x128xbf16>
    tpu.vector_store %arg11[%c336, %c0_47], %104 {strides = array<i32>} : memref<400x128xbf16, #tpu.memory_space<vmem>>, vector<16x128xbf16>,
    %106 = vector.extract_strided_slice %61 {offsets = [0, 66], sizes = [16, 128], strides = [1, 1]} : vector<16x256xbf16> to vector<16x128xbf16>
    %c352 = arith.constant 352 : index
    %c0_48 = arith.constant 0 : index
    %107 = vector.load %arg11[%c352, %c0_48] : memref<400x128xbf16, #tpu.memory_space<vmem>>, vector<16x128xbf16>
    tpu.vector_store %arg11[%c352, %c0_48], %106 {strides = array<i32>} : memref<400x128xbf16, #tpu.memory_space<vmem>>, vector<16x128xbf16>,
    %108 = vector.extract_strided_slice %61 {offsets = [0, 67], sizes = [16, 128], strides = [1, 1]} : vector<16x256xbf16> to vector<16x128xbf16>
    %c368 = arith.constant 368 : index
    %c0_49 = arith.constant 0 : index
    %109 = vector.load %arg11[%c368, %c0_49] : memref<400x128xbf16, #tpu.memory_space<vmem>>, vector<16x128xbf16>
    tpu.vector_store %arg11[%c368, %c0_49], %108 {strides = array<i32>} : memref<400x128xbf16, #tpu.memory_space<vmem>>, vector<16x128xbf16>,
    %110 = vector.extract_strided_slice %61 {offsets = [0, 68], sizes = [16, 128], strides = [1, 1]} : vector<16x256xbf16> to vector<16x128xbf16>
    %c384 = arith.constant 384 : index
    %c0_50 = arith.constant 0 : index
    %111 = vector.load %arg11[%c384, %c0_50] : memref<400x128xbf16, #tpu.memory_space<vmem>>, vector<16x128xbf16>
    tpu.vector_store %arg11[%c384, %c0_50], %110 {strides = array<i32>} : memref<400x128xbf16, #tpu.memory_space<vmem>>, vector<16x128xbf16>,
    %c0_51 = arith.constant 0 : index
    %c0_52 = arith.constant 0 : index
    %112 = vector.load %arg11[%c0_51, %c0_52] : memref<400x128xbf16, #tpu.memory_space<vmem>>, vector<400x128xbf16>
    %cst_53 = arith.constant dense<0.000000e+00> : vector<8x128xf32>
    %113 = tpu.matmul %55, %112, %cst_53 {dimension_numbers = #tpu.dot_dimension_numbers<[1], [0], [0], [1], [0, 0, 1, 1], [], []>} : vector<8x400xbf16>, vector<400x128xbf16>, vector<8x128xf32> -> vector<8x128xf32>
    %c0_54 = arith.constant 0 : index
    %c0_55 = arith.constant 0 : index
    %c0_56 = arith.constant 0 : index
    %c0_57 = arith.constant 0 : index
    %114 = vector.load %arg10[%c0_54, %c0_55, %c0_56, %c0_57] : memref<1x1x8x128xf32, #tpu.memory_space<vmem>>, vector<1x1x8x128xf32>
    %115 = vector.shape_cast %114 : vector<1x1x8x128xf32> to vector<8x128xf32>
    %116 = vector.shape_cast %113 : vector<8x128xf32> to vector<1x1x8x128xf32>
    tpu.vector_store %arg10[%c0_54, %c0_55, %c0_56, %c0_57], %116 {strides = array<i32>} : memref<1x1x8x128xf32, #tpu.memory_space<vmem>>, vector<1x1x8x128xf32>,
    return
  }
  func.func @transform_0(%arg0: i32, %arg1: i32) -> (i32, i32) {
    %c0_i32 = arith.constant 0 : i32
    %c0_i32_0 = arith.constant 0 : i32
    %c0_i32_1 = arith.constant 0 : i32
    return %c0_i32, %c0_i32_0 : i32, i32
  }
  func.func @transform_1(%arg0: i32, %arg1: i32) -> (i32, i32) {
    %c0_i32 = arith.constant 0 : i32
    %c0_i32_0 = arith.constant 0 : i32
    %c0_i32_1 = arith.constant 0 : i32
    return %c0_i32, %c0_i32_0 : i32, i32
  }
  func.func @transform_2(%arg0: i32, %arg1: i32) -> (i32, i32) {
    %c0_i32 = arith.constant 0 : i32
    %c0_i32_0 = arith.constant 0 : i32
    %c0_i32_1 = arith.constant 0 : i32
    return %c0_i32, %c0_i32_0 : i32, i32
  }
  func.func @transform_3(%arg0: i32, %arg1: i32) -> (i32, i32) {
    %c0_i32 = arith.constant 0 : i32
    %c0_i32_0 = arith.constant 0 : i32
    %c0_i32_1 = arith.constant 0 : i32
    return %c0_i32, %c0_i32_0 : i32, i32
  }
  func.func @transform_4(%arg0: i32, %arg1: i32) -> (i32, i32, i32) {
    %c0_i32 = arith.constant 0 : i32
    %c0_i32_0 = arith.constant 0 : i32
    %c0_i32_1 = arith.constant 0 : i32
    %c0_i32_2 = arith.constant 0 : i32
    return %c0_i32, %c0_i32_0, %c0_i32_1 : i32, i32, i32
  }
  func.func @transform_5(%arg0: i32, %arg1: i32) -> (i32, i32, i32) {
    %c0_i32 = arith.constant 0 : i32
    %c0_i32_0 = arith.constant 0 : i32
    %c0_i32_1 = arith.constant 0 : i32
    %c0_i32_2 = arith.constant 0 : i32
    return %c0_i32, %c0_i32_0, %c0_i32_1 : i32, i32, i32
  }
  func.func @transform_6(%arg0: i32, %arg1: i32) -> (i32, i32, i32, i32) {
    %c0_i32 = arith.constant 0 : i32
    %c0_i32_0 = arith.constant 0 : i32
    %c0_i32_1 = arith.constant 0 : i32
    return %arg0, %arg1, %c0_i32, %c0_i32_0 : i32, i32, i32, i32
  }
  func.func @transform_7(%arg0: i32, %arg1: i32) -> (i32, i32, i32, i32) {
    %c1_i32 = arith.constant 1 : i32
    %0 = arith.addi %arg1, %c1_i32 : i32
    %c0_i32 = arith.constant 0 : i32
    %c0_i32_0 = arith.constant 0 : i32
    %c0_i32_1 = arith.constant 0 : i32
    return %arg0, %0, %c0_i32, %c0_i32_0 : i32, i32, i32, i32
  }
  func.func @transform_8(%arg0: i32, %arg1: i32) -> (i32, i32, i32, i32) {
    %c0_i32 = arith.constant 0 : i32
    %c0_i32_0 = arith.constant 0 : i32
    %c0_i32_1 = arith.constant 0 : i32
    return %arg0, %arg1, %c0_i32, %c0_i32_0 : i32, i32, i32, i32
  }
}

</mosaic_0001>

<bundles_post_ra>
// kernel: tpu_custom_call.1
= control target key start
LH: loop header
LB: loop body
LE: loop exit
PB: predicated region body
PF: predicated region fallthrough
CT: control target
= control target key end

     0   :  { %s12201_s0 = inlined_call_operand.vmem [shape: f32[8,16], index: 0, kind: input, shape index: {}]   ;;  %s12202_s1 = inlined_call_operand.vmem [shape: f32[8,16], index: 1, kind: input, shape index: {}]   ;;  %s12203_s2 = inlined_call_operand.vmem [shape: f32[8,16], index: 2, kind: input, shape index: {}]   ;;  %s12204_s3 = inlined_call_operand.vmem [shape: f32[8,16], index: 3, kind: input, shape index: {}]   ;;  %s12205_s4 = inlined_call_operand.vmem [shape: f32[1,25,1], index: 4, kind: input, shape index: {}]   ;;  %s12206_s5 = inlined_call_operand.vmem [shape: f32[1,25,1], index: 5, kind: input, shape index: {}]   ;;  %s12207_s6 = inlined_call_operand.hbm [shape: f32[2,3,16,128], index: 6, kind: input, shape index: {}]   ;;  %s12208_s7 = inlined_call_operand.hbm [shape: f32[2,3,16,128], index: 7, kind: input, shape index: {}]   ;;  %s12209_s8 = inlined_call_operand.hbm [shape: f32[2,2,8,128], index: 8, kind: output, shape index: {}]  }
   0x1   :  { %12437 = sst [smem:[#allocation89_spill]] %s12201_s0 }
   0x2   :  { %12438 = sst [smem:[#allocation90_spill]] %s12203_s2 }
   0x3   :  { %12439 = sst [smem:[#allocation91_spill]] %s12204_s3 }
   0x4   :  { %12440 = sst [smem:[#allocation92_spill]] %s12207_s6 }
   0x5   :  { %12441 = sst [smem:[#allocation93_spill]] %s12209_s8 }
   0x6   :  { %13 = vsyncpa [#allocation4], 0 }
   0x7   :  { %15 = vsyncpa [#allocation4 + $0x1], 0 }
   0x8   :  { %16 = vsyncpa [#allocation7], 0 }
   0x9   :  { %18 = vsyncpa [#allocation7 + $0x1], 0 }
   0xa   :  { %19 = vsyncpa [#allocation5], 0 }
   0xb   :  { %21 = vsyncpa [#allocation5 + $0x1], 0  ;;  %s7022_s27 = smov 0   ;;  %s7024_s28 = smov 0  }
   0xc   :  { %s7026_s29 = smov 0   ;;  %s7028_s30 = smov 0  }
   0xd   :  { %s7030_s9 = smov 0   ;;  %s7032_s10 = smov 0  }
   0xe   :  { %s7034_s11 = smov 0   ;;  %s7036_s12 = smov 0  }
   0xf   :  { %s7038_s13 = smov 0   ;;  %s7040_s14 = smov 0  }
  0x10   :  { %s7042_s15 = smov 0  }
  0x11 LB: > { %12442 = sst [smem:[#allocation12_spill]] %s6917_s11  ;;  %s6050_s16 = sadd.s32 4294967295, %s6933_s15   ;;  %s6933_s15 = sphi %s7042_s15, %s27_s15   ;;  %s6929_s14 = sphi %s7040_s14, %s12933_s14   ;;  %s6925_s13 = sphi %s7038_s13, %s12932_s13   ;;  %s6921_s12 = sphi %s7036_s12, %s12931_s12   ;;  %s6917_s11 = sphi %s7034_s11, %s12930_s11   ;;  %s6913_s10 = sphi %s7032_s10, %s12939_s10   ;;  %s6909_s9 = sphi %s7030_s9, %s12938_s9   ;;  %s6905_s30 = sphi %s7028_s30, %s12937_s30   ;;  %s6901_s29 = sphi %s7026_s29, %s12936_s29   ;;  %s6897_s28 = sphi %s7024_s28, %s12935_s28   ;;  %s6893_s27 = sphi %s7022_s27, %s12934_s27  }
  0x12   : > { %12443 = sst [smem:[#allocation13_spill]] %s6921_s12  ;;  %s6051_s17 = sadd.s32 4294967294, %s6933_s15  }
  0x13   : > { %12444 = sst [smem:[#allocation14_spill]] %s6925_s13  ;;  %s36_s18 = sadd.s32 1, %s6925_s13 }
  0x14   : > { %12445 = sst [smem:[#allocation15_spill]] %s6929_s14  ;;  %s39_s19 = sadd.s32 1, %s6929_s14 }
  0x15   : > { %p37_p0 = scmp.ge.s32.totalorder %s36_s18, 2  ;;  %s174_s20 = sadd.s32 1, %s6913_s10 }
  0x16   : > { %p181_p1 = scmp.ne.s32.totalorder %s6913_s10, %s6909_s9  ;;  %p12216_p2 = scmp.eq.s32.totalorder %s6933_s15, 0 }
  0x17   : > { %s7085_s21 = scalar_select %p37_p0, 0, %s36_s18  }
  0x18   : > { %s12941_s19 = smov (!%p37_p0, %s39_s19), %s6929_s14  ;;  %p7095_p3 = por %p12216_p2, %p181_p1 }
  0x19   : > { %12446 = sst [smem:[#allocation16_spill]] %s7085_s21  ;;  %s170_s22 = ssub.s32 %s6925_s13, %s7085_s21 }
  0x1a   : > { %p41_p4 = scmp.ge.s32.totalorder %s12941_s19, 2  ;;  %p187_p5 = scmp.ne.s32.totalorder %s6909_s9, %s6905_s30 }
  0x1b   : > { %p7101_p6 = scmp.eq.s32.totalorder %s6050_s16, 0  ;;  %s198_s25 = sadd.s32 1, %s7085_s21 }
  0x1c   : > { %s12943_s19 = smov (%p41_p4, %s12941_s19), 0  ;;  %s200_s8 = ssub.s32 %s36_s18, %s198_s25 }
  0x1d   : > { %s12448_s24 = scalar_select %p7101_p6, 1, 0 }
  0x1e   : > { %12449 = sst [smem:[#allocation17_spill]] %s12943_s19  ;;  %p7113_p7 = por %p7101_p6, %p187_p5 }
  0x1f   : > { %s169_s11 = ssub.s32 %s6929_s14, %s12943_s19  ;;  %p243_p8 = scmp.eq.s32.totalorder %s6050_s16, 3 }
  0x20   : > { %s12450_s26 = scalar_select %p7113_p7, 1, 0 }
  0x21   : > { %s171_s12 = sor.u32 %s170_s22, %s169_s11  ;;  %s201_s3 = sor.u32 %s200_s8, %s169_s11 }
  0x22   : > { %p172_p9 = scmp.eq.s32.totalorder %s171_s12, 0  ;;  %p7119_p10 = scmp.eq.s32.totalorder %s201_s3, 0 }
  0x23   : > { %p7126_p11 = por %p243_p8, %p181_p1  ;;  %p249_p12 = scmp.eq.s32.totalorder %s6051_s17, 3 }
  0x24   : > { %s7131_s2 = scalar_select %p172_p9, %s6913_s10, %s174_s20  }
  0x25   : > { %s12452_s0 = scalar_select %p7126_p11, 1, 0 }
  0x26   : > { %p7136_p13 = por %p249_p12, %p187_p5  ;;  %p12215_p0 = scmp.lt.s32.totalorder %s6933_s15, 4 }
  0x27   : > { %s287_s8 = sand.u32 1, %s6913_s10   ;;  %s6055_s3 = sshll.u32 %s6925_s13, 1 }
  0x28   : > { %s12453_s16 = scalar_select %p7136_p13, 1, 0 }
  0x29   : > { %s6054_s11 = sshll.u32 %s287_s8, 4  ;;  %s6228_s12 = smul.u32 6, %s6929_s14 }
  0x2a   : > { %s291_s18 = scalar_lea.vmem [#allocation3], %s6054_s11  ;;  %p7150_p1 = pnand %p12215_p0, %p7095_p3 }
  0x2b   : > { %s300_s22 = sshll.u32 %s291_s18, 4  ;;  %s7154_s20 = sadd.s32 %s6228_s12, %s6055_s3  ;;  %s7144_s22 = int_to_ptr.vmem [resolvable:$true] %s300_s22 }
  0x2c   : > { %s12214_s25 = sshll.u32 %s7154_s20, 7  ;;  %s12455_s6 = sld [smem:[#allocation92_spill]] }
  0x2d   : > { %s7164_s23 = scalar_lea.sflag [#allocation4], %s287_s8  ;;  %p6748_p4 = pneg %p7150_p1 }
  0x32   : > { %s7162_s11 = scalar_lea.hbm %s12455_s6, %s12214_s25  ;;  %s6751_s14 = scalar_lea.hbm %s12455_s6, 1536 }
  0x33   : > { %s6746_s18 = scalar_lea.hbm %s7162_s11, 256  ;;  %p6752_p9 = scmp.lt.u32.totalorder %s7162_s11, %s12455_s6 }
  0x34   : > { %p6747_p3 = scmp.ne.s32.totalorder %s7162_s11, %s6746_s18  ;;  %p6753_p12 = scmp.lt.u32.totalorder %s6751_s14, %s6746_s18 }
  0x35   : > { %p6755_p2 = scmp.lt.u32.totalorder %s6746_s18, %s7162_s11 }
  0x36   : > { %p6749_p5 = pnand %p6748_p4, %p6747_p3  ;;  %p6754_p0 = por %p6753_p12, %p6752_p9 }
  0x38   : > { %p6750_p8 = pneg %p6749_p5  ;;  %p6756_p13 = por %p6755_p2, %p6754_p0 }
  0x3a   : > { %p6757_p11 = pnand %p6756_p13, %p6750_p8 }
  0x3c   : > { %6760 = shalt.err (!%p6757_p11)
}
  0x3d   : > { %s6761_s8 = scalar_lea.vmem %s7144_s22, 256  ;;  %s6935_s3 = smov [#allocation3]  }
  0x3e   : > { %p6762_p3 = scmp.ne.s32.totalorder %s7144_s22, %s6761_s8  ;;  %s6766_s12 = sshll.u32 %s6935_s3, 4  ;;  %s6767_s12 = int_to_ptr.vmem [resolvable:$false] %s6766_s12 }
  0x3f   : > { %s6768_s25 = scalar_lea.vmem %s6767_s12, 512  ;;  %p6769_p6 = scmp.lt.s32.totalorder %s7144_s22, %s6767_s12 }
  0x40   : > { %p6764_p5 = pnand %p6762_p3, %p6748_p4  ;;  %p6770_p9 = scmp.lt.s32.totalorder %s6768_s25, %s6761_s8 }
  0x42   : > { %p6765_p7 = pneg %p6764_p5  ;;  %p6771_p12 = por %p6770_p9, %p6769_p6 }
  0x44   : > { %p6772_p2 = pnand %p6771_p12, %p6765_p7 }
  0x46   : > { %6775 = shalt.err (!%p6772_p2)
}
  0x47   : > { %s6936_s18 = smov 128   ;;  %s6937_s14 = smov 8  }
  0x48   : > { %6370 = dma.hbm_to_vmem [thread:$0]  (!%p7150_p1), %s7162_s11, 256, %s7144_s22, %s7164_s23, %s6936_s18, %s6936_s18, %s6937_s14  }
  0x49   : > { %p6060_p6 = scmp.ge.s32.totalorder %s6933_s15, 1  ;;  %p332_p7 = scmp.lt.s32.totalorder %s6933_s15, 5 }
  0x4a   : > { %s204_s8 = sadd.s32 1, %s6901_s29  ;;  %p211_p13 = scmp.ne.s32.totalorder %s6901_s29, %s6897_s28 }
  0x4b   : > { %p7197_p11 = pnand %p6060_p6, %p332_p7  ;;  %p217_p0 = scmp.ne.s32.totalorder %s6897_s28, %s6893_s27 }
  0x4c   : > { %s7205_s3 = scalar_select %p7119_p10, %s6901_s29, %s204_s8  }
  0x4d   : > { %s310_s12 = sand.u32 1, %s6901_s29   ;;  %s12457_s25 = sshll.u32 %s7154_s20, 7 }
  0x4e   : > { %s5979_s13 = scalar_lea.hbm %s12208_s7, %s12457_s25  ;;  %p12458_p1 = scmp.eq.s32.totalorder %s6933_s15, 0 }
  0x4f   : > { %p12459_p8 = scmp.ne.s32.totalorder %s12448_s24, 0  ;;  %s6057_s11 = sshll.u32 %s310_s12, 4 }
  0x50   : > { %p213_p4 = por %p211_p13, %p12458_p1  ;;  %s7225_s23 = scalar_lea.hbm %s5979_s13, 256 }
  0x51   : > { %p7221_p3 = por %p217_p0, %p12459_p8  ;;  %s314_s27 = scalar_lea.vmem [#allocation6], %s6057_s11 }
  0x52   : > { %s324_s21 = sshll.u32 %s314_s27, 4  ;;  %p12461_p10 = scmp.lt.s32.totalorder %s6933_s15, 4  ;;  %s7233_s21 = int_to_ptr.vmem [resolvable:$true] %s324_s21 }
  0x53   : > { %s12460_s22 = scalar_select %p7221_p3, 1, 0 }
  0x54   : > { %p7229_p5 = pnand %p12461_p10, %p213_p4  ;;  %s7235_s6 = scalar_lea.sflag [#allocation7], %s310_s12 }
  0x55   : > { %s6806_s24 = scalar_lea.hbm %s5979_s13, 512  ;;  %s6781_s17 = scalar_lea.hbm %s12208_s7, 1536 }
  0x56   : > { %p6777_p9 = scmp.ne.s32.totalorder %s7225_s23, %s6806_s24  ;;  %p6778_p12 = pneg %p7229_p5 }
  0x57   : > { %p6782_p7 = scmp.lt.u32.totalorder %s7225_s23, %s12208_s7  ;;  %p6783_p13 = scmp.lt.u32.totalorder %s6781_s17, %s6806_s24 }
  0x58   : > { %p6779_p2 = pnand %p6778_p12, %p6777_p9  ;;  %p6785_p1 = scmp.lt.u32.totalorder %s6806_s24, %s7225_s23 }
  0x59   : > { %p6784_p0 = por %p6783_p13, %p6782_p7 }
  0x5a   : > { %p6780_p6 = pneg %p6779_p2 }
  0x5b   : > { %p6786_p4 = por %p6785_p1, %p6784_p0 }
  0x5d   : > { %p6787_p8 = pnand %p6786_p4, %p6780_p6 }
  0x5f   : > { %6790 = shalt.err (!%p6787_p8)
}
  0x60   : > { %s6791_s13 = scalar_lea.vmem %s7233_s21, 256  ;;  %s6938_s12 = smov [#allocation6]  }
  0x61   : > { %p6792_p10 = scmp.ne.s32.totalorder %s7233_s21, %s6791_s13  ;;  %s6796_s8 = sshll.u32 %s6938_s12, 4  ;;  %s6797_s8 = int_to_ptr.vmem [resolvable:$false] %s6796_s8 }
  0x62   : > { %s6798_s25 = scalar_lea.vmem %s6797_s8, 512  ;;  %p6799_p3 = scmp.lt.s32.totalorder %s7233_s21, %s6797_s8 }
  0x63   : > { %p6794_p9 = pnand %p6792_p10, %p6778_p12  ;;  %p6800_p7 = scmp.lt.s32.totalorder %s6798_s25, %s6791_s13 }
  0x65   : > { %p6795_p2 = pneg %p6794_p9  ;;  %p6801_p13 = por %p6800_p7, %p6799_p3 }
  0x67   : > { %p6802_p0 = pnand %p6801_p13, %p6795_p2 }
  0x69   : > { %6805 = shalt.err (!%p6802_p0)
}
  0x6a   : > { %6373 = dma.hbm_to_vmem [thread:$0]  (!%p7229_p5), %s7225_s23, 256, %s7233_s21, %s7235_s6, %s6936_s18, %s6936_s18, %s6937_s14  }
  0x6b   : > { %336 = sbr.rel (%p7197_p11) target bundleno = 1626 (0x65a), region = 52 }
  0x72   : > { %s7268_s24 = sand.u32 1, %s6909_s9   ;;  %p12463_p3 = scmp.ne.s32.totalorder %s12450_s26, 0 }
  0x73   : > { %s6061_s17 = sshll.u32 %s7268_s24, 4  ;;  %s339_s11 = scalar_lea.sflag [#allocation4], %s7268_s24 }
  0x74   : > { %s7272_s27 = scalar_lea.vmem [#allocation3], %s6061_s17 }
  0x75   : > { %6880 = dma.done.wait (%p12463_p3), %s339_s11, 256  }
  0x76   : > { %6882 = vsyncadd (%p12463_p3), %s339_s11, 4294967040  ;;  %s347_s18 = sand.u32 1, %s6897_s28   ;;  %p12464_p11 = scmp.ne.s32.totalorder %s12460_s22, 0 }
  0x77   : > { %s7279_s14 = sshll.u32 %s347_s18, 4  ;;  %s348_s19 = scalar_lea.sflag [#allocation7], %s347_s18 }
  0x78   : > { %s351_s23 = scalar_lea.vmem [#allocation6], %s7279_s14 }
  0x79   : > { %6884 = dma.done.wait (%p12464_p11), %s348_s19, 256  }
  0x7a   : > { %6886 = vsyncadd (%p12464_p11), %s348_s19, 4294967040  ;;  %v12222_v0 = vmov 0   ;;  %v911_v1 = vld [vmem:[%s12205_s4 + $0x8] sm:$0xff]  ;;  %v910_v2 = vld [vmem:[%s12205_s4] sm:$0xff]  ;;  %v12234_v27 = vmov 683565275  }
  0x7b   : > { %6508 = vset.pattern.permute.xlu1 %v12222_v0  ;;  %6507 = vset.pattern.permute.xlu0 %v12222_v0  ;;  %v915_v3 = vld [vmem:[%s12206_s5 + $0x8] sm:$0xff]  ;;  %v914_v4 = vld [vmem:[%s12206_s5] sm:$0xff]  ;;  %v912_v7 = vld [vmem:[%s12205_s4 + $0x10] sm:$0xff]  ;;  %v12232_v29 = vmov 2475754826   ;;  %s6948_s13 = smov 108  }
  0x7c   : > { %5880 = vmatprep.subr.bf16.mxu1 %v12222_v0  ;;  %925 = vperm.xlu0 %6507, %v911_v1   ;;  %v7304_v5 = vld [vmem:[%s12202_s1] sm:$0xff]  ;;  %v916_v8 = vld [vmem:[%s12206_s5 + $0x10] sm:$0xff]  ;;  %v913_v12 = vld [vmem:[%s12205_s4 + $0x18] sm:$0x1]  ;;  %v12230_v31 = vmov 2131351028  }
  0x7d   : > { %920 = vperm.xlu1 %6508, %v910_v2   ;;  %v398_v6 = vand.u32 2139095040, %v7304_v5  ;;  %v395_v10 = vand.u32 2147483647, %v7304_v5  ;;  %v917_v13 = vld [vmem:[%s12206_s5 + $0x18] sm:$0x1]  ;;  %v5613_v14 = vld [vmem:[%s351_s23] sm:$0xff]  ;;  %vm487_vm15 = vweird.f32 %v7304_v5 }
  0x7e   : > { %v5614_v15 = vld [vmem:[%s351_s23 + $0x8] sm:$0xff]  ;;  %v5611_v18 = vld [vmem:[%s7272_s27] sm:$0xff]  ;;  %v12228_v33 = vmov 2102212464   ;;  %v12226_v35 = vmov 920167782  }
  0x7f   : > { %v399_v9 = vshrl.u32 %v398_v6, 23  ;;  %v402_v17 = vand.u32 8388607, %v395_v10  ;;  %v5612_v19 = vld [vmem:[%s7272_s27 + $0x8] sm:$0xff]  ;;  %v7324_v20 = vpack.c.bf16 %v5614_v15, %v5613_v14  ;;  %s6943_s27 = smov 109   ;;  %s6947_s23 = smov 79  }
  0x80   : > { %1017 = vperm.xlu0 %6507, %v915_v3   ;;  %v7326_v21 = vpack.c.bf16 %v5612_v19, %v5611_v18  ;;  %v12224_v42 = vmov 1326507024   ;;  %s6949_s22 = smov 78   ;;  %s6950_s12 = smov 127   ;;  %vm397_vm7 = vcmp.lt.s32.totalorder %v7304_v5, 0 }
  0x81   : > { %1012 = vperm.xlu1 %6508, %v914_v4   ;;  %v6064_v11 = vadd.s32 4294967169, %v399_v9  ;;  %12465 = vst [vmem:[#allocation18_spill] sm:$0xff] %v7324_v20  ;;  %v403_v24 = vor.u32 8388608, %v402_v17  ;;  %s6951_s8 = smov 96   ;;  %s6952_s25 = smov 77  }
  0x82   : > { %12466 = vst [vmem:[#allocation19_spill] sm:$0xff] %v7326_v21  ;;  %s6953_s17 = smov 126   ;;  %s6954_s11 = smov 95   ;;  %vm7395_vm8 = vcmp.le.f32.partialorder %v395_v10, 0.7853982 }
  0x83   : > { %v405_v16 = vadd.s32 1, %v6064_v11  ;;  %v443_v44 = vshll.u32 %v403_v24, 8  ;;  %s6955_s18 = smov 76   ;;  %s6956_s14 = smov 125  }
  0x84   : > { %930 = vperm.xlu0 %6507, %v912_v7   ;;  %s6957_s19 = smov 94   ;;  %s6958_s26 = smov 64  }
  0x85   : > { %1022 = vperm.xlu1 %6508, %v916_v8   ;;  %vm406_vm0 = vcmp.gt.s32.totalorder %v405_v16, 0  ;;  %s6959_s21 = smov 124   ;;  %s6960_s20 = smov 93  }
  0x86   : > { %v407_v22 = vsel %vm406_vm0, %v405_v16, 0  ;;  %s6961_s6 = smov 63   ;;  %p12928_p12 = scmp.ne.s32.totalorder %s12452_s0, 0 }
  0x87   : > { %v409_v23 = vand.u32 31, %v407_v22  ;;  %v408_v25 = vshrl.u32 %v407_v22, 5 }
  0x88   : > { %935 = vperm.xlu0 %6507, %v913_v12  }
  0x89   : > { %1027 = vperm.xlu1 %6508, %v917_v13   ;;  %v410_v26 = vsub.s32 32, %v409_v23  ;;  %v412_v28 = vshll.u32 %v12234_v27, %v409_v23  ;;  %v415_v30 = vshll.u32 %v12232_v29, %v409_v23  ;;  %v418_v32 = vshll.u32 %v12230_v31, %v409_v23 }
  0x8a   : > { %v421_v34 = vshll.u32 %v12228_v33, %v409_v23  ;;  %v424_v36 = vshll.u32 %v12226_v35, %v409_v23  ;;  %vm427_vm1 = vcmp.lt.s32.totalorder %v408_v25, 1  ;;  %vm430_vm2 = vcmp.lt.s32.totalorder %v408_v25, 4 }
  0x8b   : > { %v411_v37 = vshrl.u32 %v12234_v27, %v410_v26  ;;  %v413_v38 = vshrl.u32 %v12232_v29, %v410_v26  ;;  %v416_v39 = vshrl.u32 %v12230_v31, %v410_v26  ;;  %v419_v40 = vshrl.u32 %v12228_v33, %v410_v26 }
  0x8c   : > { %5676 = vrot.lane.b32.xlu0 %v7326_v21, %s6943_s27  ;;  %v422_v41 = vshrl.u32 %v12226_v35, %v410_v26  ;;  %v425_v43 = vshrl.u32 %v12224_v42, %v410_v26  ;;  %vm428_vm3 = vcmp.lt.s32.totalorder %v408_v25, 2  ;;  %vm429_vm4 = vcmp.lt.s32.totalorder %v408_v25, 3 }
  0x8d   : > { %5678 = vrot.lane.b32.xlu1 %v7324_v20, %s6943_s27  ;;  %v414_v45 = vor.u32 %v413_v38, %v412_v28  ;;  %v417_v46 = vor.u32 %v416_v39, %v415_v30  ;;  %v420_v47 = vor.u32 %v419_v40, %v418_v32  ;;  %s6962_s27 = smov 112  }
  0x8e   : > { %v423_v48 = vor.u32 %v422_v41, %v421_v34  ;;  %v426_v49 = vor.u32 %v425_v43, %v424_v36 }
  0x8f   : > { %v431_v50 = vsel %vm427_vm1, %v411_v37, %v414_v45  ;;  %v432_v51 = vsel %vm430_vm2, %v420_v47, 2102212464  ;;  %v435_v52 = vsel %vm427_vm1, %v414_v45, %v417_v46  ;;  %v439_v53 = vsel %vm427_vm1, %v417_v46, %v420_v47 }
  0x90   : > { %5740 = vrot.lane.b32.xlu0 %v7326_v21, %s6947_s23  ;;  %v433_v54 = vsel %vm429_vm4, %v417_v46, %v432_v51  ;;  %v436_v55 = vsel %vm430_vm2, %v423_v48, 920167782  ;;  %v440_v56 = vsel %vm430_vm2, %v426_v49, 1326507024  ;;  %v503_v51 = vlaneseq }
  0x91   : > { %5742 = vrot.lane.b32.xlu1 %v7324_v20, %s6947_s23  ;;  %v437_v57 = vsel %vm429_vm4, %v420_v47, %v436_v55  ;;  %v441_v58 = vsel %vm429_vm4, %v423_v48, %v440_v56  ;;  %v434_v59 = vsel %vm428_vm3, %v431_v50, %v433_v54  ;;  %s6963_s23 = smov 92   ;;  %v6967_v54 = vmov 1966171168  }
  0x92   : > { %v438_v60 = vsel %vm428_vm3, %v435_v52, %v437_v57  ;;  %v442_v61 = vsel %vm428_vm3, %v439_v53, %v441_v58  ;;  %v450_v3 = vmul.u32 %v443_v44, %v434_v59  ;;  %v501_v55 = vunpack.c.l.s4 %v6967_v54 }
  0x93   : > { %v7351_v62 = vmul.u32.u64.low %v443_v44, %v442_v61  ;;  %v7352_v63 = vmul.u32.u64.high %v443_v44, %v442_v61, %v7351_v62  ;;  %v7354_v1 = vmul.u32.u64.low %v443_v44, %v438_v60  ;;  %v7355_v2 = vmul.u32.u64.high %v443_v44, %v438_v60, %v7354_v1 }
  0x94   : > { %5684 = vrot.lane.b32.xlu0 %v7326_v21, %s6948_s13  ;;  %v502_v59 = vunpack.c.0.s8 %v501_v55  ;;  %v7429_v60 = vshrl.u32 %v503_v51, 7 }
  0x95   : > { %5686 = vrot.lane.b32.xlu1 %v7324_v20, %s6948_s13  ;;  %vm452_vm5 = vc.u32 %v7352_v63, %v7354_v1  ;;  %v453_v4 = vadd.s32 1, %v7355_v2  ;;  %v451_v17 = vadd.s32 %v7354_v1, %v7352_v63  ;;  %s6964_s13 = smov 62  }
  0x96   : > { %12469 = vst [vmem:[#allocation20_spill] sm:$0xff] %v7429_v60  ;;  %v7434_v63 = vsub.s32 %v502_v59, %v7429_v60 }
  0x97   : > { %v454_v6 = vsel %vm452_vm5, %v453_v4, %v7355_v2 }
  0x98   : > { %5748 = vrot.lane.b32.xlu0 %v7326_v21, %s6949_s22  ;;  %v455_v7 = vadd.s32 %v454_v6, %v450_v3  ;;  %12470 = vst [vmem:[#allocation21_spill] sm:$0xff] %v7434_v63 }
  0x99   : > { %5750 = vrot.lane.b32.xlu1 %v7324_v20, %s6949_s22  ;;  %s6965_s22 = smov 111  }
  0x9a   : > { %v456_v8 = vadd.s32 536870912, %v455_v7 }
  0x9c   : > { %5620 = vrot.lane.b32.xlu0 %v7326_v21, %s6950_s12  ;;  %v7368_v9 = vshrl.u32 %v456_v8, 30 }
  0x9d   : > { %5622 = vrot.lane.b32.xlu1 %v7324_v20, %s6950_s12  ;;  %s6966_s12 = smov 80  }
  0x9e   : > { %v458_v11 = vshll.u32 %v7368_v9, 30  ;;  %v481_v41 = vsub.s32 4, %v7368_v9 }
  0xa0   : > { %5692 = vrot.lane.b32.xlu0 %v7326_v21, %s6951_s8  ;;  %v459_v12 = vsub.s32 %v455_v7, %v458_v11  ;;  %v482_v10 = vsel %vm397_vm7, %v481_v41, %v7368_v9 }
  0xa1   : > { %5694 = vrot.lane.b32.xlu1 %v7324_v20, %s6951_s8  ;;  %v484_v43 = vsel %vm7395_vm8, 0, %v482_v10 }
  0xa2   : > { %v461_v13 = vsub.s32 0, %v459_v12  ;;  %v641_v44 = vadd.s32 3, %v484_v43  ;;  %v488_v47 = vand.u32 3, %v484_v43 }
  0xa4   : > { %5756 = vrot.lane.b32.xlu0 %v7326_v21, %s6952_s25  ;;  %v6065_v14 = vmin.u32 %v461_v13, %v459_v12  ;;  %v642_v48 = vand.u32 3, %v641_v44  ;;  %vm490_vm9 = vcmp.eq.s32.totalorder %v488_v47, 0  ;;  %vm493_vm10 = vcmp.eq.s32.totalorder %v488_v47, 2 }
  0xa5   : > { %5758 = vrot.lane.b32.xlu1 %v7324_v20, %s6952_s25  ;;  %vm489_vm13 = vcmp.lt.s32.totalorder %v488_v47, 2  ;;  %s6968_s25 = smov 61  }
  0xa6   : > { %v463_v15 = vclz %v6065_v14  ;;  %vm644_vm11 = vcmp.eq.s32.totalorder %v642_v48, 0  ;;  %vm647_vm12 = vcmp.eq.s32.totalorder %v642_v48, 2  ;;  %vm643_vm14 = vcmp.lt.s32.totalorder %v642_v48, 2 }
  0xa8   : > { %5628 = vrot.lane.b32.xlu0 %v7326_v21, %s6953_s17  ;;  %v6066_v16 = vadd.s32 4294967294, %v463_v15 }
  0xa9   : > { %5630 = vrot.lane.b32.xlu1 %v7324_v20, %s6953_s17  ;;  %s6969_s17 = smov 110  }
  0xaa   : > { %vm6067_vm6 = vcmp.lt.s32.totalorder %v6066_v16, 0 }
  0xab   : > { %v466_v18 = vsel %vm6067_vm6, 0, %v6066_v16 }
  0xac   : > { %5700 = vrot.lane.b32.xlu0 %v7326_v21, %s6954_s11  ;;  %v467_v19 = vsub.s32 32, %v466_v18  ;;  %v468_v22 = vshll.u32 %v459_v12, %v466_v18  ;;  %v471_v23 = vsub.s32 4294967266, %v466_v18 }
  0xad   : > { %5702 = vrot.lane.b32.xlu1 %v7324_v20, %s6954_s11  ;;  %s6970_s11 = smov 60  }
  0xae   : > { %v469_v24 = vshrl.u32 %v451_v17, %v467_v19  ;;  %v472_v25 = vadd.s32 127, %v471_v23 }
  0xb0   : > { %5764 = vrot.lane.b32.xlu0 %v7326_v21, %s6955_s18  ;;  %v470_v26 = vor.u32 %v469_v24, %v468_v22  ;;  %v473_v28 = vshll.u32 %v472_v25, 23 }
  0xb1   : > { %5766 = vrot.lane.b32.xlu1 %v7324_v20, %s6955_s18  ;;  %s6975_s18 = smov 48  }
  0xb2   : > { %v474_v30 = vor.u32 4788187, %v473_v28  ;;  %v477_v34 = vcvt.s32.f32 %v470_v26 }
  0xb4   : > { %5636 = vrot.lane.b32.xlu0 %v7326_v21, %s6956_s14  ;;  %v475_v32 = vand.u32 2147483647, %v474_v30 }
  0xb5   : > { %5638 = vrot.lane.b32.xlu1 %v7324_v20, %s6956_s14 }
  0xb6   : > { %v478_v36 = vmul.f32 %v477_v34, %v475_v32  ;;  %v7454_v32 = vsub.s32 0, %v7429_v60 }
  0xb8   : > { %5708 = vrot.lane.b32.xlu0 %v7326_v21, %s6957_s19  ;;  %v479_v37 = vxor.u32 2147483648, %v478_v36  ;;  %12472 = vst [vmem:[#allocation22_spill] sm:$0xff] %v7454_v32 }
  0xb9   : > { %5710 = vrot.lane.b32.xlu1 %v7324_v20, %s6957_s19  ;;  %s12471_s19 = sld [smem:[#allocation90_spill]] }
  0xba   : > { %v480_v39 = vsel %vm397_vm7, %v479_v37, %v478_v36 }
  0xbb   : > { %v483_v40 = vsel %vm7395_vm8, %v7304_v5, %v480_v39 }
  0xbc   : > { %5772 = vrot.lane.b32.xlu0 %v7326_v21, %s6958_s26  ;;  %6546 = vcosq.f32 %v483_v40 }
  0xbd   : > { %5774 = vrot.lane.b32.xlu1 %v7324_v20, %s6958_s26  ;;  %6548 = vsinq.f32 %v483_v40 }
  0xbf   : > { %v393_v8 = vld [vmem:[%s12471_s19] sm:$0xff] }
  0xc0   : > { %5644 = vrot.lane.b32.xlu0 %v7326_v21, %s6959_s21  ;;  %v702_v14 = vadd.f32 0.001, %v393_v8  ;;  %v756_v26 = vmul.f32 6.2831855, %v393_v8 }
  0xc1   : > { %5646 = vrot.lane.b32.xlu1 %v7324_v20, %s6959_s21 }
  0xc2   : > { %v703_v25 = vmul.f32 %v702_v14, %v702_v14  ;;  %v7456_v41 = vmul.f32 %v756_v26, %v393_v8 }
  0xc4   : > { %5716 = vrot.lane.b32.xlu0 %v7326_v21, %s6960_s20  ;;  %6550 = vrcp.f32 %v703_v25  ;;  %12473 = vst [vmem:[#allocation23_spill] sm:$0xff] %v7456_v41 }
  0xc5   : > { %5718 = vrot.lane.b32.xlu1 %v7324_v20, %s6960_s20 }
  0xc6   : > { %v6547_v45 = vpop.eup %6546 }
  0xc7   : > { %v6549_v46 = vpop.eup %6548  ;;  %v494_v50 = vxor.u32 2147483648, %v6547_v45 }
  0xc8   : > { %5780 = vrot.lane.b32.xlu0 %v7326_v21, %s6961_s6  ;;  %v491_v49 = vxor.u32 2147483648, %v6549_v46 }
  0xc9   : > { %5782 = vrot.lane.b32.xlu1 %v7324_v20, %s6961_s6  ;;  %v495_v53 = vsel %vm493_vm10, %v494_v50, %v6549_v46  ;;  %v649_v57 = vsel %vm647_vm12, %v494_v50, %v6549_v46  ;;  %s12506_s6 = sld [smem:[#allocation89_spill]] }
  0xca   : > { %v492_v52 = vsel %vm490_vm9, %v6547_v45, %v491_v49  ;;  %v646_v56 = vsel %vm644_vm11, %v6547_v45, %v491_v49 }
  0xcb   : > { %v496_v58 = vsel %vm489_vm13, %v492_v52, %v495_v53  ;;  %v650_v61 = vsel %vm643_vm14, %v646_v56, %v649_v57 }
  0xcc   : > { %5652 = vrot.lane.b32.xlu0 %v7326_v21, %s6962_s27  ;;  %v497_v62 = vsel %vm487_vm15, nan, %v496_v58  ;;  %v651_v5 = vsel %vm487_vm15, nan, %v650_v61 }
  0xcd   : > { %5654 = vrot.lane.b32.xlu1 %v7324_v20, %s6962_s27  ;;  %v499_v1 = vcombine.high %v497_v62, %v497_v62  ;;  %v653_v2 = vcombine.high %v651_v5, %v651_v5  ;;  %v506_v3 = vrot.slane %v497_v62, %v7434_v63  ;;  %v660_v6 = vrot.slane %v651_v5, %v7434_v63 }
  0xcf   : > { %v513_v4 = vrot.slane %v499_v1, %v7434_v63  ;;  %v667_v7 = vrot.slane %v653_v2, %v7434_v63  ;;  %v514_v9 = vcombine.high %v506_v3, %v506_v3  ;;  %v668_v12 = vcombine.high %v660_v6, %v660_v6 }
  0xd0   : > { %5724 = vrot.lane.b32.xlu0 %v7326_v21, %s6963_s23  ;;  %v522_v15 = vrot.slane %v506_v3, %v7434_v63  ;;  %v676_v19 = vrot.slane %v660_v6, %v7434_v63 }
  0xd1   : > { %5726 = vrot.lane.b32.xlu1 %v7324_v20, %s6963_s23  ;;  %v515_v11 = vcombine.high %v513_v4, %v513_v4  ;;  %v669_v13 = vcombine.high %v667_v7, %v667_v7  ;;  %v536_v16 = vrot.slane %v514_v9, %v7434_v63  ;;  %v529_v17 = vrot.slane %v513_v4, %v7434_v63  ;;  %s12927_s23 = sld [smem:[#allocation93_spill]] }
  0xd2   : > { %v690_v22 = vrot.slane %v668_v12, %v7434_v63  ;;  %v683_v23 = vrot.slane %v667_v7, %v7434_v63  ;;  %v544_v28 = vcombine.high %v522_v15, %v522_v15  ;;  %v698_v37 = vcombine.high %v676_v19, %v676_v19 }
  0xd3   : > { %v543_v18 = vrot.slane %v515_v11, %v7434_v63  ;;  %v697_v24 = vrot.slane %v669_v13, %v7434_v63  ;;  %v546_v30 = vcombine.high %v536_v16, %v536_v16  ;;  %v545_v34 = vcombine.high %v529_v17, %v529_v17 }
  0xd4   : > { %5788 = vrot.lane.b32.xlu0 %v7326_v21, %s6964_s13  ;;  %v700_v38 = vcombine.high %v690_v22, %v690_v22  ;;  %v699_v39 = vcombine.high %v683_v23, %v683_v23  ;;  %v7459_v10 = vrot.slane %v522_v15, %v7454_v32  ;;  %v7462_v43 = vrot.slane %v536_v16, %v7454_v32 }
  0xd5   : > { %5790 = vrot.lane.b32.xlu1 %v7324_v20, %s6964_s13  ;;  %v547_v36 = vcombine.high %v543_v18, %v543_v18  ;;  %v701_v40 = vcombine.high %v697_v24, %v697_v24  ;;  %v7465_v44 = vrot.slane %v544_v28, %v7454_v32  ;;  %v7468_v45 = vrot.slane %v546_v30, %v7454_v32 }
  0xd6   : > { %12474 = vst [vmem:[#allocation24_spill] sm:$0xff] %v7459_v10  ;;  %12475 = vst [vmem:[#allocation25_spill] sm:$0xff] %v7462_v43  ;;  %v7471_v46 = vrot.slane %v529_v17, %v7454_v32  ;;  %v7474_v47 = vrot.slane %v543_v18, %v7454_v32  ;;  %v7477_v48 = vrot.slane %v545_v34, %v7454_v32 }
  0xd7   : > { %12476 = vst [vmem:[#allocation26_spill] sm:$0xff] %v7465_v44  ;;  %12477 = vst [vmem:[#allocation27_spill] sm:$0xff] %v7468_v45  ;;  %v7480_v49 = vrot.slane %v547_v36, %v7454_v32  ;;  %v7483_v50 = vrot.slane %v676_v19, %v7454_v32  ;;  %v7486_v51 = vrot.slane %v690_v22, %v7454_v32 }
  0xd8   : > { %5662 = vrot.lane.b32.xlu0 %v7324_v20, %s6965_s22  ;;  %12478 = vst [vmem:[#allocation28_spill] sm:$0xff] %v7471_v46  ;;  %12479 = vst [vmem:[#allocation29_spill] sm:$0xff] %v7474_v47  ;;  %v7489_v52 = vrot.slane %v698_v37, %v7454_v32  ;;  %v7492_v53 = vrot.slane %v700_v38, %v7454_v32  ;;  %v7499_v56 = vrot.slane %v683_v23, %v7454_v32 }
  0xd9   : > { %5660 = vrot.lane.b32.xlu1 %v7326_v21, %s6965_s22  ;;  %12480 = vst [vmem:[#allocation30_spill] sm:$0xff] %v7477_v48  ;;  %12481 = vst [vmem:[#allocation31_spill] sm:$0xff] %v7480_v49  ;;  %v7502_v57 = vrot.slane %v697_v24, %v7454_v32  ;;  %v7505_v58 = vrot.slane %v699_v39, %v7454_v32  ;;  %v7508_v59 = vrot.slane %v701_v40, %v7454_v32  ;;  %v7546_v24 = vpop.eup %6550  ;;  %s12509_s22 = sld [smem:[#allocation91_spill]] }
  0xda   : > { %12482 = vst [vmem:[#allocation32_spill] sm:$0xff] %v7483_v50  ;;  %12483 = vst [vmem:[#allocation33_spill] sm:$0xff] %v7486_v51 }
  0xdb   : > { %12484 = vst [vmem:[#allocation34_spill] sm:$0xff] %v7489_v52  ;;  %12485 = vst [vmem:[#allocation35_spill] sm:$0xff] %v7492_v53 }
  0xdc   : > { %5732 = vrot.lane.b32.xlu0 %v7326_v21, %s6966_s12  ;;  %12486 = vst [vmem:[#allocation36_spill] sm:$0xff] %v7499_v56  ;;  %12487 = vst [vmem:[#allocation37_spill] sm:$0xff] %v7502_v57 }
  0xdd   : > { %5734 = vrot.lane.b32.xlu1 %v7324_v20, %s6966_s12  ;;  %12488 = vst [vmem:[#allocation38_spill] sm:$0xff] %v7505_v58  ;;  %12489 = vst [vmem:[#allocation39_spill] sm:$0xff] %v7508_v59 }
  0xde   : > { %12490 = vst [vmem:[#allocation40_spill] sm:$0xff] %v7546_v24 }
  0xe0   : > { %5796 = vrot.lane.b32.xlu0 %v7326_v21, %s6968_s25 }
  0xe1   : > { %5798 = vrot.lane.b32.xlu1 %v7324_v20, %s6968_s25  ;;  %s6973_s25 = smov 32  }
  0xe4   : > { %5668 = vrot.lane.b32.xlu0 %v7326_v21, %s6969_s17 }
  0xe5   : > { %5670 = vrot.lane.b32.xlu1 %v7324_v20, %s6969_s17  ;;  %s6974_s17 = smov 16  }
  0xe9   : > { %5804 = vrot.lane.b32.xlu1 %v7326_v21, %s6970_s11 }
  0xfb   : > { %v7494_v54 = vpop.permute.xlu0 %925 }
  0xfc   : > { %v7496_v55 = vpop.permute.xlu1 %920  ;;  %v979_v62 = vmul.f32 %v7459_v10, %v7494_v54  ;;  %v983_v1 = vmul.f32 %v7462_v43, %v7494_v54  ;;  %v987_v3 = vmul.f32 %v7465_v44, %v7494_v54  ;;  %v991_v6 = vmul.f32 %v7468_v45, %v7494_v54 }
  0xfd   : > { %v978_v61 = vmul.f32 %v7459_v10, %v7496_v55  ;;  %v982_v5 = vmul.f32 %v7462_v43, %v7496_v55  ;;  %v986_v2 = vmul.f32 %v7465_v44, %v7496_v55  ;;  %v990_v4 = vmul.f32 %v7468_v45, %v7496_v55 }
  0xfe   : > { %v994_v7 = vmul.f32 %v7471_v46, %v7496_v55  ;;  %v995_v8 = vmul.f32 %v7471_v46, %v7494_v54  ;;  %v998_v9 = vmul.f32 %v7474_v47, %v7496_v55  ;;  %v999_v11 = vmul.f32 %v7474_v47, %v7494_v54 }
  0xff   : > { %v1018_v12 = vpop.permute.xlu0 %1017  ;;  %v1002_v14 = vmul.f32 %v7477_v48, %v7496_v55  ;;  %v1003_v15 = vmul.f32 %v7477_v48, %v7494_v54  ;;  %v1006_v16 = vmul.f32 %v7480_v49, %v7496_v55  ;;  %v1007_v17 = vmul.f32 %v7480_v49, %v7494_v54 }
 0x100   : > { %v1013_v13 = vpop.permute.xlu1 %1012  ;;  %v1071_v19 = vmul.f32 %v7483_v50, %v1018_v12  ;;  %v1075_v23 = vmul.f32 %v7486_v51, %v1018_v12  ;;  %v1079_v26 = vmul.f32 %v7489_v52, %v1018_v12  ;;  %v1083_v30 = vmul.f32 %v7492_v53, %v1018_v12 }
 0x101   : > { %v1070_v18 = vmul.f32 %v7483_v50, %v1013_v13  ;;  %v1074_v22 = vmul.f32 %v7486_v51, %v1013_v13  ;;  %v1078_v25 = vmul.f32 %v7489_v52, %v1013_v13  ;;  %v1082_v28 = vmul.f32 %v7492_v53, %v1013_v13 }
 0x102   : > { %v1086_v34 = vmul.f32 %v7499_v56, %v1013_v13  ;;  %v1087_v36 = vmul.f32 %v7499_v56, %v1018_v12  ;;  %v1090_v37 = vmul.f32 %v7502_v57, %v1013_v13  ;;  %v1091_v38 = vmul.f32 %v7502_v57, %v1018_v12 }
 0x103   : > { %v1094_v39 = vmul.f32 %v7505_v58, %v1013_v13  ;;  %v1095_v40 = vmul.f32 %v7505_v58, %v1018_v12  ;;  %v1098_v0 = vmul.f32 %v7508_v59, %v1013_v13  ;;  %v1099_v42 = vmul.f32 %v7508_v59, %v1018_v12 }
 0x104   : > { %v7560_v35 = vadd.f32 %v1070_v18, %v978_v61  ;;  %v7562_v33 = vadd.f32 %v1071_v19, %v979_v62  ;;  %v7564_v31 = vadd.f32 %v1074_v22, %v982_v5  ;;  %v7566_v29 = vadd.f32 %v1075_v23, %v983_v1 }
 0x105   : > { %v7568_v27 = vadd.f32 %v1078_v25, %v986_v2  ;;  %v7570_v20 = vadd.f32 %v1079_v26, %v987_v3  ;;  %v7572_v21 = vadd.f32 %v1082_v28, %v990_v4  ;;  %v7574_v60 = vadd.f32 %v1083_v30, %v991_v6 }
 0x106   : > { %v7576_v32 = vadd.f32 %v1086_v34, %v994_v7  ;;  %v7578_v24 = vadd.f32 %v1087_v36, %v995_v8  ;;  %v7580_v61 = vadd.f32 %v1090_v37, %v998_v9  ;;  %v7582_v62 = vadd.f32 %v1091_v38, %v999_v11 }
 0x107   : > { %12491 = vst [vmem:[#allocation41_spill] sm:$0xff] %v7570_v20  ;;  %12492 = vst [vmem:[#allocation42_spill] sm:$0xff] %v7572_v21  ;;  %v7584_v5 = vadd.f32 %v1094_v39, %v1002_v14  ;;  %v7586_v1 = vadd.f32 %v1095_v40, %v1003_v15  ;;  %v7588_v2 = vadd.f32 %v1098_v0, %v1006_v16 }
 0x108   : > { %12493 = vst [vmem:[#allocation43_spill] sm:$0xff] %v7574_v60  ;;  %12494 = vst [vmem:[#allocation44_spill] sm:$0xff] %v7576_v32  ;;  %v7590_v3 = vadd.f32 %v1099_v42, %v1007_v17  ;;  %v1134_v4 = vmul.f32 %v1013_v13, %v7459_v10  ;;  %v1135_v6 = vmul.f32 %v1018_v12, %v7459_v10 }
 0x109   : > { %12495 = vst [vmem:[#allocation45_spill] sm:$0xff] %v7578_v24  ;;  %12496 = vst [vmem:[#allocation46_spill] sm:$0xff] %v7580_v61  ;;  %v1138_v7 = vmul.f32 %v1013_v13, %v7462_v43  ;;  %v1139_v8 = vmul.f32 %v1018_v12, %v7462_v43  ;;  %v1142_v9 = vmul.f32 %v1013_v13, %v7465_v44 }
 0x10a   : > { %12497 = vst [vmem:[#allocation47_spill] sm:$0xff] %v7582_v62  ;;  %12498 = vst [vmem:[#allocation48_spill] sm:$0xff] %v7584_v5  ;;  %v1143_v11 = vmul.f32 %v1018_v12, %v7465_v44  ;;  %v1146_v14 = vmul.f32 %v1013_v13, %v7468_v45  ;;  %v1147_v15 = vmul.f32 %v1018_v12, %v7468_v45 }
 0x10b   : > { %12499 = vst [vmem:[#allocation49_spill] sm:$0xff] %v7586_v1  ;;  %12500 = vst [vmem:[#allocation50_spill] sm:$0xff] %v7588_v2  ;;  %v1150_v0 = vmul.f32 %v1013_v13, %v7471_v46  ;;  %v1151_v42 = vmul.f32 %v1018_v12, %v7471_v46  ;;  %v1154_v16 = vmul.f32 %v1013_v13, %v7474_v47 }
 0x10c   : > { %12501 = vst [vmem:[#allocation51_spill] sm:$0xff] %v7590_v3  ;;  %v1155_v17 = vmul.f32 %v1018_v12, %v7474_v47  ;;  %v1158_v18 = vmul.f32 %v1013_v13, %v7477_v48  ;;  %v1159_v19 = vmul.f32 %v1018_v12, %v7477_v48  ;;  %v1162_v22 = vmul.f32 %v1013_v13, %v7480_v49 }
 0x10d   : > { %v1163_v23 = vmul.f32 %v1018_v12, %v7480_v49  ;;  %v1166_v25 = vmul.f32 %v7483_v50, %v7496_v55  ;;  %v1167_v26 = vmul.f32 %v7483_v50, %v7494_v54  ;;  %v1170_v28 = vmul.f32 %v7486_v51, %v7496_v55 }
 0x10e   : > { %v1171_v30 = vmul.f32 %v7486_v51, %v7494_v54  ;;  %v1174_v34 = vmul.f32 %v7489_v52, %v7496_v55  ;;  %v1175_v13 = vmul.f32 %v7489_v52, %v7494_v54  ;;  %v1178_v12 = vmul.f32 %v7492_v53, %v7496_v55 }
 0x10f   : > { %v1179_v36 = vmul.f32 %v7492_v53, %v7494_v54  ;;  %v1182_v37 = vmul.f32 %v7499_v56, %v7496_v55  ;;  %v1183_v38 = vmul.f32 %v7499_v56, %v7494_v54  ;;  %v1186_v39 = vmul.f32 %v7502_v57, %v7496_v55 }
 0x110   : > { %v1187_v40 = vmul.f32 %v7502_v57, %v7494_v54  ;;  %v1190_v49 = vmul.f32 %v7505_v58, %v7496_v55  ;;  %v1191_v52 = vmul.f32 %v7505_v58, %v7494_v54  ;;  %v1194_v53 = vmul.f32 %v7508_v59, %v7496_v55 }
 0x111   : > { %v1195_v51 = vmul.f32 %v7508_v59, %v7494_v54  ;;  %v1198_v48 = vsub.f32 %v1134_v4, %v1166_v25  ;;  %v1199_v56 = vsub.f32 %v1135_v6, %v1167_v26  ;;  %v1202_v50 = vsub.f32 %v1138_v7, %v1170_v28 }
 0x112   : > { %v1203_v47 = vsub.f32 %v1139_v8, %v1171_v30  ;;  %v1206_v46 = vsub.f32 %v1142_v9, %v1174_v34  ;;  %v1207_v45 = vsub.f32 %v1143_v11, %v1175_v13  ;;  %v1210_v44 = vsub.f32 %v1146_v14, %v1178_v12 }
 0x113   : > { %v1211_v57 = vsub.f32 %v1147_v15, %v1179_v36  ;;  %v1214_v43 = vsub.f32 %v1150_v0, %v1182_v37  ;;  %v1215_v10 = vsub.f32 %v1151_v42, %v1183_v38  ;;  %v1218_v63 = vsub.f32 %v1154_v16, %v1186_v39  ;;  %v12502_v15 = vld [vmem:[#allocation49_spill] sm:$0xff]  ;;  %v12503_v42 = vld [vmem:[#allocation50_spill] sm:$0xff] }
 0x114   : > { %v1219_v41 = vsub.f32 %v1155_v17, %v1187_v40  ;;  %v1222_v3 = vsub.f32 %v1158_v18, %v1190_v49  ;;  %v1223_v58 = vsub.f32 %v1159_v19, %v1191_v52  ;;  %v1226_v2 = vsub.f32 %v1162_v22, %v1194_v53  ;;  %v12504_v17 = vld [vmem:[#allocation51_spill] sm:$0xff] }
 0x115   : > { %v1227_v1 = vsub.f32 %v1163_v23, %v1195_v51  ;;  %v1230_v55 = vmul.f32 %v7560_v35, %v7560_v35  ;;  %v1231_v54 = vmul.f32 %v7562_v33, %v7562_v33  ;;  %v1234_v4 = vmul.f32 %v7564_v31, %v7564_v31 }
 0x116   : > { %v1235_v6 = vmul.f32 %v7566_v29, %v7566_v29  ;;  %v1238_v7 = vmul.f32 %v7568_v27, %v7568_v27  ;;  %v1239_v49 = vmul.f32 %v7570_v20, %v7570_v20  ;;  %v1242_v51 = vmul.f32 %v7572_v21, %v7572_v21 }
 0x117   : > { %v1243_v52 = vmul.f32 %v7574_v60, %v7574_v60  ;;  %v1246_v53 = vmul.f32 %v7576_v32, %v7576_v32  ;;  %v1247_v8 = vmul.f32 %v7578_v24, %v7578_v24  ;;  %v1250_v9 = vmul.f32 %v7580_v61, %v7580_v61 }
 0x118   : > { %v1251_v11 = vmul.f32 %v7582_v62, %v7582_v62  ;;  %v1254_v14 = vmul.f32 %v7584_v5, %v7584_v5  ;;  %v1255_v0 = vmul.f32 %v12502_v15, %v12502_v15  ;;  %v1258_v16 = vmul.f32 %v12503_v42, %v12503_v42 }
 0x119   : > { %v1259_v18 = vmul.f32 %v12504_v17, %v12504_v17  ;;  %v1262_v19 = vmul.f32 %v1198_v48, %v1198_v48  ;;  %v1263_v22 = vmul.f32 %v1199_v56, %v1199_v56  ;;  %v1266_v23 = vmul.f32 %v1202_v50, %v1202_v50  ;;  %v391_v56 = vld [vmem:[%s12506_s6] sm:$0xff] }
 0x11a   : > { %v1267_v25 = vmul.f32 %v1203_v47, %v1203_v47  ;;  %v1270_v26 = vmul.f32 %v1206_v46, %v1206_v46  ;;  %v1271_v28 = vmul.f32 %v1207_v45, %v1207_v45  ;;  %v1274_v30 = vmul.f32 %v1210_v44, %v1210_v44 }
 0x11b   : > { %v1275_v34 = vmul.f32 %v1211_v57, %v1211_v57  ;;  %v1278_v13 = vmul.f32 %v1214_v43, %v1214_v43  ;;  %v1279_v12 = vmul.f32 %v1215_v10, %v1215_v10  ;;  %v1282_v36 = vmul.f32 %v1218_v63, %v1218_v63 }
 0x11c   : > { %v1283_v37 = vmul.f32 %v1219_v41, %v1219_v41  ;;  %v1286_v38 = vmul.f32 %v1222_v3, %v1222_v3  ;;  %v1287_v39 = vmul.f32 %v1223_v58, %v1223_v58  ;;  %v1290_v40 = vmul.f32 %v1226_v2, %v1226_v2  ;;  %v12508_v3 = vld [vmem:[#allocation23_spill] sm:$0xff] }
 0x11d   : > { %v1291_v59 = vmul.f32 %v1227_v1, %v1227_v1  ;;  %v7672_v42 = vadd.f32 %v1262_v19, %v1230_v55  ;;  %v7674_v15 = vadd.f32 %v1263_v22, %v1231_v54  ;;  %v7676_v48 = vadd.f32 %v1266_v23, %v1234_v4  ;;  %v394_v54 = vld [vmem:[%s12509_s22] sm:$0xff]  ;;  %v12510_v4 = vld [vmem:[#allocation21_spill] sm:$0xff]  ;;  %s5922_s22 = scalar_lea.sflag [#allocation5], %s7268_s24 }
 0x11e   : > { %v7678_v50 = vadd.f32 %v1267_v25, %v1235_v6  ;;  %v7680_v46 = vadd.f32 %v1270_v26, %v1238_v7  ;;  %v7682_v44 = vadd.f32 %v1271_v28, %v1239_v49  ;;  %v7684_v43 = vadd.f32 %v1274_v30, %v1242_v51  ;;  %v12511_v51 = vld [vmem:[#allocation40_spill] sm:$0xff] }
 0x11f   : > { %v7686_v63 = vadd.f32 %v1275_v34, %v1243_v52  ;;  %v7688_v41 = vadd.f32 %v1278_v13, %v1246_v53  ;;  %v7690_v10 = vadd.f32 %v1279_v12, %v1247_v8  ;;  %v7692_v45 = vadd.f32 %v1282_v36, %v1250_v9 }
 0x120   : > { %v7694_v47 = vadd.f32 %v1283_v37, %v1251_v11  ;;  %v7699_v57 = vadd.f32 %v1286_v38, %v1254_v14  ;;  %v7701_v58 = vadd.f32 %v1287_v39, %v1255_v0  ;;  %v7703_v1 = vadd.f32 %v1290_v40, %v1258_v16 }
 0x121   : > { %v7705_v2 = vadd.f32 %v1291_v59, %v1259_v18  ;;  %6552 = vrcp.f32 %v12508_v3  ;;  %v811_v55 = vcombine.high %v391_v56, %v391_v56  ;;  %v818_v6 = vrot.slane %v391_v56, %v12510_v4  ;;  %v12512_v18 = vld [vmem:[#allocation22_spill] sm:$0xff] }
 0x122   : > { %12505 = vst [vmem:[#allocation52_spill] sm:$0xff] %v7694_v47  ;;  %v861_v49 = vcombine.high %v394_v54, %v394_v54  ;;  %v707_v52 = vcombine.high %v12511_v51, %v12511_v51  ;;  %v868_v11 = vrot.slane %v394_v54, %v12510_v4  ;;  %v714_v14 = vrot.slane %v12511_v51, %v12510_v4 }
 0x123   : > { %12507 = vst [vmem:[#allocation53_spill] sm:$0xff] %v7705_v2  ;;  %v825_v7 = vrot.slane %v811_v55, %v12510_v4  ;;  %v826_v53 = vcombine.high %v818_v6, %v818_v6  ;;  %v7716_v59 = vrot.slane %v818_v6, %v12510_v4 }
 0x124   : > { %v875_v0 = vrot.slane %v861_v49, %v12510_v4  ;;  %v721_v16 = vrot.slane %v707_v52, %v12510_v4  ;;  %v876_v30 = vcombine.high %v868_v11, %v868_v11  ;;  %v7738_v34 = vrot.slane %v868_v11, %v12510_v4 }
 0x125   : > { %v827_v9 = vcombine.high %v825_v7, %v825_v7  ;;  %v7725_v19 = vrot.slane %v7716_v59, %v12512_v18  ;;  %v7729_v25 = vrot.slane %v825_v7, %v12510_v4  ;;  %v7732_v26 = vrot.slane %v826_v53, %v12510_v4 }
 0x126   : > { %v722_v13 = vcombine.high %v714_v14, %v714_v14  ;;  %v856_v12 = vcombine.high %v7716_v59, %v7716_v59  ;;  %v877_v36 = vcombine.high %v875_v0, %v875_v0  ;;  %v723_v37 = vcombine.high %v721_v16, %v721_v16 }
 0x127   : > { %12513 = vst [vmem:[#allocation23_spill] sm:$0xff] %v7725_v19  ;;  %v7735_v28 = vrot.slane %v827_v9, %v12510_v4  ;;  %v7744_v38 = vrot.slane %v7732_v26, %v12512_v18  ;;  %v1534_v39 = vmul.f32 %v7725_v19, %v7560_v35  ;;  %v7750_v40 = vrot.slane %v7738_v34, %v12512_v18 }
 0x128   : > { %v857_v55 = vcombine.high %v7729_v25, %v7729_v25  ;;  %v858_v54 = vcombine.high %v7732_v26, %v7732_v26  ;;  %v7760_v7 = vrot.slane %v875_v0, %v12510_v4  ;;  %v898_v35 = vrot.slane %v876_v30, %v12510_v4 }
 0x129   : > { %12514 = vst [vmem:[#allocation21_spill] sm:$0xff] %v7744_v38  ;;  %12515 = vst [vmem:[#allocation40_spill] sm:$0xff] %v7750_v40  ;;  %v859_v6 = vcombine.high %v7735_v28, %v7735_v28  ;;  %v1535_v49 = vmul.f32 %v7725_v19, %v7562_v33  ;;  %v730_v51 = vrot.slane %v714_v14, %v12510_v4 }
 0x12a   : > { %v737_v52 = vrot.slane %v721_v16, %v12510_v4  ;;  %v744_v53 = vrot.slane %v722_v13, %v12510_v4  ;;  %v751_v9 = vrot.slane %v723_v37, %v12510_v4  ;;  %v1538_v59 = vmul.f32 %v7744_v38, %v7564_v31 }
 0x12b   : > { %v6553_v8 = vpop.eup %6552  ;;  %v7773_v11 = vrot.slane %v898_v35, %v12512_v18  ;;  %v7776_v0 = vadd.f32 %v7750_v40, %v1534_v39  ;;  %v906_v26 = vcombine.high %v7738_v34, %v7738_v34  ;;  %v907_v31 = vcombine.high %v7760_v7, %v7760_v7 }
 0x12c   : > { %v761_v22 = vcombine.high %v6553_v8, %v6553_v8  ;;  %v768_v23 = vrot.slane %v6553_v8, %v12510_v4  ;;  %v905_v8 = vrot.slane %v877_v36, %v12510_v4  ;;  %v908_v30 = vcombine.high %v898_v35, %v898_v35 }
 0x12d   : > { %12516 = vst [vmem:[#allocation54_spill] sm:$0xff] %v7773_v11  ;;  %12517 = vst [vmem:[#allocation55_spill] sm:$0xff] %v7776_v0  ;;  %v7792_v13 = vadd.f32 %v7750_v40, %v1535_v49  ;;  %v752_v36 = vcombine.high %v730_v51, %v730_v51  ;;  %v753_v37 = vcombine.high %v737_v52, %v737_v52  ;;  %v1641_v2 = vand.u32 2139095040, %v7776_v0 }
 0x12e   : > { %v775_v56 = vrot.slane %v761_v22, %v12510_v4  ;;  %v776_v3 = vcombine.high %v768_v23, %v768_v23  ;;  %v7779_v14 = vrot.slane %v768_v23, %v12510_v4  ;;  %v754_v23 = vcombine.high %v744_v53, %v744_v53 }
 0x12f   : > { %12521 = vst [vmem:[#allocation59_spill] sm:$0xff] %v7792_v13  ;;  %v909_v39 = vcombine.high %v905_v8, %v905_v8  ;;  %v755_v19 = vcombine.high %v751_v9, %v751_v9  ;;  %v7809_v47 = vrot.slane %v730_v51, %v12512_v18  ;;  %v1744_v17 = vand.u32 2139095040, %v7792_v13 }
 0x130   : > { %v777_v33 = vcombine.high %v775_v56, %v775_v56  ;;  %12518 = vst [vmem:[#allocation56_spill] sm:$0xff] %v7779_v14  ;;  %v7782_v16 = vrot.slane %v775_v56, %v12510_v4  ;;  %v7785_v22 = vrot.slane %v776_v3, %v12510_v4  ;;  %v7795_v56 = vadd.f32 %v7773_v11, %v1538_v59 }
 0x131   : > { %12524 = vst [vmem:[#allocation62_spill] sm:$0xff] %v7809_v47  ;;  %v7812_v59 = vrot.slane %v744_v53, %v12512_v18  ;;  %v1642_v3 = vshrl.u32 %v1641_v2, 23  ;;  %v7822_v49 = vrot.slane %v737_v52, %v12512_v18  ;;  %v7825_v40 = vrot.slane %v751_v9, %v12512_v18 }
 0x132   : > { %12519 = vst [vmem:[#allocation57_spill] sm:$0xff] %v7782_v16  ;;  %12520 = vst [vmem:[#allocation58_spill] sm:$0xff] %v7785_v22  ;;  %v7800_v34 = vrot.slane %v777_v33, %v12510_v4  ;;  %v7816_v4 = vrot.slane %v752_v36, %v12512_v18  ;;  %v7819_v33 = vrot.slane %v754_v23, %v12512_v18  ;;  %v12530_v35 = vand.u32 2147483647, %v7776_v0 }
 0x133   : > { %12522 = vst [vmem:[#allocation60_spill] sm:$0xff] %v7795_v56  ;;  %12525 = vst [vmem:[#allocation63_spill] sm:$0xff] %v7812_v59  ;;  %v6072_v51 = vadd.s32 4294967169, %v1642_v3  ;;  %v2053_v2 = vand.u32 2139095040, %v7795_v56  ;;  %v7831_v16 = vrot.slane %v753_v37, %v12512_v18  ;;  %v7834_v36 = vrot.slane %v755_v19, %v12512_v18 }
 0x134   : > { %12523 = vst [vmem:[#allocation61_spill] sm:$0xff] %v7800_v34  ;;  %12526 = vst [vmem:[#allocation64_spill] sm:$0xff] %v7816_v4  ;;  %v1645_v53 = vand.u32 8388607, %v12530_v35  ;;  %v1745_v34 = vshrl.u32 %v1744_v17, 23  ;;  %v7837_v23 = vrot.slane %v856_v12, %v12512_v18  ;;  %v7840_v52 = vrot.slane %v858_v54, %v12512_v18 }
 0x135   : > { %12527 = vst [vmem:[#allocation65_spill] sm:$0xff] %v7819_v33  ;;  %12528 = vst [vmem:[#allocation66_spill] sm:$0xff] %v7822_v49  ;;  %v7844_v9 = vrot.slane %v7729_v25, %v12512_v18  ;;  %v7848_v17 = vrot.slane %v7735_v28, %v12512_v18  ;;  %v1648_v3 = vadd.s32 1, %v6072_v51  ;;  %v7851_v35 = vrot.slane %v857_v55, %v12512_v18 }
 0x136   : > { %12529 = vst [vmem:[#allocation67_spill] sm:$0xff] %v7825_v40  ;;  %12531 = vst [vmem:[#allocation68_spill] sm:$0xff] %v7831_v16  ;;  %v6076_v37 = vadd.s32 4294967169, %v1745_v34  ;;  %v7854_v19 = vrot.slane %v859_v6, %v12512_v18  ;;  %v1539_v12 = vmul.f32 %v7744_v38, %v7566_v29  ;;  %v12300_v54 = vand.u32 2147483647, %v7792_v13 }
 0x137   : > { %12532 = vst [vmem:[#allocation69_spill] sm:$0xff] %v7834_v36  ;;  %12533 = vst [vmem:[#allocation70_spill] sm:$0xff] %v7837_v23  ;;  %v1646_v22 = vor.u32 8388608, %v1645_v53  ;;  %vm1649_vm0 = vcmp.gt.s32.totalorder %v1648_v3, 0  ;;  %v2054_v14 = vshrl.u32 %v2053_v2, 23  ;;  %v7860_v28 = vrot.slane %v906_v26, %v12512_v18 }
 0x138   : > { %12534 = vst [vmem:[#allocation71_spill] sm:$0xff] %v7840_v52  ;;  %12535 = vst [vmem:[#allocation72_spill] sm:$0xff] %v7844_v9  ;;  %v1751_v25 = vadd.s32 1, %v6076_v37  ;;  %v7863_v34 = vrot.slane %v908_v30, %v12512_v18  ;;  %v7867_v55 = vrot.slane %v7760_v7, %v12512_v18  ;;  %v1650_v6 = vsel %vm1649_vm0, %v1648_v3, 0 }
 0x139   : > { %12536 = vst [vmem:[#allocation73_spill] sm:$0xff] %v7848_v17  ;;  %12537 = vst [vmem:[#allocation74_spill] sm:$0xff] %v7851_v35  ;;  %v7870_v51 = vrot.slane %v905_v8, %v12512_v18  ;;  %v7873_v29 = vrot.slane %v907_v31, %v12512_v18  ;;  %v1652_v53 = vand.u32 31, %v1650_v6  ;;  %v7876_v2 = vrot.slane %v909_v39, %v12512_v18 }
 0x13a   : > { %12538 = vst [vmem:[#allocation75_spill] sm:$0xff] %v7854_v19  ;;  %12539 = vst [vmem:[#allocation76_spill] sm:$0xff] %v7860_v28  ;;  %vm1752_vm1 = vcmp.gt.s32.totalorder %v1751_v25, 0  ;;  %v7879_v26 = vadd.f32 %v7773_v11, %v1539_v12  ;;  %v1651_v30 = vshrl.u32 %v1650_v6, 5  ;;  %v7883_v7 = vand.u32 8388607, %v12300_v54 }
 0x13b   : > { %12540 = vst [vmem:[#allocation77_spill] sm:$0xff] %v7863_v34  ;;  %12541 = vst [vmem:[#allocation78_spill] sm:$0xff] %v7867_v55  ;;  %v1653_v3 = vsub.s32 32, %v1652_v53  ;;  %v7885_v37 = vshll.u32 %v1646_v22, 8  ;;  %v1753_v8 = vsel %vm1752_vm1, %v1751_v25, 0  ;;  %v6088_v38 = vadd.s32 4294967169, %v2054_v14 }
 0x13c   : > { %12542 = vst [vmem:[#allocation79_spill] sm:$0xff] %v7870_v51  ;;  %12543 = vst [vmem:[#allocation80_spill] sm:$0xff] %v7873_v29  ;;  %v12545_v31 = vmov 683565275   ;;  %v12546_v29 = vmov 2475754826  }
 0x13d   : > { %12544 = vst [vmem:[#allocation81_spill] sm:$0xff] %v7876_v2  ;;  %v1655_v0 = vshll.u32 %v12545_v31, %v1652_v53  ;;  %v1658_v51 = vshll.u32 %v12546_v29, %v1652_v53  ;;  %v12547_v55 = vmov 2131351028   ;;  %v12548_v18 = vmov 2102212464  }
 0x13e   : > { %v1661_v39 = vshll.u32 %v12547_v55, %v1652_v53  ;;  %v1664_v2 = vshll.u32 %v12548_v18, %v1652_v53  ;;  %v1656_v12 = vshrl.u32 %v12546_v29, %v1653_v3  ;;  %v1659_v6 = vshrl.u32 %v12547_v55, %v1653_v3 }
 0x13f   : > { %v1662_v54 = vshrl.u32 %v12548_v18, %v1653_v3  ;;  %v12549_v11 = vmov 920167782   ;;  %v1654_v22 = vshrl.u32 %v12545_v31, %v1653_v3  ;;  %v12550_v25 = vmov 1326507024  }
 0x140   : > { %v1667_v13 = vshll.u32 %v12549_v11, %v1652_v53  ;;  %v1665_v14 = vshrl.u32 %v12549_v11, %v1653_v3  ;;  %v1668_v34 = vshrl.u32 %v12550_v25, %v1653_v3  ;;  %vm1670_vm2 = vcmp.lt.s32.totalorder %v1651_v30, 1 }
 0x141   : > { %v1657_v19 = vor.u32 %v1656_v12, %v1655_v0  ;;  %v1660_v35 = vor.u32 %v1659_v6, %v1658_v51  ;;  %v1663_v5 = vor.u32 %v1662_v54, %v1661_v39  ;;  %vm1672_vm3 = vcmp.lt.s32.totalorder %v1651_v30, 3 }
 0x142   : > { %v1666_v62 = vor.u32 %v1665_v14, %v1664_v2  ;;  %v1669_v17 = vor.u32 %v1668_v34, %v1667_v13  ;;  %vm1673_vm4 = vcmp.lt.s32.totalorder %v1651_v30, 4  ;;  %v1755_v61 = vand.u32 31, %v1753_v8 }
 0x143   : > { %v1674_v24 = vsel %vm1670_vm2, %v1654_v22, %v1657_v19  ;;  %v1675_v9 = vsel %vm1673_vm4, %v1663_v5, 2102212464  ;;  %v1678_v32 = vsel %vm1670_vm2, %v1657_v19, %v1660_v35  ;;  %v1682_v60 = vsel %vm1670_vm2, %v1660_v35, %v1663_v5 }
 0x144   : > { %v1676_v53 = vsel %vm1672_vm3, %v1660_v35, %v1675_v9  ;;  %v1679_v52 = vsel %vm1673_vm4, %v1666_v62, 920167782  ;;  %v1683_v21 = vsel %vm1673_vm4, %v1669_v17, 1326507024  ;;  %v1756_v20 = vsub.s32 32, %v1755_v61 }
 0x145   : > { %vm1671_vm5 = vcmp.lt.s32.totalorder %v1651_v30, 2  ;;  %v1680_v28 = vsel %vm1672_vm3, %v1663_v5, %v1679_v52  ;;  %v1684_v3 = vsel %vm1672_vm3, %v1666_v62, %v1683_v21  ;;  %v2060_v23 = vadd.s32 1, %v6088_v38 }
 0x146   : > { %v1677_v0 = vsel %vm1671_vm5, %v1674_v24, %v1676_v53  ;;  %v1681_v51 = vsel %vm1671_vm5, %v1678_v32, %v1680_v28  ;;  %v1685_v54 = vsel %vm1671_vm5, %v1682_v60, %v1684_v3  ;;  %v7898_v39 = vshrl.u32 %v1753_v8, 5 }
 0x147   : > { %v7901_v13 = vmul.u32.u64.low %v7885_v37, %v1685_v54  ;;  %v7902_v34 = vmul.u32.u64.high %v7885_v37, %v1685_v54, %v7901_v13  ;;  %v7905_v19 = vmul.u32.u64.low %v7885_v37, %v1681_v51  ;;  %v7906_v2 = vmul.u32.u64.high %v7885_v37, %v1681_v51, %v7905_v19 }
 0x148   : > { %v1758_v9 = vshll.u32 %v12545_v31, %v1755_v61  ;;  %v1759_v5 = vshrl.u32 %v12546_v29, %v1756_v20  ;;  %v1761_v21 = vshll.u32 %v12546_v29, %v1755_v61  ;;  %v1762_v32 = vshrl.u32 %v12547_v55, %v1756_v20 }
 0x149   : > { %v1764_v60 = vshll.u32 %v12547_v55, %v1755_v61  ;;  %v1765_v24 = vshrl.u32 %v12548_v18, %v1756_v20  ;;  %v1767_v62 = vshll.u32 %v12548_v18, %v1755_v61  ;;  %v1768_v38 = vshrl.u32 %v12549_v11, %v1756_v20 }
 0x14a   : > { %v1760_v52 = vor.u32 %v1759_v5, %v1758_v9  ;;  %v1763_v17 = vor.u32 %v1762_v32, %v1761_v21  ;;  %v1770_v35 = vshll.u32 %v12549_v11, %v1755_v61  ;;  %v1771_v28 = vshrl.u32 %v12550_v25, %v1756_v20 }
 0x14b   : > { %vm1695_vm6 = vc.u32 %v7902_v34, %v7905_v19  ;;  %v1696_v30 = vadd.s32 1, %v7906_v2  ;;  %v1749_v8 = vor.u32 8388608, %v7883_v7  ;;  %v1766_v12 = vor.u32 %v1765_v24, %v1764_v60 }
 0x14c   : > { %v1693_v6 = vmul.u32 %v7885_v37, %v1677_v0  ;;  %v1769_v22 = vor.u32 %v1768_v38, %v1767_v62  ;;  %v1772_v14 = vor.u32 %v1771_v28, %v1770_v35  ;;  %vm1773_vm7 = vcmp.lt.s32.totalorder %v7898_v39, 1 }
 0x14d   : > { %v1697_v53 = vsel %vm1695_vm6, %v1696_v30, %v7906_v2  ;;  %vm1776_vm8 = vcmp.lt.s32.totalorder %v7898_v39, 4  ;;  %v1781_v61 = vsel %vm1773_vm7, %v1760_v52, %v1763_v17  ;;  %vm2061_vm9 = vcmp.gt.s32.totalorder %v2060_v23, 0 }
 0x14e   : > { %v1698_v3 = vadd.s32 %v1697_v53, %v1693_v6  ;;  %vm1775_vm10 = vcmp.lt.s32.totalorder %v7898_v39, 3  ;;  %v1782_v7 = vsel %vm1776_vm8, %v1769_v22, 920167782  ;;  %v1785_v37 = vsel %vm1773_vm7, %v1763_v17, %v1766_v12 }
 0x14f   : > { %vm1774_vm11 = vcmp.lt.s32.totalorder %v7898_v39, 2  ;;  %v1783_v0 = vsel %vm1775_vm10, %v1766_v12, %v1782_v7  ;;  %v1786_v51 = vsel %vm1776_vm8, %v1772_v14, 1326507024  ;;  %v1789_v54 = vshll.u32 %v1749_v8, 8 }
 0x150   : > { %v1699_v13 = vadd.s32 536870912, %v1698_v3  ;;  %v1784_v2 = vsel %vm1774_vm11, %v1781_v61, %v1783_v0  ;;  %v1787_v9 = vsel %vm1775_vm10, %v1769_v22, %v1786_v51  ;;  %v2062_v5 = vsel %vm2061_vm9, %v2060_v23, 0 }
 0x151   : > { %v1326_v21 = vmul.f32 -0.5, %v7672_v42  ;;  %v1788_v32 = vsel %vm1774_vm11, %v1785_v37, %v1787_v9  ;;  %v7946_v60 = vmul.u32.u64.low %v1789_v54, %v1784_v2  ;;  %v7947_v24 = vmul.u32.u64.high %v1789_v54, %v1784_v2, %v7946_v60 }
 0x152   : > { %v7950_v62 = vshrl.u32 %v1699_v13, 30  ;;  %v1778_v38 = vsel %vm1776_vm8, %v1766_v12, 2102212464  ;;  %v7954_v35 = vmul.u32.u64.low %v1789_v54, %v1788_v32  ;;  %v7955_v28 = vmul.u32.u64.high %v1789_v54, %v1788_v32, %v7954_v35 }
 0x153   : > { %v1327_v30 = vmul.f32 -0.5, %v7674_v15  ;;  %v1757_v23 = vshrl.u32 %v12545_v31, %v1756_v20  ;;  %v2064_v42 = vand.u32 31, %v2062_v5  ;;  %v2156_v8 = vand.u32 2139095040, %v7879_v26 }
 0x154   : > { %v1330_v6 = vmul.f32 -0.5, %v7676_v48  ;;  %v1331_v22 = vmul.f32 -0.5, %v7678_v50  ;;  %v1334_v14 = vmul.f32 -0.5, %v7680_v46  ;;  %v1335_v53 = vmul.f32 -0.5, %v7682_v44 }
 0x155   : > { %v1701_v12 = vshll.u32 %v7950_v62, 30  ;;  %v1777_v61 = vsel %vm1773_vm7, %v1757_v23, %v1760_v52  ;;  %v1779_v15 = vsel %vm1775_vm10, %v1763_v17, %v1778_v38  ;;  %v12321_v20 = vand.u32 2147483647, %v7795_v56 }
 0x156   : > { %v1338_v7 = vmul.f32 -0.5, %v7684_v43  ;;  %v1339_v48 = vmul.f32 -0.5, %v7686_v63  ;;  %v1799_v50 = vadd.s32 1, %v7947_v24  ;;  %v2065_v37 = vsub.s32 32, %v2064_v42 }
 0x157   : > { %v1342_v46 = vmul.f32 -0.5, %v7688_v41  ;;  %v7975_v44 = vmul.f32 -0.5, %v7690_v10  ;;  %vm1798_vm12 = vc.u32 %v7955_v28, %v7946_v60  ;;  %v2157_v52 = vshrl.u32 %v2156_v8, 23 }
 0x158   : > { %v7980_v17 = vmul.f32 -0.5, %v7692_v45  ;;  %v7983_v0 = vmul.f32 -0.5, %v7699_v57  ;;  %v7986_v43 = vmul.f32 -0.5, %v7701_v58  ;;  %v1780_v63 = vsel %vm1774_vm11, %v1777_v61, %v1779_v15 }
 0x159   : > { %v7991_v41 = vmul.f32 -0.5, %v7703_v1  ;;  %v7993_v10 = vsub.s32 %v1698_v3, %v1701_v12  ;;  %v2057_v51 = vand.u32 8388607, %v12321_v20  ;;  %v7997_v13 = vshrl.u32 %v2062_v5, 5 }
 0x15a   : > { %v1800_v45 = vsel %vm1798_vm12, %v1799_v50, %v7947_v24  ;;  %v2068_v57 = vshrl.u32 %v12546_v29, %v2065_v37  ;;  %v2071_v58 = vshrl.u32 %v12547_v55, %v2065_v37  ;;  %v2074_v2 = vshrl.u32 %v12548_v18, %v2065_v37 }
 0x15b   : > { %v1796_v39 = vmul.u32 %v1789_v54, %v1780_v63  ;;  %v2076_v9 = vshll.u32 %v12548_v18, %v2064_v42  ;;  %v2077_v1 = vshrl.u32 %v12549_v11, %v2065_v37  ;;  %v6092_v3 = vadd.s32 4294967169, %v2157_v52 }
 0x15c   : > { %v2067_v32 = vshll.u32 %v12545_v31, %v2064_v42  ;;  %v2070_v38 = vshll.u32 %v12546_v29, %v2064_v42  ;;  %v2073_v5 = vshll.u32 %v12547_v55, %v2064_v42  ;;  %v2080_v24 = vshrl.u32 %v12550_v25, %v2065_v37 }
 0x15d   : > { %v1704_v35 = vsub.s32 0, %v7993_v10  ;;  %v8010_v23 = vadd.s32 %v1800_v45, %v1796_v39  ;;  %v2078_v8 = vor.u32 %v2077_v1, %v2076_v9  ;;  %v2079_v54 = vshll.u32 %v12549_v11, %v2064_v42 }
 0x15e   : > { %v2069_v12 = vor.u32 %v2068_v57, %v2067_v32  ;;  %v2072_v61 = vor.u32 %v2071_v58, %v2070_v38  ;;  %v2075_v15 = vor.u32 %v2074_v2, %v2073_v5  ;;  %vm2085_vm13 = vcmp.lt.s32.totalorder %v7997_v13, 4 }
 0x15f   : > { %v1398_v50 = vmul.f32 %v7809_v47, %v1326_v21  ;;  %v1399_v52 = vmul.f32 %v7809_v47, %v1327_v30  ;;  %v2081_v63 = vor.u32 %v2080_v24, %v2079_v54  ;;  %v2091_v20 = vsel %vm2085_vm13, %v2078_v8, 920167782 }
 0x160   : > { %v1402_v56 = vmul.f32 %v7812_v59, %v1330_v6  ;;  %v1403_v45 = vmul.f32 %v7812_v59, %v1331_v22  ;;  %v1406_v39 = vmul.f32 %v7816_v4, %v1334_v14  ;;  %v2163_v42 = vadd.s32 1, %v6092_v3 }
 0x161   : > { %v1407_v57 = vmul.f32 %v7816_v4, %v1335_v53  ;;  %v2058_v58 = vor.u32 8388608, %v2057_v51  ;;  %vm2082_vm14 = vcmp.lt.s32.totalorder %v7997_v13, 1  ;;  %vm2084_vm15 = vcmp.lt.s32.totalorder %v7997_v13, 3 }
 0x162   : > { %v6073_v21 = vmin.u32 %v1704_v35, %v7993_v10  ;;  %v1802_v30 = vadd.s32 536870912, %v8010_v23  ;;  %v2090_v2 = vsel %vm2082_vm14, %v2069_v12, %v2072_v61  ;;  %v2092_v6 = vsel %vm2084_vm15, %v2075_v15, %v2091_v20 }
 0x163   : > { %v1410_v22 = vmul.f32 %v7819_v33, %v1338_v7  ;;  %v1411_v14 = vmul.f32 %v7819_v33, %v1339_v48  ;;  %v2094_v53 = vsel %vm2082_vm14, %v2072_v61, %v2075_v15  ;;  %v2095_v51 = vsel %vm2085_vm13, %v2081_v63, 1326507024 }
 0x164   : > { %vm2083_vm0 = vcmp.lt.s32.totalorder %v7997_v13, 2  ;;  %v2087_v9 = vsel %vm2085_vm13, %v2075_v15, 2102212464  ;;  %v2096_v1 = vsel %vm2084_vm15, %v2078_v8, %v2095_v51  ;;  %vm2164_vm1 = vcmp.gt.s32.totalorder %v2163_v42, 0 }
 0x165   : > { %v1414_v20 = vmul.f32 %v7822_v49, %v1342_v46  ;;  %v2066_v7 = vshrl.u32 %v12545_v31, %v2065_v37  ;;  %v2093_v48 = vsel %vm2083_vm0, %v2090_v2, %v2092_v6  ;;  %v2098_v3 = vshll.u32 %v2058_v58, 8 }
 0x166   : > { %v1706_v32 = vclz %v6073_v21  ;;  %v8045_v38 = vshrl.u32 %v1802_v30, 30  ;;  %v2097_v5 = vsel %vm2083_vm0, %v2094_v53, %v2096_v1  ;;  %v2165_v24 = vsel %vm2164_vm1, %v2163_v42, 0 }
 0x167   : > { %v2086_v35 = vsel %vm2082_vm14, %v2066_v7, %v2069_v12  ;;  %v2088_v8 = vsel %vm2084_vm15, %v2072_v61, %v2087_v9  ;;  %v8053_v46 = vmul.u32.u64.low %v2098_v3, %v2097_v5  ;;  %v8054_v54 = vmul.u32.u64.high %v2098_v3, %v2097_v5, %v8053_v46 }
 0x168   : > { %v1415_v37 = vmul.f32 %v7822_v49, %v7975_v44  ;;  %v1430_v15 = vmul.f32 1.442695, %v1398_v50  ;;  %v8058_v63 = vmul.u32.u64.low %v2098_v3, %v2093_v48  ;;  %v8059_v58 = vmul.u32.u64.high %v2098_v3, %v2093_v48, %v8058_v63 }
 0x169   : > { %v1418_v42 = vmul.f32 %v7825_v40, %v7980_v17  ;;  %v1422_v12 = vmul.f32 %v7831_v16, %v7983_v0  ;;  %v1423_v61 = vmul.f32 %v7831_v16, %v7986_v43  ;;  %v2167_v21 = vand.u32 31, %v2165_v24 }
 0x16a   : > { %v1426_v30 = vmul.f32 %v7834_v36, %v7991_v41  ;;  %v1432_v2 = vmul.f32 1.442695, %v1399_v52  ;;  %v1804_v44 = vshll.u32 %v8045_v38, 30  ;;  %v2089_v50 = vsel %vm2083_vm0, %v2086_v35, %v2088_v8 }
 0x16b   : > { %v1438_v6 = vmul.f32 1.442695, %v1402_v56  ;;  %v1440_v53 = vmul.f32 1.442695, %v1403_v45  ;;  %v6074_v51 = vadd.s32 4294967294, %v1706_v32  ;;  %vm2107_vm2 = vc.u32 %v8054_v54, %v8058_v63 }
 0x16c   : > { %6554 = vpow2.f32 %v1430_v15  ;;  %v1446_v17 = vmul.f32 1.442695, %v1406_v39  ;;  %v8075_v0 = vmul.f32 1.442695, %v1407_v57  ;;  %v2108_v43 = vadd.s32 1, %v8059_v58 }
 0x16d   : > { %v8078_v9 = vmul.f32 1.442695, %v1410_v22  ;;  %v8080_v41 = vmul.f32 1.442695, %v1411_v14  ;;  %v2105_v52 = vmul.u32 %v2098_v3, %v2089_v50  ;;  %v8082_v1 = vsub.s32 32, %v2167_v21 }
 0x16e   : > { %v8084_v13 = vmul.f32 1.442695, %v1414_v20  ;;  %v8087_v56 = vsub.s32 %v8010_v23, %v1804_v44  ;;  %v2109_v45 = vsel %vm2107_vm2, %v2108_v43, %v8059_v58  ;;  %v12324_v39 = vand.u32 2147483647, %v7879_v26  ;;  %v12551_v23 = vld [vmem:[#allocation70_spill] sm:$0xff] }
 0x16f   : > { %6556 = vpow2.f32 %v1432_v2  ;;  %v8091_v57 = vmul.f32 1.442695, %v1415_v37  ;;  %vm6075_vm3 = vcmp.lt.s32.totalorder %v6074_v51, 0  ;;  %v8093_v22 = vadd.s32 %v2109_v45, %v2105_v52  ;;  %v12554_v52 = vld [vmem:[#allocation76_spill] sm:$0xff] }
 0x170   : > { %6558 = vpow2.f32 %v1438_v6  ;;  %v8095_v14 = vmul.f32 1.442695, %v1418_v42  ;;  %v8097_v7 = vmul.f32 1.442695, %v1422_v12  ;;  %v8099_v20 = vmul.f32 1.442695, %v1423_v61 }
 0x171   : > { %v1542_v48 = vmul.f32 %v12551_v23, %v7568_v27  ;;  %v2171_v3 = vshrl.u32 %v12546_v29, %v8082_v1  ;;  %v2174_v32 = vshrl.u32 %v12547_v55, %v8082_v1  ;;  %v2177_v5 = vshrl.u32 %v12548_v18, %v8082_v1 }
 0x172   : > { %v8109_v35 = vsel %vm6075_vm3, 0, %v6074_v51  ;;  %v1807_v8 = vsub.s32 0, %v8087_v56  ;;  %v2160_v46 = vand.u32 8388607, %v12324_v39  ;;  %v8114_v37 = vshrl.u32 %v2165_v24, 5 }
 0x173   : > { %v2111_v27 = vadd.s32 536870912, %v8093_v22  ;;  %v2170_v15 = vshll.u32 %v12545_v31, %v2167_v21  ;;  %v2173_v58 = vshll.u32 %v12546_v29, %v2167_v21  ;;  %v2176_v42 = vshll.u32 %v12547_v55, %v2167_v21 }
 0x174   : > { %v2179_v12 = vshll.u32 %v12548_v18, %v2167_v21  ;;  %v2180_v61 = vshrl.u32 %v12549_v11, %v8082_v1  ;;  %v2182_v2 = vshll.u32 %v12549_v11, %v2167_v21  ;;  %v2183_v44 = vshrl.u32 %v12550_v25, %v8082_v1 }
 0x175   : > { %v8126_v24 = vmul.f32 1.442695, %v1426_v30  ;;  %v2172_v50 = vor.u32 %v2171_v3, %v2170_v15  ;;  %v2175_v6 = vor.u32 %v2174_v32, %v2173_v58  ;;  %v2178_v51 = vor.u32 %v2177_v5, %v2176_v42 }
 0x176   : > { %v8128_v43 = vpop.eup %6554  ;;  %v8131_v45 = vadd.f32 %v12554_v52, %v1542_v48  ;;  %v1714_v39 = vsub.s32 4294967266, %v8109_v35  ;;  %v2181_v16 = vor.u32 %v2180_v61, %v2179_v12  ;;  %v2184_v49 = vor.u32 %v2183_v44, %v2182_v2 }
 0x177   : > { %12552 = vst [vmem:[#allocation82_spill] sm:$0xff] %v8126_v24  ;;  %12553 = vst [vmem:[#allocation83_spill] sm:$0xff] %v8128_v43  ;;  %v6077_v33 = vmin.u32 %v1807_v8, %v8087_v56  ;;  %v8135_v21 = vshrl.u32 %v2111_v27, 30  ;;  %v2161_v4 = vor.u32 8388608, %v2160_v46  ;;  %vm2188_vm4 = vcmp.lt.s32.totalorder %v8114_v37, 4  ;;  %v12557_v27 = vld [vmem:[#allocation41_spill] sm:$0xff] }
 0x178   : > { %vm2185_vm5 = vcmp.lt.s32.totalorder %v8114_v37, 1  ;;  %vm2187_vm6 = vcmp.lt.s32.totalorder %v8114_v37, 3  ;;  %v2194_v30 = vsel %vm2188_vm4, %v2181_v16, 920167782  ;;  %v2198_v48 = vsel %vm2188_vm4, %v2184_v49, 1326507024 }
 0x179   : > { %v8144_v3 = vpop.eup %6556  ;;  %6560 = vpow2.f32 %v1440_v53  ;;  %v2193_v32 = vsel %vm2185_vm5, %v2172_v50, %v2175_v6  ;;  %v2195_v5 = vsel %vm2187_vm6, %v2178_v51, %v2194_v30  ;;  %v2197_v8 = vsel %vm2185_vm5, %v2175_v6, %v2178_v51 }
 0x17a   : > { %12555 = vst [vmem:[#allocation84_spill] sm:$0xff] %v8144_v3  ;;  %v8152_v46 = vpop.eup %6558  ;;  %6562 = vpow2.f32 %v1446_v17  ;;  %v1543_v15 = vmul.f32 %v12551_v23, %v12557_v27  ;;  %v1715_v58 = vadd.s32 127, %v1714_v39  ;;  %v2199_v49 = vsel %vm2187_vm6, %v2181_v16, %v2198_v48  ;;  %v12558_v39 = vld [vmem:[#allocation42_spill] sm:$0xff]  ;;  %v12559_v16 = vld [vmem:[#allocation71_spill] sm:$0xff] }
 0x17b   : > { %12556 = vst [vmem:[#allocation85_spill] sm:$0xff] %v8152_v46  ;;  %v1710_v53 = vsub.s32 32, %v8109_v35  ;;  %v1809_v42 = vclz %v6077_v33  ;;  %v2113_v12 = vshll.u32 %v8135_v21, 30  ;;  %vm2186_vm7 = vcmp.lt.s32.totalorder %v8114_v37, 2 }
 0x17c   : > { %v2196_v61 = vsel %vm2186_vm7, %v2193_v32, %v2195_v5  ;;  %v2200_v17 = vsel %vm2186_vm7, %v2197_v8, %v2199_v49  ;;  %v2201_v2 = vshll.u32 %v2161_v4, 8  ;;  %v2465_v44 = vand.u32 2139095040, %v8131_v45 }
 0x17d   : > { %6564 = vpow2.f32 %v8075_v0  ;;  %v1546_v30 = vmul.f32 %v12559_v16, %v12558_v39  ;;  %v1694_v33 = vadd.s32 %v7905_v19, %v7902_v34  ;;  %v2190_v48 = vsel %vm2188_vm4, %v2178_v51, 2102212464 }
 0x17e   : > { %v1716_v27 = vshll.u32 %v1715_v58, 23  ;;  %v2169_v32 = vshrl.u32 %v12545_v31, %v8082_v1  ;;  %v8175_v5 = vmul.u32.u64.low %v2201_v2, %v2200_v17  ;;  %v8176_v8 = vmul.u32.u64.high %v2201_v2, %v2200_v17, %v8175_v5  ;;  %v12560_v1 = vld [vmem:[#allocation43_spill] sm:$0xff]  ;;  %v12563_v17 = vld [vmem:[#allocation45_spill] sm:$0xff] }
 0x17f   : > { %v1712_v4 = vshrl.u32 %v1694_v33, %v1710_v53  ;;  %v8179_v49 = vsub.s32 %v8093_v22, %v2113_v12  ;;  %v8181_v0 = vmul.u32.u64.low %v2201_v2, %v2196_v61  ;;  %v8182_v59 = vmul.u32.u64.high %v2201_v2, %v2196_v61, %v8181_v0  ;;  %v12561_v53 = vld [vmem:[#allocation44_spill] sm:$0xff]  ;;  %v12564_v33 = vld [vmem:[#allocation46_spill] sm:$0xff] }
 0x180   : > { %v6078_v39 = vadd.s32 4294967294, %v1809_v42  ;;  %v2189_v34 = vsel %vm2185_vm5, %v2169_v32, %v2172_v50  ;;  %v2191_v19 = vsel %vm2187_vm6, %v2175_v6, %v2190_v48  ;;  %v2466_v51 = vshrl.u32 %v2465_v44, 23  ;;  %v12562_v22 = vld [vmem:[#allocation72_spill] sm:$0xff]  ;;  %v12565_v42 = vld [vmem:[#allocation73_spill] sm:$0xff]  ;;  %v12567_v6 = vld [vmem:[#allocation47_spill] sm:$0xff] }
 0x181   : > { %6566 = vpow2.f32 %v8078_v9  ;;  %v1547_v58 = vmul.f32 %v12559_v16, %v12560_v1  ;;  %v1550_v12 = vmul.f32 %v12562_v22, %v12561_v53  ;;  %v1551_v61 = vmul.f32 %v12562_v22, %v12563_v17  ;;  %v12570_v22 = vld [vmem:[#allocation74_spill] sm:$0xff] }
 0x182   : > { %v1554_v5 = vmul.f32 %v12565_v42, %v12564_v33  ;;  %v1711_v50 = vshll.u32 %v7993_v10, %v8109_v35  ;;  %v1717_v32 = vor.u32 4788187, %v1716_v27  ;;  %vm2210_vm8 = vc.u32 %v8176_v8, %v8181_v0  ;;  %v12569_v33 = vld [vmem:[#allocation48_spill] sm:$0xff] }
 0x183   : > { %v8202_v9 = vpop.eup %6560  ;;  %v1555_v44 = vmul.f32 %v12565_v42, %v12567_v6  ;;  %v2116_v48 = vsub.s32 0, %v8179_v49  ;;  %v2192_v1 = vsel %vm2186_vm7, %v2189_v34, %v2191_v19  ;;  %v2211_v53 = vadd.s32 1, %v8182_v59  ;;  %v12571_v42 = vld [vmem:[#allocation49_spill] sm:$0xff] }
 0x184   : > { %12566 = vst [vmem:[#allocation41_spill] sm:$0xff] %v8202_v9  ;;  %v8210_v17 = vpop.eup %6562  ;;  %v8213_v10 = vadd.f32 %v12554_v52, %v1543_v15  ;;  %v1713_v35 = vor.u32 %v1712_v4, %v1711_v50  ;;  %vm6079_vm9 = vcmp.lt.s32.totalorder %v6078_v39, 0  ;;  %v6104_v27 = vadd.s32 4294967169, %v2466_v51  ;;  %v12573_v4 = vld [vmem:[#allocation50_spill] sm:$0xff] }
 0x185   : > { %12568 = vst [vmem:[#allocation42_spill] sm:$0xff] %v8210_v17  ;;  %6568 = vpow2.f32 %v8080_v41  ;;  %v1558_v6 = vmul.f32 %v12570_v22, %v12569_v33  ;;  %v8220_v47 = vmul.f32 %v12570_v22, %v12571_v42  ;;  %v2212_v37 = vsel %vm2210_vm8, %v2211_v53, %v8182_v59  ;;  %v12574_v41 = vld [vmem:[#allocation75_spill] sm:$0xff] }
 0x186   : > { %6570 = vpow2.f32 %v8084_v13  ;;  %v1718_v34 = vand.u32 2147483647, %v1717_v32  ;;  %v2208_v19 = vmul.u32 %v2201_v2, %v2192_v1  ;;  %v2472_v15 = vadd.s32 1, %v6104_v27  ;;  %v12575_v13 = vld [vmem:[#allocation51_spill] sm:$0xff] }
 0x187   : > { %v8224_v16 = vpop.eup %6564  ;;  %6572 = vpow2.f32 %v8091_v57  ;;  %v8229_v51 = vmul.f32 %v12574_v41, %v12573_v4  ;;  %v8231_v50 = vsel %vm6079_vm9, 0, %v6078_v39  ;;  %v6089_v42 = vmin.u32 %v2116_v48, %v8179_v49  ;;  %v12576_v57 = vld [vmem:[#allocation77_spill] sm:$0xff] }
 0x188   : > { %12572 = vst [vmem:[#allocation43_spill] sm:$0xff] %v8224_v16  ;;  %v1720_v33 = vcvt.s32.f32 %v1713_v35  ;;  %v8234_v22 = vadd.s32 %v2212_v37, %v2208_v19  ;;  %vm2473_vm10 = vcmp.gt.s32.totalorder %v2472_v15, 0  ;;  %v2568_v59 = vand.u32 2139095040, %v8213_v10  ;;  %v12578_v37 = vld [vmem:[#allocation78_spill] sm:$0xff] }
 0x189   : > { %6574 = vpow2.f32 %v8095_v14  ;;  %v8240_v2 = vmul.f32 %v12574_v41, %v12575_v13  ;;  %v8243_v32 = vadd.f32 %v12576_v57, %v1546_v30  ;;  %v2474_v1 = vsel %vm2473_vm10, %v2472_v15, 0  ;;  %v12579_v13 = vld [vmem:[#allocation79_spill] sm:$0xff] }
 0x18a   : > { %v8246_v39 = vadd.f32 %v12576_v57, %v1547_v58  ;;  %v1721_v48 = vmul.f32 %v1720_v33, %v1718_v34  ;;  %v1817_v53 = vsub.s32 4294967266, %v8231_v50  ;;  %v2476_v35 = vand.u32 31, %v2474_v1 }
 0x18b   : > { %v8249_v27 = vpop.eup %6566  ;;  %v8252_v19 = vadd.f32 %v12578_v37, %v1550_v12  ;;  %v8255_v14 = vadd.f32 %v12578_v37, %v1551_v61  ;;  %v2118_v4 = vclz %v6089_v42  ;;  %v8259_v15 = vadd.f32 %v12579_v13, %v1554_v5  ;;  %v12582_v12 = vld [vmem:[#allocation80_spill] sm:$0xff]  ;;  %v12584_v61 = vld [vmem:[#allocation55_spill] sm:$0xff] }
 0x18c   : > { %12577 = vst [vmem:[#allocation44_spill] sm:$0xff] %v8249_v27  ;;  %v2214_v58 = vadd.s32 536870912, %v8234_v22  ;;  %v2477_v34 = vsub.s32 32, %v2476_v35  ;;  %v2569_v33 = vshrl.u32 %v2568_v59, 23  ;;  %6576 = vpow2.f32 %v8097_v7 }
 0x18d   : > { %12580 = vst [vmem:[#allocation45_spill] sm:$0xff] %v8259_v15  ;;  %v8264_v41 = vadd.f32 %v12579_v13, %v1555_v44  ;;  %v8267_v57 = vadd.f32 %v12582_v12, %v1558_v6  ;;  %vm1640_vm11 = vcmp.lt.s32.totalorder %v12584_v61, 0  ;;  %v1722_v42 = vxor.u32 2147483648, %v1721_v48 }
 0x18e   : > { %v1797_v30 = vadd.s32 %v7946_v60, %v7955_v28  ;;  %v1813_v5 = vsub.s32 32, %v8231_v50  ;;  %v1818_v37 = vadd.s32 127, %v1817_v53  ;;  %v6090_v59 = vadd.s32 4294967294, %v2118_v4 }
 0x18f   : > { %12581 = vst [vmem:[#allocation46_spill] sm:$0xff] %v8264_v41  ;;  %12583 = vst [vmem:[#allocation47_spill] sm:$0xff] %v8267_v57  ;;  %v8273_v52 = vpop.eup %6568  ;;  %v12586_v7 = vand.u32 2147483647, %v8131_v45  ;;  %v2480_v44 = vshrl.u32 %v12546_v29, %v2477_v34  ;;  %v2483_v6 = vshrl.u32 %v12547_v55, %v2477_v34  ;;  %v8281_v36 = vshrl.u32 %v2214_v58, 30 }
 0x190   : > { %12585 = vst [vmem:[#allocation48_spill] sm:$0xff] %v8273_v52  ;;  %v8279_v13 = vpop.eup %6570  ;;  %v2479_v40 = vshll.u32 %v12545_v31, %v2476_v35  ;;  %v2486_v60 = vshrl.u32 %v12548_v18, %v2477_v34  ;;  %v6108_v28 = vadd.s32 4294967169, %v2569_v33  ;;  %v2482_v4 = vshll.u32 %v12546_v29, %v2476_v35 }
 0x191   : > { %v2469_v23 = vand.u32 8388607, %v12586_v7  ;;  %12587 = vst [vmem:[#allocation49_spill] sm:$0xff] %v8279_v13  ;;  %v8285_v53 = vpop.eup %6572  ;;  %v2485_v24 = vshll.u32 %v12547_v55, %v2476_v35  ;;  %v2488_v7 = vshll.u32 %v12548_v18, %v2476_v35  ;;  %v2489_v52 = vshrl.u32 %v12549_v11, %v2477_v34 }
 0x192   : > { %12588 = vst [vmem:[#allocation50_spill] sm:$0xff] %v8285_v53  ;;  %v1724_v27 = vsub.s32 4, %v7950_v62  ;;  %v1814_v58 = vshll.u32 %v8087_v56, %v8231_v50  ;;  %v1815_v13 = vshrl.u32 %v1797_v30, %v1813_v5  ;;  %v2475_v16 = vshrl.u32 %v2474_v1, 5 }
 0x193   : > { %v8294_v17 = vpop.eup %6574  ;;  %v2481_v33 = vor.u32 %v2480_v44, %v2479_v40  ;;  %v2484_v9 = vor.u32 %v2483_v6, %v2482_v4  ;;  %v2487_v53 = vor.u32 %v2486_v60, %v2485_v24  ;;  %v2490_v46 = vor.u32 %v2489_v52, %v2488_v7 }
 0x194   : > { %12589 = vst [vmem:[#allocation51_spill] sm:$0xff] %v8294_v17  ;;  %v1723_v3 = vsel %vm1640_vm11, %v1722_v42, %v1721_v48  ;;  %v1819_v43 = vshll.u32 %v1818_v37, 23  ;;  %v2491_v57 = vshll.u32 %v12549_v11, %v2476_v35  ;;  %v2492_v41 = vshrl.u32 %v12550_v25, %v2477_v34 }
 0x195   : > { %vm6091_vm12 = vcmp.lt.s32.totalorder %v6090_v59, 0  ;;  %v2216_v15 = vshll.u32 %v8281_v36, 30  ;;  %v2470_v56 = vor.u32 8388608, %v2469_v23  ;;  %v2575_v50 = vadd.s32 1, %v6108_v28 }
 0x196   : > { %v2493_v1 = vor.u32 %v2492_v41, %v2491_v57  ;;  %vm2494_vm13 = vcmp.lt.s32.totalorder %v2475_v16, 1  ;;  %vm2496_vm14 = vcmp.lt.s32.totalorder %v2475_v16, 3  ;;  %vm2497_vm15 = vcmp.lt.s32.totalorder %v2475_v16, 4  ;;  %v8301_v40 = vpop.eup %6576 }
 0x197   : > { %12590 = vst [vmem:[#allocation55_spill] sm:$0xff] %v8301_v40  ;;  %v2499_v24 = vsel %vm2497_vm15, %v2487_v53, 2102212464  ;;  %v2502_v52 = vsel %vm2494_vm13, %v2481_v33, %v2484_v9  ;;  %v2503_v48 = vsel %vm2497_vm15, %v2490_v46, 920167782  ;;  %v2506_v37 = vsel %vm2494_vm13, %v2484_v9, %v2487_v53 }
 0x198   : > { %v2478_v35 = vshrl.u32 %v12545_v31, %v2477_v34  ;;  %vm2495_vm0 = vcmp.lt.s32.totalorder %v2475_v16, 2  ;;  %v2504_v30 = vsel %vm2496_vm14, %v2487_v53, %v2503_v48  ;;  %v2507_v42 = vsel %vm2497_vm15, %v2493_v1, 1326507024 }
 0x199   : > { %v8308_v23 = vsub.s32 %v8234_v22, %v2216_v15  ;;  %v2505_v41 = vsel %vm2495_vm0, %v2502_v52, %v2504_v30  ;;  %v2508_v57 = vsel %vm2496_vm14, %v2490_v46, %v2507_v42  ;;  %v2510_v5 = vshll.u32 %v2470_v56, 8 }
 0x19a   : > { %v1820_v44 = vor.u32 4788187, %v1819_v43  ;;  %v2498_v6 = vsel %vm2494_vm13, %v2478_v35, %v2481_v33  ;;  %v2500_v60 = vsel %vm2496_vm14, %v2484_v9, %v2499_v24  ;;  %v2509_v28 = vsel %vm2495_vm0, %v2506_v37, %v2508_v57 }
 0x19b   : > { %v8315_v34 = vmul.u32.u64.low %v2510_v5, %v2509_v28  ;;  %v8316_v4 = vmul.u32.u64.high %v2510_v5, %v2509_v28, %v8315_v34  ;;  %v8318_v53 = vmul.u32.u64.low %v2510_v5, %v2505_v41  ;;  %v8319_v7 = vmul.u32.u64.high %v2510_v5, %v2505_v41, %v8318_v53 }
 0x19c   : > { %v8324_v22 = vadd.f32 %v12582_v12, %v8220_v47  ;;  %v12591_v46 = vand.u32 2147483647, %v12584_v61  ;;  %v2121_v9 = vsel %vm6091_vm12, 0, %v6090_v59  ;;  %vm2576_vm2 = vcmp.gt.s32.totalorder %v2575_v50, 0  ;;  %v12594_v47 = vld [vmem:[#allocation81_spill] sm:$0xff] }
 0x19d   : > { %v1816_v15 = vor.u32 %v1815_v13, %v1814_v58  ;;  %v2219_v33 = vsub.s32 0, %v8308_v23  ;;  %v2501_v56 = vsel %vm2495_vm0, %v2498_v6, %v2500_v60  ;;  %v2577_v1 = vsel %vm2576_vm2, %v2575_v50, 0 }
 0x19e   : > { %vm8328_vm1 = vcmp.le.f32.partialorder %v12591_v46, 0.7853982  ;;  %6578 = vpow2.f32 %v8099_v20  ;;  %v8338_v24 = vadd.f32 %v12594_v47, %v8229_v51  ;;  %v8343_v52 = vsel %vm1640_vm11, %v1724_v27, %v7950_v62 }
 0x19f   : > { %v1726_v13 = vsel %vm8328_vm1, %v12584_v61, %v1723_v3  ;;  %v1821_v59 = vand.u32 2147483647, %v1820_v44  ;;  %v2122_v58 = vsub.s32 32, %v2121_v9  ;;  %vm2519_vm3 = vc.u32 %v8316_v4, %v8318_v53 }
 0x1a0   : > { %12595 = vst [vmem:[#allocation86_spill] sm:$0xff] %v8338_v24  ;;  %v2520_v20 = vadd.s32 1, %v8319_v7  ;;  %v2126_v16 = vsub.s32 4294967266, %v2121_v9  ;;  %v2517_v50 = vmul.u32 %v2510_v5, %v2501_v56  ;;  %v12354_v51 = vand.u32 2147483647, %v8213_v10 }
 0x1a1   : > { %v2579_v48 = vand.u32 31, %v2577_v1  ;;  %v1823_v37 = vcvt.s32.f32 %v1816_v15  ;;  %v2106_v62 = vadd.s32 %v8058_v63, %v8054_v54  ;;  %v6093_v27 = vmin.u32 %v2219_v33, %v8308_v23 }
 0x1a2   : > { %v2521_v3 = vsel %vm2519_vm3, %v2520_v20, %v8319_v7  ;;  %6580 = vcosq.f32 %v1726_v13  ;;  %v2123_v5 = vshll.u32 %v8179_v49, %v2121_v9  ;;  %v2127_v6 = vadd.s32 127, %v2126_v16 }
 0x1a3   : > { %v2522_v42 = vadd.s32 %v2521_v3, %v2517_v50  ;;  %v2580_v41 = vsub.s32 32, %v2579_v48  ;;  %v8360_v57 = vmul.f32 %v1823_v37, %v1821_v59  ;;  %v2124_v44 = vshrl.u32 %v2106_v62, %v2122_v58 }
 0x1a4   : > { %v2572_v63 = vand.u32 8388607, %v12354_v51  ;;  %v2221_v28 = vclz %v6093_v27  ;;  %v2582_v33 = vshll.u32 %v12545_v31, %v2579_v48  ;;  %v2585_v49 = vshll.u32 %v12546_v29, %v2579_v48 }
 0x1a5   : > { %v2523_v54 = vadd.s32 536870912, %v2522_v42  ;;  %v2583_v60 = vshrl.u32 %v12546_v29, %v2580_v41  ;;  %v2586_v34 = vshrl.u32 %v12547_v55, %v2580_v41  ;;  %v2589_v7 = vshrl.u32 %v12548_v18, %v2580_v41 }
 0x1a6   : > { %v2592_v46 = vshrl.u32 %v12549_v11, %v2580_v41  ;;  %v2591_v9 = vshll.u32 %v12548_v18, %v2579_v48  ;;  %v2578_v56 = vshrl.u32 %v2577_v1, 5  ;;  %v2588_v59 = vshll.u32 %v12547_v55, %v2579_v48 }
 0x1a7   : > { %v8369_v15 = vshrl.u32 %v2523_v54, 30  ;;  %v2594_v58 = vshll.u32 %v12549_v11, %v2579_v48  ;;  %v2595_v20 = vshrl.u32 %v12550_v25, %v2580_v41  ;;  %v2584_v37 = vor.u32 %v2583_v60, %v2582_v33 }
 0x1a8   : > { %v8377_v16 = vpop.eup %6578  ;;  %v2587_v62 = vor.u32 %v2586_v34, %v2585_v49  ;;  %v2593_v27 = vor.u32 %v2592_v46, %v2591_v9  ;;  %6582 = vsinq.f32 %v1726_v13  ;;  %v1825_v3 = vxor.u32 2147483648, %v8360_v57 }
 0x1a9   : > { %12596 = vst [vmem:[#allocation87_spill] sm:$0xff] %v8377_v16  ;;  %v2525_v50 = vshll.u32 %v8369_v15, 30  ;;  %v2590_v54 = vor.u32 %v2589_v7, %v2588_v59  ;;  %v2596_v51 = vor.u32 %v2595_v20, %v2594_v58  ;;  %v2125_v35 = vor.u32 %v2124_v44, %v2123_v5 }
 0x1aa   : > { %v2128_v1 = vshll.u32 %v2127_v6, 23  ;;  %v6094_v30 = vadd.s32 4294967294, %v2221_v28  ;;  %v2573_v12 = vor.u32 8388608, %v2572_v63  ;;  %v2581_v48 = vshrl.u32 %v12545_v31, %v2580_v41 }
 0x1ab   : > { %vm2597_vm4 = vcmp.lt.s32.totalorder %v2578_v56, 1  ;;  %vm2600_vm5 = vcmp.lt.s32.totalorder %v2578_v56, 4  ;;  %v2877_v17 = vand.u32 2139095040, %v8243_v32  ;;  %v8383_v16 = vsub.s32 %v2522_v42, %v2525_v50 }
 0x1ac   : > { %vm2599_vm6 = vcmp.lt.s32.totalorder %v2578_v56, 3  ;;  %v2605_v60 = vsel %vm2597_vm4, %v2584_v37, %v2587_v62  ;;  %v2606_v13 = vsel %vm2600_vm5, %v2593_v27, 920167782  ;;  %v8386_v34 = vpop.eup %6580  ;;  %v2602_v7 = vsel %vm2600_vm5, %v2590_v54, 2102212464 }
 0x1ad   : > { %v2607_v5 = vsel %vm2599_vm6, %v2590_v54, %v2606_v13  ;;  %v2609_v44 = vsel %vm2597_vm4, %v2587_v62, %v2590_v54  ;;  %v2610_v6 = vsel %vm2600_vm5, %v2596_v51, 1326507024  ;;  %v2129_v63 = vor.u32 4788187, %v2128_v1 }
 0x1ae   : > { %vm6095_vm7 = vcmp.lt.s32.totalorder %v6094_v30, 0  ;;  %vm2598_vm8 = vcmp.lt.s32.totalorder %v2578_v56, 2  ;;  %v2613_v41 = vshll.u32 %v2573_v12, 8  ;;  %v2601_v28 = vsel %vm2597_vm4, %v2581_v48, %v2584_v37 }
 0x1af   : > { %v2608_v42 = vsel %vm2598_vm8, %v2605_v60, %v2607_v5  ;;  %v2611_v46 = vsel %vm2599_vm6, %v2593_v27, %v2610_v6  ;;  %v2878_v33 = vshrl.u32 %v2877_v17, 23  ;;  %v2603_v49 = vsel %vm2599_vm6, %v2587_v62, %v2602_v7  ;;  %v12598_v27 = vld [vmem:[#allocation59_spill] sm:$0xff] }
 0x1b0   : > { %v2612_v9 = vsel %vm2598_vm8, %v2609_v44, %v2611_v46  ;;  %v8395_v59 = vmul.u32.u64.low %v2613_v41, %v2608_v42  ;;  %v8396_v58 = vmul.u32.u64.high %v2613_v41, %v2608_v42, %v8395_v59  ;;  %v2528_v51 = vsub.s32 0, %v8383_v16 }
 0x1b1   : > { %v8400_v20 = vmul.u32.u64.low %v2613_v41, %v2612_v9  ;;  %v8401_v50 = vmul.u32.u64.high %v2613_v41, %v2612_v9, %v8400_v20  ;;  %v6120_v12 = vadd.s32 4294967169, %v2878_v33  ;;  %v8405_v37 = vadd.f32 %v12594_v47, %v8240_v2 }
 0x1b2   : > { %v12599_v17 = vand.u32 2147483647, %v12598_v27  ;;  %vm1743_vm10 = vcmp.lt.s32.totalorder %v12598_v27, 0  ;;  %v2130_v54 = vand.u32 2147483647, %v2129_v63  ;;  %v8414_v1 = vpop.eup %6582  ;;  %v12602_v48 = vsub.s32 4, %v8045_v38 }
 0x1b3   : > { %12597 = vst [vmem:[#allocation88_spill] sm:$0xff] %v8405_v37  ;;  %v2136_v13 = vsub.s32 4, %v8135_v21  ;;  %v2604_v2 = vsel %vm2598_vm8, %v2601_v28, %v2603_v49  ;;  %v2884_v7 = vadd.s32 1, %v6120_v12  ;;  %v12603_v5 = vsel %vm8328_vm1, 0, %v8343_v52 }
 0x1b4   : > { %vm8409_vm9 = vcmp.le.f32.partialorder %v12599_v17, 0.7853982  ;;  %v1828_v60 = vsel %vm1743_vm10, %v12602_v48, %v8045_v38  ;;  %v8425_v44 = vand.u32 3, %v12603_v5  ;;  %v2132_v6 = vcvt.s32.f32 %v2125_v35  ;;  %v12604_v38 = vld [vmem:[#allocation60_spill] sm:$0xff] }
 0x1b5   : > { %v8428_v63 = vsel %vm6095_vm7, 0, %v6094_v30  ;;  %v2623_v42 = vadd.s32 1, %v8396_v58  ;;  %v1826_v46 = vsel %vm1743_vm10, %v1825_v3, %v8360_v57  ;;  %vm2052_vm11 = vcmp.lt.s32.totalorder %v12604_v38, 0 }
 0x1b6   : > { %v6105_v56 = vmin.u32 %v2528_v51, %v8383_v16  ;;  %vm2622_vm12 = vc.u32 %v8401_v50, %v8395_v59  ;;  %v1830_v43 = vsel %vm8409_vm9, 0, %v1828_v60  ;;  %v12605_v52 = vand.u32 2147483647, %v12604_v38 }
 0x1b7   : > { %v2133_v30 = vmul.f32 %v2132_v6, %v2130_v54  ;;  %v2620_v28 = vmul.u32 %v2613_v41, %v2604_v2  ;;  %v8447_v57 = vsel %vm2052_vm11, %v2136_v13, %v8135_v21  ;;  %v2229_v3 = vsub.s32 4294967266, %v8428_v63 }
 0x1b8   : > { %vm8440_vm13 = vcmp.le.f32.partialorder %v12605_v52, 0.7853982  ;;  %v2624_v33 = vsel %vm2622_vm12, %v2623_v42, %v8396_v58  ;;  %vm2885_vm14 = vcmp.gt.s32.totalorder %v2884_v7, 0  ;;  %vm1736_vm15 = vcmp.eq.s32.totalorder %v8425_v44, 2 }
 0x1b9   : > { %v1829_v49 = vsel %vm8409_vm9, %v12598_v27, %v1826_v46  ;;  %v2625_v9 = vadd.s32 %v2624_v33, %v2620_v28  ;;  %v12356_v51 = vand.u32 2147483647, %v8243_v32  ;;  %v8456_v41 = vand.u32 3, %v1830_v43 }
 0x1ba   : > { %v2530_v20 = vclz %v6105_v56  ;;  %v2886_v12 = vsel %vm2885_vm14, %v2884_v7, 0  ;;  %v2980_v21 = vand.u32 2139095040, %v8246_v39  ;;  %v1737_v17 = vxor.u32 2147483648, %v8386_v34 }
 0x1bb   : > { %v2134_v54 = vxor.u32 2147483648, %v2133_v30  ;;  %v2626_v48 = vadd.s32 536870912, %v2625_v9  ;;  %vm1733_vm0 = vcmp.eq.s32.totalorder %v8425_v44, 0  ;;  %6584 = vcosq.f32 %v1829_v49 }
 0x1bc   : > { %v2225_v62 = vsub.s32 32, %v8428_v63  ;;  %v2230_v60 = vadd.s32 127, %v2229_v3  ;;  %v2888_v13 = vand.u32 31, %v2886_v12  ;;  %v1734_v2 = vxor.u32 2147483648, %v8414_v1 }
 0x1bd   : > { %6586 = vsinq.f32 %v1829_v49  ;;  %v8466_v7 = vshrl.u32 %v2626_v48, 30  ;;  %v2881_v5 = vand.u32 8388607, %v12356_v51  ;;  %v2209_v6 = vadd.s32 %v8181_v0, %v8176_v8 }
 0x1be   : > { %v6106_v42 = vadd.s32 4294967294, %v2530_v20  ;;  %v2889_v46 = vsub.s32 32, %v2888_v13  ;;  %v2981_v56 = vshrl.u32 %v2980_v21, 23  ;;  %v8475_v43 = vsel %vm1736_vm15, %v1737_v17, %v8414_v1 }
 0x1bf   : > { %v2135_v52 = vsel %vm2052_vm11, %v2134_v54, %v2133_v30  ;;  %v2226_v28 = vshll.u32 %v8308_v23, %v8428_v63  ;;  %v2628_v3 = vshll.u32 %v8466_v7, 30  ;;  %v2227_v33 = vshrl.u32 %v2209_v6, %v2225_v62 }
 0x1c0   : > { %v2231_v49 = vshll.u32 %v2230_v60, 23  ;;  %v2892_v8 = vshrl.u32 %v12546_v29, %v2889_v46  ;;  %v2895_v0 = vshrl.u32 %v12547_v55, %v2889_v46  ;;  %v2882_v20 = vor.u32 8388608, %v2881_v5 }
 0x1c1   : > { %v2891_v21 = vshll.u32 %v12545_v31, %v2888_v13  ;;  %v2898_v1 = vshrl.u32 %v12548_v18, %v2889_v46  ;;  %v2901_v17 = vshrl.u32 %v12549_v11, %v2889_v46  ;;  %vm6107_vm1 = vcmp.lt.s32.totalorder %v6106_v42, 0 }
 0x1c2   : > { %v2894_v30 = vshll.u32 %v12546_v29, %v2888_v13  ;;  %v2900_v23 = vshll.u32 %v12548_v18, %v2888_v13  ;;  %v6124_v63 = vadd.s32 4294967169, %v2981_v56  ;;  %v8489_v54 = vsub.s32 %v2625_v9, %v2628_v3 }
 0x1c3   : > { %v2887_v48 = vshrl.u32 %v2886_v12, 5  ;;  %v2893_v62 = vor.u32 %v2892_v8, %v2891_v21  ;;  %v2897_v60 = vshll.u32 %v12547_v55, %v2888_v13  ;;  %v2903_v51 = vshll.u32 %v12549_v11, %v2888_v13 }
 0x1c4   : > { %v2896_v6 = vor.u32 %v2895_v0, %v2894_v30  ;;  %v2902_v5 = vor.u32 %v2901_v17, %v2900_v23  ;;  %v2904_v58 = vshrl.u32 %v12550_v25, %v2889_v46  ;;  %v1735_v47 = vsel %vm1733_vm0, %v8386_v34, %v1734_v2 }
 0x1c5   : > { %v2138_v56 = vsel %vm8440_vm13, %v12604_v38, %v2135_v52  ;;  %v8500_v9 = vsel %vm6107_vm1, 0, %v6106_v42  ;;  %v2899_v12 = vor.u32 %v2898_v1, %v2897_v60  ;;  %v8502_v3 = vpop.eup %6584  ;;  %v2228_v8 = vor.u32 %v2227_v33, %v2226_v28 }
 0x1c6   : > { %v2232_v0 = vor.u32 4788187, %v2231_v49  ;;  %v2905_v21 = vor.u32 %v2904_v58, %v2903_v51  ;;  %v2987_v17 = vadd.s32 1, %v6124_v63  ;;  %vm1732_vm2 = vcmp.lt.s32.totalorder %v8425_v44, 2 }
 0x1c7   : > { %v8504_v13 = vpop.eup %6586  ;;  %v2631_v30 = vsub.s32 0, %v8489_v54  ;;  %vm2906_vm3 = vcmp.lt.s32.totalorder %v2887_v48, 1  ;;  %vm2909_vm4 = vcmp.lt.s32.totalorder %v2887_v48, 4  ;;  %v2922_v34 = vshll.u32 %v2882_v20, 8 }
 0x1c8   : > { %vm1839_vm5 = vcmp.eq.s32.totalorder %v8456_v41, 2  ;;  %v2538_v2 = vsub.s32 4294967266, %v8500_v9  ;;  %vm2908_vm6 = vcmp.lt.s32.totalorder %v2887_v48, 3  ;;  %v2914_v42 = vsel %vm2906_vm3, %v2893_v62, %v2896_v6 }
 0x1c9   : > { %v2915_v52 = vsel %vm2909_vm4, %v2902_v5, 920167782  ;;  %vm2907_vm7 = vcmp.lt.s32.totalorder %v2887_v48, 2  ;;  %v2911_v51 = vsel %vm2909_vm4, %v2899_v12, 2102212464  ;;  %v2918_v28 = vsel %vm2906_vm3, %v2896_v6, %v2899_v12 }
 0x1ca   : > { %v2916_v58 = vsel %vm2908_vm6, %v2899_v12, %v2915_v52  ;;  %v2890_v33 = vshrl.u32 %v12545_v31, %v2889_v46  ;;  %v2919_v1 = vsel %vm2909_vm4, %v2905_v21, 1326507024  ;;  %vm2988_vm8 = vcmp.gt.s32.totalorder %v2987_v17, 0 }
 0x1cb   : > { %v2917_v49 = vsel %vm2907_vm7, %v2914_v42, %v2916_v58  ;;  %v6109_v20 = vmin.u32 %v2631_v30, %v8489_v54  ;;  %v2920_v23 = vsel %vm2908_vm6, %v2902_v5, %v2919_v1  ;;  %v2912_v37 = vsel %vm2908_vm6, %v2896_v6, %v2911_v51 }
 0x1cc   : > { %v8515_v63 = vmul.u32.u64.low %v2922_v34, %v2917_v49  ;;  %v8516_v60 = vmul.u32.u64.high %v2922_v34, %v2917_v49, %v8515_v63  ;;  %v2910_v40 = vsel %vm2906_vm3, %v2890_v33, %v2893_v62  ;;  %v2921_v52 = vsel %vm2907_vm7, %v2918_v28, %v2920_v23 }
 0x1cd   : > { %v2989_v24 = vsel %vm2988_vm8, %v2987_v17, 0  ;;  %v1840_v12 = vxor.u32 2147483648, %v8502_v3  ;;  %6588 = vcosq.f32 %v2138_v56  ;;  %v2233_v46 = vand.u32 2147483647, %v2232_v0 }
 0x1ce   : > { %v2977_v21 = vand.u32 2147483647, %v8246_v39  ;;  %v2534_v42 = vsub.s32 32, %v8500_v9  ;;  %v8524_v30 = vmul.u32.u64.low %v2922_v34, %v2921_v52  ;;  %v8525_v5 = vmul.u32.u64.high %v2922_v34, %v2921_v52, %v8524_v30 }
 0x1cf   : > { %v2991_v58 = vand.u32 31, %v2989_v24  ;;  %v2539_v49 = vadd.s32 127, %v2538_v2  ;;  %v2633_v1 = vclz %v6109_v20  ;;  %v2913_v62 = vsel %vm2907_vm7, %v2910_v40, %v2912_v37 }
 0x1d0   : > { %v2932_v6 = vadd.s32 1, %v8516_v60  ;;  %v8532_v17 = vsel %vm1732_vm2, %v1735_v47, %v8475_v43  ;;  %vm1836_vm9 = vcmp.eq.s32.totalorder %v8456_v41, 0  ;;  %v12608_v0 = vsel %vm8440_vm13, 0, %v8447_v57 }
 0x1d1   : > { %v8539_v51 = vand.u32 3, %v12608_v0  ;;  %v2235_v28 = vcvt.s32.f32 %v2228_v8  ;;  %v8541_v2 = vsub.s32 32, %v2991_v58  ;;  %v1837_v40 = vxor.u32 2147483648, %v8504_v13 }
 0x1d2   : > { %v8547_v37 = vsel %vm1839_vm5, %v1840_v12, %v8504_v13  ;;  %6590 = vsinq.f32 %v2138_v56  ;;  %v2518_v47 = vadd.s32 %v8318_v53, %v8316_v4  ;;  %v2929_v35 = vmul.u32 %v2922_v34, %v2913_v62 }
 0x1d3   : > { %v8551_v44 = vmul.f32 %v2235_v28, %v2233_v46  ;;  %vm2931_vm10 = vc.u32 %v8525_v5, %v8515_v63  ;;  %v2984_v57 = vand.u32 8388607, %v2977_v21  ;;  %v2540_v48 = vshll.u32 %v2539_v49, 23 }
 0x1d4   : > { %v2536_v43 = vshrl.u32 %v2518_v47, %v2534_v42  ;;  %v6110_v8 = vadd.s32 4294967294, %v2633_v1  ;;  %v2933_v33 = vsel %vm2931_vm10, %v2932_v6, %v8516_v60  ;;  %v2994_v56 = vshll.u32 %v12545_v31, %v2991_v58 }
 0x1d5   : > { %v8558_v13 = vadd.s32 %v2933_v33, %v2929_v35  ;;  %v2995_v4 = vshrl.u32 %v12546_v29, %v8541_v2  ;;  %v2998_v53 = vshrl.u32 %v12547_v55, %v8541_v2  ;;  %v2997_v34 = vshll.u32 %v12546_v29, %v2991_v58 }
 0x1d6   : > { %v3001_v20 = vshrl.u32 %v12548_v18, %v8541_v2  ;;  %v3003_v23 = vshll.u32 %v12548_v18, %v2991_v58  ;;  %v3004_v60 = vshrl.u32 %v12549_v11, %v8541_v2  ;;  %v2535_v52 = vshll.u32 %v8383_v16, %v8500_v9 }
 0x1d7   : > { %v2935_v12 = vadd.s32 536870912, %v8558_v13  ;;  %v2985_v46 = vor.u32 8388608, %v2984_v57  ;;  %v8574_v42 = vshrl.u32 %v2989_v24, 5  ;;  %v8576_v30 = vpop.eup %6588  ;;  %vm2155_vm11 = vcmp.lt.s32.totalorder %v7879_v26, 0 }
 0x1d8   : > { %v2996_v49 = vor.u32 %v2995_v4, %v2994_v56  ;;  %v2999_v1 = vor.u32 %v2998_v53, %v2997_v34  ;;  %v3000_v62 = vshll.u32 %v12547_v55, %v2991_v58  ;;  %v3005_v6 = vor.u32 %v3004_v60, %v3003_v23 }
 0x1d9   : > { %v2537_v0 = vor.u32 %v2536_v43, %v2535_v52  ;;  %v2541_v28 = vor.u32 4788187, %v2540_v48  ;;  %v3006_v47 = vshll.u32 %v12549_v11, %v2991_v58  ;;  %v3007_v16 = vshrl.u32 %v12550_v25, %v8541_v2 }
 0x1da   : > { %vm1730_vm12 = vweird.f32 %v12584_v61  ;;  %v1838_v24 = vsel %vm1836_vm9, %v8502_v3, %v1837_v40  ;;  %v2239_v9 = vsub.s32 4, %v8281_v36  ;;  %vm6111_vm13 = vcmp.lt.s32.totalorder %v6110_v8, 0 }
 0x1db   : > { %v3002_v35 = vor.u32 %v3001_v20, %v3000_v62  ;;  %vm1835_vm14 = vcmp.lt.s32.totalorder %v8456_v41, 2  ;;  %v12609_v57 = vand.u32 2147483647, %v7879_v26  ;;  %v8595_v58 = vshrl.u32 %v2935_v12, 30 }
 0x1dc   : > { %v3008_v48 = vor.u32 %v3007_v16, %v3006_v47  ;;  %vm3009_vm0 = vcmp.lt.s32.totalorder %v8574_v42, 1  ;;  %vm3012_vm1 = vcmp.lt.s32.totalorder %v8574_v42, 4  ;;  %v6591_v3 = vpop.eup %6590  ;;  %v2149_v40 = vxor.u32 2147483648, %v8576_v30 }
 0x1dd   : > { %vm8591_vm15 = vcmp.le.f32.partialorder %v12609_v57, 0.7853982  ;;  %v2237_v33 = vxor.u32 2147483648, %v8551_v44  ;;  %v3017_v56 = vsel %vm3009_vm0, %v2996_v49, %v2999_v1  ;;  %v3018_v4 = vsel %vm3012_vm1, %v3005_v6, 920167782 }
 0x1de   : > { %vm2145_vm2 = vcmp.eq.s32.totalorder %v8539_v51, 0  ;;  %vm2148_vm3 = vcmp.eq.s32.totalorder %v8539_v51, 2  ;;  %v2542_v53 = vand.u32 2147483647, %v2541_v28  ;;  %v2544_v34 = vcvt.s32.f32 %v2537_v0 }
 0x1df   : > { %vm3011_vm4 = vcmp.lt.s32.totalorder %v8574_v42, 3  ;;  %v3025_v20 = vshll.u32 %v2985_v46, 8  ;;  %v8609_v23 = vsel %vm6111_vm13, 0, %v6110_v8  ;;  %vm3010_vm5 = vcmp.lt.s32.totalorder %v8574_v42, 2 }
 0x1e0   : > { %v3019_v60 = vsel %vm3011_vm4, %v3002_v35, %v3018_v4  ;;  %v3022_v52 = vsel %vm3012_vm1, %v3008_v48, 1326507024  ;;  %v2937_v12 = vshll.u32 %v8595_v58, 30  ;;  %v3014_v62 = vsel %vm3012_vm1, %v3002_v35, 2102212464 }
 0x1e1   : > { %v3020_v0 = vsel %vm3010_vm5, %v3017_v56, %v3019_v60  ;;  %v3021_v8 = vsel %vm3009_vm0, %v2999_v1, %v3002_v35  ;;  %vm2464_vm6 = vcmp.lt.s32.totalorder %v8131_v45, 0  ;;  %v2993_v46 = vshrl.u32 %v12545_v31, %v8541_v2 }
 0x1e2   : > { %v3023_v28 = vsel %vm3011_vm4, %v3005_v6, %v3022_v52  ;;  %v8628_v47 = vmul.u32.u64.low %v3025_v20, %v3020_v0  ;;  %v8629_v16 = vmul.u32.u64.high %v3025_v20, %v3020_v0, %v8628_v47  ;;  %v2146_v57 = vxor.u32 2147483648, %v6591_v3 }
 0x1e3   : > { %v2238_v48 = vsel %vm2155_vm11, %v2237_v33, %v8551_v44  ;;  %v2545_v56 = vmul.f32 %v2544_v34, %v2542_v53  ;;  %v2641_v35 = vsub.s32 4294967266, %v8609_v23  ;;  %v3013_v4 = vsel %vm3009_vm0, %v2993_v46, %v2996_v49 }
 0x1e4   : > { %v3015_v2 = vsel %vm3011_vm4, %v2999_v1, %v3014_v62  ;;  %v3024_v6 = vsel %vm3010_vm5, %v3021_v8, %v3023_v28  ;;  %v3289_v60 = vand.u32 2139095040, %v8252_v19  ;;  %v8646_v52 = vsel %vm1730_vm12, nan, %v8532_v17 }
 0x1e5   : > { %vm2144_vm7 = vcmp.lt.s32.totalorder %v8539_v51, 2  ;;  %v12612_v44 = vand.u32 2147483647, %v8131_v45  ;;  %v8656_v49 = vsub.s32 %v8558_v13, %v2937_v12  ;;  %v1842_v61 = vsel %vm1835_vm14, %v1838_v24, %v8547_v37 }
 0x1e6   : > { %v8658_v1 = vmul.u32.u64.low %v3025_v20, %v3024_v6  ;;  %v8659_v53 = vmul.u32.u64.high %v3025_v20, %v3024_v6, %v8658_v1  ;;  %v2241_v17 = vsel %vm8591_vm15, %v7879_v26, %v2238_v48  ;;  %v3035_v34 = vadd.s32 1, %v8629_v16 }
 0x1e7   : > { %vm8651_vm8 = vcmp.le.f32.partialorder %v12612_v44, 0.7853982  ;;  %v3290_v62 = vshrl.u32 %v3289_v60, 23  ;;  %vm1833_vm9 = vweird.f32 %v12598_v27  ;;  %v2546_v0 = vxor.u32 2147483648, %v2545_v56 }
 0x1e8   : > { %v2637_v13 = vsub.s32 32, %v8609_v23  ;;  %v2642_v12 = vadd.s32 127, %v2641_v35  ;;  %v3016_v8 = vsel %vm3010_vm5, %v3013_v4, %v3015_v2  ;;  %vm2142_vm10 = vweird.f32 %v12604_v38 }
 0x1e9   : > { %v2147_v41 = vsel %vm2145_vm2, %v8576_v30, %v2146_v57  ;;  %v2150_v37 = vsel %vm2148_vm3, %v2149_v40, %v6591_v3  ;;  %v2240_v24 = vsel %vm2155_vm11, %v2239_v9, %v8281_v36  ;;  %v6136_v46 = vadd.s32 4294967169, %v3290_v62 }
 0x1ea   : > { %v2548_v28 = vsub.s32 4, %v8369_v15  ;;  %v2621_v42 = vadd.s32 %v8395_v59, %v8401_v50  ;;  %v2940_v48 = vsub.s32 0, %v8656_v49  ;;  %vm3034_vm12 = vc.u32 %v8659_v53, %v8628_v47 }
 0x1eb   : > { %6592 = vcosq.f32 %v2241_v17  ;;  %v3032_v30 = vmul.u32 %v3025_v20, %v3016_v8  ;;  %v3036_v57 = vsel %vm3034_vm12, %v3035_v34, %v8629_v16  ;;  %v3296_v3 = vadd.s32 1, %v6136_v46 }
 0x1ec   : > { %v2547_v40 = vsel %vm2464_vm6, %v2546_v0, %v2545_v56  ;;  %v2639_v36 = vshrl.u32 %v2621_v42, %v2637_v13  ;;  %v2643_v9 = vshll.u32 %v2642_v12, 23  ;;  %v12361_v35 = vand.u32 2147483647, %v8252_v19 }
 0x1ed   : > { %v2242_v59 = vsel %vm8591_vm15, 0, %v2240_v24  ;;  %6594 = vsinq.f32 %v2241_v17  ;;  %v3037_v50 = vadd.s32 %v3036_v57, %v3032_v30  ;;  %vm3297_vm11 = vcmp.gt.s32.totalorder %v3296_v3, 0 }
 0x1ee   : > { %v2638_v4 = vshll.u32 %v8489_v54, %v8609_v23  ;;  %v6121_v20 = vmin.u32 %v2940_v48, %v8656_v49  ;;  %v3298_v16 = vsel %vm3297_vm11, %v3296_v3, 0  ;;  %v3392_v2 = vand.u32 2139095040, %v8255_v14 }
 0x1ef   : > { %v2151_v56 = vsel %vm2144_vm7, %v2147_v41, %v2150_v37  ;;  %v2550_v6 = vsel %vm8651_vm8, %v8131_v45, %v2547_v40  ;;  %v3038_v43 = vadd.s32 536870912, %v3037_v50  ;;  %v3300_v60 = vand.u32 31, %v3298_v16 }
 0x1f0   : > { %v2549_v44 = vsel %vm2464_vm6, %v2548_v28, %v8369_v15  ;;  %v2640_v1 = vor.u32 %v2639_v36, %v2638_v4  ;;  %v2644_v54 = vor.u32 4788187, %v2643_v9  ;;  %v3293_v23 = vand.u32 8388607, %v12361_v35 }
 0x1f1   : > { %v8709_v17 = vsel %vm1833_vm9, nan, %v1842_v61  ;;  %v8711_v51 = vand.u32 3, %v2242_v59  ;;  %v8713_v34 = vshrl.u32 %v3038_v43, 30  ;;  %v3301_v62 = vsub.s32 32, %v3300_v60 }
 0x1f2   : > { %v8717_v0 = vsel %vm2142_vm10, nan, %v2151_v56  ;;  %6596 = vcosq.f32 %v2550_v6  ;;  %v2942_v15 = vclz %v6121_v20  ;;  %v3393_v13 = vshrl.u32 %v3392_v2, 23 }
 0x1f3   : > { %v2551_v12 = vsel %vm8651_vm8, 0, %v2549_v44  ;;  %6598 = vsinq.f32 %v2550_v6  ;;  %v3040_v27 = vshll.u32 %v8713_v34, 30  ;;  %v3304_v61 = vshrl.u32 %v12546_v29, %v3301_v62 }
 0x1f4   : > { %v2645_v8 = vand.u32 2147483647, %v2644_v54  ;;  %v2647_v41 = vcvt.s32.f32 %v2640_v1  ;;  %v3294_v37 = vor.u32 8388608, %v3293_v23  ;;  %v3307_v24 = vshrl.u32 %v12547_v55, %v3301_v62 }
 0x1f5   : > { %v8724_v46 = vpop.eup %6592  ;;  %v8726_v38 = vsub.s32 %v3037_v50, %v3040_v27  ;;  %v3303_v28 = vshll.u32 %v12545_v31, %v3300_v60  ;;  %v3310_v42 = vshrl.u32 %v12548_v18, %v3301_v62  ;;  %v3313_v33 = vshrl.u32 %v12549_v11, %v3301_v62 }
 0x1f6   : > { %v6122_v48 = vadd.s32 4294967294, %v2942_v15  ;;  %v3306_v30 = vshll.u32 %v12546_v29, %v3300_v60  ;;  %v3312_v57 = vshll.u32 %v12548_v18, %v3300_v60  ;;  %v6140_v3 = vadd.s32 4294967169, %v3393_v13 }
 0x1f7   : > { %v6595_v40 = vpop.eup %6594  ;;  %v3043_v36 = vsub.s32 0, %v8726_v38  ;;  %v3299_v9 = vshrl.u32 %v3298_v16, 5  ;;  %v3305_v59 = vor.u32 %v3304_v61, %v3303_v28  ;;  %v3309_v50 = vshll.u32 %v12547_v55, %v3300_v60 }
 0x1f8   : > { %v3308_v4 = vor.u32 %v3307_v24, %v3306_v30  ;;  %v3314_v20 = vor.u32 %v3313_v33, %v3312_v57  ;;  %v3315_v2 = vshll.u32 %v12549_v11, %v3300_v60  ;;  %v3316_v56 = vshrl.u32 %v12550_v25, %v3301_v62 }
 0x1f9   : > { %v2252_v6 = vxor.u32 2147483648, %v8724_v46  ;;  %v8738_v43 = vand.u32 3, %v2551_v12  ;;  %v6125_v44 = vmin.u32 %v3043_v36, %v8726_v38  ;;  %v3311_v1 = vor.u32 %v3310_v42, %v3309_v50 }
 0x1fa   : > { %v2249_v54 = vxor.u32 2147483648, %v6595_v40  ;;  %v2648_v23 = vmul.f32 %v2647_v41, %v2645_v8  ;;  %v2651_v16 = vsub.s32 4, %v8466_v7  ;;  %v3317_v15 = vor.u32 %v3316_v56, %v3315_v2 }
 0x1fb   : > { %vm2248_vm13 = vcmp.eq.s32.totalorder %v8711_v51, 0  ;;  %vm2251_vm14 = vcmp.eq.s32.totalorder %v8711_v51, 2  ;;  %vm6123_vm15 = vcmp.lt.s32.totalorder %v6122_v48, 0  ;;  %vm3318_vm0 = vcmp.lt.s32.totalorder %v3299_v9, 1 }
 0x1fc   : > { %vm3321_vm1 = vcmp.lt.s32.totalorder %v3299_v9, 4  ;;  %v3334_v60 = vshll.u32 %v3294_v37, 8  ;;  %v6597_v13 = vpop.eup %6596  ;;  %vm2567_vm2 = vcmp.lt.s32.totalorder %v8213_v10, 0  ;;  %vm3320_vm3 = vcmp.lt.s32.totalorder %v3299_v9, 3 }
 0x1fd   : > { %v3326_v12 = vsel %vm3318_vm0, %v3305_v59, %v3308_v4  ;;  %v3327_v27 = vsel %vm3321_vm1, %v3314_v20, 920167782  ;;  %v3399_v61 = vadd.s32 1, %v6140_v3  ;;  %v6599_v8 = vpop.eup %6598  ;;  %vm2557_vm4 = vcmp.eq.s32.totalorder %v8738_v43, 0 }
 0x1fe   : > { %v3045_v41 = vclz %v6125_v44  ;;  %vm3319_vm5 = vcmp.lt.s32.totalorder %v3299_v9, 2  ;;  %v3323_v24 = vsel %vm3321_vm1, %v3311_v1, 2102212464  ;;  %v3328_v28 = vsel %vm3320_vm3, %v3311_v1, %v3327_v27 }
 0x1ff   : > { %v3302_v37 = vshrl.u32 %v12545_v31, %v3301_v62  ;;  %v3329_v42 = vsel %vm3319_vm5, %v3326_v12, %v3328_v28  ;;  %v3330_v33 = vsel %vm3318_vm0, %v3308_v4, %v3311_v1  ;;  %v3331_v30 = vsel %vm3321_vm1, %v3317_v15, 1326507024 }
 0x200   : > { %v8755_v57 = vsel %vm6123_vm15, 0, %v6122_v48  ;;  %v3332_v3 = vsel %vm3320_vm3, %v3314_v20, %v3331_v30  ;;  %v8758_v36 = vmul.u32.u64.low %v3334_v60, %v3329_v42  ;;  %v8759_v50 = vmul.u32.u64.high %v3334_v60, %v3329_v42, %v8758_v36  ;;  %v12622_v30 = vld [vmem:[#allocation46_spill] sm:$0xff] }
 0x201   : > { %v3322_v2 = vsel %vm3318_vm0, %v3302_v37, %v3305_v59  ;;  %v3324_v56 = vsel %vm3320_vm3, %v3308_v4, %v3323_v24  ;;  %v3333_v62 = vsel %vm3319_vm5, %v3330_v33, %v3332_v3  ;;  %vm3400_vm6 = vcmp.gt.s32.totalorder %v3399_v61, 0 }
 0x202   : > { %v2558_v44 = vxor.u32 2147483648, %v6599_v8  ;;  %v2561_v1 = vxor.u32 2147483648, %v6597_v13  ;;  %v6126_v12 = vadd.s32 4294967294, %v3045_v41  ;;  %v3401_v15 = vsel %vm3400_vm6, %v3399_v61, 0 }
 0x203   : > { %v2649_v27 = vxor.u32 2147483648, %v2648_v23  ;;  %v8765_v48 = vmul.u32.u64.low %v3334_v60, %v3333_v62  ;;  %v8766_v28 = vmul.u32.u64.high %v3334_v60, %v3333_v62, %v8765_v48  ;;  %v3403_v20 = vand.u32 31, %v3401_v15 }
 0x204   : > { %v12615_v42 = vand.u32 2147483647, %v8213_v10  ;;  %v2950_v59 = vsub.s32 4294967266, %v8755_v57  ;;  %v3325_v4 = vsel %vm3319_vm5, %v3322_v2, %v3324_v56  ;;  %v3344_v24 = vadd.s32 1, %v8759_v50 }
 0x205   : > { %v12360_v41 = vand.u32 2147483647, %v8255_v14  ;;  %v8781_v61 = vsel %vm2248_vm13, %v8724_v46, %v2249_v54  ;;  %v8785_v37 = vsel %vm2251_vm14, %v2252_v6, %v6595_v40  ;;  %vm2560_vm8 = vcmp.eq.s32.totalorder %v8738_v43, 2 }
 0x206   : > { %vm8770_vm7 = vcmp.le.f32.partialorder %v12615_v42, 0.7853982  ;;  %v8788_v33 = vsub.s32 32, %v3403_v20  ;;  %v8790_v3 = vsel %vm2560_vm8, %v2561_v1, %v6599_v8  ;;  %v8795_v9 = vsel %vm2567_vm2, %v2651_v16, %v8466_v7 }
 0x207   : > { %v2930_v2 = vadd.s32 %v8515_v63, %v8525_v5  ;;  %vm6127_vm9 = vcmp.lt.s32.totalorder %v6126_v12, 0  ;;  %v8801_v46 = vsel %vm2557_vm4, %v6597_v13, %v2558_v44  ;;  %v2650_v40 = vsel %vm2567_vm2, %v2649_v27, %v2648_v23 }
 0x208   : > { %v3341_v6 = vmul.u32 %v3334_v60, %v3325_v4  ;;  %vm3343_vm10 = vc.u32 %v8766_v28, %v8758_v36  ;;  %v2951_v54 = vadd.s32 127, %v2950_v59  ;;  %v3396_v7 = vand.u32 8388607, %v12360_v41 }
 0x209   : > { %v3345_v8 = vsel %vm3343_vm10, %v3344_v24, %v8759_v50  ;;  %v3407_v63 = vshrl.u32 %v12546_v29, %v8788_v33  ;;  %v8812_v5 = vsel %vm6127_vm9, 0, %v6126_v12  ;;  %v3406_v13 = vshll.u32 %v12545_v31, %v3403_v20 }
 0x20a   : > { %v3346_v16 = vadd.s32 %v3345_v8, %v3341_v6  ;;  %v3410_v23 = vshrl.u32 %v12547_v55, %v8788_v33  ;;  %v3409_v60 = vshll.u32 %v12546_v29, %v3403_v20  ;;  %v3413_v56 = vshrl.u32 %v12548_v18, %v8788_v33 }
 0x20b   : > { %v3415_v50 = vshll.u32 %v12548_v18, %v3403_v20  ;;  %v3416_v62 = vshrl.u32 %v12549_v11, %v8788_v33  ;;  %v2946_v44 = vsub.s32 32, %v8755_v57  ;;  %v8824_v12 = vshrl.u32 %v3401_v15, 5 }
 0x20c   : > { %v3347_v1 = vadd.s32 536870912, %v3346_v16  ;;  %v3412_v27 = vshll.u32 %v12547_v55, %v3403_v20  ;;  %v3408_v48 = vor.u32 %v3407_v63, %v3406_v13  ;;  %v3411_v42 = vor.u32 %v3410_v23, %v3409_v60 }
 0x20d   : > { %v3417_v59 = vor.u32 %v3416_v62, %v3415_v50  ;;  %v3419_v4 = vshrl.u32 %v12550_v25, %v8788_v33  ;;  %v8832_v24 = vsel %vm8770_vm7, %v8213_v10, %v2650_v40  ;;  %v2952_v6 = vshll.u32 %v2951_v54, 23 }
 0x20e   : > { %v3053_v8 = vsub.s32 4294967266, %v8812_v5  ;;  %v8835_v41 = vshrl.u32 %v3347_v1, 30  ;;  %v3033_v15 = vadd.s32 %v8628_v47, %v8659_v53  ;;  %v3397_v35 = vor.u32 8388608, %v3396_v7 }
 0x20f   : > { %v3414_v63 = vor.u32 %v3413_v56, %v3412_v27  ;;  %v3418_v13 = vshll.u32 %v12549_v11, %v3403_v20  ;;  %v2948_v23 = vshrl.u32 %v2930_v2, %v2946_v44  ;;  %vm3421_vm12 = vcmp.lt.s32.totalorder %v8824_v12, 1 }
 0x210   : > { %v3349_v60 = vshll.u32 %v8835_v41, 30  ;;  %vm3424_vm11 = vcmp.lt.s32.totalorder %v8824_v12, 4  ;;  %vm2247_vm13 = vcmp.lt.s32.totalorder %v8711_v51, 2  ;;  %v2947_v40 = vshll.u32 %v8656_v49, %v8755_v57 }
 0x211   : > { %v3420_v54 = vor.u32 %v3419_v4, %v3418_v13  ;;  %v3429_v47 = vsel %vm3421_vm12, %v3408_v48, %v3411_v42  ;;  %v3430_v53 = vsel %vm3424_vm11, %v3417_v59, 920167782  ;;  %v2953_v20 = vor.u32 4788187, %v2952_v6 }
 0x212   : > { %v3054_v2 = vadd.s32 127, %v3053_v8  ;;  %v8850_v7 = vsub.s32 %v3346_v16, %v3349_v60  ;;  %vm3423_vm14 = vcmp.lt.s32.totalorder %v8824_v12, 3  ;;  %vm2556_vm15 = vcmp.lt.s32.totalorder %v8738_v43, 2 }
 0x213   : > { %v3049_v56 = vsub.s32 32, %v8812_v5  ;;  %vm3422_vm0 = vcmp.lt.s32.totalorder %v8824_v12, 2  ;;  %v3431_v49 = vsel %vm3423_vm14, %v3414_v63, %v3430_v53  ;;  %v3437_v57 = vshll.u32 %v3397_v35, 8 }
 0x214   : > { %v2949_v50 = vor.u32 %v2948_v23, %v2947_v40  ;;  %v3352_v62 = vsub.s32 0, %v8850_v7  ;;  %v3426_v44 = vsel %vm3424_vm11, %v3414_v63, 2102212464  ;;  %v3432_v16 = vsel %vm3422_vm0, %v3429_v47, %v3431_v49  ;;  %v12618_v40 = vld [vmem:[#allocation45_spill] sm:$0xff] }
 0x215   : > { %v3433_v1 = vsel %vm3421_vm12, %v3411_v42, %v3414_v63  ;;  %v3434_v27 = vsel %vm3424_vm11, %v3420_v54, 1326507024  ;;  %v8867_v4 = vmul.u32.u64.low %v3437_v57, %v3432_v16  ;;  %v8868_v6 = vmul.u32.u64.high %v3437_v57, %v3432_v16, %v8867_v4 }
 0x216   : > { %6600 = vcosq.f32 %v8832_v24  ;;  %v3055_v35 = vshll.u32 %v3054_v2, 23  ;;  %v6137_v8 = vmin.u32 %v3352_v62, %v8850_v7  ;;  %v3405_v13 = vshrl.u32 %v12545_v31, %v8788_v33 }
 0x217   : > { %vm2245_vm1 = vweird.f32 %v7879_v26  ;;  %v2954_v23 = vand.u32 2147483647, %v2953_v20  ;;  %v3051_v60 = vshrl.u32 %v3033_v15, %v3049_v56  ;;  %v3435_v63 = vsel %vm3423_vm14, %v3417_v59, %v3434_v27 }
 0x218   : > { %v3701_v54 = vand.u32 2139095040, %v12618_v40  ;;  %vm2876_vm2 = vcmp.lt.s32.totalorder %v8243_v32, 0  ;;  %v3354_v47 = vclz %v6137_v8  ;;  %v3425_v53 = vsel %vm3421_vm12, %v3405_v13, %v3408_v48 }
 0x219   : > { %v3427_v2 = vsel %vm3423_vm14, %v3411_v42, %v3426_v44  ;;  %v3436_v33 = vsel %vm3422_vm0, %v3433_v1, %v3435_v63  ;;  %vm2554_vm3 = vweird.f32 %v8131_v45  ;;  %v2956_v15 = vcvt.s32.f32 %v2949_v50 }
 0x21a   : > { %v8887_v20 = vmul.u32.u64.low %v3437_v57, %v3436_v33  ;;  %v8888_v56 = vmul.u32.u64.high %v3437_v57, %v3436_v33, %v8887_v20  ;;  %v3702_v59 = vshrl.u32 %v3701_v54, 23  ;;  %v2254_v49 = vsel %vm2247_vm13, %v8781_v61, %v8785_v37 }
 0x21b   : > { %v3050_v48 = vshll.u32 %v8726_v38, %v8812_v5  ;;  %v3056_v62 = vor.u32 4788187, %v3055_v35  ;;  %v6138_v42 = vadd.s32 4294967294, %v3354_v47  ;;  %v12619_v44 = vand.u32 2147483647, %v8243_v32 }
 0x21c   : > { %v2957_v50 = vmul.f32 %v2956_v15, %v2954_v23  ;;  %v3428_v1 = vsel %vm3422_vm0, %v3425_v53, %v3427_v2  ;;  %v3447_v27 = vadd.s32 1, %v8868_v6  ;;  %v6152_v8 = vadd.s32 4294967169, %v3702_v59 }
 0x21d   : > { %vm8898_vm4 = vcmp.le.f32.partialorder %v12619_v44, 0.7853982  ;;  %v2563_v51 = vsel %vm2556_vm15, %v8801_v46, %v8790_v3  ;;  %v2654_v38 = vsel %vm8770_vm7, 0, %v8795_v9  ;;  %v3052_v61 = vor.u32 %v3051_v60, %v3050_v48 }
 0x21e   : > { %vm6139_vm5 = vcmp.lt.s32.totalorder %v6138_v42, 0  ;;  %v2960_v37 = vsub.s32 4, %v8595_v58  ;;  %vm3446_vm6 = vc.u32 %v8888_v56, %v8867_v4  ;;  %v3708_v12 = vadd.s32 1, %v6152_v8 }
 0x21f   : > { %v3357_v5 = vsel %vm6139_vm5, 0, %v6138_v42  ;;  %v3057_v35 = vand.u32 2147483647, %v3056_v62  ;;  %v3444_v23 = vmul.u32 %v3437_v57, %v3428_v1  ;;  %v12362_v63 = vand.u32 2147483647, %v12618_v40 }
 0x220   : > { %v3362_v13 = vsub.s32 4294967266, %v3357_v5  ;;  %v2958_v43 = vxor.u32 2147483648, %v2957_v50  ;;  %v3448_v3 = vsel %vm3446_vm6, %v3447_v27, %v8868_v6  ;;  %vm3709_vm8 = vcmp.gt.s32.totalorder %v3708_v12, 0  ;;  %v8918_v46 = vpop.eup %6600 }
 0x221   : > { %v3804_v9 = vand.u32 2139095040, %v12622_v30  ;;  %v8922_v60 = vsel %vm2245_vm1, nan, %v2254_v49  ;;  %v8924_v54 = vand.u32 3, %v2654_v38  ;;  %v3059_v47 = vcvt.s32.f32 %v3052_v61 }
 0x222   : > { %v3449_v53 = vadd.s32 %v3448_v3, %v3444_v23  ;;  %v8929_v57 = vsel %vm2876_vm2, %v2960_v37, %v8595_v58  ;;  %v3358_v2 = vsub.s32 32, %v3357_v5  ;;  %v3363_v6 = vadd.s32 127, %v3362_v13 }
 0x223   : > { %v3710_v33 = vsel %vm3709_vm8, %v3708_v12, 0  ;;  %v8933_v15 = vsel %vm2554_vm3, nan, %v2563_v51  ;;  %v3060_v20 = vmul.f32 %v3059_v47, %v3057_v35  ;;  %v3705_v59 = vand.u32 8388607, %v12362_v63 }
 0x224   : > { %v3450_v26 = vadd.s32 536870912, %v3449_v53  ;;  %v2959_v49 = vsel %vm2876_vm2, %v2958_v43, %v2957_v50  ;;  %vm2979_vm7 = vcmp.lt.s32.totalorder %v8246_v39, 0  ;;  %v3342_v58 = vadd.s32 %v8758_v36, %v8766_v28 }
 0x225   : > { %v3712_v48 = vand.u32 31, %v3710_v33  ;;  %v3805_v62 = vshrl.u32 %v3804_v9, 23  ;;  %6602 = vsinq.f32 %v8832_v24  ;;  %v2664_v45 = vxor.u32 2147483648, %v8918_v46 }
 0x226   : > { %v2963_v42 = vsel %vm8898_vm4, 0, %v8929_v57  ;;  %v8947_v44 = vshrl.u32 %v3450_v26, 30  ;;  %v3063_v1 = vsub.s32 4, %v8713_v34  ;;  %v3360_v50 = vshrl.u32 %v3342_v58, %v3358_v2 }
 0x227   : > { %v3364_v27 = vshll.u32 %v3363_v6, 23  ;;  %v3713_v8 = vsub.s32 32, %v3712_v48  ;;  %v8953_v36 = vsel %vm8898_vm4, %v8243_v32, %v2959_v49  ;;  %v3061_v28 = vxor.u32 2147483648, %v3060_v20 }
 0x228   : > { %v3452_v24 = vshll.u32 %v8947_v44, 30  ;;  %v3706_v51 = vor.u32 8388608, %v3705_v59  ;;  %v3359_v38 = vshll.u32 %v8850_v7, %v3357_v5  ;;  %v6156_v12 = vadd.s32 4294967169, %v3805_v62 }
 0x229   : > { %v3716_v61 = vshrl.u32 %v12546_v29, %v3713_v8  ;;  %v3719_v37 = vshrl.u32 %v12547_v55, %v3713_v8  ;;  %v3715_v13 = vshll.u32 %v12545_v31, %v3712_v48  ;;  %v3722_v23 = vshrl.u32 %v12548_v18, %v3713_v8 }
 0x22a   : > { %v8959_v35 = vsub.s32 %v3449_v53, %v3452_v24  ;;  %v3725_v43 = vshrl.u32 %v12549_v11, %v3713_v8  ;;  %v3361_v3 = vor.u32 %v3360_v50, %v3359_v38  ;;  %v3365_v9 = vor.u32 4788187, %v3364_v27 }
 0x22b   : > { %v3718_v47 = vshll.u32 %v12546_v29, %v3712_v48  ;;  %v3724_v2 = vshll.u32 %v12548_v18, %v3712_v48  ;;  %v3711_v5 = vshrl.u32 %v3710_v33, 5  ;;  %v3717_v6 = vor.u32 %v3716_v61, %v3715_v13 }
 0x22c   : > { %v3455_v7 = vsub.s32 0, %v8959_v35  ;;  %v3721_v26 = vshll.u32 %v12547_v55, %v3712_v48  ;;  %vm8970_vm9 = vcmp.le.f32.partialorder %v2977_v21, 0.7853982  ;;  %v3727_v58 = vshll.u32 %v12549_v11, %v3712_v48 }
 0x22d   : > { %v3720_v59 = vor.u32 %v3719_v37, %v3718_v47  ;;  %v3726_v49 = vor.u32 %v3725_v43, %v3724_v2  ;;  %v3728_v62 = vshrl.u32 %v12550_v25, %v3713_v8  ;;  %v3062_v50 = vsel %vm2979_vm7, %v3061_v28, %v3060_v20 }
 0x22e   : > { %v6141_v33 = vmin.u32 %v3455_v7, %v8959_v35  ;;  %v3723_v27 = vor.u32 %v3722_v23, %v3721_v26  ;;  %v8979_v24 = vshll.u32 %v3706_v51, 8  ;;  %v3366_v38 = vand.u32 2147483647, %v3365_v9 }
 0x22f   : > { %v3368_v61 = vcvt.s32.f32 %v3361_v3  ;;  %v3729_v21 = vor.u32 %v3728_v62, %v3727_v58  ;;  %v3811_v13 = vadd.s32 1, %v6156_v12  ;;  %v6603_v63 = vpop.eup %6602  ;;  %vm2663_vm10 = vcmp.eq.s32.totalorder %v8924_v54, 2 }
 0x230   : > { %v3457_v37 = vclz %v6141_v33  ;;  %v3714_v48 = vshrl.u32 %v12545_v31, %v3713_v8  ;;  %vm3730_vm12 = vcmp.lt.s32.totalorder %v3711_v5, 1  ;;  %vm3733_vm11 = vcmp.lt.s32.totalorder %v3711_v5, 4 }
 0x231   : > { %vm2660_vm13 = vcmp.eq.s32.totalorder %v8924_v54, 0  ;;  %vm3731_vm14 = vcmp.lt.s32.totalorder %v3711_v5, 2  ;;  %vm3732_vm15 = vcmp.lt.s32.totalorder %v3711_v5, 3  ;;  %v3738_v20 = vsel %vm3730_vm12, %v3717_v6, %v3720_v59 }
 0x232   : > { %v3739_v28 = vsel %vm3733_vm11, %v3726_v49, 920167782  ;;  %v6142_v51 = vadd.s32 4294967294, %v3457_v37  ;;  %v3735_v23 = vsel %vm3733_vm11, %v3723_v27, 2102212464  ;;  %v3742_v3 = vsel %vm3730_vm12, %v3720_v59, %v3723_v27 }
 0x233   : > { %v3740_v43 = vsel %vm3732_vm15, %v3723_v27, %v3739_v28  ;;  %v3734_v9 = vsel %vm3730_vm12, %v3714_v48, %v3717_v6  ;;  %v3743_v47 = vsel %vm3733_vm11, %v3729_v21, 1326507024  ;;  %vm3812_vm0 = vcmp.gt.s32.totalorder %v3811_v13, 0 }
 0x234   : > { %v3741_v12 = vsel %vm3731_vm14, %v3738_v20, %v3740_v43  ;;  %vm6143_vm1 = vcmp.lt.s32.totalorder %v6142_v51, 0  ;;  %v3744_v2 = vsel %vm3732_vm15, %v3726_v49, %v3743_v47  ;;  %v3736_v58 = vsel %vm3732_vm15, %v3720_v59, %v3735_v23 }
 0x235   : > { %v8986_v8 = vmul.u32.u64.low %v8979_v24, %v3741_v12  ;;  %v8987_v7 = vmul.u32.u64.high %v8979_v24, %v3741_v12, %v8986_v8  ;;  %v8990_v26 = vsel %vm6143_vm1, 0, %v6142_v51  ;;  %v3745_v62 = vsel %vm3731_vm14, %v3742_v3, %v3744_v2 }
 0x236   : > { %v3813_v33 = vsel %vm3812_vm0, %v3811_v13, 0  ;;  %v2661_v37 = vxor.u32 2147483648, %v6603_v63  ;;  %v8998_v6 = vsel %vm2979_vm7, %v3063_v1, %v8713_v34  ;;  %v3065_v49 = vsel %vm8970_vm9, %v8246_v39, %v3062_v50 }
 0x237   : > { %vm3288_vm2 = vcmp.lt.s32.totalorder %v8252_v19, 0  ;;  %v12363_v27 = vand.u32 2147483647, %v12622_v30  ;;  %v3369_v59 = vmul.f32 %v3368_v61, %v3366_v38  ;;  %v3815_v48 = vand.u32 31, %v3813_v33 }
 0x238   : > { %v9006_v21 = vmul.u32.u64.low %v8979_v24, %v3745_v62  ;;  %v9007_v13 = vmul.u32.u64.high %v8979_v24, %v3745_v62, %v9006_v21  ;;  %6604 = vcosq.f32 %v8953_v36  ;;  %v3465_v20 = vsub.s32 4294967266, %v8990_v26 }
 0x239   : > { %v3737_v34 = vsel %vm3731_vm14, %v3734_v9, %v3736_v58  ;;  %v3756_v1 = vadd.s32 1, %v8987_v7  ;;  %v9017_v50 = vsel %vm2663_vm10, %v2664_v45, %v6603_v63  ;;  %6606 = vsinq.f32 %v8953_v36 }
 0x23a   : > { %v9024_v38 = vand.u32 3, %v2963_v42  ;;  %v12625_v61 = vand.u32 2147483647, %v8252_v19  ;;  %v9032_v28 = vsub.s32 32, %v3815_v48  ;;  %v9037_v63 = vsel %vm2660_vm13, %v8918_v46, %v2661_v37 }
 0x23b   : > { %v3066_v16 = vsel %vm8970_vm9, 0, %v8998_v6  ;;  %6608 = vcosq.f32 %v3065_v49  ;;  %v3370_v45 = vxor.u32 2147483648, %v3369_v59  ;;  %v3753_v42 = vmul.u32 %v8979_v24, %v3737_v34 }
 0x23c   : > { %vm9028_vm3 = vcmp.le.f32.partialorder %v12625_v61, 0.7853982  ;;  %vm3755_vm4 = vc.u32 %v9007_v13, %v8986_v8  ;;  %v3808_v36 = vand.u32 8388607, %v12363_v27  ;;  %v3445_v46 = vadd.s32 %v8867_v4, %v8888_v56 }
 0x23d   : > { %v3461_v51 = vsub.s32 32, %v8990_v26  ;;  %v3466_v23 = vadd.s32 127, %v3465_v20  ;;  %v3757_v43 = vsel %vm3755_vm4, %v3756_v1, %v8987_v7  ;;  %v3818_v9 = vshll.u32 %v12545_v31, %v3815_v48 }
 0x23e   : > { %v3758_v3 = vadd.s32 %v3757_v43, %v3753_v42  ;;  %v3819_v24 = vshrl.u32 %v12546_v29, %v9032_v28  ;;  %v3822_v12 = vshrl.u32 %v12547_v55, %v9032_v28  ;;  %v3821_v47 = vshll.u32 %v12546_v29, %v3815_v48 }
 0x23f   : > { %v3825_v2 = vshrl.u32 %v12548_v18, %v9032_v28  ;;  %v3827_v4 = vshll.u32 %v12548_v18, %v3815_v48  ;;  %v3828_v56 = vshrl.u32 %v12549_v11, %v9032_v28  ;;  %v3371_v7 = vsel %vm3288_vm2, %v3370_v45, %v3369_v59 }
 0x240   : > { %v3759_v58 = vadd.s32 536870912, %v3758_v3  ;;  %v3809_v62 = vor.u32 8388608, %v3808_v36  ;;  %v9065_v37 = vshrl.u32 %v3813_v33, 5  ;;  %v3820_v21 = vor.u32 %v3819_v24, %v3818_v9 }
 0x241   : > { %v3823_v20 = vor.u32 %v3822_v12, %v3821_v47  ;;  %v3824_v34 = vshll.u32 %v12547_v55, %v3815_v48  ;;  %v3829_v1 = vor.u32 %v3828_v56, %v3827_v4  ;;  %v3467_v61 = vshll.u32 %v3466_v23, 23 }
 0x242   : > { %v9068_v42 = vshrl.u32 %v3759_v58, 30  ;;  %v3830_v43 = vshll.u32 %v12549_v11, %v3815_v48  ;;  %v3831_v27 = vshrl.u32 %v12550_v25, %v9032_v28  ;;  %v9073_v57 = vpop.eup %6604  ;;  %6610 = vsinq.f32 %v3065_v49 }
 0x243   : > { %v3374_v33 = vsel %vm9028_vm3, %v8252_v19, %v3371_v7  ;;  %v3463_v59 = vshrl.u32 %v3445_v46, %v3461_v51  ;;  %v3826_v45 = vor.u32 %v3825_v2, %v3824_v34  ;;  %v9078_v36 = vpop.eup %6606  ;;  %vm3833_vm5 = vcmp.lt.s32.totalorder %v9065_v37, 1 }
 0x244   : > { %v3761_v23 = vshll.u32 %v9068_v42, 30  ;;  %v3832_v9 = vor.u32 %v3831_v27, %v3830_v43  ;;  %vm3836_vm6 = vcmp.lt.s32.totalorder %v9065_v37, 4  ;;  %vm2659_vm8 = vcmp.lt.s32.totalorder %v8924_v54, 2 }
 0x245   : > { %v9083_v48 = vpop.eup %6608  ;;  %v3462_v49 = vshll.u32 %v8959_v35, %v8990_v26  ;;  %v3841_v46 = vsel %vm3833_vm5, %v3820_v21, %v3823_v20  ;;  %v3842_v51 = vsel %vm3836_vm6, %v3829_v1, 920167782  ;;  %v9092_v24 = vshll.u32 %v3809_v62, 8 }
 0x246   : > { %6612 = vcosq.f32 %v3374_v33  ;;  %v3468_v27 = vor.u32 4788187, %v3467_v61  ;;  %v9094_v12 = vsub.s32 %v3758_v3, %v3761_v23  ;;  %vm3835_vm7 = vcmp.lt.s32.totalorder %v9065_v37, 3 }
 0x247   : > { %vm3391_vm10 = vcmp.lt.s32.totalorder %v8255_v14, 0  ;;  %v3464_v47 = vor.u32 %v3463_v59, %v3462_v49  ;;  %vm3834_vm12 = vcmp.lt.s32.totalorder %v9065_v37, 2  ;;  %v3843_v35 = vsel %vm3835_vm7, %v3826_v45, %v3842_v51 }
 0x248   : > { %v3846_v26 = vsel %vm3836_vm6, %v3832_v9, 1326507024  ;;  %v3764_v2 = vsub.s32 0, %v9094_v12  ;;  %v3838_v4 = vsel %vm3836_vm6, %v3826_v45, 2102212464  ;;  %v3844_v3 = vsel %vm3834_vm12, %v3841_v46, %v3843_v35  ;;  %v12632_v9 = vld [vmem:[#allocation47_spill] sm:$0xff] }
 0x249   : > { %v3845_v56 = vsel %vm3833_vm5, %v3823_v20, %v3826_v45  ;;  %vm2972_vm11 = vcmp.eq.s32.totalorder %v9024_v38, 2  ;;  %v3817_v7 = vshrl.u32 %v12545_v31, %v9032_v28  ;;  %v3847_v58 = vsel %vm3835_vm7, %v3829_v1, %v3846_v26 }
 0x24a   : > { %v9116_v62 = vmul.u32.u64.low %v9092_v24, %v3844_v3  ;;  %v9117_v34 = vmul.u32.u64.high %v9092_v24, %v3844_v3, %v9116_v62  ;;  %vm2969_vm13 = vcmp.eq.s32.totalorder %v9024_v38, 0  ;;  %v9125_v61 = vand.u32 3, %v3066_v16 }
 0x24b   : > { %v12628_v43 = vsub.s32 4, %v8835_v41  ;;  %v3469_v1 = vand.u32 2147483647, %v3468_v27  ;;  %v6153_v59 = vmin.u32 %v3764_v2, %v9094_v12  ;;  %v12629_v45 = vand.u32 2147483647, %v8255_v14 }
 0x24c   : > { %v3837_v53 = vsel %vm3833_vm5, %v3817_v7, %v3820_v21  ;;  %v3839_v6 = vsel %vm3835_vm7, %v3823_v20, %v3838_v4  ;;  %v3848_v16 = vsel %vm3834_vm12, %v3845_v56, %v3847_v58  ;;  %6614 = vsinq.f32 %v3374_v33  ;;  %v6611_v27 = vpop.eup %6610 }
 0x24d   : > { %v3373_v28 = vsel %vm3288_vm2, %v12628_v43, %v8835_v41  ;;  %vm9135_vm14 = vcmp.le.f32.partialorder %v12629_v45, 0.7853982  ;;  %v4113_v41 = vand.u32 2139095040, %v12632_v9  ;;  %v3475_v49 = vsub.s32 4, %v8947_v44 }
 0x24e   : > { %v9148_v46 = vmul.u32.u64.low %v9092_v24, %v3848_v16  ;;  %v9149_v51 = vmul.u32.u64.high %v9092_v24, %v3848_v16, %v9148_v46  ;;  %vm2968_vm9 = vcmp.lt.s32.totalorder %v9024_v38, 2  ;;  %v3471_v35 = vcvt.s32.f32 %v3464_v47 }
 0x24f   : > { %v3766_v21 = vclz %v6153_v59  ;;  %v3859_v26 = vadd.s32 1, %v9117_v34  ;;  %v4114_v20 = vshrl.u32 %v4113_v41, 23  ;;  %v9157_v2 = vsel %vm2659_vm8, %v9037_v63, %v9017_v50 }
 0x250   : > { %v2973_v33 = vxor.u32 2147483648, %v9073_v57  ;;  %vm3072_vm15 = vcmp.eq.s32.totalorder %v9125_v61, 0  ;;  %v3840_v4 = vsel %vm3834_vm12, %v3837_v53, %v3839_v6  ;;  %v2970_v3 = vxor.u32 2147483648, %v9078_v36  ;;  %v9167_v58 = vpop.eup %6612 }
 0x251   : > { %vm3071_vm0 = vcmp.lt.s32.totalorder %v9125_v61, 2  ;;  %v3375_v47 = vsel %vm9028_vm3, 0, %v3373_v28  ;;  %v3472_v56 = vmul.f32 %v3471_v35, %v3469_v1  ;;  %v6168_v7 = vadd.s32 4294967169, %v4114_v20 }
 0x252   : > { %v3073_v54 = vxor.u32 2147483648, %v6611_v27  ;;  %v3076_v50 = vxor.u32 2147483648, %v9083_v48  ;;  %v3476_v63 = vsel %vm3391_vm10, %v3475_v49, %v8947_v44  ;;  %vm3858_vm1 = vc.u32 %v9149_v51, %v9116_v62 }
 0x253   : > { %v6154_v37 = vadd.s32 4294967294, %v3766_v21  ;;  %v3856_v43 = vmul.u32 %v9092_v24, %v3840_v4  ;;  %v3860_v5 = vsel %vm3858_vm1, %v3859_v26, %v9117_v34  ;;  %v4120_v28 = vadd.s32 1, %v6168_v7 }
 0x254   : > { %v2974_v1 = vsel %vm2972_vm11, %v2973_v33, %v9078_v36  ;;  %vm3075_vm2 = vcmp.eq.s32.totalorder %v9125_v61, 2  ;;  %v9181_v59 = vand.u32 3, %v3375_v47  ;;  %v4110_v45 = vand.u32 2147483647, %v12632_v9 }
 0x255   : > { %v2971_v44 = vsel %vm2969_vm13, %v9073_v57, %v2970_v3  ;;  %v3473_v53 = vxor.u32 2147483648, %v3472_v56  ;;  %v3861_v6 = vadd.s32 %v3860_v5, %v3856_v43  ;;  %vm4121_vm3 = vcmp.gt.s32.totalorder %v4120_v28, 0 }
 0x256   : > { %v3074_v24 = vsel %vm3072_vm15, %v9083_v48, %v3073_v54  ;;  %v3077_v34 = vsel %vm3075_vm2, %v3076_v50, %v6611_v27  ;;  %v3478_v36 = vsel %vm9135_vm14, 0, %v3476_v63  ;;  %v4122_v16 = vsel %vm4121_vm3, %v4120_v28, 0  ;;  %v6615_v35 = vpop.eup %6614 }
 0x257   : > { %vm6155_vm4 = vcmp.lt.s32.totalorder %v6154_v37, 0  ;;  %v3862_v41 = vadd.s32 536870912, %v3861_v6  ;;  %v4124_v49 = vand.u32 31, %v4122_v16  ;;  %v4216_v46 = vand.u32 2139095040, %v8324_v22 }
 0x258   : > { %v9195_v57 = vsel %vm2968_vm9, %v2971_v44, %v2974_v1  ;;  %vm3381_vm5 = vcmp.eq.s32.totalorder %v9181_v59, 0  ;;  %v3385_v21 = vxor.u32 2147483648, %v9167_v58  ;;  %v4117_v48 = vand.u32 8388607, %v4110_v45 }
 0x259   : > { %vm3384_vm6 = vcmp.eq.s32.totalorder %v9181_v59, 2  ;;  %v3474_v27 = vsel %vm3391_vm10, %v3473_v53, %v3472_v56  ;;  %v9204_v26 = vshrl.u32 %v3862_v41, 30  ;;  %v4125_v20 = vsub.s32 32, %v4124_v49 }
 0x25a   : > { %v9208_v38 = vsel %vm3071_vm0, %v3074_v24, %v3077_v34  ;;  %v9210_v33 = vand.u32 3, %v3478_v36  ;;  %v3754_v4 = vadd.s32 %v8986_v8, %v9007_v13  ;;  %v9215_v3 = vsel %vm6155_vm4, 0, %v6154_v37 }
 0x25b   : > { %v3382_v47 = vxor.u32 2147483648, %v6615_v35  ;;  %v3864_v7 = vshll.u32 %v9204_v26, 30  ;;  %v4128_v56 = vshrl.u32 %v12546_v29, %v4125_v20  ;;  %v4217_v54 = vshrl.u32 %v4216_v46, 23 }
 0x25c   : > { %v3386_v50 = vsel %vm3384_vm6, %v3385_v21, %v6615_v35  ;;  %v3477_v61 = vsel %vm9135_vm14, %v8255_v14, %v3474_v27  ;;  %v4118_v63 = vor.u32 8388608, %v4117_v48  ;;  %v4131_v43 = vshrl.u32 %v12547_v55, %v4125_v20 }
 0x25d   : > { %v3770_v5 = vsub.s32 32, %v9215_v3  ;;  %v4127_v8 = vshll.u32 %v12545_v31, %v4124_v49  ;;  %v4134_v13 = vshrl.u32 %v12548_v18, %v4125_v20  ;;  %v4137_v37 = vshrl.u32 %v12549_v11, %v4125_v20 }
 0x25e   : > { %v3774_v28 = vsub.s32 4294967266, %v9215_v3  ;;  %v9228_v1 = vsub.s32 %v3861_v6, %v3864_v7  ;;  %v4130_v44 = vshll.u32 %v12546_v29, %v4124_v49  ;;  %v4136_v23 = vshll.u32 %v12548_v18, %v4124_v49 }
 0x25f   : > { %v4123_v53 = vshrl.u32 %v4122_v16, 5  ;;  %v4129_v24 = vor.u32 %v4128_v56, %v4127_v8  ;;  %v4133_v34 = vshll.u32 %v12547_v55, %v4124_v49  ;;  %v6172_v36 = vadd.s32 4294967169, %v4217_v54 }
 0x260   : > { %vm3380_vm8 = vcmp.lt.s32.totalorder %v9181_v59, 2  ;;  %vm3700_vm7 = vcmp.lt.s32.totalorder %v12618_v40, 0  ;;  %v4132_v41 = vor.u32 %v4131_v43, %v4130_v44  ;;  %v4138_v46 = vor.u32 %v4137_v37, %v4136_v23 }
 0x261   : > { %v4139_v35 = vshll.u32 %v12549_v11, %v4124_v49  ;;  %v4140_v6 = vshrl.u32 %v12550_v25, %v4125_v20  ;;  %v3383_v21 = vsel %vm3381_vm5, %v9167_v58, %v3382_v47  ;;  %6616 = vcosq.f32 %v3477_v61 }
 0x262   : > { %v3784_v16 = vsub.s32 4, %v9068_v42  ;;  %v4135_v48 = vor.u32 %v4134_v13, %v4133_v34  ;;  %6618 = vsinq.f32 %v3477_v61  ;;  %v3867_v27 = vsub.s32 0, %v9228_v1 }
 0x263   : > { %v4141_v7 = vor.u32 %v4140_v6, %v4139_v35  ;;  %v4158_v56 = vshll.u32 %v4118_v63, 8  ;;  %vm2657_vm10 = vweird.f32 %v8213_v10  ;;  %v3772_v54 = vshrl.u32 %v3754_v4, %v3770_v5 }
 0x264   : > { %v3775_v43 = vadd.s32 127, %v3774_v28  ;;  %vm4142_vm12 = vcmp.lt.s32.totalorder %v4123_v53, 1  ;;  %vm4145_vm11 = vcmp.lt.s32.totalorder %v4123_v53, 4  ;;  %vm2966_vm13 = vweird.f32 %v8243_v32 }
 0x265   : > { %vm3069_vm14 = vweird.f32 %v8246_v39  ;;  %vm4144_vm9 = vcmp.lt.s32.totalorder %v4123_v53, 3  ;;  %v4150_v58 = vsel %vm4142_vm12, %v4129_v24, %v4132_v41  ;;  %v4151_v49 = vsel %vm4145_vm11, %v4138_v46, 920167782 }
 0x266   : > { %v4223_v47 = vadd.s32 1, %v6172_v36  ;;  %v4126_v61 = vshrl.u32 %v12545_v31, %v4125_v20  ;;  %vm4143_vm15 = vcmp.lt.s32.totalorder %v4123_v53, 2  ;;  %v4147_v8 = vsel %vm4145_vm11, %v4135_v48, 2102212464 }
 0x267   : > { %v4152_v63 = vsel %vm4144_vm9, %v4135_v48, %v4151_v49  ;;  %v6157_v4 = vmin.u32 %v3867_v27, %v9228_v1  ;;  %v4154_v13 = vsel %vm4142_vm12, %v4132_v41, %v4135_v48  ;;  %v4155_v37 = vsel %vm4145_vm11, %v4141_v7, 1326507024 }
 0x268   : > { %v4153_v5 = vsel %vm4143_vm15, %v4150_v58, %v4152_v63  ;;  %v3776_v28 = vshll.u32 %v3775_v43, 23  ;;  %v4156_v44 = vsel %vm4144_vm9, %v4138_v46, %v4155_v37  ;;  %v4146_v20 = vsel %vm4142_vm12, %v4126_v61, %v4129_v24 }
 0x269   : > { %v9252_v23 = vmul.u32.u64.low %v4158_v56, %v4153_v5  ;;  %v9253_v34 = vmul.u32.u64.high %v4158_v56, %v4153_v5, %v9252_v23  ;;  %v4148_v36 = vsel %vm4144_vm9, %v4132_v41, %v4147_v8  ;;  %v4157_v35 = vsel %vm4143_vm15, %v4154_v13, %v4156_v44 }
 0x26a   : > { %vm4224_vm0 = vcmp.gt.s32.totalorder %v4223_v47, 0  ;;  %v3387_v6 = vsel %vm3380_vm8, %v3383_v21, %v3386_v50  ;;  %v3771_v48 = vshll.u32 %v9094_v12, %v9215_v3  ;;  %v3785_v46 = vsel %vm3700_vm7, %v3784_v16, %v9068_v42 }
 0x26b   : > { %v4225_v27 = vsel %vm4224_vm0, %v4223_v47, 0  ;;  %v3869_v7 = vclz %v6157_v4  ;;  %v9266_v43 = vmul.u32.u64.low %v4158_v56, %v4157_v35  ;;  %v9267_v58 = vmul.u32.u64.high %v4158_v56, %v4157_v35, %v9266_v43  ;;  %v9269_v41 = vpop.eup %6616 }
 0x26c   : > { %v4227_v24 = vand.u32 31, %v4225_v27  ;;  %v3773_v49 = vor.u32 %v3772_v54, %v3771_v48  ;;  %v4149_v61 = vsel %vm4143_vm15, %v4146_v20, %v4148_v36  ;;  %v4168_v59 = vadd.s32 1, %v9253_v34  ;;  %v9274_v12 = vpop.eup %6618 }
 0x26d   : > { %v4213_v50 = vand.u32 2147483647, %v8324_v22  ;;  %v9279_v42 = vsel %vm2657_vm10, nan, %v9157_v2  ;;  %vm3378_vm1 = vweird.f32 %v8252_v19  ;;  %v3777_v3 = vor.u32 4788187, %v3776_v28 }
 0x26e   : > { %v9282_v21 = vsub.s32 32, %v4227_v24  ;;  %v9287_v53 = vsel %vm2966_vm13, nan, %v9195_v57  ;;  %v9292_v16 = vsel %vm3069_vm14, nan, %v9208_v38  ;;  %v9294_v54 = vsel %vm3378_vm1, nan, %v3387_v6 }
 0x26f   : > { %v12633_v10 = vand.u32 2147483647, %v12618_v40  ;;  %v6158_v47 = vadd.s32 4294967294, %v3869_v7  ;;  %v4165_v32 = vmul.u32 %v4158_v56, %v4149_v61  ;;  %vm4167_vm3 = vc.u32 %v9267_v58, %v9252_v23 }
 0x270   : > { %vm3487_vm4 = vcmp.eq.s32.totalorder %v9210_v33, 2  ;;  %v3780_v39 = vcvt.s32.f32 %v3773_v49  ;;  %v4169_v57 = vsel %vm4167_vm3, %v4168_v59, %v9253_v34  ;;  %v4220_v38 = vand.u32 8388607, %v4213_v50 }
 0x271   : > { %vm9298_vm2 = vcmp.le.f32.partialorder %v12633_v10, 0.7853982  ;;  %v4231_v8 = vshrl.u32 %v12546_v29, %v9282_v21  ;;  %v3778_v63 = vand.u32 2147483647, %v3777_v3  ;;  %v4170_v4 = vadd.s32 %v4169_v57, %v4165_v32 }
 0x272   : > { %v3787_v19 = vsel %vm9298_vm2, 0, %v3785_v46  ;;  %v4230_v5 = vshll.u32 %v12545_v31, %v4227_v24  ;;  %v4234_v56 = vshrl.u32 %v12547_v55, %v9282_v21  ;;  %vm3484_vm5 = vcmp.eq.s32.totalorder %v9210_v33, 0 }
 0x273   : > { %v4233_v13 = vshll.u32 %v12546_v29, %v4227_v24  ;;  %v4237_v37 = vshrl.u32 %v12548_v18, %v9282_v21  ;;  %v4239_v28 = vshll.u32 %v12548_v18, %v4227_v24  ;;  %v4240_v44 = vshrl.u32 %v12549_v11, %v9282_v21 }
 0x274   : > { %vm6159_vm6 = vcmp.lt.s32.totalorder %v6158_v47, 0  ;;  %v4171_v34 = vadd.s32 536870912, %v4170_v4  ;;  %v9322_v20 = vshrl.u32 %v4225_v27, 5  ;;  %v4236_v36 = vshll.u32 %v12547_v55, %v4227_v24 }
 0x275   : > { %v4232_v35 = vor.u32 %v4231_v8, %v4230_v5  ;;  %v4235_v6 = vor.u32 %v4234_v56, %v4233_v13  ;;  %v4241_v48 = vor.u32 %v4240_v44, %v4239_v28  ;;  %v4243_v46 = vshrl.u32 %v12550_v25, %v9282_v21 }
 0x276   : > { %v3488_v7 = vxor.u32 2147483648, %v9269_v41  ;;  %v3781_v43 = vmul.f32 %v3780_v39, %v3778_v63  ;;  %v9328_v49 = vand.u32 3, %v3787_v19  ;;  %v4172_v61 = vshrl.u32 %v4171_v34, 30 }
 0x277   : > { %v3485_v59 = vxor.u32 2147483648, %v9274_v12  ;;  %v4221_v3 = vor.u32 8388608, %v4220_v38  ;;  %v4238_v10 = vor.u32 %v4237_v37, %v4236_v36  ;;  %v4242_v27 = vshll.u32 %v12549_v11, %v4227_v24 }
 0x278   : > { %v9333_v32 = vsel %vm6159_vm6, 0, %v6158_v47  ;;  %v4173_v57 = vshll.u32 %v4172_v61, 30  ;;  %vm4245_vm8 = vcmp.lt.s32.totalorder %v9322_v20, 1  ;;  %vm4248_vm10 = vcmp.lt.s32.totalorder %v9322_v20, 4 }
 0x279   : > { %vm3483_vm12 = vcmp.lt.s32.totalorder %v9210_v33, 2  ;;  %v3857_v19 = vadd.s32 %v9116_v62, %v9149_v51  ;;  %v4244_v39 = vor.u32 %v4243_v46, %v4242_v27  ;;  %v4253_v38 = vsel %vm4245_vm8, %v4232_v35, %v4235_v6  ;;  %v12636_v27 = vld [vmem:[#allocation86_spill] sm:$0xff] }
 0x27a   : > { %v4254_v24 = vsel %vm4248_vm10, %v4241_v48, 920167782  ;;  %v3489_v47 = vsel %vm3487_vm4, %v3488_v7, %v9274_v12  ;;  %v3782_v8 = vxor.u32 2147483648, %v3781_v43  ;;  %v9347_v63 = vsub.s32 %v4170_v4, %v4173_v57 }
 0x27b   : > { %vm4247_vm11 = vcmp.lt.s32.totalorder %v9322_v20, 3  ;;  %v3877_v5 = vsub.s32 4294967266, %v9333_v32  ;;  %vm4112_vm13 = vcmp.lt.s32.totalorder %v12632_v9, 0  ;;  %vm4246_vm14 = vcmp.lt.s32.totalorder %v9322_v20, 2  ;;  %v12639_v20 = vld [vmem:[#allocation88_spill] sm:$0xff] }
 0x27c   : > { %v4255_v62 = vsel %vm4247_vm11, %v4238_v10, %v4254_v24  ;;  %v4261_v51 = vshll.u32 %v4221_v3, 8  ;;  %v3486_v56 = vsel %vm3484_vm5, %v9269_v41, %v3485_v59  ;;  %v4176_v12 = vsub.s32 0, %v9347_v63 }
 0x27d   : > { %v4250_v4 = vsel %vm4248_vm10, %v4238_v10, 2102212464  ;;  %v4256_v13 = vsel %vm4246_vm14, %v4253_v38, %v4255_v62  ;;  %v4257_v37 = vsel %vm4245_vm8, %v4235_v6, %v4238_v10  ;;  %v4258_v28 = vsel %vm4248_vm10, %v4244_v39, 1326507024 }
 0x27e   : > { %v9367_v44 = vmul.u32.u64.low %v4261_v51, %v4256_v13  ;;  %v9368_v34 = vmul.u32.u64.high %v4261_v51, %v4256_v13, %v9367_v44  ;;  %v3783_v41 = vsel %vm3700_vm7, %v3782_v8, %v3781_v43  ;;  %v3873_v36 = vsub.s32 32, %v9333_v32 }
 0x27f   : > { %v6169_v46 = vmin.u32 %v4176_v12, %v9347_v63  ;;  %v4229_v7 = vshrl.u32 %v12545_v31, %v9282_v21  ;;  %v3878_v59 = vadd.s32 127, %v3877_v5  ;;  %v4196_v3 = vsub.s32 4, %v4172_v61 }
 0x280   : > { %v4259_v10 = vsel %vm4247_vm11, %v4241_v48, %v4258_v28  ;;  %v4525_v57 = vand.u32 2139095040, %v12636_v27  ;;  %vm9382_vm9 = vcmp.le.f32.partialorder %v4110_v45, 0.7853982  ;;  %v4251_v21 = vsel %vm4247_vm11, %v4235_v6, %v4250_v4 }
 0x281   : > { %v4178_v43 = vclz %v6169_v46  ;;  %v4249_v38 = vsel %vm4245_vm8, %v4229_v7, %v4232_v35  ;;  %v4260_v24 = vsel %vm4246_vm14, %v4257_v37, %v4259_v10  ;;  %v12365_v5 = vand.u32 2147483647, %v12636_v27 }
 0x282   : > { %v9392_v8 = vmul.u32.u64.low %v4261_v51, %v4260_v24  ;;  %v9393_v48 = vmul.u32.u64.high %v4261_v51, %v4260_v24, %v9392_v8  ;;  %v4526_v62 = vshrl.u32 %v4525_v57, 23  ;;  %vm3481_vm7 = vweird.f32 %v8255_v14 }
 0x283   : > { %v3490_v45 = vsel %vm3483_vm12, %v3486_v56, %v3489_v47  ;;  %v9402_v35 = vsel %vm9298_vm2, %v12618_v40, %v3783_v41  ;;  %v3875_v6 = vshrl.u32 %v3857_v19, %v3873_v36  ;;  %v6170_v12 = vadd.s32 4294967294, %v4178_v43 }
 0x284   : > { %v3879_v4 = vshll.u32 %v3878_v59, 23  ;;  %v4252_v13 = vsel %vm4246_vm14, %v4249_v38, %v4251_v21  ;;  %v4271_v37 = vadd.s32 1, %v9368_v34  ;;  %v6184_v28 = vadd.s32 4294967169, %v4526_v62 }
 0x285   : > { %v3874_v46 = vshll.u32 %v9228_v1, %v9333_v32  ;;  %v4166_v33 = vadd.s32 %v9252_v23, %v9267_v58  ;;  %vm6171_vm15 = vcmp.lt.s32.totalorder %v6170_v12, 0  ;;  %v4197_v2 = vsel %vm4112_vm13, %v4196_v3, %v4172_v61 }
 0x286   : > { %v4181_v47 = vsel %vm6171_vm15, 0, %v6170_v12  ;;  %vm4270_vm0 = vc.u32 %v9393_v48, %v9367_v44  ;;  %v4532_v19 = vadd.s32 1, %v6184_v28  ;;  %v4628_v56 = vand.u32 2139095040, %v12639_v20 }
 0x287   : > { %v4182_v41 = vsub.s32 32, %v4181_v47  ;;  %v4186_v36 = vsub.s32 4294967266, %v4181_v47  ;;  %v4268_v7 = vmul.u32 %v4261_v51, %v4252_v13  ;;  %v4529_v1 = vand.u32 8388607, %v12365_v5 }
 0x288   : > { %v9418_v32 = vor.u32 %v3875_v6, %v3874_v46  ;;  %v9420_v23 = vor.u32 4788187, %v3879_v4  ;;  %v4272_v58 = vsel %vm4270_vm0, %v4271_v37, %v9368_v34  ;;  %vm4533_vm1 = vcmp.gt.s32.totalorder %v4532_v19, 0 }
 0x289   : > { %v4183_v61 = vshll.u32 %v9347_v63, %v4181_v47  ;;  %v4184_v59 = vshrl.u32 %v4166_v33, %v4182_v41  ;;  %v4187_v3 = vadd.s32 127, %v4186_v36  ;;  %v4273_v10 = vadd.s32 %v4272_v58, %v4268_v7 }
 0x28a   : > { %v4199_v57 = vsel %vm9382_vm9, 0, %v4197_v2  ;;  %v4534_v43 = vsel %vm4533_vm1, %v4532_v19, 0  ;;  %v12364_v51 = vand.u32 2147483647, %v12639_v20  ;;  %v4629_v38 = vshrl.u32 %v4628_v56, 23 }
 0x28b   : > { %v4185_v21 = vor.u32 %v4184_v59, %v4183_v61  ;;  %v4188_v24 = vshll.u32 %v4187_v3, 23  ;;  %v4274_v8 = vadd.s32 536870912, %v4273_v10  ;;  %v4530_v62 = vor.u32 8388608, %v4529_v1 }
 0x28c   : > { %v9429_v34 = vsel %vm3481_vm7, nan, %v3490_v45  ;;  %6620 = vcosq.f32 %v9402_v35  ;;  %v4536_v6 = vand.u32 31, %v4534_v43  ;;  %v3881_v12 = vand.u32 2147483647, %v9420_v23 }
 0x28d   : > { %v3883_v4 = vcvt.s32.f32 %v9418_v32  ;;  %v4189_v13 = vor.u32 4788187, %v4188_v24  ;;  %v9435_v37 = vshrl.u32 %v4274_v8, 30  ;;  %v9437_v28 = vand.u32 3, %v4199_v57 }
 0x28e   : > { %v4537_v46 = vsub.s32 32, %v4536_v6  ;;  %v6188_v33 = vadd.s32 4294967169, %v4629_v38  ;;  %v9441_v14 = vand.u32 8388607, %v12364_v51  ;;  %v4192_v2 = vcvt.s32.f32 %v4185_v21 }
 0x28f   : > { %v4190_v45 = vand.u32 2147483647, %v4189_v13  ;;  %v4276_v47 = vshll.u32 %v9435_v37, 30  ;;  %v9444_v19 = vshll.u32 %v4530_v62, 8  ;;  %v4539_v56 = vshll.u32 %v12545_v31, %v4536_v6 }
 0x290   : > { %v4540_v41 = vshrl.u32 %v12546_v29, %v4537_v46  ;;  %v4543_v36 = vshrl.u32 %v12547_v55, %v4537_v46  ;;  %v4546_v7 = vshrl.u32 %v12548_v18, %v4537_v46  ;;  %v4542_v61 = vshll.u32 %v12546_v29, %v4536_v6 }
 0x291   : > { %v4193_v1 = vmul.f32 %v4192_v2, %v4190_v45  ;;  %v9450_v58 = vsub.s32 %v4273_v10, %v4276_v47  ;;  %v4549_v59 = vshrl.u32 %v12549_v11, %v4537_v46  ;;  %v4535_v3 = vshrl.u32 %v4534_v43, 5 }
 0x292   : > { %v4545_v57 = vshll.u32 %v12547_v55, %v4536_v6  ;;  %v4548_v38 = vshll.u32 %v12548_v18, %v4536_v6  ;;  %v4635_v21 = vadd.s32 1, %v6188_v33  ;;  %v4541_v62 = vor.u32 %v4540_v41, %v4539_v56 }
 0x293   : > { %v4194_v24 = vxor.u32 2147483648, %v4193_v1  ;;  %v4279_v8 = vsub.s32 0, %v9450_v58  ;;  %v4544_v13 = vor.u32 %v4543_v36, %v4542_v61  ;;  %vm4215_vm2 = vcmp.lt.s32.totalorder %v8324_v22, 0 }
 0x294   : > { %v4547_v45 = vor.u32 %v4546_v7, %v4545_v57  ;;  %v4550_v10 = vor.u32 %v4549_v59, %v4548_v38  ;;  %v4551_v2 = vshll.u32 %v12549_v11, %v4536_v6  ;;  %v4552_v47 = vshrl.u32 %v12550_v25, %v4537_v46 }
 0x295   : > { %v4195_v43 = vsel %vm4112_vm13, %v4194_v24, %v4193_v1  ;;  %v6173_v51 = vmin.u32 %v4279_v8, %v9450_v58  ;;  %v4299_v33 = vsub.s32 4, %v9435_v37  ;;  %v4538_v63 = vshrl.u32 %v12545_v31, %v4537_v46 }
 0x296   : > { %v9465_v5 = vpop.eup %6620  ;;  %v4198_v56 = vsel %vm9382_vm9, %v12632_v9, %v4195_v43  ;;  %v4553_v41 = vor.u32 %v4552_v47, %v4551_v2  ;;  %vm4554_vm3 = vcmp.lt.s32.totalorder %v4535_v3, 1  ;;  %vm4555_vm4 = vcmp.lt.s32.totalorder %v4535_v3, 2 }
 0x297   : > { %6622 = vcosq.f32 %v4198_v56  ;;  %v4281_v6 = vclz %v6173_v51  ;;  %vm4556_vm5 = vcmp.lt.s32.totalorder %v4535_v3, 3  ;;  %vm4557_vm6 = vcmp.lt.s32.totalorder %v4535_v3, 4 }
 0x298   : > { %vm9472_vm8 = vcmp.le.f32.partialorder %v4213_v50, 0.7853982  ;;  %v4558_v46 = vsel %vm4554_vm3, %v4538_v63, %v4541_v62  ;;  %v4559_v7 = vsel %vm4557_vm6, %v4547_v45, 2102212464  ;;  %v4562_v1 = vsel %vm4554_vm3, %v4541_v62, %v4544_v13 }
 0x299   : > { %v4563_v61 = vsel %vm4557_vm6, %v4550_v10, 920167782  ;;  %6624 = vsinq.f32 %v4198_v56  ;;  %v6174_v39 = vadd.s32 4294967294, %v4281_v6  ;;  %v4566_v57 = vsel %vm4554_vm3, %v4544_v13, %v4547_v45 }
 0x29a   : > { %v4564_v59 = vsel %vm4556_vm5, %v4547_v45, %v4563_v61  ;;  %v4560_v38 = vsel %vm4556_vm5, %v4544_v13, %v4559_v7  ;;  %v4567_v24 = vsel %vm4557_vm6, %v4553_v41, 1326507024  ;;  %vm4636_vm10 = vcmp.gt.s32.totalorder %v4635_v21, 0 }
 0x29b   : > { %v4565_v51 = vsel %vm4555_vm4, %v4562_v1, %v4564_v59  ;;  %vm6175_vm12 = vcmp.lt.s32.totalorder %v6174_v39, 0  ;;  %v4568_v50 = vsel %vm4556_vm5, %v4550_v10, %v4567_v24  ;;  %v4633_v47 = vor.u32 8388608, %v9441_v14 }
 0x29c   : > { %v9481_v8 = vmul.u32.u64.low %v9444_v19, %v4565_v51  ;;  %v9482_v63 = vmul.u32.u64.high %v9444_v19, %v4565_v51, %v9481_v8  ;;  %v4284_v62 = vsel %vm6175_vm12, 0, %v6174_v39  ;;  %v4569_v2 = vsel %vm4555_vm4, %v4566_v57, %v4568_v50 }
 0x29d   : > { %v4637_v45 = vsel %vm4636_vm10, %v4635_v21, 0  ;;  %v4269_v13 = vadd.s32 %v9367_v44, %v9393_v48  ;;  %v4285_v43 = vsub.s32 32, %v4284_v62  ;;  %v4289_v56 = vsub.s32 4294967266, %v4284_v62 }
 0x29e   : > { %v4300_v10 = vsel %vm4215_vm2, %v4299_v33, %v9435_v37  ;;  %v4561_v41 = vsel %vm4555_vm4, %v4558_v46, %v4560_v38  ;;  %v9494_v6 = vmul.u32.u64.low %v9444_v19, %v4569_v2  ;;  %v9495_v7 = vmul.u32.u64.high %v9444_v19, %v4569_v2, %v9494_v6 }
 0x29f   : > { %v4639_v1 = vand.u32 31, %v4637_v45  ;;  %v4286_v61 = vshll.u32 %v9450_v58, %v4284_v62  ;;  %v4287_v14 = vshrl.u32 %v4269_v13, %v4285_v43  ;;  %v4290_v21 = vadd.s32 127, %v4289_v56 }
 0x2a0   : > { %v4580_v39 = vadd.s32 1, %v9482_v63  ;;  %v9503_v44 = vmul.f32 %v3883_v4, %v3881_v12  ;;  %vm4208_vm11 = vcmp.eq.s32.totalorder %v9437_v28, 2  ;;  %v9506_v37 = vshll.u32 %v4633_v47, 8 }
 0x2a1   : > { %v4640_v48 = vsub.s32 32, %v4639_v1  ;;  %v6623_v3 = vpop.eup %6622  ;;  %vm4205_vm13 = vcmp.eq.s32.totalorder %v9437_v28, 0  ;;  %v4288_v33 = vor.u32 %v4287_v14, %v4286_v61  ;;  %v4291_v58 = vshll.u32 %v4290_v21, 23 }
 0x2a2   : > { %v4302_v46 = vsel %vm9472_vm8, 0, %v4300_v10  ;;  %v4577_v59 = vmul.u32 %v9444_v19, %v4561_v41  ;;  %vm4579_vm14 = vc.u32 %v9495_v7, %v9481_v8  ;;  %v9514_v32 = vshrl.u32 %v4637_v45, 5 }
 0x2a3   : > { %v4642_v23 = vshll.u32 %v12545_v31, %v4639_v1  ;;  %v4645_v12 = vshll.u32 %v12546_v29, %v4639_v1  ;;  %v6625_v4 = vpop.eup %6624  ;;  %v4292_v57 = vor.u32 4788187, %v4291_v58  ;;  %v4581_v38 = vsel %vm4579_vm14, %v4580_v39, %v9482_v63 }
 0x2a4   : > { %v4648_v51 = vshll.u32 %v12547_v55, %v4639_v1  ;;  %v4651_v24 = vshll.u32 %v12548_v18, %v4639_v1  ;;  %v4209_v50 = vxor.u32 2147483648, %v6623_v3  ;;  %v4582_v62 = vadd.s32 %v4581_v38, %v4577_v59 }
 0x2a5   : > { %v4643_v19 = vshrl.u32 %v12546_v29, %v4640_v48  ;;  %v4646_v2 = vshrl.u32 %v12547_v55, %v4640_v48  ;;  %v4293_v47 = vand.u32 2147483647, %v4292_v57  ;;  %v4295_v45 = vcvt.s32.f32 %v4288_v33 }
 0x2a6   : > { %v4649_v13 = vshrl.u32 %v12548_v18, %v4640_v48  ;;  %v4652_v43 = vshrl.u32 %v12549_v11, %v4640_v48  ;;  %v4206_v56 = vxor.u32 2147483648, %v6625_v4  ;;  %v9525_v10 = vand.u32 3, %v4302_v46 }
 0x2a7   : > { %v4583_v63 = vadd.s32 536870912, %v4582_v62  ;;  %v4644_v41 = vor.u32 %v4643_v19, %v4642_v23  ;;  %v4296_v6 = vmul.f32 %v4295_v45, %v4293_v47  ;;  %v4647_v61 = vor.u32 %v4646_v2, %v4645_v12 }
 0x2a8   : > { %v4650_v14 = vor.u32 %v4649_v13, %v4648_v51  ;;  %v4653_v21 = vor.u32 %v4652_v43, %v4651_v24  ;;  %v4654_v58 = vshll.u32 %v12549_v11, %v4639_v1  ;;  %v4655_v59 = vshrl.u32 %v12550_v25, %v4640_v48 }
 0x2a9   : > { %v9527_v39 = vshrl.u32 %v4583_v63, 30  ;;  %vm4657_vm9 = vcmp.lt.s32.totalorder %v9514_v32, 1  ;;  %v4210_v33 = vsel %vm4208_vm11, %v4209_v50, %v6625_v4  ;;  %v4297_v57 = vxor.u32 2147483648, %v4296_v6 }
 0x2aa   : > { %v4641_v46 = vshrl.u32 %v12545_v31, %v4640_v48  ;;  %vm4660_vm7 = vcmp.lt.s32.totalorder %v9514_v32, 4  ;;  %v4207_v23 = vsel %vm4205_vm13, %v6623_v3, %v4206_v56  ;;  %v4656_v38 = vor.u32 %v4655_v59, %v4654_v58 }
 0x2ab   : > { %v4585_v12 = vshll.u32 %v9527_v39, 30  ;;  %v4662_v1 = vsel %vm4660_vm7, %v4650_v14, 2102212464  ;;  %vm4202_vm15 = vweird.f32 %v12632_v9  ;;  %v4298_v51 = vsel %vm4215_vm2, %v4297_v57, %v4296_v6  ;;  %v12642_v6 = vld [vmem:[#allocation83_spill] sm:$0xff]  ;;  %v12649_v9 = vld [vmem:[#allocation48_spill] sm:$0xff] }
 0x2ac   : > { %vm4658_vm0 = vcmp.lt.s32.totalorder %v9514_v32, 2  ;;  %v4665_v48 = vsel %vm4657_vm9, %v4644_v41, %v4647_v61  ;;  %v4666_v4 = vsel %vm4660_vm7, %v4653_v21, 920167782  ;;  %v4301_v3 = vsel %vm9472_vm8, %v8324_v22, %v4298_v51 }
 0x2ad   : > { %v9552_v24 = vsub.s32 %v4582_v62, %v4585_v12  ;;  %vm4659_vm1 = vcmp.lt.s32.totalorder %v9514_v32, 3  ;;  %v4661_v50 = vsel %vm4657_vm9, %v4641_v46, %v4644_v41  ;;  %6626 = vcosq.f32 %v4301_v3 }
 0x2ae   : > { %v4663_v19 = vsel %vm4659_vm1, %v4647_v61, %v4662_v1  ;;  %v4667_v2 = vsel %vm4659_vm1, %v4650_v14, %v4666_v4  ;;  %v4670_v47 = vsel %vm4660_vm7, %v4656_v38, 1326507024  ;;  %6628 = vsinq.f32 %v4301_v3  ;;  %v12645_v1 = vld [vmem:[#allocation41_spill] sm:$0xff]  ;;  %v12648_v3 = vld [vmem:[#allocation44_spill] sm:$0xff] }
 0x2af   : > { %v4588_v45 = vsub.s32 0, %v9552_v24  ;;  %v4668_v36 = vsel %vm4658_vm0, %v4665_v48, %v4667_v2  ;;  %v4669_v62 = vsel %vm4657_vm9, %v4647_v61, %v4650_v14  ;;  %6630 = vsinq.f32 %v9402_v35  ;;  %v12643_v14 = vld [vmem:[#allocation84_spill] sm:$0xff]  ;;  %v12646_v48 = vld [vmem:[#allocation42_spill] sm:$0xff] }
 0x2b0   : > { %v4671_v13 = vsel %vm4659_vm1, %v4653_v21, %v4670_v47  ;;  %v9566_v43 = vmul.u32.u64.low %v9506_v37, %v4668_v36  ;;  %v9567_v56 = vmul.u32.u64.high %v9506_v37, %v4668_v36, %v9566_v43  ;;  %v3885_v63 = vxor.u32 2147483648, %v9503_v44 }
 0x2b1   : > { %vm4204_vm2 = vcmp.lt.s32.totalorder %v9437_v28, 2  ;;  %v6185_v41 = vmin.u32 %v4588_v45, %v9552_v24  ;;  %v4934_v58 = vmul.f32 %v12642_v6, %v8646_v52  ;;  %v4664_v61 = vsel %vm4658_vm0, %v4661_v50, %v4663_v19  ;;  %v12652_v45 = vld [vmem:[#allocation55_spill] sm:$0xff] }
 0x2b2   : > { %v4211_v59 = vsel %vm4204_vm2, %v4207_v23, %v4210_v33  ;;  %v4672_v35 = vsel %vm4658_vm0, %v4669_v62, %v4671_v13  ;;  %v4935_v21 = vmul.f32 %v12643_v14, %v8709_v17  ;;  %vm4308_vm3 = vcmp.eq.s32.totalorder %v9525_v10, 0  ;;  %v12644_v33 = vld [vmem:[#allocation85_spill] sm:$0xff]  ;;  %v12654_v62 = vld [vmem:[#allocation56_spill] sm:$0xff] }
 0x2b3   : > { %v4590_v57 = vclz %v6185_v41  ;;  %v9583_v28 = vmul.u32.u64.low %v9506_v37, %v4672_v35  ;;  %v9584_v46 = vmul.u32.u64.high %v9506_v37, %v4672_v35, %v9583_v28  ;;  %vm4307_vm4 = vcmp.lt.s32.totalorder %v9525_v10, 2 }
 0x2b4   : > { %vm4311_vm5 = vcmp.eq.s32.totalorder %v9525_v10, 2  ;;  %v4578_v52 = vadd.s32 %v9481_v8, %v9495_v7  ;;  %v4683_v32 = vadd.s32 1, %v9567_v56  ;;  %v4938_v23 = vmul.f32 %v12644_v33, %v8717_v0  ;;  %v12647_v8 = vld [vmem:[#allocation43_spill] sm:$0xff] }
 0x2b5   : > { %v4212_v17 = vsel %vm4202_vm15, nan, %v4211_v59  ;;  %vm4305_vm6 = vweird.f32 %v8324_v22  ;;  %v6186_v12 = vadd.s32 4294967294, %v4590_v57  ;;  %v4680_v38 = vmul.u32 %v9506_v37, %v4664_v61  ;;  %v12650_v37 = vld [vmem:[#allocation49_spill] sm:$0xff]  ;;  %v12656_v61 = vld [vmem:[#allocation58_spill] sm:$0xff] }
 0x2b6   : > { %v4939_v51 = vmul.f32 %v12645_v1, %v8922_v60  ;;  %v4942_v4 = vmul.f32 %v12646_v48, %v8933_v15  ;;  %v4943_v7 = vmul.f32 %v12647_v8, %v9279_v42  ;;  %v4946_v0 = vmul.f32 %v12648_v3, %v9287_v53  ;;  %v12651_v60 = vld [vmem:[#allocation50_spill] sm:$0xff]  ;;  %v12662_v8 = vld [vmem:[#allocation57_spill] sm:$0xff] }
 0x2b7   : > { %v4947_v50 = vmul.f32 %v12649_v9, %v9292_v16  ;;  %vm6187_vm8 = vcmp.lt.s32.totalorder %v6186_v12, 0  ;;  %vm4682_vm10 = vc.u32 %v9584_v46, %v9566_v43  ;;  %v4950_v19 = vmul.f32 %v12650_v37, %v9294_v54  ;;  %v6627_v15 = vpop.eup %6626  ;;  %v12653_v53 = vld [vmem:[#allocation22_spill] sm:$0xff] }
 0x2b8   : > { %v4951_v2 = vmul.f32 %v12651_v60, %v9429_v34  ;;  %v4593_v47 = vsel %vm6187_vm8, 0, %v6186_v12  ;;  %v4684_v42 = vsel %vm4682_vm10, %v4683_v32, %v9567_v56  ;;  %v4958_v36 = vmul.f32 %v12652_v45, %v4212_v17  ;;  %v6629_v16 = vpop.eup %6628 }
 0x2b9   : > { %v9617_v13 = vrot.slane %v12654_v62, %v12653_v53  ;;  %v4312_v41 = vxor.u32 2147483648, %v6627_v15  ;;  %v4594_v6 = vsub.s32 32, %v4593_v47  ;;  %v4598_v59 = vsub.s32 4294967266, %v4593_v47  ;;  %v9623_v35 = vpop.eup %6630 }
 0x2ba   : > { %v9621_v54 = vrot.slane %v12656_v61, %v12653_v53  ;;  %v4309_v34 = vxor.u32 2147483648, %v6629_v16  ;;  %v4685_v14 = vadd.s32 %v4684_v42, %v4680_v38  ;;  %v12658_v56 = vcombine.high %v12654_v62, %v12654_v62 }
 0x2bb   : > { %12655 = vst [vmem:[#allocation59_spill] sm:$0xff] %v9617_v13  ;;  %v12660_v28 = vcombine.high %v12656_v61, %v12656_v61  ;;  %vm3803_vm12 = vcmp.lt.s32.totalorder %v12622_v30, 0  ;;  %v4313_v33 = vsel %vm4311_vm5, %v4312_v41, %v6629_v16  ;;  %v4595_v17 = vshll.u32 %v9552_v24, %v4593_v47 }
 0x2bc   : > { %12657 = vst [vmem:[#allocation60_spill] sm:$0xff] %v9621_v54  ;;  %v9629_v57 = vrot.slane %v12658_v56, %v12653_v53  ;;  %v4596_v12 = vshrl.u32 %v4578_v52, %v4594_v6  ;;  %v4599_v38 = vadd.s32 127, %v4598_v59  ;;  %v4310_v1 = vsel %vm4308_vm3, %v6627_v15, %v4309_v34  ;;  %v12672_v59 = vld [vmem:[#allocation87_spill] sm:$0xff] }
 0x2bd   : > { %v9635_v32 = vrot.slane %v12660_v28, %v12653_v53  ;;  %v4686_v48 = vadd.s32 536870912, %v4685_v14  ;;  %v9645_v3 = vrot.slane %v12662_v8, %v12653_v53  ;;  %v12664_v9 = vcombine.high %v12662_v8, %v12662_v8 }
 0x2be   : > { %12659 = vst [vmem:[#allocation45_spill] sm:$0xff] %v9629_v57  ;;  %vm3796_vm11 = vcmp.eq.s32.totalorder %v9328_v49, 2  ;;  %v4314_v24 = vsel %vm4307_vm4, %v4310_v1, %v4313_v33  ;;  %v4597_v52 = vor.u32 %v4596_v12, %v4595_v17  ;;  %v4600_v60 = vshll.u32 %v4599_v38, 23 }
 0x2bf   : > { %12661 = vst [vmem:[#allocation46_spill] sm:$0xff] %v9635_v32  ;;  %12663 = vst [vmem:[#allocation47_spill] sm:$0xff] %v9645_v3  ;;  %v9651_v37 = vrot.slane %v12664_v9, %v12653_v53  ;;  %v9657_v15 = vmul.f32 %v9617_v13, %v4934_v58  ;;  %v12666_v47 = vand.u32 2147483647, %v12622_v30  ;;  %v4315_v45 = vsel %vm4305_vm6, nan, %v4314_v24 }
 0x2c0   : > { %v9667_v62 = vshrl.u32 %v4686_v48, 30  ;;  %v9670_v16 = vmul.f32 %v9617_v13, %v4935_v21  ;;  %v9673_v10 = vmul.f32 %v9629_v57, %v4942_v4  ;;  %v12669_v58 = vand.u32 2147483647, %v12636_v27 }
 0x2c1   : > { %12665 = vst [vmem:[#allocation86_spill] sm:$0xff] %v9651_v37  ;;  %vm9661_vm13 = vcmp.le.f32.partialorder %v12666_v47, 0.7853982  ;;  %v4601_v6 = vor.u32 4788187, %v4600_v60  ;;  %v4959_v61 = vmul.f32 %v12672_v59, %v4315_v45  ;;  %v9683_v22 = vmul.f32 %v9621_v54, %v4938_v23 }
 0x2c2   : > { %vm9677_vm14 = vcmp.le.f32.partialorder %v12669_v58, 0.7853982  ;;  %v9686_v34 = vmul.f32 %v9635_v32, %v4946_v0  ;;  %v4688_v21 = vshll.u32 %v9667_v62, 30  ;;  %v9690_v4 = vmul.f32 %v9621_v54, %v4939_v51 }
 0x2c3   : > { %v9693_v56 = vmul.f32 %v9629_v57, %v4943_v7  ;;  %v9696_v28 = vmul.f32 %v9645_v3, %v4950_v19  ;;  %v4602_v33 = vand.u32 2147483647, %v4601_v6  ;;  %v4604_v17 = vcvt.s32.f32 %v4597_v52 }
 0x2c4   : > { %v9699_v12 = vmul.f32 %v9635_v32, %v4947_v50  ;;  %v9702_v23 = vmul.f32 %v9651_v37, %v4958_v36  ;;  %vm3793_vm9 = vcmp.eq.s32.totalorder %v9328_v49, 0  ;;  %v3797_v0 = vxor.u32 2147483648, %v9465_v5 }
 0x2c5   : > { %v9706_v51 = vsub.s32 %v4685_v14, %v4688_v21  ;;  %v9709_v7 = vmul.f32 %v9645_v3, %v4951_v2  ;;  %v5038_v19 = vcombine.low %v9657_v15, %v9673_v10  ;;  %v4605_v38 = vmul.f32 %v4604_v17, %v4602_v33 }
 0x2c6   : > { %v9714_v1 = vmul.f32 %v9651_v37, %v4959_v61  ;;  %v5054_v50 = vcombine.low %v9683_v22, %v9686_v34  ;;  %v3886_v36 = vsel %vm3803_vm12, %v3885_v63, %v9503_v44  ;;  %v6971_v2 = vmov 1983009808  }
 0x2c7   : > { %v4691_v14 = vsub.s32 0, %v9706_v51  ;;  %v5041_v48 = vunpack.c.l.s4 %v6971_v2  ;;  %v4606_v9 = vxor.u32 2147483648, %v4605_v38  ;;  %v4608_v24 = vsub.s32 4, %v9527_v39 }
 0x2c8   : > { %v5174_v52 = vcombine.low %v9670_v16, %v9693_v56  ;;  %v5190_v60 = vcombine.low %v9690_v4, %v9699_v12  ;;  %vm3792_vm7 = vcmp.lt.s32.totalorder %v9328_v49, 2  ;;  %v3794_v44 = vxor.u32 2147483648, %v9623_v35 }
 0x2c9   : > { %v3798_v63 = vsel %vm3796_vm11, %v3797_v0, %v9623_v35  ;;  %vm4524_vm15 = vcmp.lt.s32.totalorder %v12636_v27, 0  ;;  %v6189_v47 = vmin.u32 %v4691_v14, %v9706_v51  ;;  %v3889_v45 = vsel %vm9661_vm13, %v12622_v30, %v3886_v36  ;;  %v12673_v0 = vld [vmem:[#allocation20_spill] sm:$0xff]  ;;  %v12675_v36 = vld [vmem:[#allocation82_spill] sm:$0xff] }
 0x2ca   : > { %v4607_v58 = vsel %vm4524_vm15, %v4606_v9, %v4605_v38  ;;  %v5042_v6 = vunpack.c.0.s8 %v5041_v48  ;;  %v4609_v17 = vsel %vm4524_vm15, %v4608_v24, %v9527_v39  ;;  %v3795_v9 = vsel %vm3793_vm9, %v9465_v5, %v3794_v44 }
 0x2cb   : > { %v4610_v61 = vsel %vm9677_vm14, %v12636_v27, %v4607_v58  ;;  %v4693_v21 = vclz %v6189_v47  ;;  %v3799_v41 = vsel %vm3792_vm7, %v3795_v9, %v3798_v63  ;;  %vm3790_vm1 = vweird.f32 %v12618_v40 }
 0x2cc   : > { %6632 = vcosq.f32 %v4610_v61  ;;  %v9752_v38 = vsub.s32 %v5042_v6, %v12673_v0  ;;  %v4611_v6 = vsel %vm9677_vm14, 0, %v4609_v17  ;;  %v6972_v35 = vmov 1934713408  }
 0x2cd   : > { %6634 = vsinq.f32 %v4610_v61  ;;  %v6190_v14 = vadd.s32 4294967294, %v4693_v21  ;;  %vm4614_vm5 = vweird.f32 %v12636_v27  ;;  %vm4627_vm10 = vcmp.lt.s32.totalorder %v12639_v20, 0 }
 0x2ce   : > { %6636 = vcosq.f32 %v3889_v45  ;;  %v9764_v39 = vrot.slane %v5038_v19, %v9752_v38  ;;  %v9767_v24 = vrot.slane %v5054_v50, %v9752_v38  ;;  %v9770_v47 = vrot.slane %v5174_v52, %v9752_v38 }
 0x2cf   : > { %6638 = vsinq.f32 %v3889_v45  ;;  %vm6191_vm0 = vcmp.lt.s32.totalorder %v6190_v14, 0  ;;  %v9773_v58 = vrot.slane %v5190_v60, %v9752_v38  ;;  %v4681_v50 = vadd.s32 %v9566_v43, %v9584_v46  ;;  %v12674_v60 = vld [vmem:[#allocation52_spill] sm:$0xff] }
 0x2d0   : > { %v4696_v61 = vsel %vm6191_vm0, 0, %v6190_v14  ;;  %v1347_v21 = vmul.f32 -0.5, %v12674_v60  ;;  %6640 = vpow2.f32 %v12675_v36  ;;  %v4615_v14 = vand.u32 3, %v4611_v6  ;;  %v12677_v6 = vld [vmem:[#allocation61_spill] sm:$0xff] }
 0x2d1   : > { %v4697_v44 = vsub.s32 32, %v4696_v61  ;;  %v4701_v45 = vsub.s32 4294967266, %v4696_v61  ;;  %v4698_v59 = vshll.u32 %v9706_v51, %v4696_v61  ;;  %v12676_v46 = vsub.s32 4, %v9204_v26  ;;  %v12678_v61 = vld [vmem:[#allocation53_spill] sm:$0xff] }
 0x2d2   : > { %v3800_v36 = vsel %vm3790_vm1, nan, %v3799_v41  ;;  %v809_v51 = vcombine.high %v12677_v6, %v12677_v6  ;;  %vm4617_vm2 = vcmp.eq.s32.totalorder %v4615_v14, 0  ;;  %vm4620_vm3 = vcmp.eq.s32.totalorder %v4615_v14, 2 }
 0x2d3   : > { %v4699_v48 = vshrl.u32 %v4681_v50, %v4697_v44  ;;  %v4702_v43 = vadd.s32 127, %v4701_v45  ;;  %v3888_v60 = vsel %vm3803_vm12, %v12676_v46, %v9204_v26  ;;  %v1355_v50 = vmul.f32 -0.5, %v12678_v61  ;;  %v12679_v44 = vld [vmem:[#allocation67_spill] sm:$0xff] }
 0x2d4   : > { %v1419_v40 = vmul.f32 %v12679_v44, %v1347_v21  ;;  %v3890_v17 = vsel %vm9661_vm13, 0, %v3888_v60  ;;  %v9809_v63 = vrot.slane %v12677_v6, %v12653_v53  ;;  %v5105_v19 = vunpack.c.l.s4 %v6972_v35 }
 0x2d5   : > { %v4700_v52 = vor.u32 %v4699_v48, %v4698_v59  ;;  %v4703_v49 = vshll.u32 %v4702_v43, 23  ;;  %v12680_v43 = vld [vmem:[#allocation51_spill] sm:$0xff]  ;;  %v3894_v60 = vand.u32 3, %v3890_v17  ;;  %vm4616_vm4 = vcmp.lt.s32.totalorder %v4615_v14, 2 }
 0x2d6   : > { %v6633_v9 = vpop.eup %6632  ;;  %v4954_v46 = vmul.f32 %v12680_v43, %v3800_v36  ;;  %12681 = vst [vmem:[#allocation88_spill] sm:$0xff] %v9809_v63  ;;  %v1472_v42 = vmul.f32 1.442695, %v1419_v40  ;;  %v9814_v36 = vrot.slane %v809_v51, %v12653_v53  ;;  %v12683_v43 = vld [vmem:[#allocation69_spill] sm:$0xff]  ;;  %v5106_v14 = vunpack.c.0.s8 %v5105_v19 }
 0x2d7   : > { %v6635_v45 = vpop.eup %6634  ;;  %v4621_v26 = vxor.u32 2147483648, %v6633_v9  ;;  %v4704_v41 = vor.u32 4788187, %v4703_v49  ;;  %v4707_v21 = vcvt.s32.f32 %v4700_v52  ;;  %v1427_v37 = vmul.f32 %v12683_v43, %v1355_v50 }
 0x2d8   : > { %v6637_v59 = vpop.eup %6636  ;;  %v4618_v48 = vxor.u32 2147483648, %v6635_v45  ;;  %12682 = vst [vmem:[#allocation83_spill] sm:$0xff] %v9814_v36  ;;  %v9818_v17 = vmul.f32 %v9809_v63, %v4954_v46  ;;  %6642 = vpow2.f32 %v1472_v42  ;;  %vm3896_vm6 = vcmp.eq.s32.totalorder %v3894_v60, 0 }
 0x2d9   : > { %v6639_v2 = vpop.eup %6638  ;;  %v4622_v61 = vsel %vm4620_vm3, %v4621_v26, %v6635_v45  ;;  %v4705_v33 = vand.u32 2147483647, %v4704_v41  ;;  %v3900_v26 = vxor.u32 2147483648, %v6637_v59  ;;  %vm3899_vm8 = vcmp.eq.s32.totalorder %v3894_v60, 2 }
 0x2da   : > { %v4619_v49 = vsel %vm4617_vm2, %v6633_v9, %v4618_v48  ;;  %v6641_v6 = vpop.eup %6640  ;;  %v3897_v45 = vxor.u32 2147483648, %v6639_v2  ;;  %v12684_v27 = vand.u32 2147483647, %v12639_v20  ;;  %v12687_v40 = vcombine.low %v9696_v28, %v9702_v23 }
 0x2db   : > { %v4623_v5 = vsel %vm4616_vm4, %v4619_v49, %v4622_v61  ;;  %v4708_v8 = vmul.f32 %v4707_v21, %v4705_v33  ;;  %v3901_v51 = vsel %vm3899_vm8, %v3900_v26, %v6639_v2  ;;  %v9843_v46 = vsub.s32 %v5106_v14, %v12673_v0  ;;  %v12722_v14 = vld [vmem:[#allocation35_spill] sm:$0xff] }
 0x2dc   : > { %v4624_v52 = vsel %vm4614_vm5, nan, %v4623_v5  ;;  %vm9823_vm12 = vcmp.le.f32.partialorder %v12684_v27, 0.7853982  ;;  %v4711_v5 = vsub.s32 4, %v9667_v62  ;;  %v3898_v19 = vsel %vm3896_vm6, %v6637_v59, %v3897_v45  ;;  %v9880_v27 = vpop.permute.xlu1 %1022 }
 0x2dd   : > { %v4709_v41 = vxor.u32 2147483648, %v4708_v8  ;;  %v4962_v35 = vmul.f32 %v6641_v6, %v4624_v52  ;;  %v5078_v48 = vrot.slane %v12687_v40, %v9752_v38  ;;  %12688 = vst [vmem:[#allocation84_spill] sm:$0xff] %v9843_v46  ;;  %v1488_v2 = vmul.f32 1.442695, %v1427_v37  ;;  %12694 = vst [vmem:[#allocation43_spill] sm:$0xff] %v9880_v27 }
 0x2de   : > { %vm3895_vm11 = vcmp.lt.s32.totalorder %v3894_v60, 2  ;;  %v4712_v61 = vsel %vm4627_vm10, %v4711_v5, %v9667_v62  ;;  %v12689_v49 = vcombine.high %v9764_v39, %v9767_v24  ;;  %v12690_v45 = vcombine.low %v9764_v39, %v9767_v24 }
 0x2df   : > { %v4710_v33 = vsel %vm4627_vm10, %v4709_v41, %v4708_v8  ;;  %v9831_v9 = vmul.f32 %v9814_v36, %v4962_v35  ;;  %v3902_v42 = vsel %vm3895_vm11, %v3898_v19, %v3901_v51  ;;  %vm3893_vm13 = vweird.f32 %v12622_v30  ;;  %v12723_v30 = vld [vmem:[#allocation36_spill] sm:$0xff] }
 0x2e0   : > { %v4713_v50 = vsel %vm9823_vm12, %v12639_v20, %v4710_v33  ;;  %v9855_v6 = vrot.slane %v12689_v49, %v9843_v46  ;;  %v9861_v37 = vrot.slane %v12690_v45, %v9843_v46  ;;  %v4714_v62 = vsel %vm9823_vm12, 0, %v4712_v61  ;;  %v9922_v49 = vpop.permute.xlu1 %1027 }
 0x2e1   : > { %6644 = vcosq.f32 %v4713_v50  ;;  %v5086_v8 = vcombine.low %v9818_v17, %v9831_v9  ;;  %v5087_v59 = vcombine.high %v9818_v17, %v9831_v9  ;;  %v3903_v26 = vsel %vm3893_vm13, nan, %v3902_v42  ;;  %v9872_v17 = vpop.permute.xlu0 %930 }
 0x2e2   : > { %6646 = vsinq.f32 %v4713_v50  ;;  %12691 = vst [vmem:[#allocation85_spill] sm:$0xff] %v9861_v37  ;;  %v6643_v35 = vpop.eup %6642  ;;  %12693 = vst [vmem:[#allocation42_spill] sm:$0xff] %v9872_v17  ;;  %v4718_v39 = vand.u32 3, %v4714_v62  ;;  %v12695_v51 = vcombine.high %v9657_v15, %v9673_v10  ;;  %v12697_v40 = vcombine.high %v9683_v22, %v9686_v34  ;;  %v12727_v17 = vld [vmem:[#allocation39_spill] sm:$0xff] }
 0x2e3   : > { %v5094_v21 = vrot.slane %v5086_v8, %v9752_v38  ;;  %6648 = vpow2.f32 %v1488_v2  ;;  %v4955_v53 = vmul.f32 %v6643_v35, %v3903_v26  ;;  %v12699_v2 = vcombine.high %v9670_v16, %v9693_v56 }
 0x2e4   : > { %v9888_v50 = vrot.slane %v12695_v51, %v9752_v38  ;;  %vm4723_vm14 = vcmp.eq.s32.totalorder %v4718_v39, 2  ;;  %v12701_v15 = vcombine.high %v9690_v4, %v9699_v12  ;;  %vm4717_vm9 = vweird.f32 %v12639_v20  ;;  %v12713_v51 = vld [vmem:[#allocation26_spill] sm:$0xff] }
 0x2e5   : > { %v5135_v0 = vcombine.high %v5078_v48, %v5094_v21  ;;  %v5134_v60 = vcombine.low %v5078_v48, %v5094_v21  ;;  %v9894_v48 = vrot.slane %v12697_v40, %v9752_v38  ;;  %v9900_v61 = vrot.slane %v12699_v2, %v9752_v38  ;;  %v9908_v21 = vpop.permute.xlu0 %935 }
 0x2e6   : > { %12696 = vst [vmem:[#allocation44_spill] sm:$0xff] %v9888_v50  ;;  %v9906_v10 = vrot.slane %v12701_v15, %v9752_v38  ;;  %vm4720_vm7 = vcmp.eq.s32.totalorder %v4718_v39, 0  ;;  %v5027_v34 = vmul.f32 %v9809_v63, %v4955_v53  ;;  %vm4719_vm15 = vcmp.lt.s32.totalorder %v4718_v39, 2  ;;  %v12726_v63 = vld [vmem:[#allocation31_spill] sm:$0xff] }
 0x2e7   : > { %v9867_v52 = vrot.slane %v5135_v0, %v9843_v46  ;;  %v9870_v41 = vrot.slane %v5134_v60, %v9843_v46  ;;  %12698 = vst [vmem:[#allocation48_spill] sm:$0xff] %v9894_v48  ;;  %12700 = vst [vmem:[#allocation49_spill] sm:$0xff] %v9900_v61  ;;  %v12703_v16 = vcombine.low %v9709_v7, %v9714_v1 }
 0x2e8   : > { %12702 = vst [vmem:[#allocation50_spill] sm:$0xff] %v9906_v10  ;;  %v12704_v4 = vcombine.high %v9770_v47, %v9773_v58  ;;  %v12705_v0 = vcombine.low %v9770_v47, %v9773_v58  ;;  %v12707_v60 = vcombine.high %v9696_v28, %v9702_v23  ;;  %v5118_v26 = vcombine.low %v9888_v50, %v9894_v48  ;;  %v12710_v47 = vld [vmem:[#allocation25_spill] sm:$0xff] }
 0x2e9   : > { %12692 = vst [vmem:[#allocation41_spill] sm:$0xff] %v9870_v41  ;;  %v5214_v56 = vrot.slane %v12703_v16, %v9752_v38  ;;  %v5254_v53 = vcombine.low %v9900_v61, %v9906_v10  ;;  %v985_v58 = vmul.f32 %v12710_v47, %v9908_v21  ;;  %v12711_v28 = vcombine.high %v9709_v7, %v9714_v1  ;;  %v12717_v16 = vld [vmem:[#allocation29_spill] sm:$0xff] }
 0x2ea   : > { %v9920_v12 = vrot.slane %v12704_v4, %v9843_v46  ;;  %v9928_v45 = vrot.slane %v12705_v0, %v9843_v46  ;;  %v9934_v62 = vrot.slane %v12707_v60, %v9752_v38  ;;  %v989_v40 = vmul.f32 %v12713_v51, %v9908_v21  ;;  %v12719_v0 = vld [vmem:[#allocation30_spill] sm:$0xff]  ;;  %v12724_v61 = vld [vmem:[#allocation37_spill] sm:$0xff] }
 0x2eb   : > { %v6645_v5 = vpop.eup %6644  ;;  %v9948_v23 = vrot.slane %v12711_v28, %v9752_v38  ;;  %v9955_v15 = vrot.slane %v5087_v59, %v9752_v38  ;;  %v1001_v4 = vmul.f32 %v12717_v16, %v9908_v21  ;;  %v1005_v60 = vmul.f32 %v12719_v0, %v9908_v21  ;;  %v12721_v59 = vld [vmem:[#allocation34_spill] sm:$0xff] }
 0x2ec   : > { %v6647_v9 = vpop.eup %6646  ;;  %v4724_v19 = vxor.u32 2147483648, %v6645_v5  ;;  %12706 = vst [vmem:[#allocation55_spill] sm:$0xff] %v9928_v45  ;;  %12708 = vst [vmem:[#allocation22_spill] sm:$0xff] %v9934_v62  ;;  %v1081_v28 = vmul.f32 %v12721_v59, %v9922_v49  ;;  %v1085_v33 = vmul.f32 %v12722_v14, %v9922_v49  ;;  %v1089_v24 = vmul.f32 %v12723_v30, %v9922_v49 }
 0x2ed   : > { %v4721_v8 = vxor.u32 2147483648, %v6647_v9  ;;  %v6649_v35 = vpop.eup %6648  ;;  %12712 = vst [vmem:[#allocation56_spill] sm:$0xff] %v9948_v23  ;;  %12715 = vst [vmem:[#allocation58_spill] sm:$0xff] %v9955_v15  ;;  %v1093_v10 = vmul.f32 %v12724_v61, %v9922_v49  ;;  %v1009_v27 = vmul.f32 %v12726_v63, %v9908_v21  ;;  %v1101_v3 = vmul.f32 %v12727_v17, %v9922_v49 }
 0x2ee   : > { %v4725_v22 = vsel %vm4723_vm14, %v4724_v19, %v6647_v9  ;;  %v9983_v43 = vrot.slane %v5118_v26, %v9843_v46  ;;  %v5150_v44 = vcombine.low %v9934_v62, %v9955_v15  ;;  %v9988_v32 = vrot.slane %v5254_v53, %v9843_v46 }
 0x2ef   : > { %v4722_v42 = vsel %vm4720_vm7, %v6645_v5, %v4721_v8  ;;  %v12709_v5 = vld [vmem:[#allocation24_spill] sm:$0xff]  ;;  %v12714_v8 = vld [vmem:[#allocation27_spill] sm:$0xff]  ;;  %v9998_v13 = vadd.f32 %v1081_v28, %v989_v40  ;;  %v10004_v11 = vadd.f32 %v1093_v10, %v1001_v4  ;;  %v1161_v28 = vmul.f32 %v9922_v49, %v12719_v0 }
 0x2f0   : > { %v4726_v20 = vsel %vm4719_vm15, %v4722_v42, %v4725_v22  ;;  %v981_v9 = vmul.f32 %v12709_v5, %v9908_v21  ;;  %v993_v2 = vmul.f32 %v12714_v8, %v9908_v21  ;;  %v12716_v22 = vld [vmem:[#allocation28_spill] sm:$0xff]  ;;  %12728 = vst [vmem:[#allocation57_spill] sm:$0xff] %v9983_v43  ;;  %12729 = vst [vmem:[#allocation87_spill] sm:$0xff] %v9988_v32 }
 0x2f1   : > { %v4727_v39 = vsel %vm4717_vm9, nan, %v4726_v20  ;;  %v997_v42 = vmul.f32 %v12716_v22, %v9908_v21  ;;  %v12718_v20 = vld [vmem:[#allocation32_spill] sm:$0xff] }
 0x2f2   : > { %v4963_v19 = vmul.f32 %v6649_v35, %v4727_v39  ;;  %v1073_v7 = vmul.f32 %v12718_v20, %v9922_v49  ;;  %v12720_v35 = vld [vmem:[#allocation33_spill] sm:$0xff]  ;;  %v10000_v25 = vadd.f32 %v1085_v33, %v993_v2  ;;  %v1137_v33 = vmul.f32 %v9922_v49, %v12709_v5 }
 0x2f3   : > { %v1077_v39 = vmul.f32 %v12720_v35, %v9922_v49  ;;  %v10002_v26 = vadd.f32 %v1089_v24, %v997_v42  ;;  %v1141_v24 = vmul.f32 %v9922_v49, %v12710_v47  ;;  %v12735_v2 = vld [vmem:[#allocation21_spill] sm:$0xff] }
 0x2f4   : > { %v5035_v1 = vmul.f32 %v9814_v36, %v4963_v19  ;;  %v12725_v19 = vld [vmem:[#allocation38_spill] sm:$0xff]  ;;  %v9990_v54 = vadd.f32 %v1073_v7, %v981_v9  ;;  %v10010_v7 = vadd.f32 %v1101_v3, %v1009_v27  ;;  %v1153_v27 = vmul.f32 %v9922_v49, %v12716_v22 }
 0x2f5   : > { %v1097_v50 = vmul.f32 %v12725_v19, %v9922_v49 }
 0x2f6   : > { %v5222_v48 = vcombine.low %v5027_v34, %v5035_v1  ;;  %v5223_v36 = vcombine.high %v5027_v34, %v5035_v1  ;;  %v9996_v1 = vadd.f32 %v1077_v39, %v985_v58  ;;  %v12734_v58 = vld [vmem:[#allocation23_spill] sm:$0xff] }
 0x2f7   : > { %v10006_v62 = vadd.f32 %v1097_v50, %v1005_v60  ;;  %v1145_v50 = vmul.f32 %v9922_v49, %v12713_v51  ;;  %v1537_v40 = vmul.f32 %v12734_v58, %v9990_v54  ;;  %v12736_v60 = vcombine.low %v9855_v6, %v9867_v52  ;;  %v12740_v58 = vld [vmem:[#allocation40_spill] sm:$0xff] }
 0x2f8   : > { %v5230_v57 = vrot.slane %v5222_v48, %v9752_v38  ;;  %v9994_v34 = vrot.slane %v5223_v36, %v9752_v38  ;;  %v10013_v36 = vrot.slane %v5150_v44, %v9843_v46  ;;  %v1149_v44 = vmul.f32 %v9922_v49, %v12714_v8 }
 0x2f9   : > { %v1541_v42 = vmul.f32 %v12735_v2, %v9996_v1  ;;  %v1177_v2 = vmul.f32 %v12721_v59, %v9908_v21 }
 0x2fa   : > { %12730 = vst [vmem:[#allocation20_spill] sm:$0xff] %v9994_v34  ;;  %v5271_v53 = vcombine.high %v5214_v56, %v5230_v57  ;;  %v5270_v9 = vcombine.low %v5214_v56, %v5230_v57  ;;  %v5286_v48 = vcombine.low %v9948_v23, %v9994_v34  ;;  %12731 = vst [vmem:[#allocation52_spill] sm:$0xff] %v10013_v36 }
 0x2fb   : > { %v1157_v56 = vmul.f32 %v9922_v49, %v12717_v16  ;;  %v1173_v23 = vmul.f32 %v12720_v35, %v9908_v21  ;;  %v10068_v35 = vadd.f32 %v12740_v58, %v1537_v40  ;;  %v1165_v40 = vmul.f32 %v9922_v49, %v12726_v63 }
 0x2fc   : > { %v5285_v10 = vrot.slane %v5271_v53, %v9843_v46  ;;  %v10023_v57 = vrot.slane %v5270_v9, %v9843_v46  ;;  %v10026_v3 = vrot.slane %v5286_v48, %v9843_v46  ;;  %v5170_v53 = vcombine.low %v9983_v43, %v10013_v36  ;;  %v12738_v43 = vld [vmem:[#allocation70_spill] sm:$0xff] }
 0x2fd   : > { %v1169_v48 = vmul.f32 %v12718_v20, %v9908_v21 }
 0x2fe   : > { %12732 = vst [vmem:[#allocation82_spill] sm:$0xff] %v10023_v57  ;;  %12733 = vst [vmem:[#allocation61_spill] sm:$0xff] %v10026_v3  ;;  %v5304_v4 = vcombine.low %v9920_v12, %v5285_v10  ;;  %v5303_v39 = vcombine.high %v9928_v45, %v10023_v57  ;;  %v5305_v9 = vcombine.high %v9920_v12, %v5285_v10 }
 0x2ff   : > { %v12737_v57 = vcombine.high %v9861_v37, %v9870_v41  ;;  %v5306_v15 = vcombine.low %v9988_v32, %v10026_v3  ;;  %v1545_v12 = vmul.f32 %v12738_v43, %v9998_v13  ;;  %v12739_v10 = vcombine.high %v9855_v6, %v9867_v52 }
 0x300   : > { %v6514_v34 = vpack.i.bf16 %v12736_v60, %v5304_v4  ;;  %v12741_v4 = vld [vmem:[#allocation54_spill] sm:$0xff]  ;;  %v1185_v6 = vmul.f32 %v12723_v30, %v9908_v21  ;;  %v1189_v52 = vmul.f32 %v12724_v61, %v9908_v21  ;;  %v1950_v41 = vand.u32 2139095040, %v10068_v35 }
 0x301   : > { %v6509_v45 = vpack.i.bf16 %v12737_v57, %v5303_v39  ;;  %v6519_v36 = vpack.i.bf16 %v12739_v10, %v5305_v9  ;;  %v10071_v60 = vadd.f32 %v12741_v4, %v1541_v42  ;;  %v1181_v57 = vmul.f32 %v12722_v14, %v9908_v21  ;;  %v12742_v9 = vld [vmem:[#allocation76_spill] sm:$0xff] }
 0x302   : > { %6515 = vrot.lane.b32.xlu1 %v6514_v34, %s6973_s25  ;;  %v1193_v42 = vmul.f32 %v12725_v19, %v9908_v21  ;;  %v1197_v34 = vmul.f32 %v12727_v17, %v9908_v21  ;;  %v6524_v39 = vpack.i.bf16 %v5170_v53, %v5306_v15  ;;  %v10089_v10 = vadd.f32 %v12742_v9, %v1545_v12 }
 0x303   : > { %6510 = vrot.lane.b32.xlu0 %v6509_v45, %s6974_s17  ;;  %v1201_v32 = vsub.f32 %v1137_v33, %v1169_v48  ;;  %v1205_v3 = vsub.f32 %v1141_v24, %v1173_v23  ;;  %v1209_v4 = vsub.f32 %v1145_v50, %v1177_v2  ;;  %v2362_v49 = vand.u32 2139095040, %v10071_v60 }
 0x304   : > { %v1213_v21 = vsub.f32 %v1149_v44, %v1181_v57  ;;  %v10096_v45 = vsub.f32 %v1153_v27, %v1185_v6  ;;  %v10098_v15 = vsub.f32 %v1157_v56, %v1189_v52  ;;  %v1951_v53 = vshrl.u32 %v1950_v41, 23 }
 0x305   : > { %v10100_v12 = vsub.f32 %v1161_v28, %v1193_v42  ;;  %v12743_v37 = vand.u32 2147483647, %v10068_v35  ;;  %v2363_v23 = vshrl.u32 %v2362_v49, 23  ;;  %v12744_v24 = vand.u32 2147483647, %v10071_v60 }
 0x306   : > { %6525 = vrot.lane.b32.xlu1 %v6524_v39, %s6958_s26  ;;  %v10106_v2 = vsub.f32 %v1165_v40, %v1197_v34  ;;  %v6084_v44 = vadd.s32 4294967169, %v1951_v53  ;;  %v2774_v27 = vand.u32 2139095040, %v10089_v10  ;;  %v10115_v41 = vmul.f32 %v9996_v1, %v9996_v1 }
 0x307   : > { %6520 = vrot.lane.b32.xlu0 %v6519_v36, %s6975_s18  ;;  %v1954_v33 = vand.u32 8388607, %v12743_v37  ;;  %v2366_v50 = vand.u32 8388607, %v12744_v24  ;;  %v10110_v36 = vmul.f32 %v9990_v54, %v9990_v54  ;;  %v10119_v37 = vmul.f32 %v9998_v13, %v9998_v13 }
 0x308   : > { %v10123_v56 = vmul.f32 %v10000_v25, %v10000_v25  ;;  %v6100_v28 = vadd.s32 4294967169, %v2363_v23  ;;  %v10127_v54 = vmul.f32 %v10002_v26, %v10002_v26  ;;  %v10131_v48 = vmul.f32 %v10004_v11, %v10004_v11 }
 0x309   : > { %v1957_v57 = vadd.s32 1, %v6084_v44  ;;  %v2775_v1 = vshrl.u32 %v2774_v27, 23  ;;  %v10135_v6 = vmul.f32 %v10006_v62, %v10006_v62  ;;  %v1955_v13 = vor.u32 8388608, %v1954_v33  ;;  %v12745_v27 = vld [vmem:[#allocation71_spill] sm:$0xff] }
 0x30a   : > { %v2367_v52 = vor.u32 8388608, %v2366_v50  ;;  %v2369_v40 = vadd.s32 1, %v6100_v28  ;;  %v10139_v42 = vmul.f32 %v10010_v7, %v10010_v7  ;;  %v10141_v34 = vmul.f32 %v1201_v32, %v1201_v32 }
 0x30b   : > { %vm1958_vm0 = vcmp.gt.s32.totalorder %v1957_v57, 0  ;;  %v6116_v39 = vadd.s32 4294967169, %v2775_v1  ;;  %v10143_v49 = vmul.f32 %v1205_v3, %v1205_v3  ;;  %v10145_v53 = vmul.f32 %v1209_v4, %v1209_v4 }
 0x30c   : > { %v1959_v23 = vsel %vm1958_vm0, %v1957_v57, 0  ;;  %vm2370_vm1 = vcmp.gt.s32.totalorder %v2369_v40, 0  ;;  %v10147_v24 = vmul.f32 %v1213_v21, %v1213_v21  ;;  %v10151_v28 = vmul.f32 %v12745_v27, %v10000_v25 }
 0x30d   : > { %v1960_v44 = vshrl.u32 %v1959_v23, 5  ;;  %v1961_v33 = vand.u32 31, %v1959_v23  ;;  %v2371_v50 = vsel %vm2370_vm1, %v2369_v40, 0  ;;  %v10153_v9 = vshll.u32 %v1955_v13, 8 }
 0x30e   : > { %v10155_v32 = vshll.u32 %v2367_v52, 8  ;;  %v10157_v1 = vadd.s32 1, %v6116_v39  ;;  %v10160_v57 = vshrl.u32 %v2371_v50, 5  ;;  %v2373_v21 = vand.u32 31, %v2371_v50 }
 0x30f   : > { %v1962_v3 = vsub.s32 32, %v1961_v33  ;;  %v1964_v4 = vshll.u32 %v12545_v31, %v1961_v33  ;;  %v1967_v43 = vshll.u32 %v12546_v29, %v1961_v33  ;;  %v1970_v40 = vshll.u32 %v12547_v55, %v1961_v33 }
 0x310   : > { %v1973_v23 = vshll.u32 %v12548_v18, %v1961_v33  ;;  %v12746_v25 = vmov 920167782   ;;  %vm1979_vm2 = vcmp.lt.s32.totalorder %v1960_v44, 1  ;;  %v12747_v50 = vmov 1326507024  }
 0x311   : > { %v1976_v27 = vshll.u32 %v12746_v25, %v1961_v33  ;;  %v1965_v13 = vshrl.u32 %v12546_v29, %v1962_v3  ;;  %v1968_v52 = vshrl.u32 %v12547_v55, %v1962_v3  ;;  %v1971_v39 = vshrl.u32 %v12548_v18, %v1962_v3 }
 0x312   : > { %v1963_v58 = vshrl.u32 %v12545_v31, %v1962_v3  ;;  %v1974_v17 = vshrl.u32 %v12746_v25, %v1962_v3  ;;  %v1977_v19 = vshrl.u32 %v12747_v50, %v1962_v3  ;;  %vm1980_vm3 = vcmp.lt.s32.totalorder %v1960_v44, 2 }
 0x313   : > { %v1966_v61 = vor.u32 %v1965_v13, %v1964_v4  ;;  %v1969_v30 = vor.u32 %v1968_v52, %v1967_v43  ;;  %v1972_v14 = vor.u32 %v1971_v39, %v1970_v40  ;;  %v2374_v59 = vsub.s32 32, %v2373_v21 }
 0x314   : > { %v1975_v63 = vor.u32 %v1974_v17, %v1973_v23  ;;  %v1978_v33 = vor.u32 %v1977_v19, %v1976_v27  ;;  %vm1981_vm4 = vcmp.lt.s32.totalorder %v1960_v44, 3  ;;  %vm1982_vm5 = vcmp.lt.s32.totalorder %v1960_v44, 4 }
 0x315   : > { %v1983_v20 = vsel %vm1979_vm2, %v1963_v58, %v1966_v61  ;;  %v1984_v0 = vsel %vm1982_vm5, %v1972_v14, 2102212464  ;;  %v1987_v46 = vsel %vm1979_vm2, %v1966_v61, %v1969_v30  ;;  %v1991_v16 = vsel %vm1979_vm2, %v1969_v30, %v1972_v14 }
 0x316   : > { %v1985_v22 = vsel %vm1981_vm4, %v1969_v30, %v1984_v0  ;;  %v1988_v8 = vsel %vm1982_vm5, %v1975_v63, 920167782  ;;  %v1992_v51 = vsel %vm1982_vm5, %v1978_v33, 1326507024  ;;  %v2376_v3 = vshll.u32 %v12545_v31, %v2373_v21 }
 0x317   : > { %v1989_v4 = vsel %vm1981_vm4, %v1972_v14, %v1988_v8  ;;  %v1993_v43 = vsel %vm1981_vm4, %v1975_v63, %v1992_v51  ;;  %v2377_v40 = vshrl.u32 %v12546_v29, %v2374_v59  ;;  %v2379_v17 = vshll.u32 %v12546_v29, %v2373_v21 }
 0x318   : > { %v1986_v19 = vsel %vm1980_vm3, %v1983_v20, %v1985_v22  ;;  %v1990_v58 = vsel %vm1980_vm3, %v1987_v46, %v1989_v4  ;;  %v1994_v27 = vsel %vm1980_vm3, %v1991_v16, %v1993_v43  ;;  %v2380_v61 = vshrl.u32 %v12547_v55, %v2374_v59 }
 0x319   : > { %v10183_v30 = vmul.u32.u64.low %v10153_v9, %v1994_v27  ;;  %v10184_v0 = vmul.u32.u64.high %v10153_v9, %v1994_v27, %v10183_v30  ;;  %v10187_v23 = vmul.u32.u64.low %v10153_v9, %v1990_v58  ;;  %v10188_v14 = vmul.u32.u64.high %v10153_v9, %v1990_v58, %v10187_v23 }
 0x31a   : > { %v2378_v63 = vor.u32 %v2377_v40, %v2376_v3  ;;  %v2381_v51 = vor.u32 %v2380_v61, %v2379_v17  ;;  %v2382_v8 = vshll.u32 %v12547_v55, %v2373_v21  ;;  %v2383_v22 = vshrl.u32 %v12548_v18, %v2374_v59 }
 0x31b   : > { %v2375_v46 = vshrl.u32 %v12545_v31, %v2374_v59  ;;  %v2385_v16 = vshll.u32 %v12548_v18, %v2373_v21  ;;  %v2386_v20 = vshrl.u32 %v12746_v25, %v2374_v59  ;;  %v2389_v44 = vshrl.u32 %v12747_v50, %v2374_v59 }
 0x31c   : > { %v2002_v13 = vmul.u32 %v10153_v9, %v1986_v19  ;;  %v2384_v52 = vor.u32 %v2383_v22, %v2382_v8  ;;  %v2388_v39 = vshll.u32 %v12746_v25, %v2373_v21  ;;  %vm2391_vm6 = vcmp.lt.s32.totalorder %v10160_v57, 1 }
 0x31d   : > { %vm2004_vm8 = vc.u32 %v10184_v0, %v10187_v23  ;;  %v2005_v33 = vadd.s32 1, %v10188_v14  ;;  %v2387_v3 = vor.u32 %v2386_v20, %v2385_v16  ;;  %vm2392_vm10 = vcmp.lt.s32.totalorder %v10160_v57, 2 }
 0x31e   : > { %v2390_v4 = vor.u32 %v2389_v44, %v2388_v39  ;;  %vm2393_vm12 = vcmp.lt.s32.totalorder %v10160_v57, 3  ;;  %vm2394_vm11 = vcmp.lt.s32.totalorder %v10160_v57, 4  ;;  %v2399_v59 = vsel %vm2391_vm6, %v2378_v63, %v2381_v51 }
 0x31f   : > { %v2006_v9 = vsel %vm2004_vm8, %v2005_v33, %v10188_v14  ;;  %v2396_v43 = vsel %vm2394_vm11, %v2384_v52, 2102212464  ;;  %v2400_v21 = vsel %vm2394_vm11, %v2387_v3, 920167782  ;;  %v2403_v40 = vsel %vm2391_vm6, %v2381_v51, %v2384_v52 }
 0x320   : > { %v2007_v17 = vadd.s32 %v2006_v9, %v2002_v13  ;;  %v2395_v19 = vsel %vm2391_vm6, %v2375_v46, %v2378_v63  ;;  %v2401_v58 = vsel %vm2393_vm12, %v2384_v52, %v2400_v21  ;;  %v2404_v27 = vsel %vm2394_vm11, %v2390_v4, 1326507024  ;;  %v12748_v63 = vld [vmem:[#allocation77_spill] sm:$0xff] }
 0x321   : > { %v2397_v61 = vsel %vm2393_vm12, %v2381_v51, %v2396_v43  ;;  %v2402_v30 = vsel %vm2392_vm10, %v2399_v59, %v2401_v58  ;;  %v2405_v8 = vsel %vm2393_vm12, %v2387_v3, %v2404_v27  ;;  %vm2782_vm13 = vcmp.gt.s32.totalorder %v10157_v1, 0 }
 0x322   : > { %v2008_v22 = vadd.s32 536870912, %v2007_v17  ;;  %v2406_v16 = vsel %vm2392_vm10, %v2403_v40, %v2405_v8  ;;  %v10213_v14 = vmul.u32.u64.low %v10155_v32, %v2402_v30  ;;  %v10214_v20 = vmul.u32.u64.high %v10155_v32, %v2402_v30, %v10213_v14 }
 0x323   : > { %v10219_v46 = vadd.f32 %v12748_v63, %v10151_v28  ;;  %v10222_v51 = vmul.u32.u64.low %v10155_v32, %v2406_v16  ;;  %v10223_v44 = vmul.u32.u64.high %v10155_v32, %v2406_v16, %v10222_v51  ;;  %v2783_v13 = vsel %vm2782_vm13, %v10157_v1, 0 }
 0x324   : > { %v1281_v52 = vmul.f32 %v10096_v45, %v10096_v45  ;;  %v10228_v39 = vshrl.u32 %v2008_v22, 30  ;;  %v2398_v33 = vsel %vm2392_vm10, %v2395_v19, %v2397_v61  ;;  %v2785_v3 = vand.u32 31, %v2783_v13 }
 0x325   : > { %v1285_v4 = vmul.f32 %v10098_v15, %v10098_v15  ;;  %v1289_v28 = vmul.f32 %v10100_v12, %v10100_v12  ;;  %v10238_v59 = vmul.f32 %v10106_v2, %v10106_v2  ;;  %v1297_v1 = vadd.f32 %v10141_v34, %v10110_v36 }
 0x326   : > { %v1301_v45 = vadd.f32 %v10143_v49, %v10115_v41  ;;  %v2010_v57 = vshll.u32 %v10228_v39, 30  ;;  %v2417_v9 = vadd.s32 1, %v10214_v20  ;;  %v2786_v43 = vsub.s32 32, %v2785_v3 }
 0x327   : > { %v2414_v15 = vmul.u32 %v10155_v32, %v2398_v33  ;;  %vm2416_vm14 = vc.u32 %v10223_v44, %v10213_v14  ;;  %v12418_v12 = vand.u32 2147483647, %v10089_v10  ;;  %v3186_v2 = vand.u32 2139095040, %v10219_v46 }
 0x328   : > { %v1305_v36 = vadd.f32 %v10145_v53, %v10119_v37  ;;  %v1309_v41 = vadd.f32 %v10147_v24, %v10123_v56  ;;  %v10255_v34 = vsub.s32 %v2007_v17, %v2010_v57  ;;  %v2418_v49 = vsel %vm2416_vm14, %v2417_v9, %v10214_v20 }
 0x329   : > { %v10259_v21 = vadd.f32 %v1281_v52, %v10127_v54  ;;  %v10262_v32 = vadd.f32 %v1285_v4, %v10131_v48  ;;  %v10265_v40 = vadd.f32 %v1289_v28, %v10135_v6  ;;  %v2419_v19 = vadd.s32 %v2418_v49, %v2414_v15 }
 0x32a   : > { %v1329_v58 = vmul.f32 -0.5, %v1297_v1  ;;  %v1333_v27 = vmul.f32 -0.5, %v1301_v45  ;;  %v2013_v37 = vsub.s32 0, %v10255_v34  ;;  %v2789_v56 = vshrl.u32 %v12546_v29, %v2786_v43 }
 0x32b   : > { %v2420_v53 = vadd.s32 536870912, %v2419_v19  ;;  %v2778_v24 = vand.u32 8388607, %v12418_v12  ;;  %v2792_v54 = vshrl.u32 %v12547_v55, %v2786_v43  ;;  %v3187_v17 = vshrl.u32 %v3186_v2, 23 }
 0x32c   : > { %v6085_v48 = vmin.u32 %v2013_v37, %v10255_v34  ;;  %v2784_v61 = vshrl.u32 %v2783_v13, 5  ;;  %v2788_v6 = vshll.u32 %v12545_v31, %v2785_v3  ;;  %v2795_v30 = vshrl.u32 %v12548_v18, %v2786_v43 }
 0x32d   : > { %v10275_v8 = vshrl.u32 %v2420_v53, 30  ;;  %v2791_v22 = vshll.u32 %v12546_v29, %v2785_v3  ;;  %v2797_v16 = vshll.u32 %v12548_v18, %v2785_v3  ;;  %v2798_v20 = vshrl.u32 %v12746_v25, %v2786_v43 }
 0x32e   : > { %v1337_v51 = vmul.f32 -0.5, %v1305_v36  ;;  %v2015_v52 = vclz %v6085_v48  ;;  %v2790_v33 = vor.u32 %v2789_v56, %v2788_v6  ;;  %v2794_v4 = vshll.u32 %v12547_v55, %v2785_v3  ;;  %v12749_v6 = vld [vmem:[#allocation62_spill] sm:$0xff] }
 0x32f   : > { %v2422_v28 = vshll.u32 %v10275_v8, 30  ;;  %v2793_v13 = vor.u32 %v2792_v54, %v2791_v22  ;;  %v2799_v1 = vor.u32 %v2798_v20, %v2797_v16  ;;  %v2801_v45 = vshrl.u32 %v12747_v50, %v2786_v43 }
 0x330   : > { %v1341_v57 = vmul.f32 -0.5, %v1309_v41  ;;  %v6086_v9 = vadd.s32 4294967294, %v2015_v52  ;;  %v2779_v15 = vor.u32 8388608, %v2778_v24  ;;  %v2796_v2 = vor.u32 %v2795_v30, %v2794_v4  ;;  %v12750_v30 = vld [vmem:[#allocation63_spill] sm:$0xff] }
 0x331   : > { %v10283_v49 = vsub.s32 %v2419_v19, %v2422_v28  ;;  %v2800_v37 = vshll.u32 %v12746_v25, %v2785_v3  ;;  %vm2806_vm9 = vcmp.lt.s32.totalorder %v2784_v61, 4  ;;  %v6132_v36 = vadd.s32 4294967169, %v3187_v17 }
 0x332   : > { %vm6087_vm7 = vcmp.lt.s32.totalorder %v6086_v9, 0  ;;  %vm2803_vm15 = vcmp.lt.s32.totalorder %v2784_v61, 1  ;;  %vm2805_vm0 = vcmp.lt.s32.totalorder %v2784_v61, 3  ;;  %v2812_v56 = vsel %vm2806_vm9, %v2799_v1, 920167782 }
 0x333   : > { %v2018_v53 = vsel %vm6087_vm7, 0, %v6086_v9  ;;  %v2425_v54 = vsub.s32 0, %v10283_v49  ;;  %v2802_v48 = vor.u32 %v2801_v45, %v2800_v37  ;;  %v2811_v41 = vsel %vm2803_vm15, %v2790_v33, %v2793_v13 }
 0x334   : > { %v1401_v24 = vmul.f32 %v12749_v6, %v1329_v58  ;;  %v1405_v19 = vmul.f32 %v12750_v30, %v1333_v27  ;;  %v2813_v22 = vsel %vm2805_vm0, %v2796_v2, %v2812_v56  ;;  %v2819_v3 = vshll.u32 %v2779_v15, 8  ;;  %v12751_v15 = vld [vmem:[#allocation72_spill] sm:$0xff] }
 0x335   : > { %v6101_v17 = vmin.u32 %v2425_v54, %v10283_v49  ;;  %vm2804_vm1 = vcmp.lt.s32.totalorder %v2784_v61, 2  ;;  %v2808_v16 = vsel %vm2806_vm9, %v2796_v2, 2102212464  ;;  %v3193_v20 = vadd.s32 1, %v6132_v36 }
 0x336   : > { %v2023_v52 = vsub.s32 4294967266, %v2018_v53  ;;  %v2787_v4 = vshrl.u32 %v12545_v31, %v2786_v43  ;;  %v2814_v28 = vsel %vm2804_vm1, %v2811_v41, %v2813_v22  ;;  %v2815_v45 = vsel %vm2803_vm15, %v2793_v13, %v2796_v2 }
 0x337   : > { %v2427_v9 = vclz %v6101_v17  ;;  %v2816_v58 = vsel %vm2806_vm9, %v2802_v48, 1326507024  ;;  %v10298_v27 = vmul.u32.u64.low %v2819_v3, %v2814_v28  ;;  %v10299_v37 = vmul.u32.u64.high %v2819_v3, %v2814_v28, %v10298_v27 }
 0x338   : > { %v1553_v56 = vmul.f32 %v12751_v15, %v10002_v26  ;;  %v2807_v54 = vsel %vm2803_vm15, %v2787_v4, %v2790_v33  ;;  %v2809_v36 = vsel %vm2805_vm0, %v2793_v13, %v2808_v16  ;;  %v2817_v43 = vsel %vm2805_vm0, %v2799_v1, %v2816_v58  ;;  %v12752_v13 = vld [vmem:[#allocation64_spill] sm:$0xff]  ;;  %v12753_v58 = vld [vmem:[#allocation65_spill] sm:$0xff] }
 0x339   : > { %v6102_v12 = vadd.s32 4294967294, %v2427_v9  ;;  %v2818_v41 = vsel %vm2804_vm1, %v2815_v45, %v2817_v43  ;;  %vm3194_vm2 = vcmp.gt.s32.totalorder %v3193_v20, 0  ;;  %v2019_v48 = vsub.s32 32, %v2018_v53 }
 0x33a   : > { %v2024_v22 = vadd.s32 127, %v2023_v52  ;;  %v10309_v17 = vmul.u32.u64.low %v2819_v3, %v2818_v41  ;;  %v10310_v28 = vmul.u32.u64.high %v2819_v3, %v2818_v41, %v10309_v17  ;;  %v2810_v26 = vsel %vm2804_vm1, %v2807_v54, %v2809_v36 }
 0x33b   : > { %vm6103_vm3 = vcmp.lt.s32.totalorder %v6102_v12, 0  ;;  %v2829_v33 = vadd.s32 1, %v10299_v37  ;;  %v3195_v4 = vsel %vm3194_vm2, %v3193_v20, 0  ;;  %v1409_v16 = vmul.f32 %v12752_v13, %v1337_v51  ;;  %v12755_v51 = vld [vmem:[#allocation78_spill] sm:$0xff] }
 0x33c   : > { %v2003_v1 = vadd.s32 %v10187_v23, %v10184_v0  ;;  %v2430_v45 = vsel %vm6103_vm3, 0, %v6102_v12  ;;  %v3197_v9 = vand.u32 31, %v3195_v4  ;;  %v1413_v43 = vmul.f32 %v12753_v58, %v1341_v57 }
 0x33d   : > { %v1436_v2 = vmul.f32 1.442695, %v1401_v24  ;;  %v2435_v52 = vsub.s32 4294967266, %v2430_v45  ;;  %v12754_v41 = vand.u32 2147483647, %v10219_v46  ;;  %v2025_v61 = vshll.u32 %v2024_v22, 23 }
 0x33e   : > { %v2021_v15 = vshrl.u32 %v2003_v1, %v2019_v48  ;;  %v2826_v54 = vmul.u32 %v2819_v3, %v2810_v26  ;;  %vm2828_vm4 = vc.u32 %v10310_v28, %v10298_v27  ;;  %v10322_v20 = vmul.f32 1.442695, %v1405_v19 }
 0x33f   : > { %v3190_v17 = vand.u32 8388607, %v12754_v41  ;;  %v10325_v36 = vadd.f32 %v12755_v51, %v1553_v56  ;;  %v2830_v0 = vsel %vm2828_vm4, %v2829_v33, %v10299_v37  ;;  %v3198_v23 = vsub.s32 32, %v3197_v9 }
 0x340   : > { %v10328_v12 = vmul.f32 1.442695, %v1409_v16  ;;  %v2020_v57 = vshll.u32 %v10255_v34, %v2018_v53  ;;  %v2431_v24 = vsub.s32 32, %v2430_v45  ;;  %v2831_v41 = vadd.s32 %v2830_v0, %v2826_v54 }
 0x341   : > { %6650 = vpow2.f32 %v1436_v2  ;;  %v10331_v48 = vmul.f32 1.442695, %v1413_v43  ;;  %v2436_v3 = vadd.s32 127, %v2435_v52  ;;  %v3191_v22 = vor.u32 8388608, %v3190_v17 }
 0x342   : > { %v2022_v26 = vor.u32 %v2021_v15, %v2020_v57  ;;  %v2026_v19 = vor.u32 4788187, %v2025_v61  ;;  %v2415_v56 = vadd.s32 %v10213_v14, %v10223_v44  ;;  %v2832_v1 = vadd.s32 536870912, %v2831_v41 }
 0x343   : > { %v10335_v51 = vshrl.u32 %v3195_v4, 5  ;;  %v3201_v37 = vshrl.u32 %v12546_v29, %v3198_v23  ;;  %v3204_v33 = vshrl.u32 %v12547_v55, %v3198_v23  ;;  %v3598_v34 = vand.u32 2139095040, %v10325_v36 }
 0x344   : > { %v2433_v53 = vshrl.u32 %v2415_v56, %v2431_v24  ;;  %v10340_v2 = vshrl.u32 %v2832_v1, 30  ;;  %v3200_v16 = vshll.u32 %v12545_v31, %v3197_v9  ;;  %v3207_v15 = vshrl.u32 %v12548_v18, %v3198_v23 }
 0x345   : > { %v2437_v43 = vshll.u32 %v2436_v3, 23  ;;  %v3203_v52 = vshll.u32 %v12546_v29, %v3197_v9  ;;  %v3209_v14 = vshll.u32 %v12548_v18, %v3197_v9  ;;  %v3210_v44 = vshrl.u32 %v12746_v25, %v3198_v23 }
 0x346   : > { %v2432_v4 = vshll.u32 %v10283_v49, %v2430_v45  ;;  %v2834_v17 = vshll.u32 %v10340_v2, 30  ;;  %v3206_v61 = vshll.u32 %v12547_v55, %v3197_v9  ;;  %v3213_v54 = vshrl.u32 %v12747_v50, %v3198_v23 }
 0x347   : > { %v2027_v0 = vand.u32 2147483647, %v2026_v19  ;;  %v3202_v57 = vor.u32 %v3201_v37, %v3200_v16  ;;  %v3205_v24 = vor.u32 %v3204_v33, %v3203_v52  ;;  %v3211_v56 = vor.u32 %v3210_v44, %v3209_v14 }
 0x348   : > { %v2434_v1 = vor.u32 %v2433_v53, %v2432_v4  ;;  %v10351_v3 = vsub.s32 %v2831_v41, %v2834_v17  ;;  %v3208_v58 = vor.u32 %v3207_v15, %v3206_v61  ;;  %v3212_v13 = vshll.u32 %v12746_v25, %v3197_v9 }
 0x349   : > { %v2029_v30 = vcvt.s32.f32 %v2022_v26  ;;  %v2438_v6 = vor.u32 4788187, %v2437_v43  ;;  %v3231_v63 = vshll.u32 %v3191_v22, 8  ;;  %v3599_v49 = vshrl.u32 %v3598_v34, 23 }
 0x34a   : > { %v2837_v45 = vsub.s32 0, %v10351_v3  ;;  %v3214_v47 = vor.u32 %v3213_v54, %v3212_v13  ;;  %vm3215_vm5 = vcmp.lt.s32.totalorder %v10335_v51, 1  ;;  %vm3218_vm6 = vcmp.lt.s32.totalorder %v10335_v51, 4 }
 0x34b   : > { %v10357_v19 = vpop.eup %6650  ;;  %v2030_v37 = vmul.f32 %v2029_v30, %v2027_v0  ;;  %v3199_v41 = vshrl.u32 %v12545_v31, %v3198_v23  ;;  %v3223_v33 = vsel %vm3215_vm5, %v3202_v57, %v3205_v24  ;;  %v3224_v9 = vsel %vm3218_vm6, %v3211_v56, 920167782 }
 0x34c   : > { %v2441_v22 = vcvt.s32.f32 %v2434_v1  ;;  %v6117_v26 = vmin.u32 %v2837_v45, %v10351_v3  ;;  %vm3217_vm8 = vcmp.lt.s32.totalorder %v10335_v51, 3  ;;  %v3220_v13 = vsel %vm3218_vm6, %v3208_v58, 2102212464 }
 0x34d   : > { %v2439_v34 = vand.u32 2147483647, %v2438_v6  ;;  %vm3216_vm10 = vcmp.lt.s32.totalorder %v10335_v51, 2  ;;  %v3225_v30 = vsel %vm3217_vm8, %v3208_v58, %v3224_v9  ;;  %v3227_v23 = vsel %vm3215_vm5, %v3205_v24, %v3208_v58 }
 0x34e   : > { %v2839_v53 = vclz %v6117_v26  ;;  %v3219_v16 = vsel %vm3215_vm5, %v3199_v41, %v3202_v57  ;;  %v3226_v15 = vsel %vm3216_vm10, %v3223_v33, %v3225_v30  ;;  %v3228_v43 = vsel %vm3218_vm6, %v3214_v47, 1326507024  ;;  %v12756_v47 = vld [vmem:[#allocation73_spill] sm:$0xff]  ;;  %v12757_v41 = vld [vmem:[#allocation74_spill] sm:$0xff] }
 0x34f   : > { %v3221_v52 = vsel %vm3217_vm8, %v3205_v24, %v3220_v13  ;;  %v3229_v14 = vsel %vm3217_vm8, %v3211_v56, %v3228_v43  ;;  %v10377_v44 = vmul.u32.u64.low %v3231_v63, %v3226_v15  ;;  %v10378_v6 = vmul.u32.u64.high %v3231_v63, %v3226_v15, %v10377_v44 }
 0x350   : > { %6652 = vpow2.f32 %v10322_v20  ;;  %v2031_v4 = vxor.u32 2147483648, %v2030_v37  ;;  %v6118_v58 = vadd.s32 4294967294, %v2839_v53  ;;  %v3230_v17 = vsel %vm3216_vm10, %v3227_v23, %v3229_v14 }
 0x351   : > { %v2442_v61 = vmul.f32 %v2441_v22, %v2439_v34  ;;  %v10384_v54 = vmul.u32.u64.low %v3231_v63, %v3230_v17  ;;  %v10385_v0 = vmul.u32.u64.high %v3231_v63, %v3230_v17, %v10384_v54  ;;  %v6148_v57 = vadd.s32 4294967169, %v3599_v49 }
 0x352   : > { %6654 = vpow2.f32 %v10328_v12  ;;  %v1557_v24 = vmul.f32 %v12756_v47, %v10004_v11  ;;  %vm6119_vm12 = vcmp.lt.s32.totalorder %v6118_v58, 0  ;;  %v3222_v56 = vsel %vm3216_vm10, %v3219_v16, %v3221_v52 }
 0x353   : > { %vm1949_vm11 = vcmp.lt.s32.totalorder %v10068_v35, 0  ;;  %v2842_v20 = vsel %vm6119_vm12, 0, %v6118_v58  ;;  %v3241_v1 = vadd.s32 1, %v10378_v6  ;;  %v3605_v45 = vadd.s32 1, %v6148_v57  ;;  %v12763_v57 = vld [vmem:[#allocation80_spill] sm:$0xff] }
 0x354   : > { %v1561_v33 = vmul.f32 %v12757_v41, %v10006_v62  ;;  %v2032_v49 = vsel %vm1949_vm11, %v2031_v4, %v2030_v37  ;;  %v2033_v12 = vsub.s32 4, %v10228_v39  ;;  %v12420_v11 = vand.u32 2147483647, %v10325_v36  ;;  %v12758_v62 = vld [vmem:[#allocation75_spill] sm:$0xff] }
 0x355   : > { %v2443_v9 = vxor.u32 2147483648, %v2442_v61  ;;  %v3238_v22 = vmul.u32 %v3231_v63, %v3222_v56  ;;  %vm3240_vm13 = vc.u32 %v10385_v0, %v10377_v44  ;;  %vm3606_vm14 = vcmp.gt.s32.totalorder %v3605_v45, 0 }
 0x356   : > { %v2843_v51 = vsub.s32 32, %v2842_v20  ;;  %v2847_v26 = vsub.s32 4294967266, %v2842_v20  ;;  %v3242_v13 = vsel %vm3240_vm13, %v3241_v1, %v10378_v6  ;;  %v3607_v34 = vsel %vm3606_vm14, %v3605_v45, 0 }
 0x357   : > { %v1565_v30 = vmul.f32 %v12758_v62, %v10010_v7  ;;  %v12759_v37 = vand.u32 2147483647, %v10068_v35  ;;  %v3243_v53 = vadd.s32 %v3242_v13, %v3238_v22  ;;  %v3609_v63 = vand.u32 31, %v3607_v34 }
 0x358   : > { %v2034_v16 = vsel %vm1949_vm11, %v2033_v12, %v10228_v39  ;;  %vm2361_vm7 = vcmp.lt.s32.totalorder %v10071_v60, 0  ;;  %v2827_v7 = vadd.s32 %v10298_v27, %v10310_v28  ;;  %v3602_v14 = vand.u32 8388607, %v12420_v11  ;;  %v12762_v39 = vld [vmem:[#allocation79_spill] sm:$0xff]  ;;  %v12764_v27 = vld [vmem:[#allocation81_spill] sm:$0xff] }
 0x359   : > { %vm10407_vm9 = vcmp.le.f32.partialorder %v12759_v37, 0.7853982  ;;  %v2444_v43 = vsel %vm2361_vm7, %v2443_v9, %v2442_v61  ;;  %v3244_v52 = vadd.s32 536870912, %v3243_v53  ;;  %v3610_v6 = vsub.s32 32, %v3609_v63 }
 0x35a   : > { %v2035_v15 = vsel %vm10407_vm9, %v10068_v35, %v2032_v49  ;;  %v10424_v4 = vpop.eup %6652  ;;  %6656 = vpow2.f32 %v10331_v48  ;;  %v10428_v58 = vadd.f32 %v12762_v39, %v1557_v24  ;;  %v2845_v17 = vshrl.u32 %v2827_v7, %v2843_v51 }
 0x35b   : > { %v2848_v54 = vadd.s32 127, %v2847_v26  ;;  %v10431_v56 = vadd.f32 %v12763_v57, %v1561_v33  ;;  %v10434_v28 = vadd.f32 %v12764_v27, %v1565_v30  ;;  %v12765_v61 = vand.u32 2147483647, %v10071_v60 }
 0x35c   : > { %v10442_v45 = vshrl.u32 %v3244_v52, 30  ;;  %v10444_v48 = vpop.eup %6654  ;;  %v2036_v24 = vsel %vm10407_vm9, 0, %v2034_v16  ;;  %6658 = vcosq.f32 %v2035_v15  ;;  %v2844_v49 = vshll.u32 %v10351_v3, %v2842_v20 }
 0x35d   : > { %vm10438_vm15 = vcmp.le.f32.partialorder %v12765_v61, 0.7853982  ;;  %v3603_v9 = vor.u32 8388608, %v3602_v14  ;;  %v3613_v22 = vshrl.u32 %v12546_v29, %v3610_v6  ;;  %v3616_v51 = vshrl.u32 %v12547_v55, %v3610_v6 }
 0x35e   : > { %v10451_v33 = vsel %vm10438_vm15, %v10071_v60, %v2444_v43  ;;  %v3246_v12 = vshll.u32 %v10442_v45, 30  ;;  %v2846_v26 = vor.u32 %v2845_v17, %v2844_v49  ;;  %v2849_v13 = vshll.u32 %v2848_v54, 23 }
 0x35f   : > { %v10457_v30 = vshrl.u32 %v3607_v34, 5  ;;  %v3619_v37 = vshrl.u32 %v12548_v18, %v3610_v6  ;;  %v3612_v16 = vshll.u32 %v12545_v31, %v3609_v63  ;;  %v3615_v7 = vshll.u32 %v12546_v29, %v3609_v63 }
 0x360   : > { %v10460_v23 = vsub.s32 %v3243_v53, %v3246_v12  ;;  %v3622_v3 = vshrl.u32 %v12746_v25, %v3610_v6  ;;  %v3618_v20 = vshll.u32 %v12547_v55, %v3609_v63  ;;  %v3621_v43 = vshll.u32 %v12548_v18, %v3609_v63 }
 0x361   : > { %v3624_v52 = vshll.u32 %v12746_v25, %v3609_v63  ;;  %v3625_v14 = vshrl.u32 %v12747_v50, %v3610_v6  ;;  %6660 = vsinq.f32 %v2035_v15  ;;  %v3614_v17 = vor.u32 %v3613_v22, %v3612_v16 }
 0x362   : > { %v3249_v34 = vsub.s32 0, %v10460_v23  ;;  %v3617_v53 = vor.u32 %v3616_v51, %v3615_v7  ;;  %v10470_v54 = vand.u32 3, %v2036_v24  ;;  %v3620_v61 = vor.u32 %v3619_v37, %v3618_v20 }
 0x363   : > { %v3623_v49 = vor.u32 %v3622_v3, %v3621_v43  ;;  %v3626_v12 = vor.u32 %v3625_v14, %v3624_v52  ;;  %v2445_v11 = vsub.s32 4, %v10275_v8  ;;  %6662 = vcosq.f32 %v10451_v33 }
 0x364   : > { %v6133_v27 = vmin.u32 %v3249_v34, %v10460_v23  ;;  %v10475_v57 = vshll.u32 %v3603_v9, 8  ;;  %v10477_v63 = vpop.eup %6656  ;;  %v2850_v15 = vor.u32 4788187, %v2849_v13  ;;  %v2853_v39 = vcvt.s32.f32 %v2846_v26 }
 0x365   : > { %v3611_v22 = vshrl.u32 %v12545_v31, %v3610_v6  ;;  %vm3627_vm0 = vcmp.lt.s32.totalorder %v10457_v30, 1  ;;  %vm3629_vm1 = vcmp.lt.s32.totalorder %v10457_v30, 3  ;;  %vm3630_vm2 = vcmp.lt.s32.totalorder %v10457_v30, 4 }
 0x366   : > { %v3251_v24 = vclz %v6133_v27  ;;  %v3635_v51 = vsel %vm3627_vm0, %v3614_v17, %v3617_v53  ;;  %v6659_v37 = vpop.eup %6658  ;;  %v3632_v16 = vsel %vm3630_vm2, %v3620_v61, 2102212464  ;;  %v3636_v9 = vsel %vm3630_vm2, %v3623_v49, 920167782 }
 0x367   : > { %v3639_v7 = vsel %vm3627_vm0, %v3617_v53, %v3620_v61  ;;  %v3640_v13 = vsel %vm3630_vm2, %v3626_v12, 1326507024  ;;  %vm3628_vm3 = vcmp.lt.s32.totalorder %v10457_v30, 2  ;;  %v3637_v6 = vsel %vm3629_vm1, %v3620_v61, %v3636_v9 }
 0x368   : > { %v6134_v26 = vadd.s32 4294967294, %v3251_v24  ;;  %v3641_v27 = vsel %vm3629_vm1, %v3623_v49, %v3640_v13  ;;  %vm2773_vm4 = vcmp.lt.s32.totalorder %v10089_v10, 0  ;;  %v2851_v3 = vand.u32 2147483647, %v2850_v15 }
 0x369   : > { %v3631_v20 = vsel %vm3627_vm0, %v3611_v22, %v3614_v17  ;;  %v3638_v43 = vsel %vm3628_vm3, %v3635_v51, %v3637_v6  ;;  %v3642_v52 = vsel %vm3628_vm3, %v3639_v7, %v3641_v27  ;;  %vm2042_vm5 = vcmp.eq.s32.totalorder %v10470_v54, 0 }
 0x36a   : > { %vm6135_vm6 = vcmp.lt.s32.totalorder %v6134_v26, 0  ;;  %v3633_v14 = vsel %vm3629_vm1, %v3617_v53, %v3632_v16  ;;  %v10503_v34 = vmul.u32.u64.low %v10475_v57, %v3642_v52  ;;  %v10504_v61 = vmul.u32.u64.high %v10475_v57, %v3642_v52, %v10503_v34 }
 0x36b   : > { %v3254_v49 = vsel %vm6135_vm6, 0, %v6134_v26  ;;  %v10507_v12 = vmul.u32.u64.low %v10475_v57, %v3638_v43  ;;  %v10508_v17 = vmul.u32.u64.high %v10475_v57, %v3638_v43, %v10507_v12  ;;  %v4010_v15 = vand.u32 2139095040, %v10428_v58  ;;  %v6661_v22 = vpop.eup %6660 }
 0x36c   : > { %v2446_v24 = vsel %vm2361_vm7, %v2445_v11, %v10275_v8  ;;  %v3239_v53 = vadd.s32 %v10377_v44, %v10385_v0  ;;  %v3255_v51 = vsub.s32 32, %v3254_v49  ;;  %v3259_v16 = vsub.s32 4294967266, %v3254_v49 }
 0x36d   : > { %v12768_v9 = vand.u32 2147483647, %v10089_v10  ;;  %v2854_v13 = vmul.f32 %v2853_v39, %v2851_v3  ;;  %v2857_v26 = vsub.s32 4, %v10340_v2  ;;  %v3634_v6 = vsel %vm3628_vm3, %v3631_v20, %v3633_v14  ;;  %v10526_v43 = vpop.eup %6662 }
 0x36e   : > { %v4011_v27 = vshrl.u32 %v4010_v15, 23  ;;  %vm2041_vm10 = vcmp.lt.s32.totalorder %v10470_v54, 2  ;;  %v2046_v8 = vxor.u32 2147483648, %v6659_v37  ;;  %v3257_v44 = vshrl.u32 %v3239_v53, %v3255_v51 }
 0x36f   : > { %vm10519_vm8 = vcmp.le.f32.partialorder %v12768_v9, 0.7853982  ;;  %v3260_v0 = vadd.s32 127, %v3259_v16  ;;  %vm3652_vm12 = vc.u32 %v10504_v61, %v10507_v12  ;;  %v2043_v11 = vxor.u32 2147483648, %v6661_v22 }
 0x370   : > { %vm3185_vm11 = vcmp.lt.s32.totalorder %v10219_v46, 0  ;;  %v3256_v39 = vshll.u32 %v10460_v23, %v3254_v49  ;;  %v3653_v3 = vadd.s32 1, %v10508_v17  ;;  %v6164_v30 = vadd.s32 4294967169, %v4011_v27 }
 0x371   : > { %vm2045_vm13 = vcmp.eq.s32.totalorder %v10470_v54, 2  ;;  %v3261_v20 = vshll.u32 %v3260_v0, 23  ;;  %v3650_v52 = vmul.u32 %v10475_v57, %v3634_v6  ;;  %v12421_v14 = vand.u32 2147483647, %v10428_v58 }
 0x372   : > { %v2855_v34 = vxor.u32 2147483648, %v2854_v13  ;;  %v3258_v15 = vor.u32 %v3257_v44, %v3256_v39  ;;  %v3654_v53 = vsel %vm3652_vm12, %v3653_v3, %v10508_v17  ;;  %v4017_v51 = vadd.s32 1, %v6164_v30 }
 0x373   : > { %v2448_v16 = vsel %vm10438_vm15, 0, %v2446_v24  ;;  %v10543_v23 = vsel %vm2773_vm4, %v2857_v26, %v10340_v2  ;;  %v3262_v49 = vor.u32 4788187, %v3261_v20  ;;  %v3655_v9 = vadd.s32 %v3654_v53, %v3650_v52 }
 0x374   : > { %v2044_v57 = vsel %vm2042_vm5, %v6659_v37, %v2043_v11  ;;  %v2047_v6 = vsel %vm2045_vm13, %v2046_v8, %v6661_v22  ;;  %v3269_v27 = vsub.s32 4, %v10442_v45  ;;  %vm4018_vm14 = vcmp.gt.s32.totalorder %v4017_v51, 0 }
 0x375   : > { %v3263_v44 = vand.u32 2147483647, %v3262_v49  ;;  %v3656_v17 = vadd.s32 536870912, %v3655_v9  ;;  %v4014_v1 = vand.u32 8388607, %v12421_v14  ;;  %v4019_v24 = vsel %vm4018_vm14, %v4017_v51, 0 }
 0x376   : > { %v2856_v0 = vsel %vm2773_vm4, %v2855_v34, %v2854_v13  ;;  %v3265_v2 = vcvt.s32.f32 %v3258_v15  ;;  %v4021_v26 = vand.u32 31, %v4019_v24  ;;  %v4422_v39 = vand.u32 2139095040, %v10431_v56 }
 0x377   : > { %6664 = vsinq.f32 %v10451_v33  ;;  %v10554_v37 = vand.u32 3, %v2448_v16  ;;  %v10559_v8 = vshrl.u32 %v3656_v17, 30  ;;  %v10563_v11 = vsel %vm2041_vm10, %v2044_v57, %v2047_v6 }
 0x378   : > { %v3266_v3 = vmul.f32 %v3265_v2, %v3263_v44  ;;  %v4022_v30 = vsub.s32 32, %v4021_v26  ;;  %v2859_v33 = vsel %vm10519_vm8, %v10089_v10, %v2856_v0  ;;  %v10572_v20 = vsel %vm3185_vm11, %v3269_v27, %v10442_v45 }
 0x379   : > { %v3658_v52 = vshll.u32 %v10559_v8, 30  ;;  %v4015_v34 = vor.u32 8388608, %v4014_v1  ;;  %v4423_v51 = vshrl.u32 %v4422_v39, 23  ;;  %v4024_v49 = vshll.u32 %v12545_v31, %v4021_v26 }
 0x37a   : > { %v4025_v54 = vshrl.u32 %v12546_v29, %v4022_v30  ;;  %v4028_v15 = vshrl.u32 %v12547_v55, %v4022_v30  ;;  %v4031_v53 = vshrl.u32 %v12548_v18, %v4022_v30  ;;  %v4027_v57 = vshll.u32 %v12546_v29, %v4021_v26 }
 0x37b   : > { %v10578_v16 = vsub.s32 %v3655_v9, %v3658_v52  ;;  %v4034_v6 = vshrl.u32 %v12746_v25, %v4022_v30  ;;  %v3267_v45 = vxor.u32 2147483648, %v3266_v3  ;;  %v4020_v27 = vshrl.u32 %v4019_v24, 5 }
 0x37c   : > { %v4030_v44 = vshll.u32 %v12547_v55, %v4021_v26  ;;  %v4033_v17 = vshll.u32 %v12548_v18, %v4021_v26  ;;  %6666 = vcosq.f32 %v2859_v33  ;;  %v4026_v0 = vor.u32 %v4025_v54, %v4024_v49 }
 0x37d   : > { %v3661_v1 = vsub.s32 0, %v10578_v16  ;;  %v4029_v2 = vor.u32 %v4028_v15, %v4027_v57  ;;  %v4036_v52 = vshll.u32 %v12746_v25, %v4021_v26  ;;  %v4037_v14 = vshrl.u32 %v12747_v50, %v4022_v30 }
 0x37e   : > { %v4032_v39 = vor.u32 %v4031_v53, %v4030_v44  ;;  %v4035_v9 = vor.u32 %v4034_v6, %v4033_v17  ;;  %6668 = vsinq.f32 %v2859_v33  ;;  %v12771_v13 = vand.u32 2147483647, %v10219_v46 }
 0x37f   : > { %v6149_v22 = vmin.u32 %v3661_v1, %v10578_v16  ;;  %v10595_v62 = vshll.u32 %v4015_v34, 8  ;;  %v6180_v41 = vadd.s32 4294967169, %v4423_v51  ;;  %vm2039_vm7 = vweird.f32 %v10068_v35 }
 0x380   : > { %vm10590_vm9 = vcmp.le.f32.partialorder %v12771_v13, 0.7853982  ;;  %vm2457_vm15 = vcmp.eq.s32.totalorder %v10554_v37, 2  ;;  %v3268_v26 = vsel %vm3185_vm11, %v3267_v45, %v3266_v3  ;;  %v4023_v33 = vshrl.u32 %v12545_v31, %v4022_v30 }
 0x381   : > { %v4038_v54 = vor.u32 %v4037_v14, %v4036_v52  ;;  %vm4039_vm0 = vcmp.lt.s32.totalorder %v4020_v27, 1  ;;  %v6665_v13 = vpop.eup %6664  ;;  %v3663_v15 = vclz %v6149_v22  ;;  %vm4041_vm1 = vcmp.lt.s32.totalorder %v4020_v27, 3 }
 0x382   : > { %vm4042_vm2 = vcmp.lt.s32.totalorder %v4020_v27, 4  ;;  %v4047_v53 = vsel %vm4039_vm0, %v4026_v0, %v4029_v2  ;;  %vm2454_vm3 = vcmp.eq.s32.totalorder %v10554_v37, 0  ;;  %v4051_v49 = vsel %vm4039_vm0, %v4029_v2, %v4032_v39 }
 0x383   : > { %v4044_v34 = vsel %vm4042_vm2, %v4032_v39, 2102212464  ;;  %v4048_v51 = vsel %vm4042_vm2, %v4035_v9, 920167782  ;;  %v4052_v57 = vsel %vm4042_vm2, %v4038_v54, 1326507024  ;;  %v4043_v30 = vsel %vm4039_vm0, %v4023_v33, %v4026_v0 }
 0x384   : > { %v6150_v6 = vadd.s32 4294967294, %v3663_v15  ;;  %vm4040_vm4 = vcmp.lt.s32.totalorder %v4020_v27, 2  ;;  %v4049_v44 = vsel %vm4041_vm1, %v4032_v39, %v4048_v51  ;;  %v4053_v3 = vsel %vm4041_vm1, %v4035_v9, %v4052_v57 }
 0x385   : > { %v4050_v14 = vsel %vm4040_vm4, %v4047_v53, %v4049_v44  ;;  %v4054_v22 = vsel %vm4040_vm4, %v4051_v49, %v4053_v3  ;;  %v4429_v45 = vadd.s32 1, %v6180_v41  ;;  %v4045_v17 = vsel %vm4041_vm1, %v4029_v2, %v4044_v34 }
 0x386   : > { %vm6151_vm5 = vcmp.lt.s32.totalorder %v6150_v6, 0  ;;  %v10609_v1 = vmul.u32.u64.low %v10595_v62, %v4054_v22  ;;  %v10610_v52 = vmul.u32.u64.high %v10595_v62, %v4054_v22, %v10609_v1  ;;  %v10617_v0 = vpop.eup %6666  ;;  %v2455_v39 = vxor.u32 2147483648, %v6665_v13 }
 0x387   : > { %v3666_v54 = vsel %vm6151_vm5, 0, %v6150_v6  ;;  %v10613_v15 = vmul.u32.u64.low %v10595_v62, %v4050_v14  ;;  %v10614_v47 = vmul.u32.u64.high %v10595_v62, %v4050_v14, %v10613_v15  ;;  %vm4430_vm6 = vcmp.gt.s32.totalorder %v4429_v45, 0 }
 0x388   : > { %v12774_v41 = vsel %vm10519_vm8, 0, %v10543_v23  ;;  %v3671_v2 = vsub.s32 4294967266, %v3666_v54  ;;  %v4431_v33 = vsel %vm4430_vm6, %v4429_v45, 0  ;;  %v3272_v53 = vsel %vm10590_vm9, 0, %v10572_v20  ;;  %v6669_v57 = vpop.eup %6668 }
 0x389   : > { %v10623_v9 = vand.u32 3, %v12774_v41  ;;  %v4046_v34 = vsel %vm4040_vm4, %v4043_v30, %v4045_v17  ;;  %v12422_v51 = vand.u32 2147483647, %v10431_v56  ;;  %v4433_v49 = vand.u32 31, %v4431_v33 }
 0x38a   : > { %v10633_v7 = vsel %vm2039_vm7, nan, %v10563_v11  ;;  %v12775_v23 = vxor.u32 2147483648, %v10526_v43  ;;  %v3271_v20 = vsel %vm10590_vm9, %v10219_v46, %v3268_v26  ;;  %v3672_v27 = vadd.s32 127, %v3671_v2 }
 0x38b   : > { %v3667_v44 = vsub.s32 32, %v3666_v54  ;;  %vm4064_vm8 = vc.u32 %v10610_v52, %v10613_v15  ;;  %v4065_v3 = vadd.s32 1, %v10614_v47  ;;  %v4434_v35 = vsub.s32 32, %v4433_v49 }
 0x38c   : > { %v10639_v6 = vsel %vm2457_vm15, %v12775_v23, %v6665_v13  ;;  %v2456_v11 = vsel %vm2454_vm3, %v10526_v43, %v2455_v39  ;;  %v10650_v30 = vand.u32 3, %v3272_v53  ;;  %v3651_v13 = vadd.s32 %v10507_v12, %v10504_v61 }
 0x38d   : > { %v4062_v24 = vmul.u32 %v10595_v62, %v4046_v34  ;;  %vm2869_vm10 = vcmp.eq.s32.totalorder %v10623_v9, 2  ;;  %6670 = vcosq.f32 %v3271_v20  ;;  %v4066_v26 = vsel %vm4064_vm8, %v4065_v3, %v10614_v47 }
 0x38e   : > { %v4426_v14 = vand.u32 8388607, %v12422_v51  ;;  %v4437_v22 = vshrl.u32 %v12546_v29, %v4434_v35  ;;  %vm2866_vm12 = vcmp.eq.s32.totalorder %v10623_v9, 0  ;;  %6672 = vsinq.f32 %v3271_v20 }
 0x38f   : > { %v3673_v43 = vshll.u32 %v3672_v27, 23  ;;  %v4067_v45 = vadd.s32 %v4066_v26, %v4062_v24  ;;  %v4436_v17 = vshll.u32 %v12545_v31, %v4433_v49  ;;  %v3669_v61 = vshrl.u32 %v3651_v13, %v3667_v44 }
 0x390   : > { %v10662_v12 = vshrl.u32 %v4431_v33, 5  ;;  %v4439_v62 = vshll.u32 %v12546_v29, %v4433_v49  ;;  %v4440_v1 = vshrl.u32 %v12547_v55, %v4434_v35  ;;  %vm2453_vm11 = vcmp.lt.s32.totalorder %v10554_v37, 2 }
 0x391   : > { %v4068_v47 = vadd.s32 536870912, %v4067_v45  ;;  %v4438_v39 = vor.u32 %v4437_v22, %v4436_v17  ;;  %v4442_v41 = vshll.u32 %v12547_v55, %v4433_v49  ;;  %v4443_v2 = vshrl.u32 %v12548_v18, %v4434_v35 }
 0x392   : > { %vm2865_vm13 = vcmp.lt.s32.totalorder %v10623_v9, 2  ;;  %v4441_v53 = vor.u32 %v4440_v1, %v4439_v62  ;;  %v4445_v34 = vshll.u32 %v12548_v18, %v4433_v49  ;;  %v4446_v33 = vshrl.u32 %v12746_v25, %v4434_v35 }
 0x393   : > { %v4449_v23 = vshrl.u32 %v12747_v50, %v4434_v35  ;;  %v2870_v20 = vxor.u32 2147483648, %v10617_v0  ;;  %v3668_v27 = vshll.u32 %v10578_v16, %v3666_v54  ;;  %v3674_v44 = vor.u32 4788187, %v3673_v43 }
 0x394   : > { %v10675_v3 = vshrl.u32 %v4068_v47, 30  ;;  %v2867_v13 = vxor.u32 2147483648, %v6669_v57  ;;  %v4444_v24 = vor.u32 %v4443_v2, %v4442_v41  ;;  %v4447_v26 = vor.u32 %v4446_v33, %v4445_v34 }
 0x395   : > { %v4448_v22 = vshll.u32 %v12746_v25, %v4433_v49  ;;  %vm2863_vm14 = vweird.f32 %v10089_v10  ;;  %v3670_v17 = vor.u32 %v3669_v61, %v3668_v27  ;;  %vm4451_vm9 = vcmp.lt.s32.totalorder %v10662_v12, 1 }
 0x396   : > { %v4070_v62 = vshll.u32 %v10675_v3, 30  ;;  %vm4454_vm7 = vcmp.lt.s32.totalorder %v10662_v12, 4  ;;  %v4427_v1 = vor.u32 8388608, %v4426_v14  ;;  %v4459_v16 = vsel %vm4451_vm9, %v4438_v39, %v4441_v53 }
 0x397   : > { %v4450_v51 = vor.u32 %v4449_v23, %v4448_v22  ;;  %v4460_v54 = vsel %vm4454_vm7, %v4447_v26, 920167782  ;;  %v2871_v49 = vsel %vm2869_vm10, %v2870_v20, %v6669_v57  ;;  %v3675_v43 = vand.u32 2147483647, %v3674_v44  ;;  %v6671_v61 = vpop.eup %6670 }
 0x398   : > { %v10688_v47 = vsub.s32 %v4067_v45, %v4070_v62  ;;  %vm4453_vm15 = vcmp.lt.s32.totalorder %v10662_v12, 3  ;;  %v2868_v14 = vsel %vm2866_vm12, %v10617_v0, %v2867_v13  ;;  %v4435_v41 = vshrl.u32 %v12545_v31, %v4434_v35  ;;  %v6673_v34 = vpop.eup %6672 }
 0x399   : > { %vm4452_vm0 = vcmp.lt.s32.totalorder %v10662_v12, 2  ;;  %v4461_v2 = vsel %vm4453_vm15, %v4444_v24, %v4460_v54  ;;  %v3677_v33 = vcvt.s32.f32 %v3670_v17  ;;  %v4456_v45 = vsel %vm4454_vm7, %v4444_v24, 2102212464 }
 0x39a   : > { %v4073_v57 = vsub.s32 0, %v10688_v47  ;;  %v4462_v23 = vsel %vm4452_vm0, %v4459_v16, %v4461_v2  ;;  %v10706_v0 = vsel %vm2453_vm11, %v2456_v11, %v10639_v6  ;;  %v4463_v35 = vsel %vm4451_vm9, %v4441_v53, %v4444_v24 }
 0x39b   : > { %v4464_v20 = vsel %vm4454_vm7, %v4450_v51, 1326507024  ;;  %v4467_v27 = vshll.u32 %v4427_v1, 8  ;;  %v2872_v44 = vsel %vm2865_vm13, %v2868_v14, %v2871_v49  ;;  %vm3597_vm1 = vcmp.lt.s32.totalorder %v10325_v36, 0 }
 0x39c   : > { %v3678_v13 = vmul.f32 %v3677_v33, %v3675_v43  ;;  %v6165_v22 = vmin.u32 %v4073_v57, %v10688_v47  ;;  %v4455_v37 = vsel %vm4451_vm9, %v4435_v41, %v4438_v39  ;;  %v4457_v6 = vsel %vm4453_vm15, %v4441_v53, %v4456_v45 }
 0x39d   : > { %v4465_v11 = vsel %vm4453_vm15, %v4447_v26, %v4464_v20  ;;  %v10722_v24 = vmul.u32.u64.low %v4467_v27, %v4462_v23  ;;  %v10723_v51 = vmul.u32.u64.high %v4467_v27, %v4462_v23, %v10722_v24  ;;  %vm3277_vm2 = vcmp.lt.s32.totalorder %v10650_v30, 2 }
 0x39e   : > { %vm3278_vm3 = vcmp.eq.s32.totalorder %v10650_v30, 0  ;;  %v4075_v9 = vclz %v6165_v22  ;;  %v4466_v17 = vsel %vm4452_vm0, %v4463_v35, %v4465_v11  ;;  %v4834_v39 = vand.u32 2139095040, %v10434_v28 }
 0x39f   : > { %v2873_v53 = vsel %vm2863_vm14, nan, %v2872_v44  ;;  %v3282_v62 = vxor.u32 2147483648, %v6671_v61  ;;  %v12776_v26 = vand.u32 2147483647, %v10325_v36  ;;  %v3279_v49 = vxor.u32 2147483648, %v6673_v34 }
 0x3a0   : > { %v10739_v16 = vmul.u32.u64.low %v4467_v27, %v4466_v17  ;;  %v10740_v54 = vmul.u32.u64.high %v4467_v27, %v4466_v17, %v10739_v16  ;;  %v6166_v43 = vadd.s32 4294967294, %v4075_v9  ;;  %v4458_v14 = vsel %vm4452_vm0, %v4455_v37, %v4457_v6  ;;  %v12780_v9 = vld [vmem:[#allocation45_spill] sm:$0xff] }
 0x3a1   : > { %vm10735_vm4 = vcmp.le.f32.partialorder %v12776_v26, 0.7853982  ;;  %v4835_v41 = vshrl.u32 %v4834_v39, 23  ;;  %vm2451_vm5 = vweird.f32 %v10071_v60  ;;  %vm3281_vm6 = vcmp.eq.s32.totalorder %v10650_v30, 2 }
 0x3a2   : > { %v3679_v10 = vxor.u32 2147483648, %v3678_v13  ;;  %v4063_v2 = vadd.s32 %v10613_v15, %v10610_v52  ;;  %v4477_v33 = vadd.s32 1, %v10723_v51  ;;  %vm6167_vm8 = vcmp.lt.s32.totalorder %v6166_v43, 0 }
 0x3a3   : > { %v6196_v57 = vadd.s32 4294967169, %v4835_v41  ;;  %v4937_v45 = vmul.f32 %v10357_v19, %v10633_v7  ;;  %v4945_v23 = vmul.f32 %v10444_v48, %v2873_v53  ;;  %v3283_v12 = vsel %vm3281_vm6, %v3282_v62, %v6673_v34 }
 0x3a4   : > { %v4078_v35 = vsel %vm6167_vm8, 0, %v6166_v43  ;;  %v4474_v20 = vmul.u32 %v4467_v27, %v4458_v14  ;;  %vm4476_vm10 = vc.u32 %v10740_v54, %v10722_v24  ;;  %v3280_v44 = vsel %vm3278_vm3, %v6671_v61, %v3279_v49  ;;  %v12779_v27 = vld [vmem:[#allocation59_spill] sm:$0xff] }
 0x3a5   : > { %v4079_v22 = vsub.s32 32, %v4078_v35  ;;  %v4083_v52 = vsub.s32 4294967266, %v4078_v35  ;;  %v4478_v15 = vsel %vm4476_vm10, %v4477_v33, %v10723_v51  ;;  %v3680_v37 = vsel %vm3597_vm1, %v3679_v10, %v3678_v13 }
 0x3a6   : > { %v4479_v6 = vadd.s32 %v4478_v15, %v4474_v20  ;;  %v4831_v19 = vand.u32 2147483647, %v10434_v28  ;;  %v4841_v48 = vadd.s32 1, %v6196_v57  ;;  %v10761_v11 = vmul.f32 %v12779_v27, %v4937_v45 }
 0x3a7   : > { %v4081_v7 = vshrl.u32 %v4063_v2, %v4079_v22  ;;  %v4084_v34 = vadd.s32 127, %v4083_v52  ;;  %v10764_v17 = vmul.f32 %v12780_v9, %v4945_v23  ;;  %v3284_v61 = vsel %vm3277_vm2, %v3280_v44, %v3283_v12 }
 0x3a8   : > { %v3681_v51 = vsub.s32 4, %v10559_v8  ;;  %v4480_v39 = vadd.s32 536870912, %v4479_v6  ;;  %vm4842_vm12 = vcmp.gt.s32.totalorder %v4841_v48, 0  ;;  %v3683_v13 = vsel %vm10735_vm4, %v10325_v36, %v3680_v37 }
 0x3a9   : > { %v4080_v53 = vshll.u32 %v10688_v47, %v4078_v35  ;;  %v4085_v62 = vshll.u32 %v4084_v34, 23  ;;  %v4843_v26 = vsel %vm4842_vm12, %v4841_v48, 0  ;;  %vm3275_vm11 = vweird.f32 %v10219_v46 }
 0x3aa   : > { %v10774_v16 = vshrl.u32 %v4480_v39, 30  ;;  %v4838_v30 = vand.u32 8388607, %v4831_v19  ;;  %v4845_v49 = vand.u32 31, %v4843_v26  ;;  %v2461_v43 = vsel %vm2451_vm5, nan, %v10706_v0 }
 0x3ab   : > { %v4082_v14 = vor.u32 %v4081_v7, %v4080_v53  ;;  %v4086_v41 = vor.u32 4788187, %v4085_v62  ;;  %v5446_v10 = vcombine.low %v10761_v11, %v10764_v17  ;;  %v3285_v47 = vsel %vm3275_vm11, nan, %v3284_v61 }
 0x3ac   : > { %6674 = vcosq.f32 %v3683_v13  ;;  %v4482_v2 = vshll.u32 %v10774_v16, 30  ;;  %v4846_v46 = vsub.s32 32, %v4845_v49  ;;  %v1345_v33 = vmul.f32 -0.5, %v10259_v21 }
 0x3ad   : > { %v10788_v57 = vsel %vm3597_vm1, %v3681_v51, %v10559_v8  ;;  %6676 = vsinq.f32 %v3683_v13  ;;  %v4087_v60 = vand.u32 2147483647, %v4086_v41  ;;  %v4839_v45 = vor.u32 8388608, %v4838_v30 }
 0x3ae   : > { %v10790_v0 = vsub.s32 %v4479_v6, %v4482_v2  ;;  %v4849_v23 = vshrl.u32 %v12546_v29, %v4846_v46  ;;  %v4941_v12 = vmul.f32 %v10424_v4, %v2461_v43  ;;  %v4089_v35 = vcvt.s32.f32 %v4082_v14  ;;  %v12782_v14 = vld [vmem:[#allocation46_spill] sm:$0xff] }
 0x3af   : > { %v4852_v20 = vshrl.u32 %v12547_v55, %v4846_v46  ;;  %v4855_v44 = vshrl.u32 %v12548_v18, %v4846_v46  ;;  %v4949_v21 = vmul.f32 %v10477_v63, %v3285_v47  ;;  %vm4009_vm13 = vcmp.lt.s32.totalorder %v10428_v58, 0 }
 0x3b0   : > { %v4485_v8 = vsub.s32 0, %v10790_v0  ;;  %v4848_v22 = vshll.u32 %v12545_v31, %v4845_v49  ;;  %v4851_v52 = vshll.u32 %v12546_v29, %v4845_v49  ;;  %v4858_v15 = vshrl.u32 %v12746_v25, %v4846_v46 }
 0x3b1   : > { %v4090_v37 = vmul.f32 %v4089_v35, %v4087_v60  ;;  %v4844_v6 = vshrl.u32 %v4843_v26, 5  ;;  %v4854_v4 = vshll.u32 %v12547_v55, %v4845_v49  ;;  %v4857_v48 = vshll.u32 %v12548_v18, %v4845_v49  ;;  %v12781_v26 = vld [vmem:[#allocation60_spill] sm:$0xff] }
 0x3b2   : > { %v4475_v7 = vadd.s32 %v10722_v24, %v10740_v54  ;;  %v6181_v63 = vmin.u32 %v4485_v8, %v10790_v0  ;;  %v4850_v34 = vor.u32 %v4849_v23, %v4848_v22  ;;  %v4853_v61 = vor.u32 %v4852_v20, %v4851_v52 }
 0x3b3   : > { %v4856_v51 = vor.u32 %v4855_v44, %v4854_v4  ;;  %v4859_v39 = vor.u32 %v4858_v15, %v4857_v48  ;;  %v4860_v13 = vshll.u32 %v12746_v25, %v4845_v49  ;;  %v4861_v53 = vshrl.u32 %v12747_v50, %v4846_v46 }
 0x3b4   : > { %v4487_v62 = vclz %v6181_v63  ;;  %v4879_v30 = vshll.u32 %v4839_v45, 8  ;;  %v5013_v43 = vmul.f32 %v12781_v26, %v4941_v12  ;;  %v5021_v41 = vmul.f32 %v12782_v14, %v4949_v21 }
 0x3b5   : > { %v4091_v47 = vxor.u32 2147483648, %v4090_v37  ;;  %v4847_v2 = vshrl.u32 %v12545_v31, %v4846_v46  ;;  %v4862_v24 = vor.u32 %v4861_v53, %v4860_v13  ;;  %vm4863_vm14 = vcmp.lt.s32.totalorder %v4844_v6, 1 }
 0x3b6   : > { %v10812_v54 = vpop.eup %6674  ;;  %v6182_v60 = vadd.s32 4294967294, %v4487_v62  ;;  %vm4865_vm9 = vcmp.lt.s32.totalorder %v4844_v6, 3  ;;  %vm4866_vm7 = vcmp.lt.s32.totalorder %v4844_v6, 4  ;;  %v4871_v49 = vsel %vm4863_vm14, %v4850_v34, %v4853_v61 }
 0x3b7   : > { %v10815_v23 = vpop.eup %6676  ;;  %v4868_v35 = vsel %vm4866_vm7, %v4856_v51, 2102212464  ;;  %v4872_v45 = vsel %vm4866_vm7, %v4859_v39, 920167782  ;;  %v4875_v12 = vsel %vm4863_vm14, %v4853_v61, %v4856_v51  ;;  %v4876_v20 = vsel %vm4866_vm7, %v4862_v24, 1326507024 }
 0x3b8   : > { %vm6183_vm15 = vcmp.lt.s32.totalorder %v6182_v60, 0  ;;  %vm4864_vm0 = vcmp.lt.s32.totalorder %v4844_v6, 2  ;;  %v4873_v46 = vsel %vm4865_vm9, %v4856_v51, %v4872_v45  ;;  %v4877_v44 = vsel %vm4865_vm9, %v4859_v39, %v4876_v20  ;;  %v12783_v39 = vld [vmem:[#allocation66_spill] sm:$0xff] }
 0x3b9   : > { %v4092_v21 = vsel %vm4009_vm13, %v4091_v47, %v4090_v37  ;;  %v4490_v8 = vsel %vm6183_vm15, 0, %v6182_v60  ;;  %v4874_v22 = vsel %vm4864_vm0, %v4871_v49, %v4873_v46  ;;  %v4878_v52 = vsel %vm4864_vm0, %v4875_v12, %v4877_v44 }
 0x3ba   : > { %v4491_v15 = vsub.s32 32, %v4490_v8  ;;  %v4495_v4 = vsub.s32 4294967266, %v4490_v8  ;;  %v4867_v48 = vsel %vm4863_vm14, %v4847_v2, %v4850_v34  ;;  %v4869_v63 = vsel %vm4865_vm9, %v4853_v61, %v4868_v35 }
 0x3bb   : > { %v10826_v13 = vmul.u32.u64.low %v4879_v30, %v4878_v52  ;;  %v10827_v53 = vmul.u32.u64.high %v4879_v30, %v4878_v52, %v10826_v13  ;;  %v10829_v51 = vmul.u32.u64.low %v4879_v30, %v4874_v22  ;;  %v10830_v62 = vmul.u32.u64.high %v4879_v30, %v4874_v22, %v10829_v51 }
 0x3bc   : > { %v1417_v37 = vmul.f32 %v12783_v39, %v1345_v33  ;;  %v4492_v47 = vshll.u32 %v10790_v0, %v4490_v8  ;;  %v4493_v24 = vshrl.u32 %v4475_v7, %v4491_v15  ;;  %v4496_v60 = vadd.s32 127, %v4495_v4  ;;  %v12787_v15 = vld [vmem:[#allocation67_spill] sm:$0xff] }
 0x3bd   : > { %v12784_v49 = vand.u32 2147483647, %v10428_v58  ;;  %v4870_v34 = vsel %vm4864_vm0, %v4867_v48, %v4869_v63  ;;  %v10846_v61 = vrot.slane %v5446_v10, %v9752_v38  ;;  %v5454_v2 = vcombine.low %v5013_v43, %v5021_v41 }
 0x3be   : > { %v3684_v33 = vsel %vm10735_vm4, 0, %v10788_v57  ;;  %v4494_v7 = vor.u32 %v4493_v24, %v4492_v47  ;;  %v4497_v35 = vshll.u32 %v4496_v60, 23  ;;  %v1325_v6 = vadd.f32 %v10238_v59, %v10139_v42 }
 0x3bf   : > { %vm10837_vm1 = vcmp.le.f32.partialorder %v12784_v49, 0.7853982  ;;  %vm4888_vm2 = vc.u32 %v10827_v53, %v10829_v51  ;;  %v4889_v11 = vadd.s32 1, %v10830_v62  ;;  %v10860_v17 = vrot.slane %v5454_v2, %v9752_v38 }
 0x3c0   : > { %v4095_v0 = vsel %vm10837_vm1, %v10428_v58, %v4092_v21  ;;  %v1349_v1 = vmul.f32 -0.5, %v10262_v32  ;;  %v1468_v10 = vmul.f32 1.442695, %v1417_v37  ;;  %v4498_v57 = vor.u32 4788187, %v4497_v35 }
 0x3c1   : > { %v4886_v43 = vmul.u32 %v4879_v30, %v4870_v34  ;;  %v3688_v41 = vand.u32 3, %v3684_v33  ;;  %6678 = vcosq.f32 %v4095_v0  ;;  %v4890_v12 = vsel %vm4888_vm2, %v4889_v11, %v10830_v62  ;;  %v12792_v33 = vld [vmem:[#allocation69_spill] sm:$0xff] }
 0x3c2   : > { %v5478_v42 = vcombine.low %v10846_v61, %v10860_v17  ;;  %6680 = vsinq.f32 %v4095_v0  ;;  %v4499_v59 = vand.u32 2147483647, %v4498_v57  ;;  %v4501_v20 = vcvt.s32.f32 %v4494_v7  ;;  %v12809_v61 = vld [vmem:[#allocation34_spill] sm:$0xff] }
 0x3c3   : > { %v4891_v46 = vadd.s32 %v4890_v12, %v4886_v43  ;;  %v1353_v44 = vmul.f32 -0.5, %v10265_v40  ;;  %v3691_v21 = vxor.u32 2147483648, %v10815_v23  ;;  %v3694_v32 = vxor.u32 2147483648, %v10812_v54  ;;  %v12788_v40 = vld [vmem:[#allocation68_spill] sm:$0xff] }
 0x3c4   : > { %v4093_v8 = vsub.s32 4, %v10675_v3  ;;  %v4502_v30 = vmul.f32 %v4501_v20, %v4499_v59  ;;  %v1357_v52 = vmul.f32 -0.5, %v1325_v6  ;;  %v1421_v4 = vmul.f32 %v12787_v15, %v1349_v1 }
 0x3c5   : > { %v4892_v22 = vadd.s32 536870912, %v4891_v46  ;;  %6682 = vpow2.f32 %v1468_v10  ;;  %v4505_v48 = vsub.s32 4, %v10774_v16  ;;  %vm3690_vm3 = vcmp.eq.s32.totalorder %v3688_v41, 0 }
 0x3c6   : > { %vm3693_vm4 = vcmp.eq.s32.totalorder %v3688_v41, 2  ;;  %v4503_v63 = vxor.u32 2147483648, %v4502_v30  ;;  %v1425_v62 = vmul.f32 %v12788_v40, %v1353_v44  ;;  %v3692_v37 = vsel %vm3690_vm3, %v10812_v54, %v3691_v21 }
 0x3c7   : > { %v10872_v13 = vshrl.u32 %v4892_v22, 30  ;;  %v3695_v47 = vsel %vm3693_vm4, %v3694_v32, %v10815_v23  ;;  %vm4421_vm5 = vcmp.lt.s32.totalorder %v10431_v56, 0  ;;  %v4094_v24 = vsel %vm4009_vm13, %v4093_v8, %v10675_v3 }
 0x3c8   : > { %v12789_v60 = vand.u32 2147483647, %v10431_v56  ;;  %v4504_v34 = vsel %vm4421_vm5, %v4503_v63, %v4502_v30  ;;  %v1429_v0 = vmul.f32 %v12792_v33, %v1357_v52  ;;  %vm3689_vm8 = vcmp.lt.s32.totalorder %v3688_v41, 2  ;;  %v12793_v52 = vld [vmem:[#allocation47_spill] sm:$0xff] }
 0x3c9   : > { %v4894_v2 = vshll.u32 %v10872_v13, 30  ;;  %v4506_v54 = vsel %vm4421_vm5, %v4505_v48, %v10774_v16  ;;  %v3696_v7 = vsel %vm3689_vm8, %v3692_v37, %v3695_v47  ;;  %v1476_v6 = vmul.f32 1.442695, %v1421_v4 }
 0x3ca   : > { %vm10883_vm6 = vcmp.le.f32.partialorder %v12789_v60, 0.7853982  ;;  %v4096_v11 = vsel %vm10837_vm1, 0, %v4094_v24  ;;  %v1484_v10 = vmul.f32 1.442695, %v1425_v62  ;;  %vm3687_vm10 = vweird.f32 %v10325_v36  ;;  %v12796_v24 = vld [vmem:[#allocation42_spill] sm:$0xff] }
 0x3cb   : > { %v4507_v23 = vsel %vm10883_vm6, %v10431_v56, %v4504_v34  ;;  %v10893_v3 = vsub.s32 %v4891_v46, %v4894_v2  ;;  %v6679_v35 = vpop.eup %6678  ;;  %v4508_v16 = vsel %vm10883_vm6, 0, %v4506_v54  ;;  %v1492_v43 = vmul.f32 1.442695, %v1429_v0 }
 0x3cc   : > { %6684 = vcosq.f32 %v4507_v23  ;;  %v6681_v1 = vpop.eup %6680  ;;  %v3697_v41 = vsel %vm3687_vm10, nan, %v3696_v7  ;;  %v4100_v12 = vand.u32 3, %v4096_v11  ;;  %v4106_v45 = vxor.u32 2147483648, %v6679_v35 }
 0x3cd   : > { %6686 = vsinq.f32 %v4507_v23  ;;  %v4897_v57 = vsub.s32 0, %v10893_v3  ;;  %v4103_v46 = vxor.u32 2147483648, %v6681_v1  ;;  %v4512_v44 = vand.u32 3, %v4508_v16 }
 0x3ce   : > { %6688 = vpow2.f32 %v1476_v6  ;;  %vm4099_vm12 = vweird.f32 %v10428_v58  ;;  %vm4511_vm11 = vweird.f32 %v10431_v56  ;;  %vm4101_vm13 = vcmp.lt.s32.totalorder %v4100_v12, 2  ;;  %v12803_v56 = vld [vmem:[#allocation30_spill] sm:$0xff] }
 0x3cf   : > { %v6197_v59 = vmin.u32 %v4897_v57, %v10893_v3  ;;  %v6683_v20 = vpop.eup %6682  ;;  %6690 = vpow2.f32 %v1484_v10  ;;  %vm4102_vm14 = vcmp.eq.s32.totalorder %v4100_v12, 0  ;;  %vm4105_vm9 = vcmp.eq.s32.totalorder %v4100_v12, 2  ;;  %v12800_v12 = vld [vmem:[#allocation28_spill] sm:$0xff] }
 0x3d0   : > { %v4953_v32 = vmul.f32 %v6683_v20, %v3697_v41  ;;  %6692 = vpow2.f32 %v1492_v43  ;;  %v4104_v8 = vsel %vm4102_vm14, %v6679_v35, %v4103_v46  ;;  %v4107_v30 = vsel %vm4105_vm9, %v4106_v45, %v6681_v1  ;;  %v12798_v35 = vld [vmem:[#allocation26_spill] sm:$0xff]  ;;  %v12799_v43 = vld [vmem:[#allocation27_spill] sm:$0xff] }
 0x3d1   : > { %v4899_v21 = vclz %v6197_v59  ;;  %vm4513_vm7 = vcmp.lt.s32.totalorder %v4512_v44, 2  ;;  %vm4833_vm15 = vcmp.lt.s32.totalorder %v10434_v28, 0  ;;  %vm4514_vm0 = vcmp.eq.s32.totalorder %v4512_v44, 0 }
 0x3d2   : > { %vm4517_vm1 = vcmp.eq.s32.totalorder %v4512_v44, 2  ;;  %v10906_v4 = vmul.f32 %v12793_v52, %v4953_v32  ;;  %vm10910_vm3 = vcmp.le.f32.partialorder %v4831_v19, 0.7853982  ;;  %v4887_v37 = vadd.s32 %v10829_v51, %v10827_v53  ;;  %v12797_v19 = vld [vmem:[#allocation25_spill] sm:$0xff] }
 0x3d3   : > { %v6198_v36 = vadd.s32 4294967294, %v4899_v21  ;;  %v980_v60 = vmul.f32 %v12709_v5, %v12796_v24  ;;  %v4108_v49 = vsel %vm4101_vm13, %v4104_v8, %v4107_v30  ;;  %v4917_v23 = vsub.s32 4, %v10872_v13  ;;  %v12801_v21 = vld [vmem:[#allocation29_spill] sm:$0xff]  ;;  %v12802_v8 = vld [vmem:[#allocation84_spill] sm:$0xff] }
 0x3d4   : > { %v984_v7 = vmul.f32 %v12797_v19, %v12796_v24  ;;  %v988_v6 = vmul.f32 %v12798_v35, %v12796_v24  ;;  %v4109_v16 = vsel %vm4099_vm12, nan, %v4108_v49  ;;  %v992_v41 = vmul.f32 %v12799_v43, %v12796_v24 }
 0x3d5   : > { %vm6199_vm2 = vcmp.lt.s32.totalorder %v6198_v36, 0  ;;  %v996_v59 = vmul.f32 %v12800_v12, %v12796_v24  ;;  %v1000_v32 = vmul.f32 %v12801_v21, %v12796_v24  ;;  %v4918_v58 = vsel %vm4833_vm15, %v4917_v23, %v10872_v13 }
 0x3d6   : > { %v6685_v22 = vpop.eup %6684  ;;  %v4902_v47 = vsel %vm6199_vm2, 0, %v6198_v36  ;;  %v10946_v30 = vrot.slane %v5478_v42, %v12802_v8  ;;  %v12810_v42 = vld [vmem:[#allocation35_spill] sm:$0xff]  ;;  %vm4923_vm8 = vweird.f32 %v10434_v28  ;;  %vm5579_vm13 = vcmask 130048  }
 0x3d7   : > { %v6687_v48 = vpop.eup %6686  ;;  %v4518_v63 = vxor.u32 2147483648, %v6685_v22  ;;  %v4903_v2 = vsub.s32 32, %v4902_v47  ;;  %v4907_v0 = vsub.s32 4294967266, %v4902_v47  ;;  %v4904_v51 = vshll.u32 %v10893_v3, %v4902_v47  ;;  %v12805_v47 = vld [vmem:[#allocation32_spill] sm:$0xff] }
 0x3d8   : > { %v4515_v34 = vxor.u32 2147483648, %v6687_v48  ;;  %v6689_v10 = vpop.eup %6688 }
 0x3d9   : > { %v4519_v54 = vsel %vm4517_vm1, %v4518_v63, %v6687_v48  ;;  %v4905_v11 = vshrl.u32 %v4887_v37, %v4903_v2  ;;  %v4908_v1 = vadd.s32 127, %v4907_v0  ;;  %v6691_v20 = vpop.eup %6690  ;;  %v4957_v63 = vmul.f32 %v6689_v10, %v4109_v16  ;;  %v12804_v37 = vld [vmem:[#allocation43_spill] sm:$0xff]  ;;  %v12807_v0 = vld [vmem:[#allocation86_spill] sm:$0xff]  ;;  %v12811_v10 = vld [vmem:[#allocation36_spill] sm:$0xff] }
 0x3da   : > { %v4516_v53 = vsel %vm4514_vm0, %v6685_v22, %v4515_v34  ;;  %v10937_v36 = vpop.eup %6692  ;;  %v1004_v22 = vmul.f32 %v12803_v56, %v12796_v24  ;;  %v1072_v49 = vmul.f32 %v12805_v47, %v12804_v37  ;;  %v12806_v34 = vld [vmem:[#allocation33_spill] sm:$0xff]  ;;  %v1080_v17 = vmul.f32 %v12809_v61, %v12804_v37 }
 0x3db   : > { %v4520_v57 = vsel %vm4513_vm7, %v4516_v53, %v4519_v54  ;;  %v4906_v45 = vor.u32 %v4905_v11, %v4904_v51  ;;  %v4909_v3 = vshll.u32 %v4908_v1, 23  ;;  %v1076_v2 = vmul.f32 %v12806_v34, %v12804_v37  ;;  %v12808_v54 = vld [vmem:[#allocation31_spill] sm:$0xff] }
 0x3dc   : > { %v4521_v46 = vsel %vm4511_vm11, nan, %v4520_v57  ;;  %v1008_v23 = vmul.f32 %v12808_v54, %v12796_v24  ;;  %v1084_v53 = vmul.f32 %v12810_v42, %v12804_v37  ;;  %v4920_v1 = vsel %vm10910_vm3, 0, %v4918_v58 }
 0x3dd   : > { %v4961_v44 = vmul.f32 %v6691_v20, %v4521_v46  ;;  %v4910_v48 = vor.u32 4788187, %v4909_v3  ;;  %v4913_v11 = vcvt.s32.f32 %v4906_v45  ;;  %v1088_v16 = vmul.f32 %v12811_v10, %v12804_v37  ;;  %v12812_v20 = vld [vmem:[#allocation37_spill] sm:$0xff]  ;;  %v12813_v3 = vld [vmem:[#allocation38_spill] sm:$0xff]  ;;  %v12815_v45 = vld [vmem:[#allocation88_spill] sm:$0xff] }
 0x3de   : > { %v1092_v46 = vmul.f32 %v12812_v20, %v12804_v37  ;;  %v10976_v52 = vmul.f32 %v12815_v45, %v4957_v63  ;;  %v1104_v58 = vadd.f32 %v1072_v49, %v980_v60  ;;  %v1108_v14 = vadd.f32 %v1076_v2, %v984_v7  ;;  %v12816_v49 = vld [vmem:[#allocation23_spill] sm:$0xff] }
 0x3df   : > { %v10955_v13 = vmul.f32 %v12807_v0, %v4961_v44  ;;  %v4911_v51 = vand.u32 2147483647, %v4910_v48  ;;  %v1096_v44 = vmul.f32 %v12813_v3, %v12804_v37  ;;  %v12814_v0 = vld [vmem:[#allocation39_spill] sm:$0xff]  ;;  %v10978_v9 = vand.u32 3, %v4920_v1 }
 0x3e0   : > { %v1100_v33 = vmul.f32 %v12814_v0, %v12804_v37  ;;  %v1112_v26 = vadd.f32 %v1080_v17, %v988_v6  ;;  %v10980_v27 = vadd.f32 %v1084_v53, %v992_v41  ;;  %v1136_v57 = vmul.f32 %v12804_v37, %v12709_v5 }
 0x3e1   : > { %v4914_v48 = vmul.f32 %v4913_v11, %v4911_v51  ;;  %v1140_v15 = vmul.f32 %v12804_v37, %v12797_v19  ;;  %v1144_v51 = vmul.f32 %v12804_v37, %v12798_v35  ;;  %v1148_v63 = vmul.f32 %v12804_v37, %v12799_v43 }
 0x3e2   : > { %v1152_v60 = vmul.f32 %v12804_v37, %v12800_v12  ;;  %v1156_v7 = vmul.f32 %v12804_v37, %v12801_v21  ;;  %v1160_v6 = vmul.f32 %v12804_v37, %v12803_v56  ;;  %v1164_v5 = vmul.f32 %v12804_v37, %v12808_v54  ;;  %v12817_v54 = vld [vmem:[#allocation21_spill] sm:$0xff] }
 0x3e3   : > { %v4915_v40 = vxor.u32 2147483648, %v4914_v48  ;;  %v1168_v35 = vmul.f32 %v12805_v47, %v12796_v24  ;;  %v1172_v43 = vmul.f32 %v12806_v34, %v12796_v24  ;;  %v1176_v41 = vmul.f32 %v12809_v61, %v12796_v24 }
 0x3e4   : > { %v1180_v21 = vmul.f32 %v12810_v42, %v12796_v24  ;;  %v1184_v56 = vmul.f32 %v12811_v10, %v12796_v24  ;;  %v1192_v37 = vmul.f32 %v12813_v3, %v12796_v24  ;;  %v1196_v47 = vmul.f32 %v12814_v0, %v12796_v24  ;;  %v12818_v3 = vld [vmem:[#allocation40_spill] sm:$0xff] }
 0x3e5   : > { %v4916_v19 = vsel %vm4833_vm15, %v4915_v40, %v4914_v48  ;;  %v1188_v40 = vmul.f32 %v12812_v20, %v12796_v24  ;;  %v1536_v34 = vmul.f32 %v12816_v49, %v1104_v58  ;;  %v11020_v62 = vadd.f32 %v1088_v16, %v996_v59 }
 0x3e6   : > { %v4919_v12 = vsel %vm10910_vm3, %v10434_v28, %v4916_v19  ;;  %v11022_v2 = vadd.f32 %v1092_v46, %v1000_v32  ;;  %v1540_v61 = vmul.f32 %v12817_v54, %v1108_v14  ;;  %v11025_v17 = vadd.f32 %v1096_v44, %v1004_v22 }
 0x3e7   : > { %6694 = vcosq.f32 %v4919_v12  ;;  %v11027_v42 = vadd.f32 %v1100_v33, %v1008_v23  ;;  %v1200_v53 = vsub.f32 %v1136_v57, %v1168_v35  ;;  %v1204_v11 = vsub.f32 %v1140_v15, %v1172_v43  ;;  %v12819_v33 = vld [vmem:[#allocation70_spill] sm:$0xff]  ;;  %v12821_v43 = vld [vmem:[#allocation76_spill] sm:$0xff] }
 0x3e8   : > { %6696 = vsinq.f32 %v4919_v12  ;;  %v1208_v1 = vsub.f32 %v1144_v51, %v1176_v41  ;;  %v1212_v10 = vsub.f32 %v1148_v63, %v1180_v21  ;;  %v1216_v20 = vsub.f32 %v1152_v60, %v1184_v56  ;;  %v12820_v57 = vld [vmem:[#allocation54_spill] sm:$0xff] }
 0x3e9   : > { %v11030_v24 = vadd.f32 %v12818_v3, %v1536_v34  ;;  %vm4929_vm4 = vcmp.eq.s32.totalorder %v10978_v9, 2  ;;  %v1220_v59 = vsub.f32 %v1156_v7, %v1188_v40  ;;  %v1224_v0 = vsub.f32 %v1160_v6, %v1192_v37 }
 0x3ea   : > { %v1228_v32 = vsub.f32 %v1164_v5, %v1196_v47  ;;  %v1232_v16 = vmul.f32 %v1104_v58, %v1104_v58  ;;  %vm4926_vm5 = vcmp.eq.s32.totalorder %v10978_v9, 0  ;;  %v1236_v22 = vmul.f32 %v1108_v14, %v1108_v14 }
 0x3eb   : > { %v1240_v46 = vmul.f32 %v1112_v26, %v1112_v26  ;;  %v1544_v23 = vmul.f32 %v12819_v33, %v1112_v26  ;;  %v11036_v15 = vadd.f32 %v12820_v57, %v1540_v61  ;;  %vm4925_vm6 = vcmp.lt.s32.totalorder %v10978_v9, 2 }
 0x3ec   : > { %v1244_v44 = vmul.f32 %v10980_v27, %v10980_v27  ;;  %v1248_v48 = vmul.f32 %v11020_v62, %v11020_v62  ;;  %v1844_v51 = vand.u32 2147483647, %v11030_v24  ;;  %v1847_v58 = vand.u32 2139095040, %v11030_v24 }
 0x3ed   : > { %v1252_v26 = vmul.f32 %v11022_v2, %v11022_v2  ;;  %v11050_v14 = vmul.f32 %v11025_v17, %v11025_v17  ;;  %v1264_v63 = vmul.f32 %v1200_v53, %v1200_v53  ;;  %v1268_v60 = vmul.f32 %v1204_v11, %v1204_v11 }
 0x3ee   : > { %v11054_v7 = vmul.f32 %v11027_v42, %v11027_v42  ;;  %v1272_v6 = vmul.f32 %v1208_v1, %v1208_v1  ;;  %v1276_v5 = vmul.f32 %v1212_v10, %v1212_v10  ;;  %v1848_v19 = vshrl.u32 %v1847_v58, 23 }
 0x3ef   : > { %v1280_v35 = vmul.f32 %v1216_v20, %v1216_v20  ;;  %v11057_v41 = vadd.f32 %v12821_v43, %v1544_v23  ;;  %v1851_v12 = vand.u32 8388607, %v1844_v51  ;;  %v2259_v21 = vand.u32 2139095040, %v11036_v15 }
 0x3f0   : > { %v1284_v40 = vmul.f32 %v1220_v59, %v1220_v59  ;;  %v11062_v37 = vmul.f32 %v1224_v0, %v1224_v0  ;;  %v11064_v47 = vmul.f32 %v1228_v32, %v1228_v32  ;;  %v6080_v49 = vadd.s32 4294967169, %v1848_v19 }
 0x3f1   : > { %v6695_v56 = vpop.eup %6694  ;;  %v11066_v61 = vadd.f32 %v1264_v63, %v1232_v16  ;;  %v11068_v53 = vadd.f32 %v1268_v60, %v1236_v22  ;;  %v2260_v11 = vshrl.u32 %v2259_v21, 23  ;;  %v11070_v10 = vadd.f32 %v1272_v6, %v1240_v46  ;;  %v12823_v21 = vld [vmem:[#allocation83_spill] sm:$0xff] }
 0x3f2   : > { %v6697_v34 = vpop.eup %6696  ;;  %v4930_v54 = vxor.u32 2147483648, %v6695_v56  ;;  %v1854_v20 = vadd.s32 1, %v6080_v49  ;;  %v12424_v3 = vand.u32 2147483647, %v11036_v15  ;;  %v1852_v0 = vor.u32 8388608, %v1851_v12 }
 0x3f3   : > { %v4927_v1 = vxor.u32 2147483648, %v6697_v34  ;;  %v6096_v32 = vadd.s32 4294967169, %v2260_v11  ;;  %v2671_v33 = vand.u32 2139095040, %v11057_v41  ;;  %v11078_v23 = vadd.f32 %v1276_v5, %v1244_v44 }
 0x3f4   : > { %v4931_v59 = vsel %vm4929_vm4, %v4930_v54, %v6697_v34  ;;  %v11080_v22 = vadd.f32 %v1280_v35, %v1248_v48  ;;  %vm1855_vm10 = vcmp.gt.s32.totalorder %v1854_v20, 0  ;;  %v11084_v57 = vadd.f32 %v1284_v40, %v1252_v26 }
 0x3f5   : > { %v4928_v16 = vsel %vm4926_vm5, %v6695_v56, %v4927_v1  ;;  %v1856_v58 = vsel %vm1855_vm10, %v1854_v20, 0  ;;  %v2266_v63 = vadd.s32 1, %v6096_v32  ;;  %v12822_v6 = vcombine.low %v10906_v4, %v10955_v13 }
 0x3f6   : > { %v4932_v46 = vsel %vm4925_vm6, %v4928_v16, %v4931_v59  ;;  %v1857_v44 = vshrl.u32 %v1856_v58, 5  ;;  %v1858_v5 = vand.u32 31, %v1856_v58  ;;  %v11093_v35 = vshll.u32 %v1852_v0, 8 }
 0x3f7   : > { %v4933_v60 = vsel %vm4923_vm8, nan, %v4932_v46  ;;  %v5469_v19 = vrot.slane %v12822_v6, %v9752_v38  ;;  %v11097_v9 = vand.u32 8388607, %v12424_v3  ;;  %v2672_v26 = vshrl.u32 %v2671_v33, 23 }
 0x3f8   : > { %v4965_v48 = vmul.f32 %v10937_v36, %v4933_v60  ;;  %v1859_v43 = vsub.s32 32, %v1858_v5  ;;  %v1861_v28 = vshll.u32 %v12545_v31, %v1858_v5  ;;  %v1864_v12 = vshll.u32 %v12546_v29, %v1858_v5 }
 0x3f9   : > { %vm2267_vm12 = vcmp.gt.s32.totalorder %v2266_v63, 0  ;;  %v1867_v13 = vshll.u32 %v12547_v55, %v1858_v5  ;;  %v1870_v56 = vshll.u32 %v12548_v18, %v1858_v5  ;;  %v1873_v36 = vshll.u32 %v12746_v25, %v1858_v5 }
 0x3fa   : > { %v5037_v4 = vmul.f32 %v12823_v21, %v4965_v48  ;;  %v1862_v40 = vshrl.u32 %v12546_v29, %v1859_v43  ;;  %v1865_v49 = vshrl.u32 %v12547_v55, %v1859_v43  ;;  %v1868_v34 = vshrl.u32 %v12548_v18, %v1859_v43 }
 0x3fb   : > { %vm1876_vm11 = vcmp.lt.s32.totalorder %v1857_v44, 1  ;;  %v1860_v11 = vshrl.u32 %v12545_v31, %v1859_v43  ;;  %v1871_v1 = vshrl.u32 %v12746_v25, %v1859_v43  ;;  %v1874_v20 = vshrl.u32 %v12747_v50, %v1859_v43 }
 0x3fc   : > { %v5470_v54 = vcombine.low %v10976_v52, %v5037_v4  ;;  %v1863_v59 = vor.u32 %v1862_v40, %v1861_v28  ;;  %v1866_v0 = vor.u32 %v1865_v49, %v1864_v12  ;;  %v1869_v32 = vor.u32 %v1868_v34, %v1867_v13 }
 0x3fd   : > { %vm1878_vm14 = vcmp.lt.s32.totalorder %v1857_v44, 3  ;;  %v1872_v16 = vor.u32 %v1871_v1, %v1870_v56  ;;  %v1875_v46 = vor.u32 %v1874_v20, %v1873_v36  ;;  %vm1879_vm9 = vcmp.lt.s32.totalorder %v1857_v44, 4 }
 0x3fe   : > { %v5477_v33 = vrot.slane %v5470_v54, %v9752_v38  ;;  %v1880_v58 = vsel %vm1876_vm11, %v1860_v11, %v1863_v59  ;;  %v1881_v60 = vsel %vm1879_vm9, %v1869_v32, 2102212464  ;;  %v1884_v52 = vsel %vm1876_vm11, %v1863_v59, %v1866_v0 }
 0x3ff   : > { %v1888_v6 = vsel %vm1876_vm11, %v1866_v0, %v1869_v32  ;;  %v1882_v48 = vsel %vm1878_vm14, %v1866_v0, %v1881_v60  ;;  %v1885_v43 = vsel %vm1879_vm9, %v1872_v16, 920167782  ;;  %v1889_v4 = vsel %vm1879_vm9, %v1875_v46, 1326507024  ;;  %v12824_v0 = vld [vmem:[#allocation71_spill] sm:$0xff] }
 0x400   : > { %v5486_v5 = vcombine.low %v5469_v19, %v5477_v33  ;;  %vm1877_vm7 = vcmp.lt.s32.totalorder %v1857_v44, 2  ;;  %v1886_v28 = vsel %vm1878_vm14, %v1869_v32, %v1885_v43  ;;  %v1890_v12 = vsel %vm1878_vm14, %v1872_v16, %v1889_v4 }
 0x401   : > { %v2268_v13 = vsel %vm2267_vm12, %v2266_v63, 0  ;;  %v1883_v36 = vsel %vm1877_vm7, %v1880_v58, %v1882_v48  ;;  %v1887_v40 = vsel %vm1877_vm7, %v1884_v52, %v1886_v28  ;;  %v1891_v49 = vsel %vm1877_vm7, %v1888_v6, %v1890_v12 }
 0x402   : > { %v5493_v56 = vrot.slane %v5486_v5, %v12802_v8  ;;  %v11119_v34 = vmul.u32.u64.low %v11093_v35, %v1891_v49  ;;  %v11120_v54 = vmul.u32.u64.high %v11093_v35, %v1891_v49, %v11119_v34  ;;  %v11130_v1 = vadd.f32 %v11062_v37, %v11050_v14 }
 0x403   : > { %v11123_v11 = vmul.u32.u64.low %v11093_v35, %v1887_v40  ;;  %v11124_v19 = vmul.u32.u64.high %v11093_v35, %v1887_v40, %v11123_v11  ;;  %v11134_v63 = vadd.f32 %v11064_v47, %v11054_v7  ;;  %v2270_v20 = vand.u32 31, %v2268_v13 }
 0x404   : > { %v5494_v44 = vcombine.low %v10946_v30, %v5493_v56  ;;  %v11137_v59 = vmul.f32 -0.5, %v11066_v61  ;;  %v11141_v32 = vmul.f32 %v12824_v0, %v10980_v27  ;;  %v2264_v33 = vor.u32 8388608, %v11097_v9 }
 0x405   : > { %v6112_v16 = vadd.s32 4294967169, %v2672_v26  ;;  %v1899_v46 = vmul.u32 %v11093_v35, %v1883_v36  ;;  %v2269_v14 = vshrl.u32 %v2268_v13, 5  ;;  %v2271_v37 = vsub.s32 32, %v2270_v20 }
 0x406   : > { %v5610_v30 = vpack.c.bf16 %v5494_v44, %v5494_v44  ;;  %vm1901_vm15 = vc.u32 %v11120_v54, %v11123_v11  ;;  %v1902_v7 = vadd.s32 1, %v11124_v19  ;;  %v2273_v47 = vshll.u32 %v12545_v31, %v2270_v20 }
 0x407   : > { %v2276_v61 = vshll.u32 %v12546_v29, %v2270_v20  ;;  %v2274_v27 = vshrl.u32 %v12546_v29, %v2271_v37  ;;  %v2277_v9 = vshrl.u32 %v12547_v55, %v2271_v37  ;;  %v2279_v26 = vshll.u32 %v12547_v55, %v2270_v20 }
 0x408   : > { %6200 = vmatprep.mubr.msk.bf16.mxu1 %vm5579_vm13, %v5610_v30  ;;  %v2280_v35 = vshrl.u32 %v12548_v18, %v2271_v37  ;;  %v1903_v58 = vsel %vm1901_vm15, %v1902_v7, %v11124_v19  ;;  %v2282_v60 = vshll.u32 %v12548_v18, %v2270_v20  ;;  %v2283_v52 = vshrl.u32 %v12746_v25, %v2271_v37 }
 0x409   : > { %v2678_v6 = vadd.s32 1, %v6112_v16  ;;  %v1904_v5 = vadd.s32 %v1903_v58, %v1899_v46  ;;  %v2275_v48 = vor.u32 %v2274_v27, %v2273_v47  ;;  %v2278_v43 = vor.u32 %v2277_v9, %v2276_v61 }
 0x40a   : > { %v2281_v4 = vor.u32 %v2280_v35, %v2279_v26  ;;  %v2272_v28 = vshrl.u32 %v12545_v31, %v2271_v37  ;;  %v2284_v12 = vor.u32 %v2283_v52, %v2282_v60  ;;  %v2285_v13 = vshll.u32 %v12746_v25, %v2270_v20 }
 0x40b   : > { %v2286_v56 = vshrl.u32 %v12747_v50, %v2271_v37  ;;  %v1905_v36 = vadd.s32 536870912, %v1904_v5  ;;  %vm2288_vm0 = vcmp.lt.s32.totalorder %v2269_v14, 1  ;;  %vm2290_vm1 = vcmp.lt.s32.totalorder %v2269_v14, 3 }
 0x40c   : > { %vm2291_vm2 = vcmp.lt.s32.totalorder %v2269_v14, 4  ;;  %v2296_v34 = vsel %vm2288_vm0, %v2275_v48, %v2278_v43  ;;  %vm2289_vm3 = vcmp.lt.s32.totalorder %v2269_v14, 2  ;;  %v2300_v16 = vsel %vm2288_vm0, %v2278_v43, %v2281_v4 }
 0x40d   : > { %v2287_v40 = vor.u32 %v2286_v56, %v2285_v13  ;;  %v2293_v49 = vsel %vm2291_vm2, %v2281_v4, 2102212464  ;;  %v2297_v19 = vsel %vm2291_vm2, %v2284_v12, 920167782  ;;  %v11162_v44 = vshrl.u32 %v1905_v36, 30  ;;  %v12825_v56 = vld [vmem:[#allocation77_spill] sm:$0xff] }
 0x40e   : > { %v2298_v0 = vsel %vm2290_vm1, %v2281_v4, %v2297_v19  ;;  %v2304_v46 = vshll.u32 %v2264_v33, 8  ;;  %vm2679_vm4 = vcmp.gt.s32.totalorder %v2678_v6, 0  ;;  %v2292_v7 = vsel %vm2288_vm0, %v2272_v28, %v2275_v48  ;;  %v12829_v19 = vld [vmem:[#allocation64_spill] sm:$0xff] }
 0x40f   : > { %v2299_v20 = vsel %vm2289_vm3, %v2296_v34, %v2298_v0  ;;  %v2301_v30 = vsel %vm2291_vm2, %v2287_v40, 1326507024  ;;  %v1907_v37 = vshll.u32 %v11162_v44, 30  ;;  %v2294_v47 = vsel %vm2290_vm1, %v2278_v43, %v2293_v49 }
 0x410   : > { %v2302_v61 = vsel %vm2290_vm1, %v2284_v12, %v2301_v30  ;;  %v11172_v9 = vmul.u32.u64.low %v2304_v46, %v2299_v20  ;;  %v11173_v26 = vmul.u32.u64.high %v2304_v46, %v2299_v20, %v11172_v9  ;;  %v2680_v35 = vsel %vm2679_vm4, %v2678_v6, 0 }
 0x411   : > { %v2303_v27 = vsel %vm2289_vm3, %v2300_v16, %v2302_v61  ;;  %v1332_v58 = vmul.f32 -0.5, %v11068_v53  ;;  %v11177_v60 = vsub.s32 %v1904_v5, %v1907_v37  ;;  %v1336_v48 = vmul.f32 -0.5, %v11070_v10 }
 0x412   : > { %v11179_v33 = vmul.u32.u64.low %v2304_v46, %v2303_v27  ;;  %v11180_v52 = vmul.u32.u64.high %v2304_v46, %v2303_v27, %v11179_v33  ;;  %v1340_v43 = vmul.f32 -0.5, %v11078_v23  ;;  %v12423_v4 = vand.u32 2147483647, %v11057_v41 }
 0x413   : > { %v2682_v28 = vand.u32 31, %v2680_v35  ;;  %v1344_v12 = vmul.f32 -0.5, %v11080_v22  ;;  %v1348_v13 = vmul.f32 -0.5, %v11084_v57  ;;  %v1910_v6 = vsub.s32 0, %v11177_v60  ;;  %v12827_v22 = vld [vmem:[#allocation62_spill] sm:$0xff]  ;;  %v12828_v57 = vld [vmem:[#allocation63_spill] sm:$0xff] }
 0x414   : > { %v2295_v53 = vsel %vm2289_vm3, %v2292_v7, %v2294_v47  ;;  %v1352_v5 = vmul.f32 -0.5, %v11130_v1  ;;  %v11192_v36 = vadd.f32 %v12825_v56, %v11141_v32  ;;  %v2314_v10 = vadd.s32 1, %v11173_v26 }
 0x415   : > { %v2683_v23 = vsub.s32 32, %v2682_v28  ;;  %v11196_v40 = vmul.f32 -0.5, %v11134_v63  ;;  %v1400_v49 = vmul.f32 %v12827_v22, %v11137_v59  ;;  %v1404_v34 = vmul.f32 %v12828_v57, %v1332_v58 }
 0x416   : > { %v6081_v14 = vmin.u32 %v1910_v6, %v11177_v60  ;;  %v11203_v0 = vmul.f32 %v12829_v19, %v1336_v48  ;;  %v2311_v1 = vmul.u32 %v2304_v46, %v2295_v53  ;;  %vm2313_vm5 = vc.u32 %v11180_v52, %v11172_v9 }
 0x417   : > { %12826 = vst [vmem:[#allocation53_spill] sm:$0xff] %v11196_v40  ;;  %v2675_v32 = vand.u32 8388607, %v12423_v4  ;;  %v2315_v63 = vsel %vm2313_vm5, %v2314_v10, %v11173_v26  ;;  %v2686_v20 = vshrl.u32 %v12546_v29, %v2683_v23  ;;  %v2689_v59 = vshrl.u32 %v12547_v55, %v2683_v23 }
 0x418   : > { %v1912_v16 = vclz %v6081_v14  ;;  %v2316_v30 = vadd.s32 %v2315_v63, %v2311_v1  ;;  %v2685_v37 = vshll.u32 %v12545_v31, %v2682_v28  ;;  %v2692_v7 = vshrl.u32 %v12548_v18, %v2683_v23  ;;  %v12830_v1 = vld [vmem:[#allocation65_spill] sm:$0xff] }
 0x419   : > { %v3083_v46 = vand.u32 2139095040, %v11192_v36  ;;  %v2688_v61 = vshll.u32 %v12546_v29, %v2682_v28  ;;  %v2694_v27 = vshll.u32 %v12548_v18, %v2682_v28  ;;  %v2695_v58 = vshrl.u32 %v12746_v25, %v2683_v23 }
 0x41a   : > { %v6082_v47 = vadd.s32 4294967294, %v1912_v16  ;;  %v2317_v33 = vadd.s32 536870912, %v2316_v30  ;;  %v2681_v26 = vshrl.u32 %v2680_v35, 5  ;;  %v2691_v48 = vshll.u32 %v12547_v55, %v2682_v28  ;;  %v12831_v35 = vld [vmem:[#allocation67_spill] sm:$0xff] }
 0x41b   : > { %v2698_v6 = vshrl.u32 %v12747_v50, %v2683_v23  ;;  %v2687_v53 = vor.u32 %v2686_v20, %v2685_v37  ;;  %v2690_v56 = vor.u32 %v2689_v59, %v2688_v61  ;;  %v2696_v10 = vor.u32 %v2695_v58, %v2694_v27 }
 0x41c   : > { %vm6083_vm6 = vcmp.lt.s32.totalorder %v6082_v47, 0  ;;  %v11222_v57 = vshrl.u32 %v2317_v33, 30  ;;  %v2693_v14 = vor.u32 %v2692_v7, %v2691_v48  ;;  %v2697_v19 = vshll.u32 %v12746_v25, %v2682_v28 }
 0x41d   : > { %v11220_v22 = vsel %vm6083_vm6, 0, %v6082_v47  ;;  %v1412_v16 = vmul.f32 %v12830_v1, %v1340_v43  ;;  %v1416_v63 = vmul.f32 %v12783_v39, %v1344_v12  ;;  %v11228_v4 = vmul.f32 %v12831_v35, %v1348_v13  ;;  %v12833_v47 = vld [vmem:[#allocation68_spill] sm:$0xff] }
 0x41e   : > { %v1920_v3 = vsub.s32 4294967266, %v11220_v22  ;;  %v2319_v20 = vshll.u32 %v11222_v57, 30  ;;  %v2699_v59 = vor.u32 %v2698_v6, %v2697_v19  ;;  %vm2700_vm8 = vcmp.lt.s32.totalorder %v2681_v26, 1 }
 0x41f   : > { %12832 = vst [vmem:[#allocation51_spill] sm:$0xff] %v11228_v4  ;;  %vm2703_vm10 = vcmp.lt.s32.totalorder %v2681_v26, 4  ;;  %v2676_v37 = vor.u32 8388608, %v2675_v32  ;;  %vm2702_vm12 = vcmp.lt.s32.totalorder %v2681_v26, 3  ;;  %v2708_v7 = vsel %vm2700_vm8, %v2687_v53, %v2690_v56 }
 0x420   : > { %v2709_v28 = vsel %vm2703_vm10, %v2696_v10, 920167782  ;;  %v1424_v43 = vmul.f32 %v12833_v47, %v1352_v5  ;;  %v11235_v61 = vsub.s32 %v2316_v30, %v2319_v20  ;;  %v3084_v12 = vshrl.u32 %v3083_v46, 23 }
 0x421   : > { %v2710_v39 = vsel %vm2702_vm12, %v2693_v14, %v2709_v28  ;;  %v1921_v13 = vadd.s32 127, %v1920_v3  ;;  %v2684_v27 = vshrl.u32 %v12545_v31, %v2683_v23  ;;  %vm2701_vm11 = vcmp.lt.s32.totalorder %v2681_v26, 2 }
 0x422   : > { %v2705_v58 = vsel %vm2703_vm10, %v2693_v14, 2102212464  ;;  %v2322_v32 = vsub.s32 0, %v11235_v61  ;;  %v2711_v33 = vsel %vm2701_vm11, %v2708_v7, %v2710_v39  ;;  %v2712_v48 = vsel %vm2700_vm8, %v2690_v56, %v2693_v14 }
 0x423   : > { %v2713_v6 = vsel %vm2703_vm10, %v2699_v59, 1326507024  ;;  %v1434_v5 = vmul.f32 1.442695, %v1400_v49  ;;  %v1442_v30 = vmul.f32 1.442695, %v1404_v34  ;;  %v2704_v46 = vsel %vm2700_vm8, %v2684_v27, %v2687_v53 }
 0x424   : > { %v2714_v19 = vsel %vm2702_vm12, %v2696_v10, %v2713_v6  ;;  %v2716_v1 = vshll.u32 %v2676_v37, 8  ;;  %v1916_v3 = vsub.s32 32, %v11220_v22  ;;  %v6097_v23 = vmin.u32 %v2322_v32, %v11235_v61 }
 0x425   : > { %v2706_v35 = vsel %vm2702_vm12, %v2690_v56, %v2705_v58  ;;  %v1922_v20 = vshll.u32 %v1921_v13, 23  ;;  %v2715_v7 = vsel %vm2701_vm11, %v2712_v48, %v2714_v19  ;;  %v6128_v10 = vadd.s32 4294967169, %v3084_v12  ;;  %v12836_v19 = vld [vmem:[#allocation74_spill] sm:$0xff] }
 0x426   : > { %v11250_v28 = vmul.u32.u64.low %v2716_v1, %v2711_v33  ;;  %v11251_v14 = vmul.u32.u64.high %v2716_v1, %v2711_v33, %v11250_v28  ;;  %v2324_v49 = vclz %v6097_v23  ;;  %v1450_v37 = vmul.f32 1.442695, %v11203_v0 }
 0x427   : > { %v11254_v34 = vmul.u32.u64.low %v2716_v1, %v2715_v7  ;;  %v11255_v59 = vmul.u32.u64.high %v2716_v1, %v2715_v7, %v11254_v34  ;;  %v1458_v47 = vmul.f32 1.442695, %v1412_v16  ;;  %v1466_v39 = vmul.f32 1.442695, %v1416_v63  ;;  %v12834_v63 = vld [vmem:[#allocation72_spill] sm:$0xff] }
 0x428   : > { %v1900_v53 = vadd.s32 %v11123_v11, %v11120_v54  ;;  %v11260_v56 = vmul.f32 1.442695, %v1424_v43  ;;  %v6098_v13 = vadd.s32 4294967294, %v2324_v49  ;;  %v2707_v27 = vsel %vm2701_vm11, %v2704_v46, %v2706_v35 }
 0x429   : > { %v3090_v58 = vadd.s32 1, %v6128_v10  ;;  %v1917_v32 = vshll.u32 %v11177_v60, %v11220_v22  ;;  %v2726_v48 = vadd.s32 1, %v11251_v14  ;;  %v12426_v12 = vand.u32 2147483647, %v11192_v36  ;;  %v12835_v22 = vld [vmem:[#allocation73_spill] sm:$0xff] }
 0x42a   : > { %v1918_v33 = vshrl.u32 %v1900_v53, %v1916_v3  ;;  %v1923_v0 = vor.u32 4788187, %v1922_v20  ;;  %vm6099_vm14 = vcmp.lt.s32.totalorder %v6098_v13, 0  ;;  %vm2725_vm9 = vc.u32 %v11255_v59, %v11250_v28 }
 0x42b   : > { %vm3091_vm7 = vcmp.gt.s32.totalorder %v3090_v58, 0  ;;  %v2327_v54 = vsel %vm6099_vm14, 0, %v6098_v13  ;;  %v2723_v11 = vmul.u32 %v2716_v1, %v2707_v27  ;;  %v2727_v26 = vsel %vm2725_vm9, %v2726_v48, %v11251_v14  ;;  %v12837_v1 = vld [vmem:[#allocation75_spill] sm:$0xff] }
 0x42c   : > { %v3092_v16 = vsel %vm3091_vm7, %v3090_v58, 0  ;;  %6698 = vpow2.f32 %v1434_v5  ;;  %v1552_v60 = vmul.f32 %v12834_v63, %v11020_v62  ;;  %v1556_v43 = vmul.f32 %v12835_v22, %v11022_v2  ;;  %v12838_v2 = vld [vmem:[#allocation78_spill] sm:$0xff]  ;;  %v12840_v58 = vld [vmem:[#allocation80_spill] sm:$0xff] }
 0x42d   : > { %v2332_v6 = vsub.s32 4294967266, %v2327_v54  ;;  %v1560_v3 = vmul.f32 %v12836_v19, %v11025_v17  ;;  %v1919_v23 = vor.u32 %v1918_v33, %v1917_v32  ;;  %v2728_v46 = vadd.s32 %v2727_v26, %v2723_v11  ;;  %v12841_v33 = vld [vmem:[#allocation81_spill] sm:$0xff] }
 0x42e   : > { %v3094_v35 = vand.u32 31, %v3092_v16  ;;  %6700 = vpow2.f32 %v1442_v30  ;;  %v1564_v20 = vmul.f32 %v12837_v1, %v11027_v42  ;;  %v2328_v7 = vsub.s32 32, %v2327_v54  ;;  %v12839_v30 = vld [vmem:[#allocation79_spill] sm:$0xff] }
 0x42f   : > { %v2333_v14 = vadd.s32 127, %v2332_v6  ;;  %v1924_v5 = vand.u32 2147483647, %v1923_v0  ;;  %v2729_v49 = vadd.s32 536870912, %v2728_v46  ;;  %v3087_v62 = vand.u32 8388607, %v12426_v12 }
 0x430   : > { %v3095_v34 = vsub.s32 32, %v3094_v35  ;;  %6702 = vpow2.f32 %v1450_v37  ;;  %v11281_v10 = vadd.f32 %v12838_v2, %v1552_v60  ;;  %v2312_v17 = vadd.s32 %v11172_v9, %v11180_v52 }
 0x431   : > { %v2334_v53 = vshll.u32 %v2333_v14, 23  ;;  %6704 = vpow2.f32 %v1458_v47  ;;  %v11286_v13 = vadd.f32 %v12839_v30, %v1556_v43  ;;  %v1926_v42 = vcvt.s32.f32 %v1919_v23 }
 0x432   : > { %v11288_v27 = vshrl.u32 %v2729_v49, 30  ;;  %6706 = vpow2.f32 %v1466_v39  ;;  %v11291_v32 = vadd.f32 %v12840_v58, %v1560_v3  ;;  %v11294_v37 = vadd.f32 %v12841_v33, %v1564_v20 }
 0x433   : > { %v2330_v48 = vshrl.u32 %v2312_v17, %v2328_v7  ;;  %v11296_v0 = vmul.f32 %v1926_v42, %v1924_v5  ;;  %v3088_v52 = vor.u32 8388608, %v3087_v62  ;;  %v3098_v47 = vshrl.u32 %v12546_v29, %v3095_v34 }
 0x434   : > { %12842 = vst [vmem:[#allocation24_spill] sm:$0xff] %v11294_v37  ;;  %v2731_v9 = vshll.u32 %v11288_v27, 30  ;;  %v2329_v11 = vshll.u32 %v11235_v61, %v2327_v54  ;;  %v2335_v26 = vor.u32 4788187, %v2334_v53  ;;  %v3101_v63 = vshrl.u32 %v12547_v55, %v3095_v34 }
 0x435   : > { %v3107_v39 = vshrl.u32 %v12746_v25, %v3095_v34  ;;  %v3097_v22 = vshll.u32 %v12545_v31, %v3094_v35  ;;  %v3104_v43 = vshrl.u32 %v12548_v18, %v3095_v34  ;;  %v3495_v6 = vand.u32 2139095040, %v11281_v10 }
 0x436   : > { %v11303_v60 = vsub.s32 %v2728_v46, %v2731_v9  ;;  %v11308_v19 = vpop.eup %6698  ;;  %v2331_v3 = vor.u32 %v2330_v48, %v2329_v11  ;;  %v3100_v23 = vshll.u32 %v12546_v29, %v3094_v35  ;;  %v3106_v61 = vshll.u32 %v12548_v18, %v3094_v35 }
 0x437   : > { %v3110_v54 = vshrl.u32 %v12747_v50, %v3095_v34  ;;  %v3093_v20 = vshrl.u32 %v3092_v16, 5  ;;  %v3099_v46 = vor.u32 %v3098_v47, %v3097_v22  ;;  %v3103_v7 = vshll.u32 %v12547_v55, %v3094_v35 }
 0x438   : > { %v2734_v1 = vsub.s32 0, %v11303_v60  ;;  %v11315_v14 = vpop.eup %6700  ;;  %vm1846_vm15 = vcmp.lt.s32.totalorder %v11030_v24, 0  ;;  %v2336_v5 = vand.u32 2147483647, %v2335_v26  ;;  %v3102_v49 = vor.u32 %v3101_v63, %v3100_v23 }
 0x439   : > { %v3108_v62 = vor.u32 %v3107_v39, %v3106_v61  ;;  %v3109_v2 = vshll.u32 %v12746_v25, %v3094_v35  ;;  %v1928_v17 = vxor.u32 2147483648, %v11296_v0  ;;  %v1930_v53 = vsub.s32 4, %v11162_v44 }
 0x43a   : > { %v6113_v30 = vmin.u32 %v2734_v1, %v11303_v60  ;;  %v3105_v42 = vor.u32 %v3104_v43, %v3103_v7  ;;  %v11322_v16 = vpop.eup %6702  ;;  %v2338_v58 = vcvt.s32.f32 %v2331_v3  ;;  %v3128_v48 = vshll.u32 %v3088_v52, 8 }
 0x43b   : > { %v3111_v33 = vor.u32 %v3110_v54, %v3109_v2  ;;  %v3496_v9 = vshrl.u32 %v3495_v6, 23  ;;  %v11324_v47 = vpop.eup %6704  ;;  %v3096_v26 = vshrl.u32 %v12545_v31, %v3095_v34  ;;  %vm3112_vm0 = vcmp.lt.s32.totalorder %v3093_v20, 1 }
 0x43c   : > { %v2736_v11 = vclz %v6113_v30  ;;  %vm3115_vm1 = vcmp.lt.s32.totalorder %v3093_v20, 4  ;;  %v11327_v35 = vpop.eup %6706  ;;  %v2339_v63 = vmul.f32 %v2338_v58, %v2336_v5  ;;  %vm3114_vm2 = vcmp.lt.s32.totalorder %v3093_v20, 3 }
 0x43d   : > { %12843 = vst [vmem:[#allocation66_spill] sm:$0xff] %v11327_v35  ;;  %v3120_v39 = vsel %vm3112_vm0, %v3099_v46, %v3102_v49  ;;  %v3121_v22 = vsel %vm3115_vm1, %v3108_v62, 920167782  ;;  %vm3113_vm3 = vcmp.lt.s32.totalorder %v3093_v20, 2  ;;  %v3117_v23 = vsel %vm3115_vm1, %v3105_v42, 2102212464 }
 0x43e   : > { %v6114_v43 = vadd.s32 4294967294, %v2736_v11  ;;  %v3122_v3 = vsel %vm3114_vm2, %v3105_v42, %v3121_v22  ;;  %v3116_v61 = vsel %vm3112_vm0, %v3096_v26, %v3099_v46  ;;  %v3124_v6 = vsel %vm3112_vm0, %v3102_v49, %v3105_v42 }
 0x43f   : > { %v3123_v52 = vsel %vm3113_vm3, %v3120_v39, %v3122_v3  ;;  %v3125_v54 = vsel %vm3115_vm1, %v3111_v33, 1326507024  ;;  %v3118_v5 = vsel %vm3114_vm2, %v3102_v49, %v3117_v23  ;;  %v6144_v58 = vadd.s32 4294967169, %v3496_v9 }
 0x440   : > { %vm6115_vm4 = vcmp.lt.s32.totalorder %v6114_v43, 0  ;;  %v3126_v1 = vsel %vm3114_vm2, %v3108_v62, %v3125_v54  ;;  %v11330_v34 = vmul.u32.u64.low %v3128_v48, %v3123_v52  ;;  %v11331_v7 = vmul.u32.u64.high %v3128_v48, %v3123_v52, %v11330_v34 }
 0x441   : > { %v2739_v2 = vsel %vm6115_vm4, 0, %v6114_v43  ;;  %v3127_v30 = vsel %vm3113_vm3, %v3124_v6, %v3126_v1  ;;  %vm11337_vm5 = vcmp.le.f32.partialorder %v1844_v51, 0.7853982  ;;  %v1931_v46 = vsel %vm1846_vm15, %v1930_v53, %v11162_v44 }
 0x442   : > { %vm2258_vm6 = vcmp.lt.s32.totalorder %v11036_v15, 0  ;;  %v2744_v62 = vsub.s32 4294967266, %v2739_v2  ;;  %v1929_v49 = vsel %vm1846_vm15, %v1928_v17, %v11296_v0  ;;  %v3502_v9 = vadd.s32 1, %v6144_v58 }
 0x443   : > { %v11348_v42 = vmul.u32.u64.low %v3128_v48, %v3127_v30  ;;  %v11349_v33 = vmul.u32.u64.high %v3128_v48, %v3127_v30, %v11348_v42  ;;  %v3119_v51 = vsel %vm3113_vm3, %v3116_v61, %v3118_v5  ;;  %v3138_v39 = vadd.s32 1, %v11331_v7 }
 0x444   : > { %v2745_v26 = vadd.s32 127, %v2744_v62  ;;  %v12425_v22 = vand.u32 2147483647, %v11281_v10  ;;  %v1933_v44 = vsel %vm11337_vm5, 0, %v1931_v46  ;;  %v2340_v53 = vxor.u32 2147483648, %v2339_v63 }
 0x445   : > { %v2740_v43 = vsub.s32 32, %v2739_v2  ;;  %vm3503_vm8 = vcmp.gt.s32.totalorder %v3502_v9, 0  ;;  %v1932_v0 = vsel %vm11337_vm5, %v11030_v24, %v1929_v49  ;;  %v2342_v17 = vsub.s32 4, %v11222_v57 }
 0x446   : > { %v2724_v20 = vadd.s32 %v11250_v28, %v11255_v59  ;;  %v3504_v23 = vsel %vm3503_vm8, %v3502_v9, 0  ;;  %v2746_v3 = vshll.u32 %v2745_v26, 23  ;;  %v3135_v61 = vmul.u32 %v3128_v48, %v3119_v51 }
 0x447   : > { %vm3137_vm10 = vc.u32 %v11349_v33, %v11330_v34  ;;  %v3506_v52 = vand.u32 31, %v3504_v23  ;;  %6708 = vpow2.f32 %v11260_v56  ;;  %v12846_v6 = vand.u32 2147483647, %v11036_v15 }
 0x448   : > { %v3139_v1 = vsel %vm3137_vm10, %v3138_v39, %v11331_v7  ;;  %v3499_v28 = vand.u32 8388607, %v12425_v22  ;;  %v2341_v59 = vsel %vm2258_vm6, %v2340_v53, %v2339_v63  ;;  %v2742_v48 = vshrl.u32 %v2724_v20, %v2740_v43 }
 0x449   : > { %vm11367_vm12 = vcmp.le.f32.partialorder %v12846_v6, 0.7853982  ;;  %v3140_v5 = vadd.s32 %v3139_v1, %v3135_v61  ;;  %v3507_v30 = vsub.s32 32, %v3506_v52  ;;  %6710 = vcosq.f32 %v1932_v0 }
 0x44a   : > { %v11376_v58 = vand.u32 3, %v1933_v44  ;;  %v11381_v56 = vsel %vm2258_vm6, %v2342_v17, %v11222_v57  ;;  %vm2670_vm11 = vcmp.lt.s32.totalorder %v11057_v41, 0  ;;  %v2741_v7 = vshll.u32 %v11303_v60, %v2739_v2 }
 0x44b   : > { %v2747_v11 = vor.u32 4788187, %v2746_v3  ;;  %v2754_v46 = vsub.s32 4, %v11288_v27  ;;  %v3141_v62 = vadd.s32 536870912, %v3140_v5  ;;  %v11389_v63 = vsel %vm11367_vm12, %v11036_v15, %v2341_v59 }
 0x44c   : > { %v3500_v49 = vor.u32 8388608, %v3499_v28  ;;  %v3510_v42 = vshrl.u32 %v12546_v29, %v3507_v30  ;;  %v3513_v9 = vshrl.u32 %v12547_v55, %v3507_v30  ;;  %v2743_v57 = vor.u32 %v2742_v48, %v2741_v7 }
 0x44d   : > { %v11393_v26 = vshrl.u32 %v3141_v62, 30  ;;  %v3505_v51 = vshrl.u32 %v3504_v23, 5  ;;  %v3516_v60 = vshrl.u32 %v12548_v18, %v3507_v30  ;;  %v3509_v2 = vshll.u32 %v12545_v31, %v3506_v52 }
 0x44e   : > { %v3512_v39 = vshll.u32 %v12546_v29, %v3506_v52  ;;  %v3518_v44 = vshll.u32 %v12548_v18, %v3506_v52  ;;  %v3519_v53 = vshrl.u32 %v12746_v25, %v3507_v30  ;;  %v2748_v43 = vand.u32 2147483647, %v2747_v11 }
 0x44f   : > { %v3143_v17 = vshll.u32 %v11393_v26, 30  ;;  %v3515_v20 = vshll.u32 %v12547_v55, %v3506_v52  ;;  %v3522_v3 = vshrl.u32 %v12747_v50, %v3507_v30  ;;  %v3511_v61 = vor.u32 %v3510_v42, %v3509_v2 }
 0x450   : > { %v3514_v6 = vor.u32 %v3513_v9, %v3512_v39  ;;  %v3520_v23 = vor.u32 %v3519_v53, %v3518_v44  ;;  %v3521_v1 = vshll.u32 %v12746_v25, %v3506_v52  ;;  %6712 = vsinq.f32 %v1932_v0 }
 0x451   : > { %v11407_v28 = vsel %vm2670_vm11, %v2754_v46, %v11288_v27  ;;  %v11409_v59 = vsub.s32 %v3140_v5, %v3143_v17  ;;  %v3517_v48 = vor.u32 %v3516_v60, %v3515_v20  ;;  %v11411_v7 = vpop.eup %6708  ;;  %6714 = vcosq.f32 %v11389_v63 }
 0x452   : > { %12849 = vst [vmem:[#allocation42_spill] sm:$0xff] %v11411_v7  ;;  %v2750_v11 = vcvt.s32.f32 %v2743_v57  ;;  %v3523_v62 = vor.u32 %v3522_v3, %v3521_v1  ;;  %v3907_v42 = vand.u32 2139095040, %v11286_v13  ;;  %vm3524_vm14 = vcmp.lt.s32.totalorder %v3505_v51, 1 }
 0x453   : > { %v3146_v9 = vsub.s32 0, %v11409_v59  ;;  %vm3527_vm9 = vcmp.lt.s32.totalorder %v3505_v51, 4  ;;  %v3540_v0 = vshll.u32 %v3500_v49, 8  ;;  %v11416_v52 = vpop.eup %6710  ;;  %v3508_v5 = vshrl.u32 %v12545_v31, %v3507_v30 }
 0x454   : > { %v2751_v27 = vmul.f32 %v2750_v11, %v2748_v43  ;;  %v3532_v46 = vsel %vm3524_vm14, %v3511_v61, %v3514_v6  ;;  %v3533_v60 = vsel %vm3527_vm9, %v3520_v23, 920167782  ;;  %vm3526_vm7 = vcmp.lt.s32.totalorder %v3505_v51, 3 }
 0x455   : > { %v6129_v2 = vmin.u32 %v3146_v9, %v11409_v59  ;;  %v3529_v57 = vsel %vm3527_vm9, %v3517_v48, 2102212464  ;;  %v3536_v39 = vsel %vm3524_vm14, %v3514_v6, %v3517_v48  ;;  %vm3525_vm15 = vcmp.lt.s32.totalorder %v3505_v51, 2 }
 0x456   : > { %v3534_v44 = vsel %vm3526_vm7, %v3517_v48, %v3533_v60  ;;  %v3537_v53 = vsel %vm3527_vm9, %v3523_v62, 1326507024  ;;  %v3908_v17 = vshrl.u32 %v3907_v42, 23  ;;  %v3528_v49 = vsel %vm3524_vm14, %v3508_v5, %v3511_v61 }
 0x457   : > { %v3148_v20 = vclz %v6129_v2  ;;  %v3535_v43 = vsel %vm3525_vm15, %v3532_v46, %v3534_v44  ;;  %v3538_v3 = vsel %vm3526_vm7, %v3520_v23, %v3537_v53  ;;  %v3530_v30 = vsel %vm3526_vm7, %v3514_v6, %v3529_v57 }
 0x458   : > { %v3539_v1 = vsel %vm3525_vm15, %v3536_v39, %v3538_v3  ;;  %v11425_v11 = vmul.u32.u64.low %v3540_v0, %v3535_v43  ;;  %v11426_v22 = vmul.u32.u64.high %v3540_v0, %v3535_v43, %v11425_v11  ;;  %v6160_v48 = vadd.s32 4294967169, %v3908_v17 }
 0x459   : > { %v6130_v9 = vadd.s32 4294967294, %v3148_v20  ;;  %v11429_v12 = vmul.u32.u64.low %v3540_v0, %v3539_v1  ;;  %v11430_v21 = vmul.u32.u64.high %v3540_v0, %v3539_v1, %v11429_v12  ;;  %vm1939_vm0 = vcmp.eq.s32.totalorder %v11376_v58, 0 }
 0x45a   : > { %vm1942_vm1 = vcmp.eq.s32.totalorder %v11376_v58, 2  ;;  %v12850_v61 = vand.u32 2147483647, %v11057_v41  ;;  %v2752_v6 = vxor.u32 2147483648, %v2751_v27  ;;  %v6713_v62 = vpop.eup %6712  ;;  %v2345_v42 = vsel %vm11367_vm12, 0, %v11381_v56 }
 0x45b   : > { %vm6131_vm3 = vcmp.lt.s32.totalorder %v6130_v9, 0  ;;  %v3531_v12 = vsel %vm3525_vm15, %v3528_v49, %v3530_v30  ;;  %v3914_v5 = vadd.s32 1, %v6160_v48  ;;  %v11444_v46 = vpop.eup %6714  ;;  %v3550_v57 = vadd.s32 1, %v11426_v22 }
 0x45c   : > { %vm11436_vm2 = vcmp.le.f32.partialorder %v12850_v61, 0.7853982  ;;  %v3151_v2 = vsel %vm6131_vm3, 0, %v6130_v9  ;;  %v12427_v39 = vand.u32 2147483647, %v11286_v13  ;;  %v1943_v44 = vxor.u32 2147483648, %v11416_v52 }
 0x45d   : > { %v2757_v60 = vsel %vm11436_vm2, 0, %v11407_v28  ;;  %6716 = vsinq.f32 %v11389_v63  ;;  %v3152_v54 = vsub.s32 32, %v3151_v2  ;;  %v3156_v56 = vsub.s32 4294967266, %v3151_v2 }
 0x45e   : > { %v2753_v51 = vsel %vm2670_vm11, %v2752_v6, %v2751_v27  ;;  %v3547_v53 = vmul.u32 %v3540_v0, %v3531_v12  ;;  %vm3549_vm4 = vc.u32 %v11430_v21, %v11425_v11  ;;  %vm3915_vm5 = vcmp.gt.s32.totalorder %v3914_v5, 0 }
 0x45f   : > { %v1940_v28 = vxor.u32 2147483648, %v6713_v62  ;;  %v3136_v17 = vadd.s32 %v11330_v34, %v11349_v33  ;;  %v3157_v20 = vadd.s32 127, %v3156_v56  ;;  %v3551_v49 = vsel %vm3549_vm4, %v3550_v57, %v11426_v22 }
 0x460   : > { %v11460_v43 = vand.u32 3, %v2345_v42  ;;  %v3552_v63 = vadd.s32 %v3551_v49, %v3547_v53  ;;  %v3911_v3 = vand.u32 8388607, %v12427_v39  ;;  %v3916_v30 = vsel %vm3915_vm5, %v3914_v5, 0 }
 0x461   : > { %v2756_v0 = vsel %vm11436_vm2, %v11057_v41, %v2753_v51  ;;  %v3154_v27 = vshrl.u32 %v3136_v17, %v3152_v54  ;;  %v3158_v1 = vshll.u32 %v3157_v20, 23  ;;  %v4319_v9 = vand.u32 2139095040, %v11291_v32 }
 0x462   : > { %v11470_v34 = vsel %vm1942_vm1, %v1943_v44, %v6713_v62  ;;  %v11472_v33 = vand.u32 3, %v2757_v60  ;;  %vm3082_vm6 = vcmp.lt.s32.totalorder %v11192_v36, 0  ;;  %v3553_v22 = vadd.s32 536870912, %v3552_v63 }
 0x463   : > { %v3918_v48 = vand.u32 31, %v3916_v30  ;;  %v11478_v61 = vsel %vm1939_vm0, %v11416_v52, %v1940_v28  ;;  %v3153_v6 = vshll.u32 %v11409_v59, %v3151_v2  ;;  %v3166_v42 = vsub.s32 4, %v11393_v26 }
 0x464   : > { %6718 = vcosq.f32 %v2756_v0  ;;  %v3159_v62 = vor.u32 4788187, %v3158_v1  ;;  %v11483_v12 = vshrl.u32 %v3553_v22, 30  ;;  %v3912_v57 = vor.u32 8388608, %v3911_v3 }
 0x465   : > { %v3919_v5 = vsub.s32 32, %v3918_v48  ;;  %v3155_v60 = vor.u32 %v3154_v27, %v3153_v6  ;;  %v11485_v44 = vshrl.u32 %v3916_v30, 5  ;;  %v4320_v54 = vshrl.u32 %v4319_v9, 23 }
 0x466   : > { %v3555_v56 = vshll.u32 %v11483_v12, 30  ;;  %v3921_v52 = vshll.u32 %v12545_v31, %v3918_v48  ;;  %v3924_v59 = vshll.u32 %v12546_v29, %v3918_v48  ;;  %v3927_v28 = vshll.u32 %v12547_v55, %v3918_v48 }
 0x467   : > { %v3922_v51 = vshrl.u32 %v12546_v29, %v3919_v5  ;;  %v11491_v2 = vpop.eup %6716  ;;  %v3925_v53 = vshrl.u32 %v12547_v55, %v3919_v5  ;;  %v3928_v17 = vshrl.u32 %v12548_v18, %v3919_v5  ;;  %v3931_v20 = vshrl.u32 %v12746_v25, %v3919_v5 }
 0x468   : > { %v3160_v49 = vand.u32 2147483647, %v3159_v62  ;;  %v11497_v3 = vsub.s32 %v3552_v63, %v3555_v56  ;;  %v3930_v30 = vshll.u32 %v12548_v18, %v3918_v48  ;;  %v3934_v27 = vshrl.u32 %v12747_v50, %v3919_v5 }
 0x469   : > { %v3923_v1 = vor.u32 %v3922_v51, %v3921_v52  ;;  %v3926_v9 = vor.u32 %v3925_v53, %v3924_v59  ;;  %v3929_v22 = vor.u32 %v3928_v17, %v3927_v28  ;;  %v3933_v6 = vshll.u32 %v12746_v25, %v3918_v48 }
 0x46a   : > { %vm1938_vm8 = vcmp.lt.s32.totalorder %v11376_v58, 2  ;;  %v2352_v39 = vxor.u32 2147483648, %v11491_v2  ;;  %vm2354_vm10 = vcmp.eq.s32.totalorder %v11460_v43, 2  ;;  %6720 = vsinq.f32 %v2756_v0 }
 0x46b   : > { %v3558_v62 = vsub.s32 0, %v11497_v3  ;;  %v3932_v63 = vor.u32 %v3931_v20, %v3930_v30  ;;  %vm2351_vm12 = vcmp.eq.s32.totalorder %v11460_v43, 0  ;;  %v12853_v56 = vand.u32 2147483647, %v11192_v36 }
 0x46c   : > { %v3162_v51 = vcvt.s32.f32 %v3155_v60  ;;  %v11516_v48 = vsel %vm3082_vm6, %v3166_v42, %v11393_v26  ;;  %v3935_v59 = vor.u32 %v3934_v27, %v3933_v6  ;;  %v3952_v53 = vshll.u32 %v3912_v57, 8 }
 0x46d   : > { %vm11509_vm11 = vcmp.le.f32.partialorder %v12853_v56, 0.7853982  ;;  %v6145_v0 = vmin.u32 %v3558_v62, %v11497_v3  ;;  %vm3936_vm14 = vcmp.lt.s32.totalorder %v11485_v44, 1  ;;  %vm3939_vm9 = vcmp.lt.s32.totalorder %v11485_v44, 4 }
 0x46e   : > { %v6176_v28 = vadd.s32 4294967169, %v4320_v54  ;;  %v3163_v17 = vmul.f32 %v3162_v51, %v3160_v49  ;;  %v3920_v20 = vshrl.u32 %v12545_v31, %v3919_v5  ;;  %v3941_v30 = vsel %vm3939_vm9, %v3929_v22, 2102212464  ;;  %v11522_v60 = vpop.eup %6718 }
 0x46f   : > { %v3944_v56 = vsel %vm3936_vm14, %v3923_v1, %v3926_v9  ;;  %v3560_v23 = vclz %v6145_v0  ;;  %vm3937_vm7 = vcmp.lt.s32.totalorder %v11485_v44, 2  ;;  %vm3938_vm15 = vcmp.lt.s32.totalorder %v11485_v44, 3 }
 0x470   : > { %v3945_v26 = vsel %vm3939_vm9, %v3932_v63, 920167782  ;;  %v3940_v42 = vsel %vm3936_vm14, %v3920_v20, %v3923_v1  ;;  %v3948_v27 = vsel %vm3936_vm14, %v3926_v9, %v3929_v22  ;;  %v3949_v6 = vsel %vm3939_vm9, %v3935_v59, 1326507024 }
 0x471   : > { %v3946_v57 = vsel %vm3938_vm15, %v3929_v22, %v3945_v26  ;;  %vm1936_vm0 = vweird.f32 %v11030_v24  ;;  %v6146_v54 = vadd.s32 4294967294, %v3560_v23  ;;  %v3942_v49 = vsel %vm3938_vm15, %v3926_v9, %v3941_v30 }
 0x472   : > { %v3947_v5 = vsel %vm3937_vm7, %v3944_v56, %v3946_v57  ;;  %v3950_v62 = vsel %vm3938_vm15, %v3932_v63, %v3949_v6  ;;  %vm2350_vm1 = vcmp.lt.s32.totalorder %v11460_v43, 2  ;;  %v3164_v51 = vxor.u32 2147483648, %v3163_v17  ;;  %v11551_v56 = vpop.permute.xlu1 %5678 }
 0x473   : > { %v3951_v0 = vsel %vm3937_vm7, %v3948_v27, %v3950_v62  ;;  %v11532_v45 = vmul.u32.u64.low %v3952_v53, %v3947_v5  ;;  %v11533_v4 = vmul.u32.u64.high %v3952_v53, %v3947_v5, %v11532_v45  ;;  %vm2763_vm2 = vcmp.eq.s32.totalorder %v11472_v33, 0 }
 0x474   : > { %vm6147_vm3 = vcmp.lt.s32.totalorder %v6146_v54, 0  ;;  %v11537_v1 = vmul.u32.u64.low %v3952_v53, %v3951_v0  ;;  %v11538_v23 = vmul.u32.u64.high %v3952_v53, %v3951_v0, %v11537_v1  ;;  %v4326_v9 = vadd.s32 1, %v6176_v28  ;;  %v6721_v26 = vpop.eup %6720 }
 0x475   : > { %v1945_v22 = vsel %vm1938_vm8, %v11478_v61, %v11470_v34  ;;  %v12856_v63 = vxor.u32 2147483648, %v11444_v46  ;;  %v3563_v20 = vsel %vm6147_vm3, 0, %v6146_v54  ;;  %v3943_v30 = vsel %vm3937_vm7, %v3940_v42, %v3942_v49  ;;  %v11567_v49 = vpop.permute.xlu0 %5676 }
 0x476   : > { %v2353_v28 = vsel %vm2351_vm12, %v11444_v46, %v2352_v39  ;;  %v3169_v58 = vsel %vm11509_vm11, 0, %v11516_v48  ;;  %v3568_v34 = vsub.s32 4294967266, %v3563_v20  ;;  %vm4327_vm4 = vcmp.gt.s32.totalorder %v4326_v9, 0 }
 0x477   : > { %v2356_v59 = vsel %vm2354_vm10, %v12856_v63, %v11491_v2  ;;  %v3165_v61 = vsel %vm3082_vm6, %v3164_v51, %v3163_v17  ;;  %v3962_v2 = vadd.s32 1, %v11533_v4  ;;  %v12428_v44 = vand.u32 2147483647, %v11291_v32  ;;  %v11569_v17 = vpop.permute.xlu1 %5742 }
 0x478   : > { %v4328_v42 = vsel %vm4327_vm4, %v4326_v9, 0  ;;  %v3564_v57 = vsub.s32 32, %v3563_v20  ;;  %v3569_v27 = vadd.s32 127, %v3568_v34  ;;  %v3959_v6 = vmul.u32 %v3952_v53, %v3943_v30 }
 0x479   : > { %vm3961_vm5 = vc.u32 %v11538_v23, %v11532_v45  ;;  %v2764_v46 = vxor.u32 2147483648, %v6721_v26  ;;  %v2767_v39 = vxor.u32 2147483648, %v11522_v60  ;;  %v4330_v54 = vand.u32 31, %v4328_v42  ;;  %v11597_v30 = vpop.permute.xlu0 %5740 }
 0x47a   : > { %v3963_v48 = vsel %vm3961_vm5, %v3962_v2, %v11533_v4  ;;  %v3168_v5 = vsel %vm11509_vm11, %v11192_v36, %v3165_v61  ;;  %v3548_v53 = vadd.s32 %v11425_v11, %v11430_v21  ;;  %v3570_v62 = vshll.u32 %v3569_v27, 23 }
 0x47b   : > { %v3964_v51 = vadd.s32 %v3963_v48, %v3959_v6  ;;  %v11578_v0 = vsel %vm1936_vm0, nan, %v1945_v22  ;;  %vm2766_vm6 = vcmp.eq.s32.totalorder %v11472_v33, 2  ;;  %v4323_v4 = vand.u32 8388607, %v12428_v44  ;;  %v11599_v34 = vpop.permute.xlu1 %5686 }
 0x47c   : > { %v4331_v1 = vsub.s32 32, %v4330_v54  ;;  %v11585_v9 = vsel %vm2350_vm1, %v2353_v28, %v2356_v59  ;;  %v11587_v52 = vand.u32 3, %v3169_v58  ;;  %v3566_v63 = vshrl.u32 %v3548_v53, %v3564_v57 }
 0x47d   : > { %v3965_v21 = vadd.s32 536870912, %v3964_v51  ;;  %v11592_v24 = vsel %vm2763_vm2, %v11522_v60, %v2764_v46  ;;  %v11594_v11 = vsel %vm2766_vm6, %v2767_v39, %v6721_v26  ;;  %6722 = vcosq.f32 %v3168_v5  ;;  %v11615_v48 = vpop.permute.xlu0 %5684 }
 0x47e   : > { %v3565_v22 = vshll.u32 %v11497_v3, %v3563_v20  ;;  %v3571_v43 = vor.u32 4788187, %v3570_v62  ;;  %v4334_v28 = vshrl.u32 %v12546_v29, %v4331_v1  ;;  %v4337_v58 = vshrl.u32 %v12547_v55, %v4331_v1 }
 0x47f   : > { %v11601_v59 = vshrl.u32 %v3965_v21, 30  ;;  %6724 = vsinq.f32 %v3168_v5  ;;  %v4324_v61 = vor.u32 8388608, %v4323_v4  ;;  %v11605_v60 = vshrl.u32 %v4328_v42, 5  ;;  %v11617_v42 = vpop.permute.xlu1 %5750 }
 0x480   : > { %v4340_v26 = vshrl.u32 %v12548_v18, %v4331_v1  ;;  %v3567_v2 = vor.u32 %v3566_v63, %v3565_v22  ;;  %v4333_v20 = vshll.u32 %v12545_v31, %v4330_v54  ;;  %v4336_v57 = vshll.u32 %v12546_v29, %v4330_v54 }
 0x481   : > { %12857 = vst [vmem:[#allocation25_spill] sm:$0xff] %v11601_v59  ;;  %v3967_v3 = vshll.u32 %v11601_v59, 30  ;;  %v4339_v27 = vshll.u32 %v12547_v55, %v4330_v54  ;;  %v4342_v6 = vshll.u32 %v12548_v18, %v4330_v54  ;;  %v4343_v46 = vshrl.u32 %v12746_v25, %v4331_v1 }
 0x482   : > { %v4346_v39 = vshrl.u32 %v12747_v50, %v4331_v1  ;;  %v3572_v5 = vand.u32 2147483647, %v3571_v43  ;;  %v4335_v62 = vor.u32 %v4334_v28, %v4333_v20  ;;  %v4338_v4 = vor.u32 %v4337_v58, %v4336_v57  ;;  %v11631_v58 = vpop.permute.xlu0 %5748 }
 0x483   : > { %v11619_v53 = vsub.s32 %v3964_v51, %v3967_v3  ;;  %v3578_v63 = vsub.s32 4, %v11483_v12  ;;  %v4341_v21 = vor.u32 %v4340_v26, %v4339_v27  ;;  %v4344_v22 = vor.u32 %v4343_v46, %v4342_v6  ;;  %v11633_v26 = vpop.permute.xlu1 %5622 }
 0x484   : > { %v4345_v44 = vshll.u32 %v12746_v25, %v4330_v54  ;;  %v3574_v40 = vcvt.s32.f32 %v3567_v2  ;;  %v11624_v35 = vshll.u32 %v4324_v61, 8  ;;  %vm3494_vm8 = vcmp.lt.s32.totalorder %v11281_v10, 0  ;;  %12858 = vst [vmem:[#allocation26_spill] sm:$0xff] %v11633_v26 }
 0x485   : > { %v3970_v7 = vsub.s32 0, %v11619_v53  ;;  %v4332_v51 = vshrl.u32 %v12545_v31, %v4331_v1  ;;  %vm4348_vm10 = vcmp.lt.s32.totalorder %v11605_v60, 1  ;;  %v4731_v28 = vand.u32 2139095040, %v11294_v37 }
 0x486   : > { %v4347_v43 = vor.u32 %v4346_v39, %v4345_v44  ;;  %vm2762_vm12 = vcmp.lt.s32.totalorder %v11472_v33, 2  ;;  %v3575_v54 = vmul.f32 %v3574_v40, %v3572_v5  ;;  %vm4351_vm11 = vcmp.lt.s32.totalorder %v11605_v60, 4  ;;  %v11658_v26 = vpop.permute.xlu0 %5620 }
 0x487   : > { %v6161_v61 = vmin.u32 %v3970_v7, %v11619_v53  ;;  %v4356_v2 = vsel %vm4348_vm10, %v4335_v62, %v4338_v4  ;;  %v6723_v1 = vpop.eup %6722  ;;  %vm4349_vm14 = vcmp.lt.s32.totalorder %v11605_v60, 2  ;;  %vm4350_vm9 = vcmp.lt.s32.totalorder %v11605_v60, 3 }
 0x488   : > { %v4353_v44 = vsel %vm4351_vm11, %v4341_v21, 2102212464  ;;  %v4357_v3 = vsel %vm4351_vm11, %v4344_v22, 920167782  ;;  %v12859_v20 = vand.u32 2147483647, %v11281_v10  ;;  %v4352_v7 = vsel %vm4348_vm10, %v4332_v51, %v4335_v62 }
 0x489   : > { %v3972_v40 = vclz %v6161_v61  ;;  %v4358_v27 = vsel %vm4350_vm9, %v4341_v21, %v4357_v3  ;;  %v4360_v6 = vsel %vm4348_vm10, %v4338_v4, %v4341_v21  ;;  %v6725_v46 = vpop.eup %6724  ;;  %v4354_v39 = vsel %vm4350_vm9, %v4338_v4, %v4353_v44  ;;  %v11660_v61 = vpop.permute.xlu1 %5694 }
 0x48a   : > { %vm11644_vm7 = vcmp.le.f32.partialorder %v12859_v20, 0.7853982  ;;  %v4359_v5 = vsel %vm4349_vm14, %v4356_v2, %v4358_v27  ;;  %v4361_v20 = vsel %vm4351_vm11, %v4347_v43, 1326507024  ;;  %v4732_v59 = vshrl.u32 %v4731_v28, 23  ;;  %12862 = vst [vmem:[#allocation27_spill] sm:$0xff] %v11660_v61  ;;  %v11684_v61 = vpop.permute.xlu0 %5692 }
 0x48b   : > { %vm2348_vm15 = vweird.f32 %v11036_v15  ;;  %v6162_v62 = vadd.s32 4294967294, %v3972_v40  ;;  %v4362_v51 = vsel %vm4350_vm9, %v4344_v22, %v4361_v20  ;;  %vm2760_vm0 = vweird.f32 %v11057_v41 }
 0x48c   : > { %v11666_v21 = vmul.u32.u64.low %v11624_v35, %v4359_v5  ;;  %v11667_v3 = vmul.u32.u64.high %v11624_v35, %v4359_v5, %v11666_v21  ;;  %v3179_v4 = vxor.u32 2147483648, %v6723_v1  ;;  %v3576_v43 = vxor.u32 2147483648, %v3575_v54 }
 0x48d   : > { %v4363_v28 = vsel %vm4349_vm14, %v4360_v6, %v4362_v51  ;;  %v6192_v2 = vadd.s32 4294967169, %v4732_v59  ;;  %v3176_v44 = vxor.u32 2147483648, %v6725_v46  ;;  %vm6163_vm1 = vcmp.lt.s32.totalorder %v6162_v62, 0  ;;  %v11686_v6 = vpop.permute.xlu1 %5758 }
 0x48e   : > { %v11674_v40 = vmul.u32.u64.low %v11624_v35, %v4363_v28  ;;  %v11675_v27 = vmul.u32.u64.high %v11624_v35, %v4363_v28, %v11674_v40  ;;  %vm3175_vm2 = vcmp.eq.s32.totalorder %v11587_v52, 0  ;;  %v4355_v22 = vsel %vm4349_vm14, %v4352_v7, %v4354_v39 }
 0x48f   : > { %v4738_v5 = vadd.s32 1, %v6192_v2  ;;  %v11682_v20 = vmul.f32 %v11308_v19, %v11578_v0  ;;  %vm3178_vm3 = vcmp.eq.s32.totalorder %v11587_v52, 2  ;;  %v3579_v59 = vsel %vm3494_vm8, %v3578_v63, %v11483_v12 }
 0x490   : > { %v11692_v51 = vsel %vm6163_vm1, 0, %v6162_v62  ;;  %v4374_v60 = vadd.s32 1, %v11667_v3  ;;  %v2769_v19 = vsel %vm2762_vm12, %v11592_v24, %v11594_v11  ;;  %v3577_v0 = vsel %vm3494_vm8, %v3576_v43, %v3575_v54  ;;  %v11710_v54 = vpop.permute.xlu0 %5756 }
 0x491   : > { %v12863_v7 = vand.u32 2147483647, %v11294_v37  ;;  %vm4739_vm4 = vcmp.gt.s32.totalorder %v4738_v5, 0  ;;  %v3177_v28 = vsel %vm3175_vm2, %v6723_v1, %v3176_v44  ;;  %v3180_v2 = vsel %vm3178_vm3, %v3179_v4, %v6725_v46  ;;  %v11712_v62 = vpop.permute.xlu1 %5630  ;;  %v12885_v37 = vld [vmem:[#allocation50_spill] sm:$0xff] }
 0x492   : > { %v4371_v12 = vmul.u32 %v11624_v35, %v4355_v22  ;;  %vm4373_vm5 = vc.u32 %v11675_v27, %v11666_v21  ;;  %v3581_v63 = vsel %vm11644_vm7, 0, %v3579_v59  ;;  %v3980_v33 = vsub.s32 4294967266, %v11692_v51 }
 0x493   : > { %v4735_v39 = vand.u32 8388607, %v12863_v7  ;;  %v4375_v24 = vsel %vm4373_vm5, %v4374_v60, %v11667_v3  ;;  %v4740_v11 = vsel %vm4739_vm4, %v4738_v5, 0  ;;  %vm3172_vm6 = vweird.f32 %v11192_v36 }
 0x494   : > { %vm3174_vm8 = vcmp.lt.s32.totalorder %v11587_v52, 2  ;;  %v3580_v35 = vsel %vm11644_vm7, %v11281_v10, %v3577_v0  ;;  %v4376_v1 = vadd.s32 %v4375_v24, %v4371_v12  ;;  %v2358_v46 = vsel %vm2348_vm15, nan, %v11585_v9  ;;  %v11729_v60 = vpop.permute.xlu0 %5628 }
 0x495   : > { %v3181_v4 = vsel %vm3174_vm8, %v3177_v28, %v3180_v2  ;;  %v4736_v3 = vor.u32 8388608, %v4735_v39  ;;  %v4742_v43 = vand.u32 31, %v4740_v11  ;;  %v2770_v44 = vsel %vm2760_vm0, nan, %v2769_v19  ;;  %v11731_v15 = vpop.permute.xlu1 %5702 }
 0x496   : > { %v11724_v40 = vand.u32 3, %v3581_v63  ;;  %v3976_v22 = vsub.s32 32, %v11692_v51  ;;  %v4377_v52 = vadd.s32 536870912, %v4376_v1  ;;  %6726 = vcosq.f32 %v3580_v35 }
 0x497   : > { %v3960_v57 = vadd.s32 %v11532_v45, %v11538_v23  ;;  %v3981_v5 = vadd.s32 127, %v3980_v33  ;;  %v4743_v59 = vsub.s32 32, %v4742_v43  ;;  %v3182_v9 = vsel %vm3172_vm6, nan, %v3181_v4 }
 0x498   : > { %6728 = vsinq.f32 %v3580_v35  ;;  %v3977_v41 = vshll.u32 %v11619_v53, %v11692_v51  ;;  %v11737_v19 = vshrl.u32 %v4377_v52, 30  ;;  %v11741_v45 = vshll.u32 %v4736_v3, 8  ;;  %v11750_v33 = vpop.permute.xlu0 %5700 }
 0x499   : > { %v4746_v0 = vshrl.u32 %v12546_v29, %v4743_v59  ;;  %v4752_v7 = vshrl.u32 %v12548_v18, %v4743_v59  ;;  %v4940_v23 = vmul.f32 %v11315_v14, %v2358_v46  ;;  %v3978_v39 = vshrl.u32 %v3960_v57, %v3976_v22  ;;  %v11752_v24 = vpop.permute.xlu1 %5766 }
 0x49a   : > { %v4379_v28 = vshll.u32 %v11737_v19, 30  ;;  %v4749_v36 = vshrl.u32 %v12547_v55, %v4743_v59  ;;  %v4944_v2 = vmul.f32 %v11322_v16, %v2770_v44  ;;  %v3982_v12 = vshll.u32 %v3981_v5, 23 }
 0x49b   : > { %v4745_v53 = vshll.u32 %v12545_v31, %v4742_v43  ;;  %v4751_v51 = vshll.u32 %v12547_v55, %v4742_v43  ;;  %v4755_v63 = vshrl.u32 %v12746_v25, %v4743_v59  ;;  %v4741_v14 = vshrl.u32 %v4740_v11, 5 }
 0x49c   : > { %v11754_v35 = vsub.s32 %v4376_v1, %v4379_v28  ;;  %v4748_v46 = vshll.u32 %v12546_v29, %v4742_v43  ;;  %v4754_v4 = vshll.u32 %v12548_v18, %v4742_v43  ;;  %v4757_v44 = vshll.u32 %v12746_v25, %v4742_v43  ;;  %v11765_v18 = vpop.permute.xlu0 %5764 }
 0x49d   : > { %v4747_v3 = vor.u32 %v4746_v0, %v4745_v53  ;;  %v4753_v16 = vor.u32 %v4752_v7, %v4751_v51  ;;  %v4758_v22 = vshrl.u32 %v12747_v50, %v4743_v59  ;;  %v4372_v55 = vadd.s32 %v11666_v21, %v11675_v27  ;;  %v11767_v0 = vpop.permute.xlu1 %5638  ;;  %v12864_v50 = vld [vmem:[#allocation59_spill] sm:$0xff] }
 0x49e   : > { %v4382_v52 = vsub.s32 0, %v11754_v35  ;;  %v4750_v57 = vor.u32 %v4749_v36, %v4748_v46  ;;  %v4756_v5 = vor.u32 %v4755_v63, %v4754_v4  ;;  %v3979_v1 = vor.u32 %v3978_v39, %v3977_v41 }
 0x49f   : > { %v4744_v11 = vshrl.u32 %v12545_v31, %v4743_v59  ;;  %v4759_v28 = vor.u32 %v4758_v22, %v4757_v44  ;;  %v4948_v29 = vmul.f32 %v11324_v47, %v3182_v9  ;;  %vm4760_vm10 = vcmp.lt.s32.totalorder %v4741_v14, 1 }
 0x4a0   : > { %v6177_v25 = vmin.u32 %v4382_v52, %v11754_v35  ;;  %vm4763_vm12 = vcmp.lt.s32.totalorder %v4741_v14, 4  ;;  %v11772_v21 = vmul.f32 %v12864_v50, %v11682_v20  ;;  %v11774_v27 = vpop.eup %6726  ;;  %v3983_v43 = vor.u32 4788187, %v3982_v12  ;;  %v11780_v20 = vpop.permute.xlu0 %5636 }
 0x4a1   : > { %vm4762_vm11 = vcmp.lt.s32.totalorder %v4741_v14, 3  ;;  %v4764_v31 = vsel %vm4760_vm10, %v4744_v11, %v4747_v3  ;;  %v4765_v59 = vsel %vm4763_vm12, %v4753_v16, 2102212464  ;;  %v4768_v7 = vsel %vm4760_vm10, %v4747_v3, %v4750_v57  ;;  %v11782_v63 = vpop.permute.xlu1 %5710 }
 0x4a2   : > { %v11776_v41 = vpop.eup %6728  ;;  %v4384_v47 = vclz %v6177_v25  ;;  %v4766_v9 = vsel %vm4762_vm11, %v4750_v57, %v4765_v59  ;;  %v4769_v39 = vsel %vm4763_vm12, %v4756_v5, 920167782  ;;  %vm4761_vm14 = vcmp.lt.s32.totalorder %v4741_v14, 2  ;;  %v12866_v59 = vld [vmem:[#allocation45_spill] sm:$0xff] }
 0x4a3   : > { %v4770_v36 = vsel %vm4762_vm11, %v4753_v16, %v4769_v39  ;;  %v4772_v53 = vsel %vm4760_vm10, %v4750_v57, %v4753_v16  ;;  %v4773_v51 = vsel %vm4763_vm12, %v4759_v28, 1326507024  ;;  %v3986_v12 = vcvt.s32.f32 %v3979_v1  ;;  %v12865_v28 = vld [vmem:[#allocation60_spill] sm:$0xff] }
 0x4a4   : > { %v6178_v46 = vadd.s32 4294967294, %v4384_v47  ;;  %v4771_v4 = vsel %vm4761_vm14, %v4768_v7, %v4770_v36  ;;  %v4774_v44 = vsel %vm4762_vm11, %v4756_v5, %v4773_v51  ;;  %v4767_v22 = vsel %vm4761_vm14, %v4764_v31, %v4766_v9  ;;  %v12867_v5 = vld [vmem:[#allocation46_spill] sm:$0xff]  ;;  %v11803_v47 = vpop.permute.xlu0 %5708 }
 0x4a5   : > { %v4775_v52 = vsel %vm4761_vm14, %v4772_v53, %v4774_v44  ;;  %v11786_v11 = vmul.u32.u64.low %v11741_v45, %v4771_v4  ;;  %v11787_v3 = vmul.u32.u64.high %v11741_v45, %v4771_v4, %v11786_v11  ;;  %v11795_v25 = vmul.f32 %v12865_v28, %v4940_v23  ;;  %v11805_v9 = vpop.permute.xlu1 %5774  ;;  %v12868_v23 = vld [vmem:[#allocation52_spill] sm:$0xff]  ;;  %v12869_v53 = vld [vmem:[#allocation57_spill] sm:$0xff]  ;;  %v12871_v4 = vld [vmem:[#allocation87_spill] sm:$0xff] }
 0x4a6   : > { %vm6179_vm9 = vcmp.lt.s32.totalorder %v6178_v46, 0  ;;  %v11791_v16 = vmul.u32.u64.low %v11741_v45, %v4775_v52  ;;  %v11792_v57 = vmul.u32.u64.high %v11741_v45, %v4775_v52, %v11791_v16  ;;  %v3984_v1 = vand.u32 2147483647, %v3983_v43 }
 0x4a7   : > { %v4387_v50 = vsel %vm6179_vm9, 0, %v6178_v46  ;;  %v11798_v14 = vmul.f32 %v12866_v59, %v4944_v2  ;;  %v11801_v31 = vmul.f32 %v12867_v5, %v4948_v29  ;;  %vm4318_vm7 = vcmp.lt.s32.totalorder %v11291_v32, 0  ;;  %v12870_v46 = vld [vmem:[#allocation61_spill] sm:$0xff] }
 0x4a8   : > { %v4388_v7 = vsub.s32 32, %v4387_v50  ;;  %v4392_v39 = vsub.s32 4294967266, %v4387_v50  ;;  %v4783_v36 = vmul.u32 %v11741_v45, %v4767_v22  ;;  %v5171_v43 = vcombine.high %v12869_v53, %v12868_v23  ;;  %v11828_v23 = vpop.permute.xlu0 %5772 }
 0x4a9   : > { %v4786_v51 = vadd.s32 1, %v11787_v3  ;;  %v5310_v2 = vcombine.low %v11772_v21, %v11798_v14  ;;  %v5326_v29 = vcombine.low %v11795_v25, %v11801_v31  ;;  %v5307_v44 = vcombine.high %v12871_v4, %v12870_v46  ;;  %12874 = vst [vmem:[#allocation84_spill] sm:$0xff] %v11828_v23  ;;  %v11830_v53 = vpop.permute.xlu1 %5646 }
 0x4aa   : > { %v4389_v52 = vshll.u32 %v11754_v35, %v4387_v50  ;;  %v4390_v16 = vshrl.u32 %v4372_v55, %v4388_v7  ;;  %v4393_v28 = vadd.s32 127, %v4392_v39  ;;  %vm4785_vm15 = vc.u32 %v11792_v57, %v11786_v11  ;;  %12875 = vst [vmem:[#allocation30_spill] sm:$0xff] %v11830_v53  ;;  %v12884_v7 = vld [vmem:[#allocation22_spill] sm:$0xff]  ;;  %v12886_v53 = vld [vmem:[#allocation49_spill] sm:$0xff] }
 0x4ab   : > { %v3987_v45 = vmul.f32 %v3986_v12, %v3984_v1  ;;  %v4787_v22 = vsel %vm4785_vm15, %v4786_v51, %v11787_v3  ;;  %v11823_v59 = vrot.slane %v5310_v2, %v9752_v38  ;;  %v11826_v5 = vrot.slane %v5326_v29, %v9752_v38 }
 0x4ac   : > { %vm3906_vm0 = vcmp.lt.s32.totalorder %v11286_v13, 0  ;;  %v12876_v35 = vand.u32 2147483647, %v11291_v32  ;;  %v4391_v12 = vor.u32 %v4390_v16, %v4389_v52  ;;  %v4394_v3 = vshll.u32 %v4393_v28, 23  ;;  %v12879_v52 = vld [vmem:[#allocation48_spill] sm:$0xff] }
 0x4ad   : > { %12872 = vst [vmem:[#allocation28_spill] sm:$0xff] %v11823_v59  ;;  %12873 = vst [vmem:[#allocation29_spill] sm:$0xff] %v11826_v5  ;;  %v4788_v1 = vadd.s32 %v4787_v22, %v4783_v36  ;;  %vm3586_vm2 = vcmp.lt.s32.totalorder %v11724_v40, 2  ;;  %v4402_v50 = vsub.s32 4, %v11737_v19  ;;  %v6529_v39 = vpack.i.bf16 %v5171_v43, %v5307_v44  ;;  %v12880_v16 = vld [vmem:[#allocation44_spill] sm:$0xff]  ;;  %v11852_v43 = vpop.permute.xlu0 %5644  ;;  %v11854_v44 = vpop.permute.xlu1 %5718 }
 0x4ae   : > { %vm11835_vm1 = vcmp.le.f32.partialorder %v12876_v35, 0.7853982  ;;  %vm3587_vm3 = vcmp.eq.s32.totalorder %v11724_v40, 0  ;;  %v3591_v2 = vxor.u32 2147483648, %v11774_v27  ;;  %v4395_v29 = vor.u32 4788187, %v4394_v3 }
 0x4af   : > { %v4789_v46 = vadd.s32 536870912, %v4788_v1  ;;  %v3588_v4 = vxor.u32 2147483648, %v11776_v41  ;;  %vm3590_vm4 = vcmp.eq.s32.totalorder %v11724_v40, 2  ;;  %v3988_v36 = vxor.u32 2147483648, %v3987_v45  ;;  %6530 = vrot.lane.b32.xlu0 %v6529_v39, %s6966_s12  ;;  %12881 = vst [vmem:[#allocation43_spill] sm:$0xff] %v11852_v43  ;;  %12882 = vst [vmem:[#allocation32_spill] sm:$0xff] %v11854_v44 }
 0x4b0   : > { %v5119_v28 = vcombine.high %v12880_v16, %v12879_v52  ;;  %v4396_v22 = vand.u32 2147483647, %v4395_v29  ;;  %v4398_v35 = vcvt.s32.f32 %v4391_v12  ;;  %v12883_v3 = vld [vmem:[#allocation58_spill] sm:$0xff]  ;;  %v4403_v59 = vsel %vm4318_vm7, %v4402_v50, %v11737_v19  ;;  %v12887_v16 = vld [vmem:[#allocation20_spill] sm:$0xff] }
 0x4b1   : > { %v11856_v51 = vshrl.u32 %v4789_v46, 30  ;;  %v5151_v5 = vcombine.high %v12884_v7, %v12883_v3  ;;  %v5255_v52 = vcombine.high %v12886_v53, %v12885_v37  ;;  %v12888_v43 = vld [vmem:[#allocation56_spill] sm:$0xff]  ;;  %v3592_v29 = vsel %vm3590_vm4, %v3591_v2, %v11776_v41  ;;  %v11878_v53 = vpop.permute.xlu0 %5716 }
 0x4b2   : > { %v5133_v39 = vrot.slane %v5119_v28, %v12802_v8  ;;  %v5287_v23 = vcombine.high %v12888_v43, %v12887_v16  ;;  %v4399_v12 = vmul.f32 %v4398_v35, %v4396_v22  ;;  %v3589_v7 = vsel %vm3587_vm3, %v11774_v27, %v3588_v4  ;;  %v11880_v28 = vpop.permute.xlu1 %5782 }
 0x4b3   : > { %v4791_v46 = vshll.u32 %v11856_v51, 30  ;;  %v5165_v44 = vrot.slane %v5151_v5, %v12802_v8  ;;  %v5269_v19 = vrot.slane %v5255_v52, %v12802_v8  ;;  %v5311_v37 = vcombine.high %v11772_v21, %v11798_v14 }
 0x4b4   : > { %v5301_v50 = vrot.slane %v5287_v23, %v12802_v8  ;;  %vm3584_vm5 = vweird.f32 %v11281_v10  ;;  %v4400_v41 = vxor.u32 2147483648, %v4399_v12  ;;  %v4405_v5 = vsel %vm11835_vm1, 0, %v4403_v59 }
 0x4b5   : > { %v11885_v2 = vsub.s32 %v4788_v1, %v4791_v46  ;;  %v5172_v27 = vcombine.low %v5133_v39, %v5165_v44  ;;  %v3989_v4 = vsel %vm3906_vm0, %v3988_v36, %v3987_v45  ;;  %v5173_v43 = vcombine.high %v5133_v39, %v5165_v44  ;;  %v11908_v3 = vpop.permute.xlu0 %5780 }
 0x4b6   : > { %v5308_v23 = vcombine.low %v5269_v19, %v5301_v50  ;;  %v5309_v22 = vcombine.high %v5269_v19, %v5301_v50  ;;  %v3593_v21 = vsel %vm3586_vm2, %v3589_v7, %v3592_v29  ;;  %v12889_v14 = vand.u32 2147483647, %v11286_v13  ;;  %v11910_v39 = vpop.permute.xlu1 %5654 }
 0x4b7   : > { %v4401_v59 = vsel %vm4318_vm7, %v4400_v41, %v4399_v12  ;;  %v4794_v1 = vsub.s32 0, %v11885_v2  ;;  %v11904_v44 = vrot.slane %v5311_v37, %v9752_v38  ;;  %v5327_v40 = vcombine.high %v11795_v25, %v11801_v31 }
 0x4b8   : > { %vm11893_vm6 = vcmp.le.f32.partialorder %v12889_v14, 0.7853982  ;;  %v4404_v45 = vsel %vm11835_vm1, %v11291_v32, %v4401_v59  ;;  %v6534_v36 = vpack.i.bf16 %v5172_v27, %v5308_v23  ;;  %v11915_v16 = vand.u32 3, %v4405_v5  ;;  %v12893_v27 = vld [vmem:[#allocation25_spill] sm:$0xff]  ;;  %v12896_v23 = vld [vmem:[#allocation27_spill] sm:$0xff] }
 0x4b9   : > { %v3992_v52 = vsel %vm11893_vm6, %v11286_v13, %v3989_v4  ;;  %6730 = vcosq.f32 %v4404_v45  ;;  %v6193_v55 = vmin.u32 %v4794_v1, %v11885_v2  ;;  %v6539_v29 = vpack.i.bf16 %v5173_v43, %v5309_v22  ;;  %v11932_v37 = vpop.permute.xlu0 %5652 }
 0x4ba   : > { %6732 = vsinq.f32 %v4404_v45  ;;  %6535 = vrot.lane.b32.xlu0 %v6534_v36, %s6951_s8  ;;  %v11920_v12 = vrot.slane %v5327_v40, %v9752_v38  ;;  %vm5680_vm8 = vcmask 891904   ;;  %vm5744_vm10 = vcmask 646144   ;;  %v11934_v41 = vpop.permute.xlu1 %5726 }
 0x4bb   : > { %v4796_v25 = vclz %v6193_v55  ;;  %v5681_v31 = vsel %vm5680_vm8, %v11567_v49, %v11551_v56  ;;  %vm5688_vm12 = vcmask 883712   ;;  %v5745_v19 = vsel %vm5744_vm10, %v11597_v30, %v11569_v17  ;;  %v12892_v49 = vld [vmem:[#allocation19_spill] sm:$0xff] }
 0x4bc   : > { %v5390_v46 = vcombine.low %v11904_v44, %v11920_v12  ;;  %6206 = vmatprep.subr.bf16.mxu0 %v5681_v31  ;;  %v5391_v7 = vcombine.high %v11904_v44, %v11920_v12  ;;  %v5689_v50 = vsel %vm5688_vm12, %v11615_v48, %v11599_v34  ;;  %5881 = vmatpush1.bf16.msra.mxu1 %v5745_v19  ;;  %vm5752_vm11 = vcmask 637952   ;;  %v12895_v34 = vld [vmem:[#allocation26_spill] sm:$0xff] }
 0x4bd   : > { %v6194_v56 = vadd.s32 4294967294, %v4796_v25  ;;  %6207 = vmatpush3.bf16.msra.mxu0 %v12892_v49  ;;  %vm5624_vm14 = vcmask 1039360   ;;  %vm5589_vm9 = vcmask 785408   ;;  %v3594_v5 = vsel %vm3584_vm5, nan, %v3593_v21  ;;  %v11950_v22 = vpop.permute.xlu0 %5724 }
 0x4be   : > { %v3990_v4 = vsub.s32 4, %v12893_v27  ;;  %6540 = vrot.lane.b32.xlu0 %v6539_v29, %s6962_s27  ;;  %6208 = vmatprep.subr.bf16.mxu0 %v5689_v50  ;;  %v5753_v17 = vsel %vm5752_vm11, %v11631_v58, %v11617_v42  ;;  %vm5760_vm7 = vcmask 629760   ;;  %6734 = vcosq.f32 %v3992_v52  ;;  %v11952_v42 = vpop.permute.xlu1 %5790 }
 0x4bf   : > { %vm6195_vm15 = vcmp.lt.s32.totalorder %v6194_v56, 0  ;;  %v12894_v30 = vmov 0   ;;  %v5625_v48 = vsel %vm5624_vm14, %v11658_v26, %v12895_v34  ;;  %v5697_v10 = vsel %vm5589_vm9, %v11684_v61, %v12896_v23  ;;  %v12902_v34 = vld [vmem:[#allocation43_spill] sm:$0xff]  ;;  %v12903_v23 = vld [vmem:[#allocation53_spill] sm:$0xff] }
 0x4c0   : > { %5882 = vmatprep.subr.bf16.mxu1 %v12894_v30  ;;  %vm4410_vm1 = vcmp.lt.s32.totalorder %v11915_v16, 2  ;;  %v4799_v43 = vsel %vm6195_vm15, 0, %v6194_v56  ;;  %vm5632_vm2 = vcmask 1031168   ;;  %vm5704_vm3 = vcmask 777216  }
 0x4c1   : > { %v4784_v58 = vadd.s32 %v11786_v11, %v11792_v57  ;;  %v4800_v21 = vsub.s32 32, %v4799_v43  ;;  %v4804_v14 = vsub.s32 4294967266, %v4799_v43  ;;  %5883 = vmatpush1.bf16.msra.mxu1 %v5753_v17  ;;  %6209 = vmatpush3.bf16.msra.mxu0 %v5625_v48  ;;  %v5761_v26 = vsel %vm5760_vm7, %v11710_v54, %v11686_v6  ;;  %v12897_v54 = vld [vmem:[#allocation66_spill] sm:$0xff]  ;;  %v11967_v40 = vpop.permute.xlu0 %5788 }
 0x4c2   : > { %v4801_v61 = vshll.u32 %v11885_v2, %v4799_v43  ;;  %6210 = vmatprep.subr.bf16.mxu0 %v5697_v10  ;;  %5884 = vmatprep.subr.bf16.mxu1 %v12894_v30  ;;  %v5633_v59 = vsel %vm5632_vm2, %v11729_v60, %v11712_v62  ;;  %v5705_v1 = vsel %vm5704_vm3, %v11750_v33, %v11731_v15  ;;  %vm5768_vm4 = vcmask 621568   ;;  %v11969_v55 = vpop.permute.xlu1 %5660  ;;  %v12899_v17 = vld [vmem:[#allocation42_spill] sm:$0xff]  ;;  %v12904_v10 = vld [vmem:[#allocation69_spill] sm:$0xff] }
 0x4c3   : > { %v6731_v11 = vpop.eup %6730  ;;  %v4802_v57 = vshrl.u32 %v4784_v58, %v4800_v21  ;;  %v4805_v45 = vadd.s32 127, %v4804_v14  ;;  %vm5640_vm5 = vcmask 1022976   ;;  %vm5712_vm8 = vcmask 769024   ;;  %v12905_v21 = vld [vmem:[#allocation32_spill] sm:$0xff] }
 0x4c4   : > { %v6733_v36 = vpop.eup %6732  ;;  %6736 = vsinq.f32 %v3992_v52  ;;  %vm4414_vm10 = vcmp.eq.s32.totalorder %v11915_v16, 2  ;;  %v4415_v6 = vxor.u32 2147483648, %v6731_v11  ;;  %v4952_v2 = vmul.f32 %v12897_v54, %v3594_v5 }
 0x4c5   : > { %v4412_v62 = vxor.u32 2147483648, %v6733_v36  ;;  %v4803_v60 = vor.u32 %v4802_v57, %v4801_v61  ;;  %v4806_v15 = vshll.u32 %v4805_v45, 23  ;;  %5885 = vmatpush1.bf16.msra.mxu1 %v5761_v26  ;;  %6211 = vmatpush3.bf16.msra.mxu0 %v5633_v59  ;;  %v5769_v33 = vsel %vm5768_vm4, %v11765_v18, %v11752_v24  ;;  %v5663_v50 = vpop.permute.xlu0 %5662  ;;  %v12906_v26 = vld [vmem:[#allocation51_spill] sm:$0xff]  ;;  %v12907_v59 = vld [vmem:[#allocation24_spill] sm:$0xff] }
 0x4c6   : > { %vm4411_vm12 = vcmp.eq.s32.totalorder %v11915_v16, 0  ;;  %v4416_v52 = vsel %vm4414_vm10, %v4415_v6, %v6733_v36  ;;  %6212 = vmatprep.subr.bf16.mxu0 %v5705_v1  ;;  %5886 = vmatprep.subr.bf16.mxu1 %v12894_v30  ;;  %v5641_v29 = vsel %vm5640_vm5, %v11780_v20, %v11767_v0  ;;  %v5713_v25 = vsel %vm5712_vm8, %v11803_v47, %v11782_v63  ;;  %v12898_v47 = vld [vmem:[#allocation47_spill] sm:$0xff]  ;;  %v5735_v5 = vpop.permute.xlu1 %5734  ;;  %v12908_v1 = vld [vmem:[#allocation86_spill] sm:$0xff] }
 0x4c7   : > { %v4413_v31 = vsel %vm4411_vm12, %v6731_v11, %v4412_v62  ;;  %v4807_v19 = vor.u32 4788187, %v4806_v15  ;;  %vm5585_vm11 = vcmask 523264   ;;  %vm5648_vm14 = vcmask 1014784  }
 0x4c8   : > { %v3991_v24 = vsel %vm3906_vm0, %v3990_v4, %v12893_v27  ;;  %vm4408_vm7 = vweird.f32 %v11291_v32  ;;  %v4417_v18 = vsel %vm4410_vm1, %v4413_v31, %v4416_v52  ;;  %vm5720_vm15 = vcmask 760832   ;;  %v11988_v0 = vpop.eup %6734  ;;  %v12900_v32 = vld [vmem:[#allocation84_spill] sm:$0xff]  ;;  %v12901_v4 = vld [vmem:[#allocation30_spill] sm:$0xff] }
 0x4c9   : > { %v4418_v20 = vsel %vm4408_vm7, nan, %v4417_v18  ;;  %v4808_v56 = vand.u32 2147483647, %v4807_v19  ;;  %v4810_v63 = vcvt.s32.f32 %v4803_v60  ;;  %v11991_v49 = vmul.f32 %v12898_v47, %v4952_v2  ;;  %5887 = vmatpush1.bf16.msra.mxu1 %v5769_v33  ;;  %6213 = vmatpush3.bf16.msra.mxu0 %v5641_v29  ;;  %v5733_v11 = vpop.permute.xlu0 %5732 }
 0x4ca   : > { %v4960_v27 = vmul.f32 %v12899_v17, %v4418_v20  ;;  %6214 = vmatprep.subr.bf16.mxu0 %v5713_v25  ;;  %5888 = vmatprep.subr.bf16.mxu1 %v12894_v30  ;;  %v5777_v16 = vsel %vm5585_vm11, %v12900_v32, %v11805_v9  ;;  %v5649_v48 = vsel %vm5648_vm14, %v12902_v34, %v12901_v4  ;;  %vm5784_vm0 = vcmask 515072  }
 0x4cb   : > { %v1428_v43 = vmul.f32 %v12904_v10, %v12903_v23  ;;  %v4811_v58 = vmul.f32 %v4810_v63, %v4808_v56  ;;  %v5721_v14 = vsel %vm5720_vm15, %v11878_v53, %v12905_v21  ;;  %vm5591_vm1 = vcmask 916480  }
 0x4cc   : > { %v1474_v61 = vmul.f32 1.442695, %v12906_v26  ;;  %vm4730_vm2 = vcmp.lt.s32.totalorder %v12907_v59, 0  ;;  %v12009_v9 = vmul.f32 %v12908_v1, %v4960_v27  ;;  %vm5728_vm3 = vcmask 752640  }
 0x4cd   : > { %v3993_v57 = vsel %vm11893_vm6, 0, %v3991_v24  ;;  %v12909_v45 = vand.u32 2147483647, %v12907_v59  ;;  %v4812_v53 = vxor.u32 2147483648, %v4811_v58  ;;  %5889 = vmatpush1.bf16.msra.mxu1 %v5777_v16  ;;  %6215 = vmatpush3.bf16.msra.mxu0 %v5649_v48  ;;  %v5785_v6 = vsel %vm5784_vm0, %v11908_v3, %v11880_v28  ;;  %v5799_v3 = vpop.permute.xlu1 %5798  ;;  %v5797_v29 = vpop.permute.xlu0 %5796 }
 0x4ce   : > { %v6737_v54 = vpop.eup %6736  ;;  %v4814_v2 = vsub.s32 4, %v11856_v51  ;;  %v5342_v62 = vcombine.low %v11991_v49, %v12009_v9  ;;  %v5343_v35 = vcombine.high %v11991_v49, %v12009_v9  ;;  %6216 = vmatprep.subr.bf16.mxu0 %v5721_v14  ;;  %5890 = vmatprep.subr.bf16.mxu1 %v12894_v30  ;;  %v5657_v60 = vsel %vm5591_vm1, %v11932_v37, %v11910_v39 }
 0x4cf   : > { %vm12015_vm4 = vcmp.le.f32.partialorder %v12909_v45, 0.7853982  ;;  %v4813_v15 = vsel %vm4730_vm2, %v4812_v53, %v4811_v58  ;;  %v5729_v28 = vsel %vm5728_vm3, %v11950_v22, %v11934_v41  ;;  %vm5792_vm6 = vcmask 506880  }
 0x4d0   : > { %vm5664_vm5 = vcmask 908288   ;;  %6738 = vpow2.f32 %v1474_v61  ;;  %v3997_v33 = vand.u32 3, %v3993_v57  ;;  %v4816_v52 = vsel %vm12015_vm4, %v12907_v59, %v4813_v15  ;;  %v12915_v57 = vld [vmem:[#allocation29_spill] sm:$0xff] }
 0x4d1   : > { %vm5587_vm8 = vcmask 654336   ;;  %v4000_v25 = vxor.u32 2147483648, %v6737_v54  ;;  %v4003_v39 = vxor.u32 2147483648, %v11988_v0  ;;  %6740 = vcosq.f32 %v4816_v52  ;;  %5891 = vmatpush1.bf16.msra.mxu1 %v5785_v6  ;;  %6217 = vmatpush3.bf16.msra.mxu0 %v5657_v60  ;;  %v5669_v24 = vpop.permute.xlu0 %5668 }
 0x4d2   : > { %v1490_v37 = vmul.f32 1.442695, %v1428_v43  ;;  %6742 = vsinq.f32 %v4816_v52  ;;  %6218 = vmatprep.subr.bf16.mxu0 %v5729_v28  ;;  %5892 = vmatprep.subr.bf16.mxu1 %v12894_v30  ;;  %v5793_v41 = vsel %vm5792_vm6, %v11967_v40, %v11952_v42  ;;  %v5665_v22 = vsel %vm5664_vm5, %v11969_v55, %v5663_v50  ;;  %v5671_v42 = vpop.permute.xlu1 %5670 }
 0x4d3   : > { %v4815_v31 = vsel %vm4730_vm2, %v4814_v2, %v11856_v51  ;;  %v5737_v19 = vsel %vm5587_vm8, %v5733_v11, %v5735_v5  ;;  %vm5800_vm10 = vcmask 498688   ;;  %vm5672_vm12 = vcmask 900096   ;;  %v12914_v11 = vld [vmem:[#allocation28_spill] sm:$0xff] }
 0x4d4   : > { %vm3999_vm14 = vcmp.eq.s32.totalorder %v3997_v33, 0  ;;  %vm4002_vm7 = vcmp.eq.s32.totalorder %v3997_v33, 2  ;;  %v4817_v40 = vsel %vm12015_vm4, 0, %v4815_v31  ;;  %v5801_v51 = vsel %vm5800_vm10, %v5797_v29, %v5799_v3 }
 0x4d5   : > { %v4001_v18 = vsel %vm3999_vm14, %v11988_v0, %v4000_v25  ;;  %v4004_v20 = vsel %vm4002_vm7, %v4003_v39, %v6737_v54  ;;  %5893 = vmatpush1.bf16.msra.mxu1 %v5793_v41  ;;  %6219 = vmatpush3.bf16.msra.mxu0 %v5665_v22  ;;  %v5673_v55 = vsel %vm5672_vm12, %v5669_v24, %v5671_v42  ;;  %6744 = vpow2.f32 %v1490_v37  ;;  %v6511_v12 = vpop.permute.xlu0 %6510  ;;  %v12920_v42 = vld [vmem:[#allocation41_spill] sm:$0xff] }
 0x4d6   : > { %6220 = vmatprep.subr.bf16.mxu0 %v5737_v19  ;;  %5894 = vmatprep.subr.bf16.mxu1 %v12894_v30  ;;  %vm3998_vm15 = vcmp.lt.s32.totalorder %v3997_v33, 2  ;;  %v4821_v56 = vand.u32 3, %v4817_v40  ;;  %vm3996_vm0 = vweird.f32 %v11286_v13  ;;  %vm4820_vm6 = vweird.f32 %v12907_v59  ;;  %v12912_v13 = vld [vmem:[#allocation88_spill] sm:$0xff] }
 0x4d7   : > { %v4005_v50 = vsel %vm3998_vm15, %v4001_v18, %v4004_v20  ;;  %v5350_v21 = vrot.slane %v5342_v62, %v9752_v38  ;;  %v5357_v26 = vrot.slane %v5343_v35, %v9752_v38  ;;  %v12916_v45 = vcombine.low %v12914_v11, %v12915_v57  ;;  %v12919_v20 = vld [vmem:[#allocation85_spill] sm:$0xff] }
 0x4d8   : > { %v4006_v47 = vsel %vm3996_vm0, nan, %v4005_v50  ;;  %vm4826_vm2 = vcmp.eq.s32.totalorder %v4821_v56, 2  ;;  %vm4823_vm3 = vcmp.eq.s32.totalorder %v4821_v56, 0  ;;  %vm4822_vm4 = vcmp.lt.s32.totalorder %v4821_v56, 2  ;;  %v12923_v50 = vld [vmem:[#allocation82_spill] sm:$0xff] }
 0x4d9   : > { %5895 = vmatpush1.bf16.msra.mxu1 %v5801_v51  ;;  %6221 = vmatpush3.bf16.msra.mxu0 %v5673_v55  ;;  %v12072_v36 = vrot.slane %v12916_v45, %v12802_v8  ;;  %v12917_v53 = vcombine.high %v12914_v11, %v12915_v57  ;;  %v5398_v49 = vrot.slane %v5390_v46, %v12802_v8  ;;  %v6521_v37 = vpop.permute.xlu0 %6520  ;;  %v6513_v22 = vunpack.i.h.bf16 %v6511_v12  ;;  %v12922_v55 = vld [vmem:[#allocation55_spill] sm:$0xff] }
 0x4da   : > { %v6739_v63 = vpop.eup %6738  ;;  %5896 = vmatprep.subr.bf16.mxu1 %v12894_v30  ;;  %v12913_v30 = vld [vmem:[#allocation83_spill] sm:$0xff]  ;;  %v5405_v62 = vrot.slane %v5391_v7, %v12802_v8  ;;  %v5805_v7 = vpop.permute.xlu1 %5804  ;;  %v6512_v31 = vunpack.i.l.bf16 %v6511_v12  ;;  %v12921_v40 = vcombine.low %v12919_v20, %v12920_v42  ;;  %v12924_v56 = vcombine.low %v12922_v55, %v12923_v50 }
 0x4db   : > { %v6741_v0 = vpop.eup %6740  ;;  %v4956_v16 = vmul.f32 %v6739_v63, %v4006_v47  ;;  %v5389_v6 = vrot.slane %v12917_v53, %v12802_v8  ;;  %v6523_v47 = vunpack.i.h.bf16 %v6521_v37  ;;  %vm5581_vm5 = vcmask 261120  }
 0x4dc   : > { %v6743_v5 = vpop.eup %6742  ;;  %v4827_v17 = vxor.u32 2147483648, %v6741_v0  ;;  %v5580_v51 = vsel %vm5579_vm13, %v12921_v40, %v6513_v22  ;;  %v5593_v63 = vsel %vm5579_vm13, %v12924_v56, %v6512_v31  ;;  %vm5583_vm10 = vcmask 392192  }
 0x4dd   : > { %v4824_v27 = vxor.u32 2147483648, %v6743_v5  ;;  %v5028_v43 = vmul.f32 %v12912_v13, %v4956_v16  ;;  %vm5808_vm12 = vcmask 490496  }
 0x4de   : > { %v4828_v32 = vsel %vm4826_vm2, %v4827_v17, %v6743_v5  ;;  %v6516_v41 = vpop.permute.xlu1 %6515  ;;  %v6522_v5 = vunpack.i.l.bf16 %v6521_v37 }
 0x4df   : > { %v4825_v4 = vsel %vm4823_vm3, %v6741_v0, %v4824_v27  ;;  %v6745_v48 = vpop.eup %6744  ;;  %v6518_v24 = vunpack.i.h.bf16 %v6516_v41  ;;  %v6517_v18 = vunpack.i.l.bf16 %v6516_v41 }
 0x4e0   : > { %v4829_v34 = vsel %vm4822_vm4, %v4825_v4, %v4828_v32 }
 0x4e1   : > { %v4830_v23 = vsel %vm4820_vm6, nan, %v4829_v34  ;;  %v5582_v32 = vsel %vm5581_vm5, %v5580_v51, %v6518_v24  ;;  %v5594_v16 = vsel %vm5581_vm5, %v5593_v63, %v6517_v18 }
 0x4e2   : > { %v4964_v10 = vmul.f32 %v6745_v48, %v4830_v23  ;;  %v6526_v0 = vpop.permute.xlu1 %6525  ;;  %v5584_v23 = vsel %vm5583_vm10, %v5582_v32, %v6523_v47 }
 0x4e3   : > { %v6528_v17 = vunpack.i.h.bf16 %v6526_v0  ;;  %v6527_v27 = vunpack.i.l.bf16 %v6526_v0 }
 0x4e4   : > { %v5036_v58 = vmul.f32 %v12913_v30, %v4964_v10  ;;  %v5595_v10 = vsel %vm5583_vm10, %v5594_v16, %v6522_v5 }
 0x4e5   : > { %v5586_v30 = vsel %vm5585_vm11, %v5584_v23, %v6528_v17 }
 0x4e6   : > { %v5358_v14 = vcombine.low %v5028_v43, %v5036_v58  ;;  %v5359_v61 = vcombine.high %v5028_v43, %v5036_v58 }
 0x4e8   : > { %v5366_v59 = vrot.slane %v5358_v14, %v9752_v38  ;;  %v5373_v1 = vrot.slane %v5359_v61, %v9752_v38 }
 0x4ea   : > { %v5406_v9 = vcombine.low %v5350_v21, %v5366_v59  ;;  %v5407_v54 = vcombine.high %v5350_v21, %v5366_v59  ;;  %v5422_v2 = vcombine.low %v5357_v26, %v5373_v1  ;;  %v5423_v38 = vcombine.high %v5357_v26, %v5373_v1 }
 0x4eb   : > { %v5596_v21 = vsel %vm5585_vm11, %v5595_v10, %v6527_v27 }
 0x4ec   : > { %v12087_v35 = vrot.slane %v5406_v9, %v12802_v8  ;;  %v5421_v60 = vrot.slane %v5407_v54, %v12802_v8  ;;  %v5430_v15 = vrot.slane %v5422_v2, %v12802_v8  ;;  %v5437_v28 = vrot.slane %v5423_v38, %v12802_v8  ;;  %v12918_v8 = vld [vmem:[#allocation18_spill] sm:$0xff] }
 0x4ee   : > { %v5439_v46 = vcombine.high %v12072_v36, %v12087_v35  ;;  %v5440_v3 = vcombine.low %v5389_v6, %v5421_v60  ;;  %v5441_v33 = vcombine.high %v5389_v6, %v5421_v60  ;;  %v5443_v52 = vcombine.high %v5398_v49, %v5430_v15 }
 0x4ef   : > { %v5442_v29 = vcombine.low %v5398_v49, %v5430_v15  ;;  %v5445_v25 = vcombine.high %v5405_v62, %v5437_v28  ;;  %v5444_v39 = vcombine.low %v5405_v62, %v5437_v28  ;;  %v5438_v44 = vcombine.low %v12072_v36, %v12087_v35 }
 0x4f0   : > { %5552 = vrot.lane.b32.xlu1 %v5439_v46, %s6974_s17  ;;  %s6976_s17 = smov [#allocation8]  }
 0x4f1   : > { %5564 = vrot.lane.b32.xlu0 %v5442_v29, %s6958_s26  ;;  %s12926_s26 = sld [smem:[#allocation12_spill]] }
 0x4f4   : > { %5556 = vrot.lane.b32.xlu1 %v5440_v3, %s6973_s25 }
 0x4f5   : > { %5572 = vrot.lane.b32.xlu0 %v5444_v39, %s6951_s8  ;;  %s12925_s8 = sld [smem:[#allocation13_spill]] }
 0x4f8   : > { %5560 = vrot.lane.b32.xlu1 %v5441_v33, %s6975_s18  ;;  %s6811_s18 = sshll.u32 %s6976_s17, 4  ;;  %s6812_s18 = int_to_ptr.vmem [resolvable:$false] %s6811_s18 }
 0x4f9   : > { %5806 = vrot.lane.b32.xlu0 %v12918_v8, %s6970_s11 }
 0x4fc   : > { %5568 = vrot.lane.b32.xlu1 %v5443_v52, %s6966_s12  ;;  %s6202_s12 = sshll.u32 %s12925_s8, 1  ;;  %s6813_s8 = scalar_lea.vmem %s6812_s18, 256 }
 0x4fd   : > { %s5933_s11 = sadd.s32 %s12926_s26, %s6202_s12 }
 0x4fe   : > { %s6203_s14 = sshll.u32 %s5933_s11, 7 }
 0x4ff   : > { %s12138_s13 = scalar_lea.hbm %s12927_s23, %s6203_s14 }
 0x500   : > { %5576 = vrot.lane.b32.xlu1 %v5445_v25, %s6962_s27  ;;  %s6063_s27 = sshll.u32 %s7268_s24, 3 }
 0x501   : > { %s388_s19 = scalar_lea.vmem [#allocation8], %s6063_s27 }
 0x502   : > { %s5937_s21 = sshll.u32 %s388_s19, 4  ;;  %s12140_s21 = int_to_ptr.vmem [resolvable:$true] %s5937_s21 }
 0x503   : > { %s6807_s25 = scalar_lea.vmem %s12140_s21, 128  ;;  %p6814_p4 = scmp.lt.s32.totalorder %s12140_s21, %s6812_s18 }
 0x504   : > { %p6808_p5 = scmp.ne.s32.totalorder %s12140_s21, %s6807_s25  ;;  %p6815_p8 = scmp.lt.s32.totalorder %s6813_s8, %s6807_s25 }
 0x506   : > { %p6809_p6 = pnand %p6808_p5, %p12928_p12  ;;  %p6816_p10 = por %p6815_p8, %p6814_p4 }
 0x508   : > { %p6810_p1 = pneg %p6809_p6 }
 0x50a   : > { %p6817_p9 = pnand %p6816_p10, %p6810_p1 }
 0x521   : > { %v6531_v19 = vpop.permute.xlu0 %6530 }
 0x522   : > { %v6533_v34 = vunpack.i.h.bf16 %v6531_v19  ;;  %v6532_v48 = vunpack.i.l.bf16 %v6531_v19 }
 0x524   : > { %v5597_v61 = vsel %vm5587_vm8, %v5596_v21, %v6532_v48  ;;  %v5588_v59 = vsel %vm5587_vm8, %v5586_v30, %v6533_v34 }
 0x52c   : > { %v6536_v4 = vpop.permute.xlu0 %6535 }
 0x52d   : > { %v6538_v13 = vunpack.i.h.bf16 %v6536_v4  ;;  %v6537_v43 = vunpack.i.l.bf16 %v6536_v4 }
 0x52f   : > { %v5598_v1 = vsel %vm5589_vm9, %v5597_v61, %v6537_v43  ;;  %v5590_v11 = vsel %vm5589_vm9, %v5588_v59, %v6538_v13 }
 0x530   : > { %v6541_v58 = vpop.permute.xlu0 %6540 }
 0x531   : > { %v6543_v14 = vunpack.i.h.bf16 %v6541_v58  ;;  %v6542_v26 = vunpack.i.l.bf16 %v6541_v58 }
 0x533   : > { %v5599_v57 = vsel %vm5591_vm1, %v5598_v1, %v6542_v26  ;;  %v5592_v45 = vsel %vm5591_vm1, %v5590_v11, %v6543_v14 }
 0x534   : > { %v5608_v36 = vpack.c.bf16 %v5599_v57, %v5599_v57  ;;  %v5607_v53 = vpack.c.bf16 %v5592_v45, %v5592_v45 }
 0x536   : > { %5872 = vmatprep.mubr.bf16.mxu0 %v5608_v36 }
 0x537   : > { %5873 = vmatmul.mubr.bf16.vlgmr.msra.gmra.mrb[0].mxu0 %v5607_v53 }
 0x562   : > { %v5553_v6 = vpop.permute.xlu1 %5552 }
 0x563   : > { %v5565_v49 = vpop.permute.xlu0 %5564  ;;  %v5600_v9 = vsel %vm5579_vm13, %v5438_v44, %v5553_v6 }
 0x566   : > { %v5557_v54 = vpop.permute.xlu1 %5556 }
 0x567   : > { %v5601_v2 = vsel %vm5581_vm5, %v5600_v9, %v5557_v54  ;;  %v5573_v38 = vpop.permute.xlu0 %5572 }
 0x56a   : > { %v5561_v62 = vpop.permute.xlu1 %5560 }
 0x56b   : > { %v5602_v35 = vsel %vm5583_vm10, %v5601_v2, %v5561_v62  ;;  %v5807_v60 = vpop.permute.xlu0 %5806 }
 0x56c   : > { %v5603_v15 = vsel %vm5585_vm11, %v5602_v35, %v5565_v49  ;;  %v5809_v28 = vsel %vm5808_vm12, %v5805_v7, %v5807_v60 }
 0x56d   : > { %5897 = vmatpush1.bf16.msra.mxu1 %v5809_v28 }
 0x56e   : > { %v5569_v46 = vpop.permute.xlu1 %5568 }
 0x56f   : > { %v5604_v3 = vsel %vm5587_vm8, %v5603_v15, %v5569_v46 }
 0x570   : > { %v5605_v33 = vsel %vm5589_vm9, %v5604_v3, %v5573_v38 }
 0x572   : > { %v5577_v52 = vpop.permute.xlu1 %5576 }
 0x573   : > { %v5606_v29 = vsel %vm5591_vm1, %v5605_v33, %v5577_v52 }
 0x574   : > { %v5609_v25 = vpack.c.bf16 %v5606_v29, %v5606_v29 }
 0x576   : > { %5913 = vmatmul.mubr.bf16.vlgmr.msra.gmra.mrb[0].mxu1 %v5609_v25 }
 0x60a   : > { %v6222_v39 = vpop.f32.mrb[0].mxu0 }
 0x60b   : > { %v6223_v44 = vpop.f32.mrb[1].mxu0 }
 0x60c   : > { %v6224_v8 = vadd.f32 %v6223_v44, %v6222_v39  ;;  %v6225_v12 = vpop.f32.mrb[2].mxu0 }
 0x60d   : > { %v6226_v37 = vpop.f32.mrb[3].mxu0 }
 0x649   : > { %v5914_v7 = vpop.f32.mrb[0].mxu1 }
 0x64a   : > { %v5915_v41 = vadd.f32 %v6224_v8, %v5914_v7  ;;  %v5916_v22 = vpop.f32.mrb[1].mxu1 }
 0x64b   : > { %v5917_v31 = vpop.f32.mrb[2].mxu1 }
 0x64c   : > { %5920 = vst [vmem:[%s388_s19] sm:$0xff] %v5915_v41  ;;  %v5918_v19 = vpop.f32.mrb[3].mxu1 }
 0x64d   : > { %6820 = shalt.err (!%p6817_p9)
}
 0x64e   : > { %s6821_s24 = scalar_lea.hbm %s12138_s13, 128  ;;  %s6825_s12 = scalar_lea.hbm %s12927_s23, 512 }
 0x64f   : > { %p6822_p2 = scmp.ne.s32.totalorder %s12138_s13, %s6821_s24  ;;  %p6826_p0 = scmp.lt.u32.totalorder %s12138_s13, %s12927_s23 }
 0x650   : > { %p6827_p3 = scmp.lt.u32.totalorder %s6825_s12, %s6821_s24  ;;  %p6829_p5 = scmp.lt.u32.totalorder %s6821_s24, %s12138_s13 }
 0x651   : > { %p6823_p7 = pnand %p6822_p2, %p12928_p12 }
 0x652   : > { %p6828_p11 = por %p6827_p3, %p6826_p0 }
 0x653   : > { %p6824_p13 = pneg %p6823_p7 }
 0x654   : > { %p6830_p6 = por %p6829_p5, %p6828_p11 }
 0x656   : > { %p6831_p1 = pnand %p6830_p6, %p6824_p13 }
 0x658   : > { %6834 = shalt.err (!%p6831_p1)
}
 0x659   : > { %6365 = dma.vmem_to_hbm [thread:$0]  (%p12928_p12), %s12140_s21, 128, %s12138_s13, %s5922_s22  }
 0x65a PF: > { %p6379_p4 = scmp.ge.s32.totalorder %s6933_s15, 2  ;;  %s5949_s19 = sand.u32 1, %s6905_s30  }
 0x65b   : > { %p12929_p8 = scmp.ne.s32.totalorder %s12453_s16, 0  ;;  %s5950_s20 = scalar_lea.sflag [#allocation5], %s5949_s19 }
 0x65d   : > { %p6375_p10 = pnand %p6379_p4, %p12929_p8 }
 0x65f   : > { %6888 = dma.done.wait (!%p6375_p10), %s5950_s20, 128  }
 0x660   : > { %6890 = vsyncadd (!%p6375_p10), %s5950_s20, 4294967168  ;;  %s27_s15 = sadd.s32 1, %s6933_s15   ;;  %s12930_s11 = sld [smem:[#allocation14_spill]] }
 0x661   : > { %p24_p9 = scmp.ge.s32.totalorder %s27_s15, 6   ;;  %s12931_s12 = sld [smem:[#allocation15_spill]] }
 0x662   : > { %s12932_s13 = sld [smem:[#allocation16_spill]]  ;;  %s12933_s14 = sld [smem:[#allocation17_spill]] }
 0x663   : > { %s12934_s27 = smov %s6897_s28  ;;  %s12935_s28 = smov %s6901_s29 }
 0x664   : > { %s12936_s29 = smov %s7205_s3  ;;  %s12937_s30 = smov %s6909_s9 }
 0x665   : > { %s12938_s9 = smov %s6913_s10  ;;  %s12939_s10 = smov %s7131_s2 }
 0x666   :  { %26 = sbr.rel (!%p24_p9) target bundleno = 17 (0x11), region = 110 }
 0x66d   :  { %5955 = vsyncpa [#allocation4], 1 }
 0x66e   :  { %5957 = vsyncpa [#allocation4 + $0x1], 1 }
 0x66f   :  { %5958 = vsyncpa [#allocation7], 1 }
 0x670   :  { %5960 = vsyncpa [#allocation7 + $0x1], 1 }
 0x671   :  { %5961 = vsyncpa [#allocation5], 1 }
 0x672   :  { %5963 = vsyncpa [#allocation5 + $0x1], 1 }

</bundles_post_ra>
